<compile_context>
chip_gen: v5e
topology: v5e:2x2
jax: 0.10.0
libtpu: 0.0.40
codegen_flags: <defaults>
</compile_context>

<pallas_src>
import jax
import jax.numpy as jnp
from jax.experimental import pallas as pl
from jax.experimental.pallas import tpu as pltpu

HIDDEN = 1024
SUBLANE = 8     # TPU sublane count (f32)


def mlp_kernel(x_ref, w1_ref, b1_ref, w2_ref, b2_ref, w3_ref, b3_ref,
               wo_ref, bo_ref, out_ref):
    # fc1 + tanh  (bf16 inputs on the MXU, f32 accumulate)
    x = x_ref[...].astype(jnp.bfloat16)
    h = jnp.tanh(
        jnp.dot(x, w1_ref[...], preferred_element_type=jnp.float32)
        + b1_ref[...])
    # fc2 + tanh
    h = jnp.tanh(
        jnp.dot(h.astype(jnp.bfloat16), w2_ref[...],
                preferred_element_type=jnp.float32)
        + b2_ref[...])
    # fc3 + tanh
    h = jnp.tanh(
        jnp.dot(h.astype(jnp.bfloat16), w3_ref[...],
                preferred_element_type=jnp.float32)
        + b3_ref[...])
    # dropout: identity (eval mode)
    # output layer (num_classes lanes; full-array block, masked store is cheap)
    out_ref[...] = (
        jnp.dot(h.astype(jnp.bfloat16), wo_ref[...],
                preferred_element_type=jnp.float32)
        + bo_ref[...])


def _round_up(n, m):
    return ((n + m - 1) // m) * m


@jax.jit
def mlp_forward(x, w1, b1, w2, b2, w3, b3, wo, bo):
    """x: [B, input_size] f32.  w*: [in, out] bf16.  b*: [1, out] f32."""
    batch = x.shape[0]                 # static (array shape)
    num_classes = wo.shape[1]          # static (array shape)
    padded_batch = _round_up(batch, SUBLANE)

    # Pad the batch to a full sublane group (extra rows are free — the kernel is
    # weight-DMA bound, not compute bound).
    x_p = jnp.pad(x, ((0, padded_batch - batch), (0, 0)))

    vmem_spec = pl.BlockSpec(memory_space=pltpu.MemorySpace.VMEM)
    out = pl.pallas_call(
        mlp_kernel,
        out_shape=jax.ShapeDtypeStruct((padded_batch, num_classes),
                                       jnp.float32),
        in_specs=[vmem_spec] * 9,
        out_specs=vmem_spec,
        compiler_params=pltpu.CompilerParams(vmem_limit_bytes=12 << 20),
    )(x_p, w1, b1, w2, b2, w3, b3, wo, bo)

    return out[:batch]                 # static slice


def init_linear(key, fan_in, fan_out):
    """PyTorch nn.Linear default init: U(-1/sqrt(fan_in), 1/sqrt(fan_in)).
    Returns weight [in, out] and bias [1, out], both f32 (master copies)."""
    kw, kb = jax.random.split(key)
    bound = 1.0 / (fan_in ** 0.5)
    w = jax.random.uniform(kw, (fan_in, fan_out), jnp.float32, -bound, bound)
    b = jax.random.uniform(kb, (1, fan_out), jnp.float32, -bound, bound)
    return w, b


if __name__ == "__main__":
    input_size = 64
    num_classes = 10
    batch = 4

    root = jax.random.PRNGKey(0)
    kx, k1, k2, k3, k4 = jax.random.split(root, 5)

    x = jax.random.normal(kx, (batch, input_size), jnp.float32)
    w1, b1 = init_linear(k1, input_size, HIDDEN)
    w2, b2 = init_linear(k2, HIDDEN, HIDDEN)
    w3, b3 = init_linear(k3, HIDDEN, HIDDEN)
    wo, bo = init_linear(k4, HIDDEN, num_classes)

    # bf16 streaming copies of the weights (cast once, outside the jitted call).
    w1s, w2s, w3s, wos = (w.astype(jnp.bfloat16) for w in (w1, w2, w3, wo))

    out = mlp_forward(x, w1s, b1, w2s, b2, w3s, b3, wos, bo)
    out = jax.block_until_ready(out)

    # Sanity check against a pure-JAX reference using the same bf16 streamed weights /
    # bf16 activations / f32 accumulate (looser tolerance than a pure f32 build).
    h = jnp.tanh(jnp.dot(x.astype(jnp.bfloat16), w1s,
                         preferred_element_type=jnp.float32) + b1)
    h = jnp.tanh(jnp.dot(h.astype(jnp.bfloat16), w2s,
                         preferred_element_type=jnp.float32) + b2)
    h = jnp.tanh(jnp.dot(h.astype(jnp.bfloat16), w3s,
                         preferred_element_type=jnp.float32) + b3)
    ref = jnp.dot(h.astype(jnp.bfloat16), wos,
                  preferred_element_type=jnp.float32) + bo

    assert out.shape == (batch, num_classes), out.shape
    assert jnp.allclose(out, ref, atol=2e-2, rtol=2e-2), (
        float(jnp.max(jnp.abs(out - ref))))

    print("KERNEL_OK")
</pallas_src>

<mosaic_0001>
module attributes {stable_mosaic.version = 11 : i64} {
  func.func @mlp_kernel(%arg0: memref<8x64xf32, #tpu.memory_space<vmem>>, %arg1: memref<64x1024xbf16, #tpu.memory_space<vmem>>, %arg2: memref<1x1024xf32, #tpu.memory_space<vmem>>, %arg3: memref<1024x1024xbf16, #tpu.memory_space<vmem>>, %arg4: memref<1x1024xf32, #tpu.memory_space<vmem>>, %arg5: memref<1024x1024xbf16, #tpu.memory_space<vmem>>, %arg6: memref<1x1024xf32, #tpu.memory_space<vmem>>, %arg7: memref<1024x10xbf16, #tpu.memory_space<vmem>>, %arg8: memref<1x10xf32, #tpu.memory_space<vmem>>, %arg9: memref<8x10xf32, #tpu.memory_space<vmem>>) attributes {dimension_semantics = [], scalar_prefetch = 0 : i64, scratch_operands = 0 : i64, tpu.core_type = #tpu.core_type<tc>} {
    %c0 = arith.constant 0 : index
    %c0_0 = arith.constant 0 : index
    %0 = vector.load %arg0[%c0, %c0_0] : memref<8x64xf32, #tpu.memory_space<vmem>>, vector<8x64xf32>
    %1 = arith.truncf %0 : vector<8x64xf32> to vector<8x64xbf16>
    %c0_1 = arith.constant 0 : index
    %c0_2 = arith.constant 0 : index
    %2 = vector.load %arg1[%c0_1, %c0_2] : memref<64x1024xbf16, #tpu.memory_space<vmem>>, vector<64x1024xbf16>
    %cst = arith.constant dense<0.000000e+00> : vector<8x1024xf32>
    %3 = tpu.matmul %1, %2, %cst {dimension_numbers = #tpu.dot_dimension_numbers<[1], [0], [0], [1], [0, 0, 1, 1], [], []>} : vector<8x64xbf16>, vector<64x1024xbf16>, vector<8x1024xf32> -> vector<8x1024xf32>
    %c0_3 = arith.constant 0 : index
    %c0_4 = arith.constant 0 : index
    %4 = vector.load %arg2[%c0_3, %c0_4] : memref<1x1024xf32, #tpu.memory_space<vmem>>, vector<1x1024xf32>
    %5 = vector.broadcast %4 : vector<1x1024xf32> to vector<8x1024xf32>
    %6 = arith.addf %3, %5 : vector<8x1024xf32>
    %7 = math.tanh %6 : vector<8x1024xf32>
    %8 = arith.truncf %7 : vector<8x1024xf32> to vector<8x1024xbf16>
    %c0_5 = arith.constant 0 : index
    %c0_6 = arith.constant 0 : index
    %9 = vector.load %arg3[%c0_5, %c0_6] : memref<1024x1024xbf16, #tpu.memory_space<vmem>>, vector<1024x1024xbf16>
    %cst_7 = arith.constant dense<0.000000e+00> : vector<8x1024xf32>
    %10 = tpu.matmul %8, %9, %cst_7 {dimension_numbers = #tpu.dot_dimension_numbers<[1], [0], [0], [1], [0, 0, 1, 1], [], []>} : vector<8x1024xbf16>, vector<1024x1024xbf16>, vector<8x1024xf32> -> vector<8x1024xf32>
    %c0_8 = arith.constant 0 : index
    %c0_9 = arith.constant 0 : index
    %11 = vector.load %arg4[%c0_8, %c0_9] : memref<1x1024xf32, #tpu.memory_space<vmem>>, vector<1x1024xf32>
    %12 = vector.broadcast %11 : vector<1x1024xf32> to vector<8x1024xf32>
    %13 = arith.addf %10, %12 : vector<8x1024xf32>
    %14 = math.tanh %13 : vector<8x1024xf32>
    %15 = arith.truncf %14 : vector<8x1024xf32> to vector<8x1024xbf16>
    %c0_10 = arith.constant 0 : index
    %c0_11 = arith.constant 0 : index
    %16 = vector.load %arg5[%c0_10, %c0_11] : memref<1024x1024xbf16, #tpu.memory_space<vmem>>, vector<1024x1024xbf16>
    %cst_12 = arith.constant dense<0.000000e+00> : vector<8x1024xf32>
    %17 = tpu.matmul %15, %16, %cst_12 {dimension_numbers = #tpu.dot_dimension_numbers<[1], [0], [0], [1], [0, 0, 1, 1], [], []>} : vector<8x1024xbf16>, vector<1024x1024xbf16>, vector<8x1024xf32> -> vector<8x1024xf32>
    %c0_13 = arith.constant 0 : index
    %c0_14 = arith.constant 0 : index
    %18 = vector.load %arg6[%c0_13, %c0_14] : memref<1x1024xf32, #tpu.memory_space<vmem>>, vector<1x1024xf32>
    %19 = vector.broadcast %18 : vector<1x1024xf32> to vector<8x1024xf32>
    %20 = arith.addf %17, %19 : vector<8x1024xf32>
    %21 = math.tanh %20 : vector<8x1024xf32>
    %22 = arith.truncf %21 : vector<8x1024xf32> to vector<8x1024xbf16>
    %c0_15 = arith.constant 0 : index
    %c0_16 = arith.constant 0 : index
    %23 = vector.load %arg7[%c0_15, %c0_16] : memref<1024x10xbf16, #tpu.memory_space<vmem>>, vector<1024x10xbf16>
    %cst_17 = arith.constant dense<0.000000e+00> : vector<8x10xf32>
    %24 = tpu.matmul %22, %23, %cst_17 {dimension_numbers = #tpu.dot_dimension_numbers<[1], [0], [0], [1], [0, 0, 1, 1], [], []>} : vector<8x1024xbf16>, vector<1024x10xbf16>, vector<8x10xf32> -> vector<8x10xf32>
    %c0_18 = arith.constant 0 : index
    %c0_19 = arith.constant 0 : index
    %25 = vector.load %arg8[%c0_18, %c0_19] : memref<1x10xf32, #tpu.memory_space<vmem>>, vector<1x10xf32>
    %26 = vector.broadcast %25 : vector<1x10xf32> to vector<8x10xf32>
    %27 = arith.addf %24, %26 : vector<8x10xf32>
    %c0_20 = arith.constant 0 : index
    %c0_21 = arith.constant 0 : index
    %28 = vector.load %arg9[%c0_20, %c0_21] : memref<8x10xf32, #tpu.memory_space<vmem>>, vector<8x10xf32>
    tpu.vector_store %arg9[%c0_20, %c0_21], %27 {strides = array<i32>} : memref<8x10xf32, #tpu.memory_space<vmem>>, vector<8x10xf32>,
    return
  }
}

</mosaic_0001>

<bundles_post_ra>
// kernel: mlp_forward.1
= control target key start
LH: loop header
LB: loop body
LE: loop exit
PB: predicated region body
PF: predicated region fallthrough
CT: control target
= control target key end

     0   :  { %14 = vsyncpa [#allocation3], 0  ;;  %s15493_s0 = inlined_call_operand.vmem [shape: f32[8,64], index: 0, kind: input, shape index: {}]   ;;  %s15494_s1 = inlined_call_operand.hbm [shape: bf16[64,1024], index: 1, kind: input, shape index: {}]   ;;  %s15495_s2 = inlined_call_operand.hbm [shape: f32[1,1024], index: 2, kind: input, shape index: {}]   ;;  %s15496_s3 = inlined_call_operand.hbm [shape: bf16[1024,1024], index: 3, kind: input, shape index: {}]   ;;  %s15497_s4 = inlined_call_operand.hbm [shape: f32[1,1024], index: 4, kind: input, shape index: {}]   ;;  %s15498_s5 = inlined_call_operand.hbm [shape: bf16[1024,1024], index: 5, kind: input, shape index: {}]   ;;  %s15499_s6 = inlined_call_operand.hbm [shape: f32[1,1024], index: 6, kind: input, shape index: {}]   ;;  %s15500_s7 = inlined_call_operand.vmem [shape: bf16[1024,10], index: 7, kind: input, shape index: {}]   ;;  %s15501_s8 = inlined_call_operand.hbm [shape: f32[1,10], index: 8, kind: input, shape index: {}]   ;;  %s15502_s9 = inlined_call_operand.vmem [shape: f32[8,10], index: 9, kind: output, shape index: {}]  }
   0x1   :  { %15 = vsyncpa [#allocation5], 0 }
   0x2   :  { %16 = vsyncpa [#allocation8], 0  ;;  %s38_s11 = sshll.u32 %s15495_s2, 4  ;;  %s39_s11 = int_to_ptr.hbm [resolvable:$true] %s38_s11 }
   0x3   :  { %17 = vsyncpa [#allocation11], 0  ;;  %s14823_s12 = smov [#allocation4]   ;;  %s62_s16 = sshll.u32 %s15497_s4, 4  ;;  %s63_s16 = int_to_ptr.hbm [resolvable:$true] %s62_s16 }
   0x4   :  { %s40_s13 = sshll.u32 %s14823_s12, 4  ;;  %s14824_s17 = smov [#allocation7]   ;;  %s41_s13 = int_to_ptr.vmem [resolvable:$true] %s40_s13 }
   0x5   :  { %43 = dma.hbm_to_vmem [thread:$0]  %s39_s11, 128, %s41_s13, [#allocation5]  }
   0x6   :  { %s64_s18 = sshll.u32 %s14824_s17, 4  ;;  %s86_s21 = sshll.u32 %s15499_s6, 4  ;;  %s65_s18 = int_to_ptr.vmem [resolvable:$true] %s64_s18  ;;  %s87_s21 = int_to_ptr.hbm [resolvable:$true] %s86_s21 }
   0x7   :  { %67 = dma.hbm_to_vmem [thread:$0]  %s63_s16, 128, %s65_s18, [#allocation8]  }
   0x8   :  { %s24_s23 = sshll.u32 %s15494_s1, 4  ;;  %s14825_s24 = smov [#allocation10]   ;;  %s25_s23 = int_to_ptr.hbm [resolvable:$true] %s24_s23 }
   0x9   :  { %s88_s25 = sshll.u32 %s14825_s24, 4  ;;  %s14826_s4 = smov [#allocation2]   ;;  %s89_s25 = int_to_ptr.vmem [resolvable:$true] %s88_s25 }
   0xa   :  { %91 = dma.hbm_to_vmem [thread:$0]  %s87_s21, 128, %s89_s25, [#allocation11]  }
   0xb   :  { %s26_s26 = sshll.u32 %s14826_s4, 4  ;;  %s14827_s27 = smov 512   ;;  %s27_s26 = int_to_ptr.vmem [resolvable:$true] %s26_s26 }
   0xc   :  { %s14828_s28 = smov 32   ;;  %s48_s30 = sshll.u32 %s15496_s3, 4  ;;  %s49_s30 = int_to_ptr.hbm [resolvable:$true] %s48_s30 }
   0xd   :  { %32 = dma.hbm_to_vmem [thread:$0]  %s25_s23, 4096, %s27_s26, [#allocation3], %s14827_s27, %s14827_s27, %s14828_s28  }
   0xe   :  { %s14829_s10 = smov [#allocation6]   ;;  %s72_s13 = sshll.u32 %s15498_s5, 4  ;;  %s73_s13 = int_to_ptr.hbm [resolvable:$true] %s72_s13 }
   0xf   :  { %s50_s11 = sshll.u32 %s14829_s10, 4  ;;  %s14830_s14 = smov [#allocation9]   ;;  %s51_s11 = int_to_ptr.vmem [resolvable:$true] %s50_s11 }
  0x10   :  { %56 = dma.hbm_to_vmem [thread:$0]  %s49_s30, 65536, %s51_s11, [#allocation5], %s14827_s27, %s14827_s27, %s14828_s28  }
  0x11   :  { %s74_s15 = sshll.u32 %s14830_s14, 4  ;;  %s99_s18 = sshll.u32 %s15501_s8, 4  ;;  %s75_s15 = int_to_ptr.vmem [resolvable:$true] %s74_s15  ;;  %s100_s18 = int_to_ptr.hbm [resolvable:$true] %s99_s18 }
  0x12   :  { %80 = dma.hbm_to_vmem [thread:$0]  %s73_s13, 65536, %s75_s15, [#allocation8], %s14827_s27, %s14827_s27, %s14828_s28  }
  0x13   :  { %s14831_s3 = smov [#allocation12]  }
  0x14   :  { %s101_s19 = sshll.u32 %s14831_s3, 4  ;;  %s102_s19 = int_to_ptr.vmem [resolvable:$true] %s101_s19 }
  0x15   :  { %104 = dma.hbm_to_vmem [thread:$0]  %s100_s18, 16, %s102_s19, [#allocation11]  }
  0x16   :  { %14815 = dma.done.wait [#allocation3], 4096  }
  0x17   :  { %14816 = vsyncadd [#allocation3], 4294963200 }
  0x18   :  { %14817 = dma.done.wait [#allocation5], 65664  }
  0x19   :  { %14818 = vsyncadd [#allocation5], 4294901632 }
  0x1a   :  { %14819 = dma.done.wait [#allocation8], 65664  }
  0x1b   :  { %14820 = vsyncadd [#allocation8], 4294901632 }
  0x1c   :  { %14821 = dma.done.wait [#allocation11], 144  }
  0x1d   :  { %14822 = vsyncadd [#allocation11], 4294967152  ;;  %v9074_v0 = vld [vmem:[#allocation2 + $0xc0] sm:$0xf]  ;;  %v13488_v2 = vld [vmem:[#allocation2 + $0xc4] sm:$0xf] }
  0x1e   :  { %v13492_v1 = vld [vmem:[#allocation2 + $0xdc] sm:$0xf0]  ;;  %v9076_v4 = vld [vmem:[#allocation2 + $0xe0] sm:$0xf0]  ;;  %v9082_v5 = vld [vmem:[#allocation2 + $0xc8] sm:$0xf] }
  0x1f   :  { %v9075_v3 = vor.u32 %v13492_v1, %v9074_v0  ;;  %v13493_v6 = vld [vmem:[#allocation2 + $0xe4] sm:$0xf0]  ;;  %v9079_v7 = vor.u32 %v13488_v2, %v9076_v4  ;;  %v13489_v9 = vld [vmem:[#allocation2 + $0xcc] sm:$0xf]  ;;  %v9042_v11 = vld [vmem:[#allocation2 + $0x80] sm:$0xf] }
  0x20   :  { %v9083_v8 = vor.u32 %v13493_v6, %v9082_v5  ;;  %v9084_v10 = vld [vmem:[#allocation2 + $0xe8] sm:$0xf0]  ;;  %v13484_v13 = vld [vmem:[#allocation2 + $0x9c] sm:$0xf0]  ;;  %v13480_v14 = vld [vmem:[#allocation2 + $0x84] sm:$0xf] }
  0x21   :  { %354 = vmatpush.bf16.msra.mxu0 %v9075_v3  ;;  %v9087_v12 = vor.u32 %v13489_v9, %v9084_v10  ;;  %v9044_v15 = vld [vmem:[#allocation2 + $0xa0] sm:$0xf0]  ;;  %367 = vmatpush.bf16.msra.mxu1 %v9079_v7  ;;  %v9043_v16 = vor.u32 %v13484_v13, %v9042_v11  ;;  %v9050_v18 = vld [vmem:[#allocation2 + $0x88] sm:$0xf]  ;;  %v13481_v20 = vld [vmem:[#allocation2 + $0x8c] sm:$0xf] }
  0x22   :  { %380 = vmatpush.bf16.msra.mxu2 %v9083_v8  ;;  %v9047_v17 = vor.u32 %v13480_v14, %v9044_v15  ;;  %v13485_v19 = vld [vmem:[#allocation2 + $0xa4] sm:$0xf0]  ;;  %v9052_v22 = vld [vmem:[#allocation2 + $0xa8] sm:$0xf0]  ;;  %v9010_v23 = vld [vmem:[#allocation2 + $0x40] sm:$0xf] }
  0x23   :  { %393 = vmatpush.bf16.msra.mxu3 %v9087_v12  ;;  %v9051_v21 = vor.u32 %v13485_v19, %v9050_v18  ;;  %v13476_v24 = vld [vmem:[#allocation2 + $0x5c] sm:$0xf0]  ;;  %v9055_v25 = vor.u32 %v13481_v20, %v9052_v22  ;;  %v13472_v26 = vld [vmem:[#allocation2 + $0x44] sm:$0xf]  ;;  %v9018_v28 = vld [vmem:[#allocation2 + $0x48] sm:$0xf] }
  0x24   :  { %v9012_v27 = vld [vmem:[#allocation2 + $0x60] sm:$0xf0]  ;;  %v9011_v29 = vor.u32 %v13476_v24, %v9010_v23  ;;  %v13477_v30 = vld [vmem:[#allocation2 + $0x64] sm:$0xf0]  ;;  %v13473_v31 = vld [vmem:[#allocation2 + $0x4c] sm:$0xf] }
  0x25   :  { %355 = vmatpush.bf16.msra.mxu0 %v9043_v16  ;;  %v9020_v32 = vld [vmem:[#allocation2 + $0x68] sm:$0xf0]  ;;  %368 = vmatpush.bf16.msra.mxu1 %v9047_v17  ;;  %v9015_v33 = vor.u32 %v13472_v26, %v9012_v27  ;;  %v9019_v34 = vor.u32 %v13477_v30, %v9018_v28  ;;  %v8978_v35 = vld [vmem:[#allocation2] sm:$0xf]  ;;  %v13464_v37 = vld [vmem:[#allocation2 + $0x4] sm:$0xf] }
  0x26   :  { %381 = vmatpush.bf16.msra.mxu2 %v9051_v21  ;;  %v13468_v36 = vld [vmem:[#allocation2 + $0x1c] sm:$0xf0]  ;;  %v9023_v38 = vor.u32 %v13473_v31, %v9020_v32  ;;  %v8980_v39 = vld [vmem:[#allocation2 + $0x20] sm:$0xf0]  ;;  %v8986_v40 = vld [vmem:[#allocation2 + $0x8] sm:$0xf] }
  0x27   :  { %394 = vmatpush.bf16.msra.mxu3 %v9055_v25  ;;  %v13469_v41 = vld [vmem:[#allocation2 + $0x24] sm:$0xf0]  ;;  %v13465_v42 = vld [vmem:[#allocation2 + $0xc] sm:$0xf]  ;;  %v134_v44 = vld [vmem:[%s15493_s0] sm:$0xff]  ;;  %v8979_v45 = vor.u32 %v13468_v36, %v8978_v35  ;;  %v8983_v49 = vor.u32 %v13464_v37, %v8980_v39  ;;  %vm346_vm0 = vcmask 523264  }
  0x28   :  { %v8988_v43 = vld [vmem:[#allocation2 + $0x28] sm:$0xf0]  ;;  %v9090_v46 = vld [vmem:[#allocation2 + $0xd0] sm:$0xf]  ;;  %v13490_v48 = vld [vmem:[#allocation2 + $0xd4] sm:$0xf]  ;;  %v8987_v50 = vor.u32 %v13469_v41, %v8986_v40  ;;  %v14906_v57 = vpack.c.bf16 %v134_v44, %v134_v44 }
  0x29   :  { %356 = vmatpush.bf16.msra.mxu0 %v9011_v29  ;;  %v13494_v47 = vld [vmem:[#allocation2 + $0xec] sm:$0xf0]  ;;  %369 = vmatpush.bf16.msra.mxu1 %v9015_v33  ;;  %v9092_v51 = vld [vmem:[#allocation2 + $0xf0] sm:$0xf0]  ;;  %v8991_v52 = vor.u32 %v13465_v42, %v8988_v43  ;;  %v9098_v54 = vld [vmem:[#allocation2 + $0xd8] sm:$0xf] }
  0x2a   :  { %382 = vmatpush.bf16.msra.mxu2 %v9019_v34  ;;  %v9091_v53 = vor.u32 %v13494_v47, %v9090_v46  ;;  %v13495_v55 = vld [vmem:[#allocation2 + $0xf4] sm:$0xf0]  ;;  %v13491_v56 = vld [vmem:[#allocation2 + $0xdc] sm:$0xf]  ;;  %v9095_v58 = vor.u32 %v13490_v48, %v9092_v51  ;;  %v9058_v60 = vld [vmem:[#allocation2 + $0x90] sm:$0xf] }
  0x2b   :  { %395 = vmatpush.bf16.msra.mxu3 %v9023_v38  ;;  %v9100_v59 = vld [vmem:[#allocation2 + $0xf8] sm:$0xf0]  ;;  %v13486_v61 = vld [vmem:[#allocation2 + $0xac] sm:$0xf0]  ;;  %v13482_v62 = vld [vmem:[#allocation2 + $0x94] sm:$0xf]  ;;  %v9099_v0 = vor.u32 %v13495_v55, %v9098_v54 }
  0x2c   :  { %v9060_v63 = vld [vmem:[#allocation2 + $0xb0] sm:$0xf0]  ;;  %v9103_v1 = vor.u32 %v13491_v56, %v9100_v59  ;;  %v9059_v2 = vor.u32 %v13486_v61, %v9058_v60  ;;  %v9066_v3 = vld [vmem:[#allocation2 + $0x98] sm:$0xf]  ;;  %v13483_v5 = vld [vmem:[#allocation2 + $0x9c] sm:$0xf] }
  0x2d   :  { %357 = vmatpush.bf16.msra.mxu0 %v8979_v45  ;;  %370 = vmatpush.bf16.msra.mxu1 %v8983_v49  ;;  %v13487_v4 = vld [vmem:[#allocation2 + $0xb4] sm:$0xf0]  ;;  %v9063_v6 = vor.u32 %v13482_v62, %v9060_v63  ;;  %v9068_v7 = vld [vmem:[#allocation2 + $0xb8] sm:$0xf0]  ;;  %v9026_v8 = vld [vmem:[#allocation2 + $0x50] sm:$0xf] }
  0x2e   :  { %383 = vmatpush.bf16.msra.mxu2 %v8987_v50  ;;  %v13478_v9 = vld [vmem:[#allocation2 + $0x6c] sm:$0xf0]  ;;  %v13474_v10 = vld [vmem:[#allocation2 + $0x54] sm:$0xf]  ;;  %v9067_v12 = vor.u32 %v13487_v4, %v9066_v3  ;;  %v9034_v13 = vld [vmem:[#allocation2 + $0x58] sm:$0xf]  ;;  %v9071_v14 = vor.u32 %v13483_v5, %v9068_v7 }
  0x2f   :  { %396 = vmatpush.bf16.msra.mxu3 %v8991_v52  ;;  %v9028_v11 = vld [vmem:[#allocation2 + $0x70] sm:$0xf0]  ;;  %v9027_v15 = vor.u32 %v13478_v9, %v9026_v8  ;;  %v13479_v16 = vld [vmem:[#allocation2 + $0x74] sm:$0xf0]  ;;  %v13475_v17 = vld [vmem:[#allocation2 + $0x5c] sm:$0xf] }
  0x30   :  { %9104 = vmatmul.msk.bf16.vlgmr.msra.gmra.mxu0 %vm346_vm0, %v14906_v57  ;;  %9105 = vmatmul.msk.bf16.vlgmr.msra.gmra.mxu1 %vm346_vm0, %v14906_v57  ;;  %v9036_v18 = vld [vmem:[#allocation2 + $0x78] sm:$0xf0]  ;;  %v9031_v19 = vor.u32 %v13474_v10, %v9028_v11  ;;  %v8994_v20 = vld [vmem:[#allocation2 + $0x10] sm:$0xf]  ;;  %v13466_v22 = vld [vmem:[#allocation2 + $0x14] sm:$0xf]  ;;  %v9035_v26 = vor.u32 %v13479_v16, %v9034_v13 }
  0x31   :  { %406 = vmatpush.bf16.msrb.mxu0 %v9091_v53  ;;  %419 = vmatpush.bf16.msrb.mxu1 %v9095_v58  ;;  %v13470_v21 = vld [vmem:[#allocation2 + $0x2c] sm:$0xf0]  ;;  %v8996_v23 = vld [vmem:[#allocation2 + $0x30] sm:$0xf0]  ;;  %v9338_v24 = vld [vmem:[#allocation6 + $0x1c0] sm:$0xf]  ;;  %v9039_v29 = vor.u32 %v13475_v17, %v9036_v18 }
  0x32   :  { %9106 = vmatmul.msk.bf16.vlgmr.msra.gmra.mxu2 %vm346_vm0, %v14906_v57  ;;  %9107 = vmatmul.msk.bf16.vlgmr.msra.gmra.mxu3 %vm346_vm0, %v14906_v57  ;;  %v13556_v25 = vld [vmem:[#allocation6 + $0x1dc] sm:$0xf0]  ;;  %v8995_v30 = vor.u32 %v13470_v21, %v8994_v20  ;;  %v9002_v31 = vld [vmem:[#allocation2 + $0x18] sm:$0xf]  ;;  %v13467_v33 = vld [vmem:[#allocation2 + $0x1c] sm:$0xf]  ;;  %v8999_v34 = vor.u32 %v13466_v22, %v8996_v23 }
  0x33   :  { %432 = vmatpush.bf16.msrb.mxu2 %v9099_v0  ;;  %445 = vmatpush.bf16.msrb.mxu3 %v9103_v1  ;;  %v9594_v27 = vld [vmem:[#allocation6 + $0x3c0] sm:$0xf]  ;;  %v13471_v32 = vld [vmem:[#allocation2 + $0x34] sm:$0xf0]  ;;  %v9004_v35 = vld [vmem:[#allocation2 + $0x38] sm:$0xf0]  ;;  %v9339_v36 = vor.u32 %v13556_v25, %v9338_v24 }
  0x34   :  { %v13620_v28 = vld [vmem:[#allocation6 + $0x3dc] sm:$0xf0]  ;;  %v9003_v42 = vor.u32 %v13471_v32, %v9002_v31  ;;  %v9007_v43 = vor.u32 %v13467_v33, %v9004_v35  ;;  %vm8966_vm1 = vcmask 80896  }
  0x35   :  { %407 = vmatpush.bf16.msrb.mxu0 %v9059_v2  ;;  %420 = vmatpush.bf16.msrb.mxu1 %v9063_v6  ;;  %v9850_v37 = vld [vmem:[#allocation6 + $0x5c0] sm:$0xf]  ;;  %v9595_v39 = vor.u32 %v13620_v28, %v9594_v27 }
  0x36   :  { %v13684_v38 = vld [vmem:[#allocation6 + $0x5dc] sm:$0xf0] }
  0x37   :  { %433 = vmatpush.bf16.msrb.mxu2 %v9067_v12  ;;  %446 = vmatpush.bf16.msrb.mxu3 %v9071_v14  ;;  %v10106_v40 = vld [vmem:[#allocation6 + $0x7c0] sm:$0xf]  ;;  %v9851_v47 = vor.u32 %v13684_v38, %v9850_v37 }
  0x38   :  { %v13748_v41 = vld [vmem:[#allocation6 + $0x7dc] sm:$0xf0] }
  0x39   :  { %408 = vmatpush.bf16.msrb.mxu0 %v9027_v15  ;;  %421 = vmatpush.bf16.msrb.mxu1 %v9031_v19  ;;  %v9306_v44 = vld [vmem:[#allocation6 + $0x180] sm:$0xf]  ;;  %v10107_v49 = vor.u32 %v13748_v41, %v10106_v40 }
  0x3a   :  { %v13548_v45 = vld [vmem:[#allocation6 + $0x19c] sm:$0xf0] }
  0x3b   :  { %434 = vmatpush.bf16.msrb.mxu2 %v9035_v26  ;;  %447 = vmatpush.bf16.msrb.mxu3 %v9039_v29  ;;  %v9562_v46 = vld [vmem:[#allocation6 + $0x380] sm:$0xf]  ;;  %v9307_v54 = vor.u32 %v13548_v45, %v9306_v44 }
  0x3c   :  { %v13612_v48 = vld [vmem:[#allocation6 + $0x39c] sm:$0xf0] }
  0x3d   :  { %409 = vmatpush.bf16.msrb.mxu0 %v8995_v30  ;;  %422 = vmatpush.bf16.msrb.mxu1 %v8999_v34  ;;  %v9818_v50 = vld [vmem:[#allocation6 + $0x580] sm:$0xf]  ;;  %v9563_v55 = vor.u32 %v13612_v48, %v9562_v46 }
  0x3e   :  { %v13676_v51 = vld [vmem:[#allocation6 + $0x59c] sm:$0xf0] }
  0x3f   :  { %v10074_v52 = vld [vmem:[#allocation6 + $0x780] sm:$0xf]  ;;  %435 = vmatpush.bf16.msrb.mxu2 %v9003_v42  ;;  %448 = vmatpush.bf16.msrb.mxu3 %v9007_v43  ;;  %v9819_v60 = vor.u32 %v13676_v51, %v9818_v50 }
  0x40   :  { %v13740_v53 = vld [vmem:[#allocation6 + $0x79c] sm:$0xf0]  ;;  %9108 = vmatmul.msk.bf16.vlgmr.msrb.gmra.mxu0 %vm346_vm0, %v14906_v57  ;;  %9109 = vmatmul.msk.bf16.vlgmr.msrb.gmra.mxu1 %vm346_vm0, %v14906_v57 }
  0x41   :  { %3560 = vmatpush.bf16.msra.mxu0 %v9339_v36  ;;  %3573 = vmatpush.bf16.msra.mxu1 %v9595_v39  ;;  %v9274_v56 = vld [vmem:[#allocation6 + $0x140] sm:$0xf]  ;;  %v10075_v62 = vor.u32 %v13740_v53, %v10074_v52 }
  0x42   :  { %v13540_v58 = vld [vmem:[#allocation6 + $0x15c] sm:$0xf0]  ;;  %9110 = vmatmul.msk.bf16.vlgmr.msrb.gmra.mxu2 %vm346_vm0, %v14906_v57  ;;  %9111 = vmatmul.msk.bf16.vlgmr.msrb.gmra.mxu3 %vm346_vm0, %v14906_v57 }
  0x43   :  { %3586 = vmatpush.bf16.msra.mxu2 %v9851_v47  ;;  %v9530_v59 = vld [vmem:[#allocation6 + $0x340] sm:$0xf]  ;;  %3599 = vmatpush.bf16.msra.mxu3 %v10107_v49  ;;  %v9275_v3 = vor.u32 %v13540_v58, %v9274_v56 }
  0x44   :  { %v13604_v61 = vld [vmem:[#allocation6 + $0x35c] sm:$0xf0] }
  0x45   :  { %v9786_v63 = vld [vmem:[#allocation6 + $0x540] sm:$0xf]  ;;  %3561 = vmatpush.bf16.msra.mxu0 %v9307_v54  ;;  %3574 = vmatpush.bf16.msra.mxu1 %v9563_v55  ;;  %v9531_v4 = vor.u32 %v13604_v61, %v9530_v59 }
  0x46   :  { %v13668_v0 = vld [vmem:[#allocation6 + $0x55c] sm:$0xf0] }
  0x47   :  { %v10042_v1 = vld [vmem:[#allocation6 + $0x740] sm:$0xf]  ;;  %3587 = vmatpush.bf16.msra.mxu2 %v9819_v60  ;;  %v9787_v8 = vor.u32 %v13668_v0, %v9786_v63  ;;  %3600 = vmatpush.bf16.msra.mxu3 %v10075_v62 }
  0x48   :  { %v13732_v2 = vld [vmem:[#allocation6 + $0x75c] sm:$0xf0] }
  0x49   :  { %v9242_v5 = vld [vmem:[#allocation6 + $0x100] sm:$0xf]  ;;  %v10043_v10 = vor.u32 %v13732_v2, %v10042_v1  ;;  %3562 = vmatpush.bf16.msra.mxu0 %v9275_v3  ;;  %3575 = vmatpush.bf16.msra.mxu1 %v9531_v4 }
  0x4a   :  { %v13532_v6 = vld [vmem:[#allocation6 + $0x11c] sm:$0xf0] }
  0x4b   :  { %v9498_v7 = vld [vmem:[#allocation6 + $0x300] sm:$0xf]  ;;  %v9243_v15 = vor.u32 %v13532_v6, %v9242_v5  ;;  %3588 = vmatpush.bf16.msra.mxu2 %v9787_v8  ;;  %3601 = vmatpush.bf16.msra.mxu3 %v10043_v10 }
  0x4c   :  { %v13596_v9 = vld [vmem:[#allocation6 + $0x31c] sm:$0xf0] }
  0x4d   :  { %v9754_v11 = vld [vmem:[#allocation6 + $0x500] sm:$0xf]  ;;  %v9499_v57 = vor.u32 %v13596_v9, %v9498_v7  ;;  %3563 = vmatpush.bf16.msra.mxu0 %v9243_v15 }
  0x4e   :  { %v13660_v12 = vld [vmem:[#allocation6 + $0x51c] sm:$0xf0] }
  0x4f   :  { %v10010_v13 = vld [vmem:[#allocation6 + $0x700] sm:$0xf]  ;;  %v9755_v19 = vor.u32 %v13660_v12, %v9754_v11  ;;  %3576 = vmatpush.bf16.msra.mxu1 %v9499_v57 }
  0x50   :  { %v13724_v14 = vld [vmem:[#allocation6 + $0x71c] sm:$0xf0] }
  0x51   :  { %v9210_v16 = vld [vmem:[#allocation6 + $0xc0] sm:$0xf]  ;;  %v10011_v21 = vor.u32 %v13724_v14, %v10010_v13  ;;  %3589 = vmatpush.bf16.msra.mxu2 %v9755_v19 }
  0x52   :  { %v13524_v17 = vld [vmem:[#allocation6 + $0xdc] sm:$0xf0] }
  0x53   :  { %v9466_v18 = vld [vmem:[#allocation6 + $0x2c0] sm:$0xf]  ;;  %v9211_v26 = vor.u32 %v13524_v17, %v9210_v16  ;;  %3602 = vmatpush.bf16.msra.mxu3 %v10011_v21 }
  0x54   :  { %v13588_v20 = vld [vmem:[#allocation6 + $0x2dc] sm:$0xf0] }
  0x55   :  { %v9722_v22 = vld [vmem:[#allocation6 + $0x4c0] sm:$0xf]  ;;  %v9467_v27 = vor.u32 %v13588_v20, %v9466_v18  ;;  %3564 = vmatpush.bf16.msra.mxu0 %v9211_v26 }
  0x56   :  { %v13652_v23 = vld [vmem:[#allocation6 + $0x4dc] sm:$0xf0] }
  0x57   :  { %v9978_v24 = vld [vmem:[#allocation6 + $0x6c0] sm:$0xf]  ;;  %v9723_v31 = vor.u32 %v13652_v23, %v9722_v22  ;;  %3577 = vmatpush.bf16.msra.mxu1 %v9467_v27 }
  0x58   :  { %v13716_v25 = vld [vmem:[#allocation6 + $0x6dc] sm:$0xf0] }
  0x59   :  { %v9178_v28 = vld [vmem:[#allocation6 + $0x80] sm:$0xf]  ;;  %v9979_v33 = vor.u32 %v13716_v25, %v9978_v24  ;;  %3590 = vmatpush.bf16.msra.mxu2 %v9723_v31 }
  0x5a   :  { %v13516_v29 = vld [vmem:[#allocation6 + $0x9c] sm:$0xf0] }
  0x5b   :  { %v9434_v30 = vld [vmem:[#allocation6 + $0x280] sm:$0xf]  ;;  %v9179_v38 = vor.u32 %v13516_v29, %v9178_v28  ;;  %3603 = vmatpush.bf16.msra.mxu3 %v9979_v33 }
  0x5c   :  { %v13580_v32 = vld [vmem:[#allocation6 + $0x29c] sm:$0xf0] }
  0x5d   :  { %v9690_v34 = vld [vmem:[#allocation6 + $0x480] sm:$0xf]  ;;  %v9435_v39 = vor.u32 %v13580_v32, %v9434_v30  ;;  %3565 = vmatpush.bf16.msra.mxu0 %v9179_v38 }
  0x5e   :  { %v13644_v35 = vld [vmem:[#allocation6 + $0x49c] sm:$0xf0] }
  0x5f   :  { %v9946_v36 = vld [vmem:[#allocation6 + $0x680] sm:$0xf]  ;;  %v9691_v43 = vor.u32 %v13644_v35, %v9690_v34  ;;  %3578 = vmatpush.bf16.msra.mxu1 %v9435_v39 }
  0x60   :  { %v13708_v37 = vld [vmem:[#allocation6 + $0x69c] sm:$0xf0] }
  0x61   :  { %v9146_v40 = vld [vmem:[#allocation6 + $0x40] sm:$0xf]  ;;  %v9947_v45 = vor.u32 %v13708_v37, %v9946_v36  ;;  %3591 = vmatpush.bf16.msra.mxu2 %v9691_v43 }
  0x62   :  { %v13508_v41 = vld [vmem:[#allocation6 + $0x5c] sm:$0xf0] }
  0x63   :  { %v9402_v42 = vld [vmem:[#allocation6 + $0x240] sm:$0xf]  ;;  %v9147_v50 = vor.u32 %v13508_v41, %v9146_v40  ;;  %3604 = vmatpush.bf16.msra.mxu3 %v9947_v45 }
  0x64   :  { %v13572_v44 = vld [vmem:[#allocation6 + $0x25c] sm:$0xf0] }
  0x65   :  { %v9658_v46 = vld [vmem:[#allocation6 + $0x440] sm:$0xf]  ;;  %v9403_v54 = vor.u32 %v13572_v44, %v9402_v42  ;;  %3566 = vmatpush.bf16.msra.mxu0 %v9147_v50 }
  0x66   :  { %v13636_v47 = vld [vmem:[#allocation6 + $0x45c] sm:$0xf0] }
  0x67   :  { %v9914_v48 = vld [vmem:[#allocation6 + $0x640] sm:$0xf]  ;;  %v9659_v59 = vor.u32 %v13636_v47, %v9658_v46  ;;  %3579 = vmatpush.bf16.msra.mxu1 %v9403_v54 }
  0x68   :  { %v13700_v49 = vld [vmem:[#allocation6 + $0x65c] sm:$0xf0] }
  0x69   :  { %v9114_v51 = vld [vmem:[#allocation6] sm:$0xf]  ;;  %v9915_v62 = vor.u32 %v13700_v49, %v9914_v48  ;;  %3592 = vmatpush.bf16.msra.mxu2 %v9659_v59 }
  0x6a   :  { %v13500_v52 = vld [vmem:[#allocation6 + $0x1c] sm:$0xf0] }
  0x6b   :  { %v9370_v53 = vld [vmem:[#allocation6 + $0x200] sm:$0xf]  ;;  %v9115_v2 = vor.u32 %v13500_v52, %v9114_v51  ;;  %3605 = vmatpush.bf16.msra.mxu3 %v9915_v62 }
  0x6c   :  { %v13564_v55 = vld [vmem:[#allocation6 + $0x21c] sm:$0xf0] }
  0x6d   :  { %v10362_v56 = vld [vmem:[#allocation6 + $0x9c0] sm:$0xf]  ;;  %v9371_v6 = vor.u32 %v13564_v55, %v9370_v53  ;;  %3567 = vmatpush.bf16.msra.mxu0 %v9115_v2 }
  0x6e   :  { %v13812_v58 = vld [vmem:[#allocation6 + $0x9dc] sm:$0xf0] }
  0x6f   :  { %v10618_v60 = vld [vmem:[#allocation6 + $0xbc0] sm:$0xf]  ;;  %v10363_v7 = vor.u32 %v13812_v58, %v10362_v56  ;;  %3580 = vmatpush.bf16.msra.mxu1 %v9371_v6 }
  0x70   :  { %v13876_v61 = vld [vmem:[#allocation6 + $0xbdc] sm:$0xf0] }
  0x71   :  { %v9626_v63 = vld [vmem:[#allocation6 + $0x400] sm:$0xf]  ;;  %v10619_v10 = vor.u32 %v13876_v61, %v10618_v60  ;;  %3612 = vmatpush.bf16.msrb.mxu0 %v10363_v7 }
  0x72   :  { %v13628_v0 = vld [vmem:[#allocation6 + $0x41c] sm:$0xf0] }
  0x73   :  { %v9882_v1 = vld [vmem:[#allocation6 + $0x600] sm:$0xf]  ;;  %v9627_v13 = vor.u32 %v13628_v0, %v9626_v63  ;;  %3625 = vmatpush.bf16.msrb.mxu1 %v10619_v10 }
  0x74   :  { %v13692_v3 = vld [vmem:[#allocation6 + $0x61c] sm:$0xf0] }
  0x75   :  { %v10874_v4 = vld [vmem:[#allocation6 + $0xdc0] sm:$0xf]  ;;  %v9883_v57 = vor.u32 %v13692_v3, %v9882_v1  ;;  %3593 = vmatpush.bf16.msra.mxu2 %v9627_v13 }
  0x76   :  { %v13940_v5 = vld [vmem:[#allocation6 + $0xddc] sm:$0xf0] }
  0x77   :  { %v11130_v8 = vld [vmem:[#allocation6 + $0xfc0] sm:$0xf]  ;;  %v10875_v16 = vor.u32 %v13940_v5, %v10874_v4  ;;  %3606 = vmatpush.bf16.msra.mxu3 %v9883_v57 }
  0x78   :  { %v14004_v9 = vld [vmem:[#allocation6 + $0xfdc] sm:$0xf0] }
  0x79   :  { %v10330_v11 = vld [vmem:[#allocation6 + $0x980] sm:$0xf]  ;;  %v11131_v17 = vor.u32 %v14004_v9, %v11130_v8  ;;  %3638 = vmatpush.bf16.msrb.mxu2 %v10875_v16 }
  0x7a   :  { %v13804_v12 = vld [vmem:[#allocation6 + $0x99c] sm:$0xf0] }
  0x7b   :  { %v10586_v14 = vld [vmem:[#allocation6 + $0xb80] sm:$0xf]  ;;  %v10331_v20 = vor.u32 %v13804_v12, %v10330_v11  ;;  %3651 = vmatpush.bf16.msrb.mxu3 %v11131_v17 }
  0x7c   :  { %v13868_v15 = vld [vmem:[#allocation6 + $0xb9c] sm:$0xf0] }
  0x7d   :  { %v10842_v18 = vld [vmem:[#allocation6 + $0xd80] sm:$0xf]  ;;  %v10587_v23 = vor.u32 %v13868_v15, %v10586_v14  ;;  %3613 = vmatpush.bf16.msrb.mxu0 %v10331_v20 }
  0x7e   :  { %v13932_v19 = vld [vmem:[#allocation6 + $0xd9c] sm:$0xf0] }
  0x7f   :  { %v11098_v21 = vld [vmem:[#allocation6 + $0xf80] sm:$0xf]  ;;  %v10843_v28 = vor.u32 %v13932_v19, %v10842_v18  ;;  %3626 = vmatpush.bf16.msrb.mxu1 %v10587_v23 }
  0x80   :  { %v13996_v22 = vld [vmem:[#allocation6 + $0xf9c] sm:$0xf0] }
  0x81   :  { %v10298_v24 = vld [vmem:[#allocation6 + $0x940] sm:$0xf]  ;;  %v11099_v29 = vor.u32 %v13996_v22, %v11098_v21  ;;  %3639 = vmatpush.bf16.msrb.mxu2 %v10843_v28 }
  0x82   :  { %v13796_v25 = vld [vmem:[#allocation6 + $0x95c] sm:$0xf0] }
  0x83   :  { %v10554_v26 = vld [vmem:[#allocation6 + $0xb40] sm:$0xf]  ;;  %v10299_v32 = vor.u32 %v13796_v25, %v10298_v24  ;;  %3652 = vmatpush.bf16.msrb.mxu3 %v11099_v29 }
  0x84   :  { %v13860_v27 = vld [vmem:[#allocation6 + $0xb5c] sm:$0xf0] }
  0x85   :  { %v10810_v30 = vld [vmem:[#allocation6 + $0xd40] sm:$0xf]  ;;  %v10555_v35 = vor.u32 %v13860_v27, %v10554_v26  ;;  %3614 = vmatpush.bf16.msrb.mxu0 %v10299_v32 }
  0x86   :  { %v13924_v31 = vld [vmem:[#allocation6 + $0xd5c] sm:$0xf0] }
  0x87   :  { %v11066_v33 = vld [vmem:[#allocation6 + $0xf40] sm:$0xf]  ;;  %v10811_v40 = vor.u32 %v13924_v31, %v10810_v30  ;;  %3627 = vmatpush.bf16.msrb.mxu1 %v10555_v35 }
  0x88   :  { %v13988_v34 = vld [vmem:[#allocation6 + $0xf5c] sm:$0xf0] }
  0x89   :  { %v10266_v36 = vld [vmem:[#allocation6 + $0x900] sm:$0xf]  ;;  %v11067_v41 = vor.u32 %v13988_v34, %v11066_v33  ;;  %3640 = vmatpush.bf16.msrb.mxu2 %v10811_v40  ;;  %v14924_v34 = vld [vmem:[#allocation4] sm:$0xff] }
  0x8a   :  { %v13788_v37 = vld [vmem:[#allocation6 + $0x91c] sm:$0xf0]  ;;  %v170_v35 = vperm.slane %v14924_v34, 0 }
  0x8b   :  { %v10522_v38 = vld [vmem:[#allocation6 + $0xb00] sm:$0xf]  ;;  %v10267_v42 = vor.u32 %v13788_v37, %v10266_v36  ;;  %3653 = vmatpush.bf16.msrb.mxu3 %v11067_v41  ;;  %v171_v36 = vperm.slane %v14924_v34, 1  ;;  %v172_v41 = vperm.slane %v14924_v34, 2 }
  0x8c   :  { %v13852_v39 = vld [vmem:[#allocation6 + $0xb1c] sm:$0xf0] }
  0x8d   :  { %v10523_v43 = vor.u32 %v13852_v39, %v10522_v38  ;;  %v10234_v44 = vld [vmem:[#allocation6 + $0x8c0] sm:$0xf]  ;;  %3615 = vmatpush.bf16.msrb.mxu0 %v10267_v42  ;;  %v173_v42 = vperm.slane %v14924_v34, 3 }
  0x8e   :  { %v13780_v45 = vld [vmem:[#allocation6 + $0x8dc] sm:$0xf0] }
  0x8f   :  { %v10490_v46 = vld [vmem:[#allocation6 + $0xac0] sm:$0xf]  ;;  %v10235_v48 = vor.u32 %v13780_v45, %v10234_v44  ;;  %3628 = vmatpush.bf16.msrb.mxu1 %v10523_v43  ;;  %v13552_v43 = vld [vmem:[#allocation6 + $0x1c4] sm:$0xf] }
  0x90   :  { %v13844_v47 = vld [vmem:[#allocation6 + $0xadc] sm:$0xf0]  ;;  %v9340_v44 = vld [vmem:[#allocation6 + $0x1e0] sm:$0xf0] }
  0x91   :  { %v10491_v49 = vor.u32 %v13844_v47, %v10490_v46  ;;  %3616 = vmatpush.bf16.msrb.mxu0 %v10235_v48  ;;  %v10778_v50 = vld [vmem:[#allocation6 + $0xd00] sm:$0xf]  ;;  %v13616_v46 = vld [vmem:[#allocation6 + $0x3c4] sm:$0xf] }
  0x92   :  { %v13916_v51 = vld [vmem:[#allocation6 + $0xd1c] sm:$0xf0]  ;;  %v9596_v47 = vld [vmem:[#allocation6 + $0x3e0] sm:$0xf0] }
  0x93   :  { %3629 = vmatpush.bf16.msrb.mxu1 %v10491_v49  ;;  %v11034_v52 = vld [vmem:[#allocation6 + $0xf00] sm:$0xf]  ;;  %v10779_v53 = vor.u32 %v13916_v51, %v10778_v50 }
  0x94   :  { %v13980_v54 = vld [vmem:[#allocation6 + $0xf1c] sm:$0xf0] }
  0x95   :  { %v11035_v55 = vor.u32 %v13980_v54, %v11034_v52  ;;  %v10202_v56 = vld [vmem:[#allocation6 + $0x880] sm:$0xf]  ;;  %3641 = vmatpush.bf16.msrb.mxu2 %v10779_v53  ;;  %v9343_v54 = vor.u32 %v13552_v43, %v9340_v44  ;;  %v10044_v43 = vld [vmem:[#allocation6 + $0x760] sm:$0xf0] }
  0x96   :  { %v13772_v58 = vld [vmem:[#allocation6 + $0x89c] sm:$0xf0]  ;;  %v13520_v44 = vld [vmem:[#allocation6 + $0xc4] sm:$0xf] }
  0x97   :  { %v10458_v59 = vld [vmem:[#allocation6 + $0xa80] sm:$0xf]  ;;  %v10203_v60 = vor.u32 %v13772_v58, %v10202_v56  ;;  %3654 = vmatpush.bf16.msrb.mxu3 %v11035_v55  ;;  %v9599_v58 = vor.u32 %v13616_v46, %v9596_v47  ;;  %v9212_v46 = vld [vmem:[#allocation6 + $0xe0] sm:$0xf0] }
  0x98   :  { %v13836_v61 = vld [vmem:[#allocation6 + $0xa9c] sm:$0xf0]  ;;  %v13584_v47 = vld [vmem:[#allocation6 + $0x2c4] sm:$0xf] }
  0x99   :  { %v10459_v62 = vor.u32 %v13836_v61, %v10458_v59  ;;  %v10746_v63 = vld [vmem:[#allocation6 + $0xcc0] sm:$0xf]  ;;  %3617 = vmatpush.bf16.msrb.mxu0 %v10203_v60  ;;  %v13544_v59 = vld [vmem:[#allocation6 + $0x184] sm:$0xf] }
  0x9a   :  { %v13908_v0 = vld [vmem:[#allocation6 + $0xcdc] sm:$0xf0]  ;;  %v9308_v60 = vld [vmem:[#allocation6 + $0x1a0] sm:$0xf0] }
  0x9b   :  { %v11002_v1 = vld [vmem:[#allocation6 + $0xec0] sm:$0xf]  ;;  %v10747_v2 = vor.u32 %v13908_v0, %v10746_v63  ;;  %3630 = vmatpush.bf16.msrb.mxu1 %v10459_v62  ;;  %v13608_v62 = vld [vmem:[#allocation6 + $0x384] sm:$0xf]  ;;  %v174_v0 = vperm.slane %v14924_v34, 4 }
  0x9c   :  { %v13972_v3 = vld [vmem:[#allocation6 + $0xedc] sm:$0xf0]  ;;  %v9564_v63 = vld [vmem:[#allocation6 + $0x3a0] sm:$0xf0] }
  0x9d   :  { %v11003_v4 = vor.u32 %v13972_v3, %v11002_v1  ;;  %v10170_v5 = vld [vmem:[#allocation6 + $0x840] sm:$0xf]  ;;  %3642 = vmatpush.bf16.msrb.mxu2 %v10747_v2  ;;  %v175_v1 = vperm.slane %v14924_v34, 5  ;;  %v9311_v2 = vor.u32 %v13544_v59, %v9308_v60  ;;  %v13680_v3 = vld [vmem:[#allocation6 + $0x5c4] sm:$0xf] }
  0x9e   :  { %v13764_v6 = vld [vmem:[#allocation6 + $0x85c] sm:$0xf0] }
  0x9f   :  { %v10426_v7 = vld [vmem:[#allocation6 + $0xa40] sm:$0xf]  ;;  %v10171_v8 = vor.u32 %v13764_v6, %v10170_v5  ;;  %3655 = vmatpush.bf16.msrb.mxu3 %v11003_v4  ;;  %v9852_v4 = vld [vmem:[#allocation6 + $0x5e0] sm:$0xf0]  ;;  %v9567_v6 = vor.u32 %v13608_v62, %v9564_v63  ;;  %v9215_v63 = vor.u32 %v13520_v44, %v9212_v46 }
  0xa0   :  { %v13828_v9 = vld [vmem:[#allocation6 + $0xa5c] sm:$0xf0]  ;;  %v13744_v5 = vld [vmem:[#allocation6 + $0x7c4] sm:$0xf] }
  0xa1   :  { %v10427_v10 = vor.u32 %v13828_v9, %v10426_v7  ;;  %v10714_v11 = vld [vmem:[#allocation6 + $0xc80] sm:$0xf]  ;;  %3618 = vmatpush.bf16.msrb.mxu0 %v10171_v8  ;;  %v10108_v7 = vld [vmem:[#allocation6 + $0x7e0] sm:$0xf0] }
  0xa2   :  { %v13900_v12 = vld [vmem:[#allocation6 + $0xc9c] sm:$0xf0]  ;;  %v13536_v8 = vld [vmem:[#allocation6 + $0x144] sm:$0xf] }
  0xa3   :  { %v10970_v13 = vld [vmem:[#allocation6 + $0xe80] sm:$0xf]  ;;  %v10715_v14 = vor.u32 %v13900_v12, %v10714_v11  ;;  %3631 = vmatpush.bf16.msrb.mxu1 %v10427_v10  ;;  %v9276_v9 = vld [vmem:[#allocation6 + $0x160] sm:$0xf0] }
  0xa4   :  { %v13964_v15 = vld [vmem:[#allocation6 + $0xe9c] sm:$0xf0]  ;;  %v13600_v11 = vld [vmem:[#allocation6 + $0x344] sm:$0xf] }
  0xa5   :  { %v10971_v57 = vor.u32 %v13964_v15, %v10970_v13  ;;  %v10138_v16 = vld [vmem:[#allocation6 + $0x800] sm:$0xf]  ;;  %3643 = vmatpush.bf16.msrb.mxu2 %v10715_v14  ;;  %v9532_v12 = vld [vmem:[#allocation6 + $0x360] sm:$0xf0] }
  0xa6   :  { %v13756_v17 = vld [vmem:[#allocation6 + $0x81c] sm:$0xf0]  ;;  %v10620_v44 = vld [vmem:[#allocation6 + $0xbe0] sm:$0xf0] }
  0xa7   :  { %v10394_v18 = vld [vmem:[#allocation6 + $0xa00] sm:$0xf]  ;;  %v10139_v19 = vor.u32 %v13756_v17, %v10138_v16  ;;  %3656 = vmatpush.bf16.msrb.mxu3 %v10971_v57  ;;  %v9855_v57 = vor.u32 %v13680_v3, %v9852_v4  ;;  %v13512_v3 = vld [vmem:[#allocation6 + $0x84] sm:$0xf] }
  0xa8   :  { %v13820_v20 = vld [vmem:[#allocation6 + $0xa1c] sm:$0xf0]  ;;  %v13632_v46 = vld [vmem:[#allocation6 + $0x444] sm:$0xf] }
  0xa9   :  { %v10395_v21 = vor.u32 %v13820_v20, %v10394_v18  ;;  %v10682_v22 = vld [vmem:[#allocation6 + $0xc40] sm:$0xf]  ;;  %3619 = vmatpush.bf16.msrb.mxu0 %v10139_v19  ;;  %v10111_v20 = vor.u32 %v13744_v5, %v10108_v7  ;;  %v9180_v5 = vld [vmem:[#allocation6 + $0xa0] sm:$0xf0] }
  0xaa   :  { %v13892_v23 = vld [vmem:[#allocation6 + $0xc5c] sm:$0xf0]  ;;  %v9436_v7 = vld [vmem:[#allocation6 + $0x2a0] sm:$0xf0] }
  0xab   :  { %v10938_v24 = vld [vmem:[#allocation6 + $0xe40] sm:$0xf]  ;;  %3632 = vmatpush.bf16.msrb.mxu1 %v10395_v21  ;;  %v10683_v26 = vor.u32 %v13892_v23, %v10682_v22  ;;  %v9279_v21 = vor.u32 %v13536_v8, %v9276_v9  ;;  %v13672_v22 = vld [vmem:[#allocation6 + $0x584] sm:$0xf] }
  0xac   :  { %v13956_v25 = vld [vmem:[#allocation6 + $0xe5c] sm:$0xf0]  ;;  %v9820_v23 = vld [vmem:[#allocation6 + $0x5a0] sm:$0xf0] }
  0xad   :  { %v10939_v27 = vor.u32 %v13956_v25, %v10938_v24  ;;  %3644 = vmatpush.bf16.msrb.mxu2 %v10683_v26  ;;  %v10650_v28 = vld [vmem:[#allocation6 + $0xc00] sm:$0xf]  ;;  %v359_v37 = vpop.f32.mrf.mxu0  ;;  %v372_v39 = vpop.f32.mrf.mxu1  ;;  %v13736_v24 = vld [vmem:[#allocation6 + $0x784] sm:$0xf] }
  0xae   :  { %v13884_v29 = vld [vmem:[#allocation6 + $0xc1c] sm:$0xf0]  ;;  %v360_v38 = vadd.f32 %v359_v37, %v170_v35  ;;  %v373_v40 = vadd.f32 %v372_v39, %v171_v36  ;;  %v9823_v35 = vor.u32 %v13672_v22, %v9820_v23  ;;  %v177_v36 = vperm.slane %v14924_v34, 7  ;;  %v13664_v39 = vld [vmem:[#allocation6 + $0x544] sm:$0xf] }
  0xaf   :  { %3657 = vmatpush.bf16.msrb.mxu3 %v10939_v27  ;;  %v10651_v30 = vor.u32 %v13884_v29, %v10650_v28  ;;  %v10906_v31 = vld [vmem:[#allocation6 + $0xe00] sm:$0xf]  ;;  %v9535_v27 = vor.u32 %v13600_v11, %v9532_v12  ;;  %v10076_v28 = vld [vmem:[#allocation6 + $0x7a0] sm:$0xf0]  ;;  %v9183_v12 = vor.u32 %v13512_v3, %v9180_v5 }
  0xb0   :  { %v13948_v32 = vld [vmem:[#allocation6 + $0xe1c] sm:$0xf0]  ;;  %14594 = vtanh.f32 %v360_v38  ;;  %v13528_v29 = vld [vmem:[#allocation6 + $0x104] sm:$0xf]  ;;  %v10079_v37 = vor.u32 %v13736_v24, %v10076_v28 }
  0xb1   :  { %v10907_v33 = vor.u32 %v13948_v32, %v10906_v31  ;;  %3645 = vmatpush.bf16.msrb.mxu2 %v10651_v30  ;;  %14596 = vtanh.f32 %v373_v40  ;;  %v9244_v30 = vld [vmem:[#allocation6 + $0x120] sm:$0xf0] }
  0xb2   :  { %v13592_v31 = vld [vmem:[#allocation6 + $0x304] sm:$0xf]  ;;  %v9247_v38 = vor.u32 %v13528_v29, %v9244_v30 }
  0xb3   :  { %3658 = vmatpush.bf16.msrb.mxu3 %v10907_v33  ;;  %v9500_v32 = vld [vmem:[#allocation6 + $0x320] sm:$0xf0]  ;;  %v176_v33 = vperm.slane %v14924_v34, 6 }
  0xb4   :  { %v9788_v40 = vld [vmem:[#allocation6 + $0x560] sm:$0xf0] }
  0xb5   :  { %v385_v45 = vpop.f32.mrf.mxu2  ;;  %v398_v49 = vpop.f32.mrf.mxu3  ;;  %v9724_v11 = vld [vmem:[#allocation6 + $0x4e0] sm:$0xf0] }
  0xb6   :  { %v386_v48 = vadd.f32 %v385_v45, %v172_v41  ;;  %v361_v50 = vpop.f32.mrf.mxu0  ;;  %v14595_v51 = vpop.eup %14594  ;;  %v399_v52 = vadd.f32 %v398_v49, %v173_v42  ;;  %v9503_v41 = vor.u32 %v13592_v31, %v9500_v32  ;;  %v13728_v42 = vld [vmem:[#allocation6 + $0x744] sm:$0xf] }
  0xb7   :  { %v374_v53 = vpop.f32.mrf.mxu1  ;;  %v14597_v55 = vpop.eup %14596  ;;  %v14930_v56 = vpack.c.bf16 %v14595_v51, %v14595_v51  ;;  %v9791_v51 = vor.u32 %v13664_v39, %v9788_v40  ;;  %v13640_v28 = vld [vmem:[#allocation6 + $0x484] sm:$0xf] }
  0xb8   :  { %14598 = vtanh.f32 %v386_v48  ;;  %v14932_v61 = vpack.c.bf16 %v14597_v55, %v14597_v55  ;;  %v9468_v48 = vld [vmem:[#allocation6 + $0x2e0] sm:$0xf0] }
  0xb9   :  { %14600 = vtanh.f32 %v399_v52  ;;  %3568 = vmatmul.bf16.vlgmr.msra.gmra.mxu0 %v14930_v56  ;;  %v13656_v55 = vld [vmem:[#allocation6 + $0x504] sm:$0xf] }
  0xba   :  { %3581 = vmatmul.bf16.vlgmr.msra.gmra.mxu1 %v14932_v61  ;;  %3664 = vmatpush.bf16.msra.mxu0 %v9343_v54  ;;  %v10047_v54 = vor.u32 %v13728_v42, %v10044_v43  ;;  %v9692_v29 = vld [vmem:[#allocation6 + $0x4a0] sm:$0xf0] }
  0xbb   :  { %3677 = vmatpush.bf16.msra.mxu1 %v9599_v58  ;;  %v9756_v58 = vld [vmem:[#allocation6 + $0x520] sm:$0xf0] }
  0xbc   :  { %v9759_v8 = vor.u32 %v13656_v55, %v9756_v58  ;;  %v13704_v30 = vld [vmem:[#allocation6 + $0x684] sm:$0xf] }
  0xbd   :  { %v387_v10 = vpop.f32.mrf.mxu2  ;;  %v400_v14 = vpop.f32.mrf.mxu3  ;;  %v9372_v39 = vld [vmem:[#allocation6 + $0x220] sm:$0xf0] }
  0xbe   :  { %v14599_v13 = vpop.eup %14598  ;;  %v411_v15 = vpop.f32.mrf.mxu0  ;;  %3665 = vmatpush.bf16.msra.mxu0 %v9311_v2  ;;  %v10012_v2 = vld [vmem:[#allocation6 + $0x720] sm:$0xf0] }
  0xbf   :  { %v14601_v16 = vpop.eup %14600  ;;  %v14938_v17 = vpack.c.bf16 %v14599_v13, %v14599_v13  ;;  %v412_v18 = vadd.f32 %v411_v15, %v174_v0  ;;  %v424_v19 = vpop.f32.mrf.mxu1  ;;  %3678 = vmatpush.bf16.msra.mxu1 %v9567_v6  ;;  %v9471_v0 = vor.u32 %v13584_v47, %v9468_v48  ;;  %v13576_v6 = vld [vmem:[#allocation6 + $0x284] sm:$0xf] }
  0xc0   :  { %v14940_v25 = vpack.c.bf16 %v14601_v16, %v14601_v16  ;;  %v425_v26 = vadd.f32 %v424_v19, %v175_v1  ;;  %v13720_v1 = vld [vmem:[#allocation6 + $0x704] sm:$0xf]  ;;  %v9439_v13 = vor.u32 %v13576_v6, %v9436_v7 }
  0xc1   :  { %14602 = vtanh.f32 %v412_v18  ;;  %3594 = vmatmul.bf16.vlgmr.msra.gmra.mxu2 %v14938_v17  ;;  %v10015_v9 = vor.u32 %v13720_v1, %v10012_v2  ;;  %v13648_v10 = vld [vmem:[#allocation6 + $0x4c4] sm:$0xf] }
  0xc2   :  { %14604 = vtanh.f32 %v425_v26  ;;  %3607 = vmatmul.bf16.vlgmr.msra.gmra.mxu3 %v14940_v25  ;;  %3690 = vmatpush.bf16.msra.mxu2 %v9855_v57  ;;  %v13712_v14 = vld [vmem:[#allocation6 + $0x6c4] sm:$0xf]  ;;  %v9727_v22 = vor.u32 %v13648_v10, %v9724_v11 }
  0xc3   :  { %3703 = vmatpush.bf16.msra.mxu3 %v10111_v20  ;;  %3666 = vmatpush.bf16.msra.mxu0 %v9279_v21  ;;  %v9980_v15 = vld [vmem:[#allocation6 + $0x6e0] sm:$0xf0] }
  0xc4   :  { %3679 = vmatpush.bf16.msra.mxu1 %v9535_v27  ;;  %v13504_v57 = vld [vmem:[#allocation6 + $0x44] sm:$0xf]  ;;  %v9983_v27 = vor.u32 %v13712_v14, %v9980_v15 }
  0xc5   :  { %v437_v45 = vpop.f32.mrf.mxu2  ;;  %v450_v50 = vpop.f32.mrf.mxu3  ;;  %v9148_v18 = vld [vmem:[#allocation6 + $0x60] sm:$0xf0] }
  0xc6   :  { %v438_v49 = vadd.f32 %v437_v45, %v176_v33  ;;  %3691 = vmatpush.bf16.msra.mxu2 %v9823_v35  ;;  %v413_v52 = vpop.f32.mrf.mxu0  ;;  %v451_v34 = vadd.f32 %v450_v50, %v177_v36  ;;  %v13568_v19 = vld [vmem:[#allocation6 + $0x244] sm:$0xf]  ;;  %v9151_v32 = vor.u32 %v13504_v57, %v9148_v18 }
  0xc7   :  { %v14603_v53 = vpop.eup %14602  ;;  %3704 = vmatpush.bf16.msra.mxu3 %v10079_v37  ;;  %3667 = vmatpush.bf16.msra.mxu0 %v9247_v38  ;;  %v426_v59 = vpop.f32.mrf.mxu1  ;;  %v9404_v20 = vld [vmem:[#allocation6 + $0x260] sm:$0xf0] }
  0xc8   :  { %v14605_v60 = vpop.eup %14604  ;;  %v14946_v62 = vpack.c.bf16 %v14603_v53, %v14603_v53  ;;  %14606 = vtanh.f32 %v438_v49  ;;  %3680 = vmatpush.bf16.msra.mxu1 %v9503_v41  ;;  %v9407_v33 = vor.u32 %v13568_v19, %v9404_v20  ;;  %v9948_v35 = vld [vmem:[#allocation6 + $0x6a0] sm:$0xf0]  ;;  %v9695_v41 = vor.u32 %v13640_v28, %v9692_v29 }
  0xc9   :  { %v14948_v4 = vpack.c.bf16 %v14605_v60, %v14605_v60  ;;  %14608 = vtanh.f32 %v451_v34  ;;  %v13496_v36 = vld [vmem:[#allocation6 + $0x4] sm:$0xf]  ;;  %v9951_v45 = vor.u32 %v13704_v30, %v9948_v35 }
  0xca   :  { %3692 = vmatpush.bf16.msra.mxu2 %v9791_v51  ;;  %3620 = vmatmul.bf16.vlgmr.msrb.gmra.mxu0 %v14946_v62  ;;  %v9116_v37 = vld [vmem:[#allocation6 + $0x20] sm:$0xf0] }
  0xcb   :  { %3705 = vmatpush.bf16.msra.mxu3 %v10047_v54  ;;  %3633 = vmatmul.bf16.vlgmr.msrb.gmra.mxu1 %v14948_v4  ;;  %v13560_v38 = vld [vmem:[#allocation6 + $0x204] sm:$0xf]  ;;  %v9119_v48 = vor.u32 %v13496_v36, %v9116_v37 }
  0xcc   :  { %3668 = vmatpush.bf16.msra.mxu0 %v9215_v63  ;;  %3681 = vmatpush.bf16.msra.mxu1 %v9471_v0  ;;  %v13808_v40 = vld [vmem:[#allocation6 + $0x9c4] sm:$0xf]  ;;  %v9375_v49 = vor.u32 %v13560_v38, %v9372_v39 }
  0xcd   :  { %v439_v16 = vpop.f32.mrf.mxu2  ;;  %v452_v23 = vpop.f32.mrf.mxu3  ;;  %v10364_v42 = vld [vmem:[#allocation6 + $0x9e0] sm:$0xf0] }
  0xce   :  { %v14607_v21 = vpop.eup %14606  ;;  %3693 = vmatpush.bf16.msra.mxu2 %v9759_v8  ;;  %v13872_v43 = vld [vmem:[#allocation6 + $0xbc4] sm:$0xf]  ;;  %v10367_v52 = vor.u32 %v13808_v40, %v10364_v42 }
  0xcf   :  { %v14609_v24 = vpop.eup %14608  ;;  %v14952_v26 = vpack.c.bf16 %v14607_v21, %v14607_v21  ;;  %3706 = vmatpush.bf16.msra.mxu3 %v10015_v9  ;;  %v9660_v47 = vld [vmem:[#allocation6 + $0x460] sm:$0xf0]  ;;  %v10623_v53 = vor.u32 %v13872_v43, %v10620_v44 }
  0xd0   :  { %v14954_v31 = vpack.c.bf16 %v14609_v24, %v14609_v24  ;;  %3669 = vmatpush.bf16.msra.mxu0 %v9183_v12  ;;  %3682 = vmatpush.bf16.msra.mxu1 %v9439_v13  ;;  %v13696_v50 = vld [vmem:[#allocation6 + $0x644] sm:$0xf]  ;;  %v9663_v54 = vor.u32 %v13632_v46, %v9660_v47 }
  0xd1   :  { %3646 = vmatmul.bf16.vlgmr.msrb.gmra.mxu2 %v14952_v26  ;;  %v9916_v51 = vld [vmem:[#allocation6 + $0x660] sm:$0xf0] }
  0xd2   :  { %3659 = vmatmul.bf16.vlgmr.msrb.gmra.mxu3 %v14954_v31  ;;  %3694 = vmatpush.bf16.msra.mxu2 %v9727_v22  ;;  %v13800_v34 = vld [vmem:[#allocation6 + $0x984] sm:$0xf]  ;;  %v9919_v60 = vor.u32 %v13696_v50, %v9916_v51 }
  0xd3   :  { %3707 = vmatpush.bf16.msra.mxu3 %v9983_v27  ;;  %v10332_v55 = vld [vmem:[#allocation6 + $0x9a0] sm:$0xf0] }
  0xd4   :  { %3670 = vmatpush.bf16.msra.mxu0 %v9151_v32  ;;  %3683 = vmatpush.bf16.msra.mxu1 %v9407_v33  ;;  %v13864_v58 = vld [vmem:[#allocation6 + $0xb84] sm:$0xf]  ;;  %v10335_v6 = vor.u32 %v13800_v34, %v10332_v55 }
  0xd5   :  { %v10588_v59 = vld [vmem:[#allocation6 + $0xba0] sm:$0xf0] }
  0xd6   :  { %3695 = vmatpush.bf16.msra.mxu2 %v9695_v41  ;;  %v13624_v63 = vld [vmem:[#allocation6 + $0x404] sm:$0xf]  ;;  %v10591_v7 = vor.u32 %v13864_v58, %v10588_v59 }
  0xd7   :  { %3708 = vmatpush.bf16.msra.mxu3 %v9951_v45  ;;  %v9628_v0 = vld [vmem:[#allocation6 + $0x420] sm:$0xf0] }
  0xd8   :  { %v13688_v1 = vld [vmem:[#allocation6 + $0x604] sm:$0xf]  ;;  %3671 = vmatpush.bf16.msra.mxu0 %v9119_v48  ;;  %3684 = vmatpush.bf16.msra.mxu1 %v9375_v49  ;;  %v9631_v11 = vor.u32 %v13624_v63, %v9628_v0 }
  0xd9   :  { %v9884_v2 = vld [vmem:[#allocation6 + $0x620] sm:$0xf0] }
  0xda   :  { %v13936_v3 = vld [vmem:[#allocation6 + $0xdc4] sm:$0xf]  ;;  %3696 = vmatpush.bf16.msra.mxu2 %v9663_v54  ;;  %v9887_v15 = vor.u32 %v13688_v1, %v9884_v2 }
  0xdb   :  { %v10876_v5 = vld [vmem:[#allocation6 + $0xde0] sm:$0xf0]  ;;  %3709 = vmatpush.bf16.msra.mxu3 %v9919_v60  ;;  %3672 = vmatmul.bf16.vlgmr.msra.gmra.mxu0 %v14930_v56 }
  0xdc   :  { %3716 = vmatpush.bf16.msrb.mxu0 %v10367_v52  ;;  %3729 = vmatpush.bf16.msrb.mxu1 %v10623_v53  ;;  %v14000_v8 = vld [vmem:[#allocation6 + $0xfc4] sm:$0xf]  ;;  %v10879_v57 = vor.u32 %v13936_v3, %v10876_v5 }
  0xdd   :  { %v11132_v9 = vld [vmem:[#allocation6 + $0xfe0] sm:$0xf0]  ;;  %3685 = vmatmul.bf16.vlgmr.msra.gmra.mxu1 %v14932_v61 }
  0xde   :  { %v13792_v10 = vld [vmem:[#allocation6 + $0x944] sm:$0xf]  ;;  %v11135_v16 = vor.u32 %v14000_v8, %v11132_v9  ;;  %3697 = vmatpush.bf16.msra.mxu2 %v9631_v11 }
  0xdf   :  { %v10300_v12 = vld [vmem:[#allocation6 + $0x960] sm:$0xf0]  ;;  %3710 = vmatpush.bf16.msra.mxu3 %v9887_v15 }
  0xe0   :  { %v13856_v13 = vld [vmem:[#allocation6 + $0xb44] sm:$0xf]  ;;  %3717 = vmatpush.bf16.msrb.mxu0 %v10335_v6  ;;  %3730 = vmatpush.bf16.msrb.mxu1 %v10591_v7  ;;  %v10303_v20 = vor.u32 %v13792_v10, %v10300_v12 }
  0xe1   :  { %v10556_v14 = vld [vmem:[#allocation6 + $0xb60] sm:$0xf0]  ;;  %3698 = vmatmul.bf16.vlgmr.msra.gmra.mxu2 %v14938_v17 }
  0xe2   :  { %v13928_v18 = vld [vmem:[#allocation6 + $0xd84] sm:$0xf]  ;;  %v10559_v21 = vor.u32 %v13856_v13, %v10556_v14  ;;  %3742 = vmatpush.bf16.msrb.mxu2 %v10879_v57  ;;  %3711 = vmatmul.bf16.vlgmr.msra.gmra.mxu3 %v14940_v25 }
  0xe3   :  { %v10844_v19 = vld [vmem:[#allocation6 + $0xda0] sm:$0xf0]  ;;  %3755 = vmatpush.bf16.msrb.mxu3 %v11135_v16 }
  0xe4   :  { %v13992_v22 = vld [vmem:[#allocation6 + $0xf84] sm:$0xf]  ;;  %v10847_v30 = vor.u32 %v13928_v18, %v10844_v19  ;;  %3718 = vmatpush.bf16.msrb.mxu0 %v10303_v20  ;;  %3731 = vmatpush.bf16.msrb.mxu1 %v10559_v21  ;;  %v9346_v20 = vld [vmem:[#allocation6 + $0x1c8] sm:$0xf] }
  0xe5   :  { %v11100_v23 = vld [vmem:[#allocation6 + $0xfa0] sm:$0xf0] }
  0xe6   :  { %v13784_v24 = vld [vmem:[#allocation6 + $0x904] sm:$0xf]  ;;  %v11103_v32 = vor.u32 %v13992_v22, %v11100_v23  ;;  %3743 = vmatpush.bf16.msrb.mxu2 %v10847_v30  ;;  %v13557_v22 = vld [vmem:[#allocation6 + $0x1e4] sm:$0xf0] }
  0xe7   :  { %v10268_v27 = vld [vmem:[#allocation6 + $0x920] sm:$0xf0]  ;;  %v9602_v23 = vld [vmem:[#allocation6 + $0x3c8] sm:$0xf] }
  0xe8   :  { %v13848_v28 = vld [vmem:[#allocation6 + $0xb04] sm:$0xf]  ;;  %v10271_v36 = vor.u32 %v13784_v24, %v10268_v27  ;;  %3756 = vmatpush.bf16.msrb.mxu3 %v11103_v32  ;;  %v13621_v24 = vld [vmem:[#allocation6 + $0x3e4] sm:$0xf0] }
  0xe9   :  { %v10524_v29 = vld [vmem:[#allocation6 + $0xb20] sm:$0xf0] }
  0xea   :  { %v13920_v33 = vld [vmem:[#allocation6 + $0xd44] sm:$0xf]  ;;  %v10527_v37 = vor.u32 %v13848_v28, %v10524_v29  ;;  %3719 = vmatpush.bf16.msrb.mxu0 %v10271_v36  ;;  %v9347_v36 = vor.u32 %v13557_v22, %v9346_v20  ;;  %v9218_v20 = vld [vmem:[#allocation6 + $0xc8] sm:$0xf] }
  0xeb   :  { %v10812_v35 = vld [vmem:[#allocation6 + $0xd60] sm:$0xf0] }
  0xec   :  { %v13984_v38 = vld [vmem:[#allocation6 + $0xf44] sm:$0xf]  ;;  %v10815_v44 = vor.u32 %v13920_v33, %v10812_v35  ;;  %3732 = vmatpush.bf16.msrb.mxu1 %v10527_v37  ;;  %v9603_v37 = vor.u32 %v13621_v24, %v9602_v23  ;;  %v9474_v23 = vld [vmem:[#allocation6 + $0x2c8] sm:$0xf] }
  0xed   :  { %v11068_v39 = vld [vmem:[#allocation6 + $0xf60] sm:$0xf0]  ;;  %v13589_v24 = vld [vmem:[#allocation6 + $0x2e4] sm:$0xf0] }
  0xee   :  { %v13776_v40 = vld [vmem:[#allocation6 + $0x8c4] sm:$0xf]  ;;  %v11071_v45 = vor.u32 %v13984_v38, %v11068_v39  ;;  %3744 = vmatpush.bf16.msrb.mxu2 %v10815_v44  ;;  %v9314_v38 = vld [vmem:[#allocation6 + $0x188] sm:$0xf] }
  0xef   :  { %v10236_v41 = vld [vmem:[#allocation6 + $0x8e0] sm:$0xf0] }
  0xf0   :  { %v13840_v42 = vld [vmem:[#allocation6 + $0xac4] sm:$0xf]  ;;  %v10239_v48 = vor.u32 %v13776_v40, %v10236_v41  ;;  %3757 = vmatpush.bf16.msrb.mxu3 %v11071_v45  ;;  %v13549_v40 = vld [vmem:[#allocation6 + $0x1a4] sm:$0xf0] }
  0xf1   :  { %v10492_v43 = vld [vmem:[#allocation6 + $0xae0] sm:$0xf0]  ;;  %v9570_v41 = vld [vmem:[#allocation6 + $0x388] sm:$0xf] }
  0xf2   :  { %v13912_v46 = vld [vmem:[#allocation6 + $0xd04] sm:$0xf]  ;;  %v10495_v49 = vor.u32 %v13840_v42, %v10492_v43  ;;  %3720 = vmatpush.bf16.msrb.mxu0 %v10239_v48  ;;  %v13613_v42 = vld [vmem:[#allocation6 + $0x3a4] sm:$0xf0] }
  0xf3   :  { %v10780_v47 = vld [vmem:[#allocation6 + $0xd20] sm:$0xf0]  ;;  %v9858_v48 = vld [vmem:[#allocation6 + $0x5c8] sm:$0xf] }
  0xf4   :  { %v13976_v50 = vld [vmem:[#allocation6 + $0xf04] sm:$0xf]  ;;  %v10783_v55 = vor.u32 %v13912_v46, %v10780_v47  ;;  %3733 = vmatpush.bf16.msrb.mxu1 %v10495_v49  ;;  %v13685_v49 = vld [vmem:[#allocation6 + $0x5e4] sm:$0xf0] }
  0xf5   :  { %v11036_v51 = vld [vmem:[#allocation6 + $0xf20] sm:$0xf0] }
  0xf6   :  { %v13768_v52 = vld [vmem:[#allocation6 + $0x884] sm:$0xf]  ;;  %v11039_v58 = vor.u32 %v13976_v50, %v11036_v51  ;;  %3745 = vmatpush.bf16.msrb.mxu2 %v10783_v55  ;;  %v9315_v50 = vor.u32 %v13549_v40, %v9314_v38  ;;  %v9571_v51 = vor.u32 %v13613_v42, %v9570_v41  ;;  %v13541_v55 = vld [vmem:[#allocation6 + $0x164] sm:$0xf0] }
  0xf7   :  { %v10204_v53 = vld [vmem:[#allocation6 + $0x8a0] sm:$0xf0]  ;;  %v13581_v40 = vld [vmem:[#allocation6 + $0x2a4] sm:$0xf0] }
  0xf8   :  { %v13832_v34 = vld [vmem:[#allocation6 + $0xa84] sm:$0xf]  ;;  %v10207_v63 = vor.u32 %v13768_v52, %v10204_v53  ;;  %3758 = vmatpush.bf16.msrb.mxu3 %v11039_v58  ;;  %v10114_v52 = vld [vmem:[#allocation6 + $0x7c8] sm:$0xf] }
  0xf9   :  { %v10460_v54 = vld [vmem:[#allocation6 + $0xaa0] sm:$0xf0]  ;;  %v13749_v53 = vld [vmem:[#allocation6 + $0x7e4] sm:$0xf0] }
  0xfa   :  { %v13904_v59 = vld [vmem:[#allocation6 + $0xcc4] sm:$0xf]  ;;  %v10463_v0 = vor.u32 %v13832_v34, %v10460_v54  ;;  %3721 = vmatpush.bf16.msrb.mxu0 %v10207_v63  ;;  %v9282_v54 = vld [vmem:[#allocation6 + $0x148] sm:$0xf] }
  0xfb   :  { %v10748_v60 = vld [vmem:[#allocation6 + $0xce0] sm:$0xf0]  ;;  %v13605_v63 = vld [vmem:[#allocation6 + $0x364] sm:$0xf0] }
  0xfc   :  { %v13968_v1 = vld [vmem:[#allocation6 + $0xec4] sm:$0xf]  ;;  %v10751_v8 = vor.u32 %v13904_v59, %v10748_v60  ;;  %3734 = vmatpush.bf16.msrb.mxu1 %v10463_v0  ;;  %v9859_v59 = vor.u32 %v13685_v49, %v9858_v48  ;;  %v9538_v60 = vld [vmem:[#allocation6 + $0x348] sm:$0xf]  ;;  %v10115_v0 = vor.u32 %v13749_v53, %v10114_v52 }
  0xfd   :  { %v11004_v2 = vld [vmem:[#allocation6 + $0xee0] sm:$0xf0]  ;;  %v9730_v42 = vld [vmem:[#allocation6 + $0x4c8] sm:$0xf] }
  0xfe   :  { %v13760_v3 = vld [vmem:[#allocation6 + $0x844] sm:$0xf]  ;;  %v11007_v9 = vor.u32 %v13968_v1, %v11004_v2  ;;  %3746 = vmatpush.bf16.msrb.mxu2 %v10751_v8  ;;  %v9826_v1 = vld [vmem:[#allocation6 + $0x588] sm:$0xf] }
  0xff   :  { %v10172_v5 = vld [vmem:[#allocation6 + $0x860] sm:$0xf0]  ;;  %v13677_v2 = vld [vmem:[#allocation6 + $0x5a4] sm:$0xf0] }
 0x100   :  { %v13824_v6 = vld [vmem:[#allocation6 + $0xa44] sm:$0xf]  ;;  %v10175_v13 = vor.u32 %v13760_v3, %v10172_v5  ;;  %3759 = vmatpush.bf16.msrb.mxu3 %v11007_v9  ;;  %v9283_v3 = vor.u32 %v13541_v55, %v9282_v54  ;;  %v10082_v5 = vld [vmem:[#allocation6 + $0x788] sm:$0xf] }
 0x101   :  { %v10428_v7 = vld [vmem:[#allocation6 + $0xa60] sm:$0xf0]  ;;  %v9250_v8 = vld [vmem:[#allocation6 + $0x108] sm:$0xf] }
 0x102   :  { %v13896_v10 = vld [vmem:[#allocation6 + $0xc84] sm:$0xf]  ;;  %v10431_v14 = vor.u32 %v13824_v6, %v10428_v7  ;;  %3722 = vmatpush.bf16.msrb.mxu0 %v10175_v13  ;;  %v13741_v6 = vld [vmem:[#allocation6 + $0x7a4] sm:$0xf0]  ;;  %v9539_v7 = vor.u32 %v13605_v63, %v9538_v60 }
 0x103   :  { %v10716_v11 = vld [vmem:[#allocation6 + $0xca0] sm:$0xf0]  ;;  %v13533_v9 = vld [vmem:[#allocation6 + $0x124] sm:$0xf0]  ;;  %v10083_v13 = vor.u32 %v13741_v6, %v10082_v5 }
 0x104   :  { %v13960_v12 = vld [vmem:[#allocation6 + $0xe84] sm:$0xf]  ;;  %v10719_v21 = vor.u32 %v13896_v10, %v10716_v11  ;;  %3735 = vmatpush.bf16.msrb.mxu1 %v10431_v14  ;;  %v9827_v10 = vor.u32 %v13677_v2, %v9826_v1  ;;  %v9506_v11 = vld [vmem:[#allocation6 + $0x308] sm:$0xf] }
 0x105   :  { %v10972_v15 = vld [vmem:[#allocation6 + $0xea0] sm:$0xf0]  ;;  %v9794_v14 = vld [vmem:[#allocation6 + $0x548] sm:$0xf] }
 0x106   :  { %v13752_v57 = vld [vmem:[#allocation6 + $0x804] sm:$0xf]  ;;  %v10975_v27 = vor.u32 %v13960_v12, %v10972_v15  ;;  %3747 = vmatpush.bf16.msrb.mxu2 %v10719_v21  ;;  %v13597_v12 = vld [vmem:[#allocation6 + $0x324] sm:$0xf0] }
 0x107   :  { %v10140_v16 = vld [vmem:[#allocation6 + $0x820] sm:$0xf0]  ;;  %v13669_v15 = vld [vmem:[#allocation6 + $0x564] sm:$0xf0] }
 0x108   :  { %v13816_v18 = vld [vmem:[#allocation6 + $0xa04] sm:$0xf]  ;;  %v10143_v30 = vor.u32 %v13752_v57, %v10140_v16  ;;  %3760 = vmatpush.bf16.msrb.mxu3 %v10975_v27  ;;  %v9251_v57 = vor.u32 %v13533_v9, %v9250_v8  ;;  %v10050_v16 = vld [vmem:[#allocation6 + $0x748] sm:$0xf]  ;;  %v9795_v22 = vor.u32 %v13669_v15, %v9794_v14 }
 0x109   :  { %v10396_v19 = vld [vmem:[#allocation6 + $0xa20] sm:$0xf0]  ;;  %v13525_v21 = vld [vmem:[#allocation6 + $0xe4] sm:$0xf0] }
 0x10a   :  { %v13888_v28 = vld [vmem:[#allocation6 + $0xc44] sm:$0xf]  ;;  %v10399_v32 = vor.u32 %v13816_v18, %v10396_v19  ;;  %3723 = vmatpush.bf16.msrb.mxu0 %v10143_v30  ;;  %v13733_v18 = vld [vmem:[#allocation6 + $0x764] sm:$0xf0]  ;;  %v9507_v19 = vor.u32 %v13597_v12, %v9506_v11  ;;  %v9219_v30 = vor.u32 %v13525_v21, %v9218_v20 }
 0x10b   :  { %v10684_v29 = vld [vmem:[#allocation6 + $0xc60] sm:$0xf0]  ;;  %v10051_v27 = vor.u32 %v13733_v18, %v10050_v16  ;;  %v9154_v48 = vld [vmem:[#allocation6 + $0x48] sm:$0xf] }
 0x10c   :  { %v13952_v33 = vld [vmem:[#allocation6 + $0xe44] sm:$0xf]  ;;  %v10687_v39 = vor.u32 %v13888_v28, %v10684_v29  ;;  %3736 = vmatpush.bf16.msrb.mxu1 %v10399_v32  ;;  %v9762_v28 = vld [vmem:[#allocation6 + $0x508] sm:$0xf] }
 0x10d   :  { %v10940_v35 = vld [vmem:[#allocation6 + $0xe60] sm:$0xf0]  ;;  %3724 = vmatmul.bf16.vlgmr.msrb.gmra.mxu0 %v14946_v62  ;;  %v13661_v29 = vld [vmem:[#allocation6 + $0x524] sm:$0xf0] }
 0x10e   :  { %v10943_v43 = vor.u32 %v13952_v33, %v10940_v35  ;;  %v13880_v44 = vld [vmem:[#allocation6 + $0xc04] sm:$0xf]  ;;  %3768 = vmatpush.bf16.msra.mxu0 %v9347_v36  ;;  %3748 = vmatpush.bf16.msrb.mxu2 %v10687_v39  ;;  %v10018_v32 = vld [vmem:[#allocation6 + $0x708] sm:$0xf]  ;;  %v9475_v35 = vor.u32 %v13589_v24, %v9474_v23  ;;  %v9763_v38 = vor.u32 %v13661_v29, %v9762_v28 }
 0x10f   :  { %v10652_v45 = vld [vmem:[#allocation6 + $0xc20] sm:$0xf0]  ;;  %3737 = vmatmul.bf16.vlgmr.msrb.gmra.mxu1 %v14948_v4  ;;  %v13725_v33 = vld [vmem:[#allocation6 + $0x724] sm:$0xf0] }
 0x110   :  { %v13944_v46 = vld [vmem:[#allocation6 + $0xe04] sm:$0xf]  ;;  %3781 = vmatpush.bf16.msra.mxu1 %v9603_v37  ;;  %v10655_v34 = vor.u32 %v13880_v44, %v10652_v45  ;;  %3761 = vmatpush.bf16.msrb.mxu3 %v10943_v43  ;;  %v9186_v36 = vld [vmem:[#allocation6 + $0x88] sm:$0xf]  ;;  %v10019_v41 = vor.u32 %v13725_v33, %v10018_v32 }
 0x111   :  { %v10908_v47 = vld [vmem:[#allocation6 + $0xe20] sm:$0xf0]  ;;  %v13517_v37 = vld [vmem:[#allocation6 + $0xa4] sm:$0xf0] }
 0x112   :  { %v10911_v58 = vor.u32 %v13944_v46, %v10908_v47  ;;  %3769 = vmatpush.bf16.msra.mxu0 %v9315_v50  ;;  %3749 = vmatpush.bf16.msrb.mxu2 %v10655_v34  ;;  %v9442_v39 = vld [vmem:[#allocation6 + $0x288] sm:$0xf]  ;;  %v9187_v44 = vor.u32 %v13517_v37, %v9186_v36 }
 0x113   :  { %v13653_v43 = vld [vmem:[#allocation6 + $0x4e4] sm:$0xf0]  ;;  %v9443_v47 = vor.u32 %v13581_v40, %v9442_v39 }
 0x114   :  { %3782 = vmatpush.bf16.msra.mxu1 %v9571_v51  ;;  %3762 = vmatpush.bf16.msrb.mxu3 %v10911_v58  ;;  %v9986_v45 = vld [vmem:[#allocation6 + $0x6c8] sm:$0xf]  ;;  %v9731_v50 = vor.u32 %v13653_v43, %v9730_v42 }
 0x115   :  { %3750 = vmatmul.bf16.vlgmr.msrb.gmra.mxu2 %v14952_v26  ;;  %v13717_v46 = vld [vmem:[#allocation6 + $0x6e4] sm:$0xf0] }
 0x116   :  { %3794 = vmatpush.bf16.msra.mxu2 %v9859_v59  ;;  %3770 = vmatpush.bf16.msra.mxu0 %v9283_v3  ;;  %v13509_v49 = vld [vmem:[#allocation6 + $0x64] sm:$0xf0]  ;;  %v9987_v53 = vor.u32 %v13717_v46, %v9986_v45 }
 0x117   :  { %3763 = vmatmul.bf16.vlgmr.msrb.gmra.mxu3 %v14954_v31  ;;  %v9410_v51 = vld [vmem:[#allocation6 + $0x248] sm:$0xf]  ;;  %v9155_v55 = vor.u32 %v13509_v49, %v9154_v48 }
 0x118   :  { %3807 = vmatpush.bf16.msra.mxu3 %v10115_v0  ;;  %3783 = vmatpush.bf16.msra.mxu1 %v9539_v7  ;;  %v13573_v52 = vld [vmem:[#allocation6 + $0x264] sm:$0xf0] }
 0x119   :  { %v9698_v34 = vld [vmem:[#allocation6 + $0x488] sm:$0xf]  ;;  %v9411_v63 = vor.u32 %v13573_v52, %v9410_v51 }
 0x11a   :  { %3795 = vmatpush.bf16.msra.mxu2 %v9827_v10  ;;  %3771 = vmatpush.bf16.msra.mxu0 %v9251_v57  ;;  %v13645_v54 = vld [vmem:[#allocation6 + $0x4a4] sm:$0xf0] }
 0x11b   :  { %v9954_v58 = vld [vmem:[#allocation6 + $0x688] sm:$0xf]  ;;  %v9699_v3 = vor.u32 %v13645_v54, %v9698_v34 }
 0x11c   :  { %3808 = vmatpush.bf16.msra.mxu3 %v10083_v13  ;;  %3784 = vmatpush.bf16.msra.mxu1 %v9507_v19  ;;  %v13709_v59 = vld [vmem:[#allocation6 + $0x6a4] sm:$0xf0] }
 0x11d   :  { %v9122_v60 = vld [vmem:[#allocation6 + $0x8] sm:$0xf]  ;;  %v9955_v8 = vor.u32 %v13709_v59, %v9954_v58 }
 0x11e   :  { %3796 = vmatpush.bf16.msra.mxu2 %v9795_v22  ;;  %3772 = vmatpush.bf16.msra.mxu0 %v9219_v30  ;;  %v13501_v0 = vld [vmem:[#allocation6 + $0x24] sm:$0xf0] }
 0x11f   :  { %v9378_v1 = vld [vmem:[#allocation6 + $0x208] sm:$0xf]  ;;  %v9123_v12 = vor.u32 %v13501_v0, %v9122_v60 }
 0x120   :  { %3809 = vmatpush.bf16.msra.mxu3 %v10051_v27  ;;  %3785 = vmatpush.bf16.msra.mxu1 %v9475_v35  ;;  %v13565_v2 = vld [vmem:[#allocation6 + $0x224] sm:$0xf0] }
 0x121   :  { %v10370_v5 = vld [vmem:[#allocation6 + $0x9c8] sm:$0xf]  ;;  %v9379_v15 = vor.u32 %v13565_v2, %v9378_v1 }
 0x122   :  { %3797 = vmatpush.bf16.msra.mxu2 %v9763_v38  ;;  %3773 = vmatpush.bf16.msra.mxu0 %v9187_v44  ;;  %v13813_v6 = vld [vmem:[#allocation6 + $0x9e4] sm:$0xf0] }
 0x123   :  { %v10626_v7 = vld [vmem:[#allocation6 + $0xbc8] sm:$0xf]  ;;  %v10371_v57 = vor.u32 %v13813_v6, %v10370_v5 }
 0x124   :  { %3810 = vmatpush.bf16.msra.mxu3 %v10019_v41  ;;  %3786 = vmatpush.bf16.msra.mxu1 %v9443_v47  ;;  %v13877_v9 = vld [vmem:[#allocation6 + $0xbe4] sm:$0xf0] }
 0x125   :  { %v9666_v10 = vld [vmem:[#allocation6 + $0x448] sm:$0xf]  ;;  %v10627_v18 = vor.u32 %v13877_v9, %v10626_v7 }
 0x126   :  { %3798 = vmatpush.bf16.msra.mxu2 %v9731_v50  ;;  %v13637_v11 = vld [vmem:[#allocation6 + $0x464] sm:$0xf0]  ;;  %3774 = vmatpush.bf16.msra.mxu0 %v9155_v55 }
 0x127   :  { %v9922_v13 = vld [vmem:[#allocation6 + $0x648] sm:$0xf]  ;;  %v9667_v19 = vor.u32 %v13637_v11, %v9666_v10 }
 0x128   :  { %3811 = vmatpush.bf16.msra.mxu3 %v9987_v53  ;;  %v13701_v14 = vld [vmem:[#allocation6 + $0x664] sm:$0xf0]  ;;  %3787 = vmatpush.bf16.msra.mxu1 %v9411_v63 }
 0x129   :  { %v10338_v16 = vld [vmem:[#allocation6 + $0x988] sm:$0xf]  ;;  %v9923_v23 = vor.u32 %v13701_v14, %v9922_v13 }
 0x12a   :  { %3799 = vmatpush.bf16.msra.mxu2 %v9699_v3  ;;  %v13805_v20 = vld [vmem:[#allocation6 + $0x9a4] sm:$0xf0]  ;;  %3775 = vmatpush.bf16.msra.mxu0 %v9123_v12 }
 0x12b   :  { %v10594_v21 = vld [vmem:[#allocation6 + $0xb88] sm:$0xf]  ;;  %v10339_v33 = vor.u32 %v13805_v20, %v10338_v16 }
 0x12c   :  { %v13869_v22 = vld [vmem:[#allocation6 + $0xba4] sm:$0xf0]  ;;  %3812 = vmatpush.bf16.msra.mxu3 %v9955_v8  ;;  %3788 = vmatpush.bf16.msra.mxu1 %v9379_v15 }
 0x12d   :  { %v9634_v24 = vld [vmem:[#allocation6 + $0x408] sm:$0xf]  ;;  %v10595_v37 = vor.u32 %v13869_v22, %v10594_v21  ;;  %3776 = vmatmul.bf16.vlgmr.msra.gmra.mxu0 %v14930_v56 }
 0x12e   :  { %v13629_v27 = vld [vmem:[#allocation6 + $0x424] sm:$0xf0]  ;;  %3820 = vmatpush.bf16.msrb.mxu0 %v10371_v57  ;;  %3800 = vmatpush.bf16.msra.mxu2 %v9667_v19 }
 0x12f   :  { %v9890_v28 = vld [vmem:[#allocation6 + $0x608] sm:$0xf]  ;;  %v9635_v38 = vor.u32 %v13629_v27, %v9634_v24  ;;  %3789 = vmatmul.bf16.vlgmr.msra.gmra.mxu1 %v14932_v61 }
 0x130   :  { %v13693_v29 = vld [vmem:[#allocation6 + $0x624] sm:$0xf0]  ;;  %3833 = vmatpush.bf16.msrb.mxu1 %v10627_v18  ;;  %3813 = vmatpush.bf16.msra.mxu3 %v9923_v23 }
 0x131   :  { %v10882_v30 = vld [vmem:[#allocation6 + $0xdc8] sm:$0xf]  ;;  %v9891_v41 = vor.u32 %v13693_v29, %v9890_v28 }
 0x132   :  { %v13941_v32 = vld [vmem:[#allocation6 + $0xde4] sm:$0xf0]  ;;  %3821 = vmatpush.bf16.msrb.mxu0 %v10339_v33  ;;  %3801 = vmatpush.bf16.msra.mxu2 %v9635_v38 }
 0x133   :  { %v11138_v35 = vld [vmem:[#allocation6 + $0xfc8] sm:$0xf]  ;;  %v10883_v42 = vor.u32 %v13941_v32, %v10882_v30 }
 0x134   :  { %v14005_v36 = vld [vmem:[#allocation6 + $0xfe4] sm:$0xf0]  ;;  %3834 = vmatpush.bf16.msrb.mxu1 %v10595_v37  ;;  %3814 = vmatpush.bf16.msra.mxu3 %v9891_v41 }
 0x135   :  { %v10306_v39 = vld [vmem:[#allocation6 + $0x948] sm:$0xf]  ;;  %v11139_v45 = vor.u32 %v14005_v36, %v11138_v35  ;;  %3802 = vmatmul.bf16.vlgmr.msra.gmra.mxu2 %v14938_v17 }
 0x136   :  { %v13797_v40 = vld [vmem:[#allocation6 + $0x964] sm:$0xf0]  ;;  %3846 = vmatpush.bf16.msrb.mxu2 %v10883_v42 }
 0x137   :  { %v10562_v43 = vld [vmem:[#allocation6 + $0xb48] sm:$0xf]  ;;  %v10307_v48 = vor.u32 %v13797_v40, %v10306_v39  ;;  %3815 = vmatmul.bf16.vlgmr.msra.gmra.mxu3 %v14940_v25 }
 0x138   :  { %v13861_v44 = vld [vmem:[#allocation6 + $0xb64] sm:$0xf0]  ;;  %3859 = vmatpush.bf16.msrb.mxu3 %v11139_v45 }
 0x139   :  { %v10850_v46 = vld [vmem:[#allocation6 + $0xd88] sm:$0xf]  ;;  %v10563_v51 = vor.u32 %v13861_v44, %v10562_v43  ;;  %3822 = vmatpush.bf16.msrb.mxu0 %v10307_v48 }
 0x13a   :  { %v13933_v47 = vld [vmem:[#allocation6 + $0xda4] sm:$0xf0] }
 0x13b   :  { %v11106_v49 = vld [vmem:[#allocation6 + $0xf88] sm:$0xf]  ;;  %v10851_v34 = vor.u32 %v13933_v47, %v10850_v46  ;;  %3835 = vmatpush.bf16.msrb.mxu1 %v10563_v51  ;;  %v13617_v51 = vld [vmem:[#allocation6 + $0x3cc] sm:$0xf] }
 0x13c   :  { %v13997_v50 = vld [vmem:[#allocation6 + $0xfa4] sm:$0xf0] }
 0x13d   :  { %v10274_v52 = vld [vmem:[#allocation6 + $0x908] sm:$0xf]  ;;  %v11107_v58 = vor.u32 %v13997_v50, %v11106_v49  ;;  %3847 = vmatpush.bf16.msrb.mxu2 %v10851_v34  ;;  %v13553_v49 = vld [vmem:[#allocation6 + $0x1cc] sm:$0xf] }
 0x13e   :  { %v13789_v53 = vld [vmem:[#allocation6 + $0x924] sm:$0xf0]  ;;  %v9348_v50 = vld [vmem:[#allocation6 + $0x1e8] sm:$0xf0] }
 0x13f   :  { %v10530_v54 = vld [vmem:[#allocation6 + $0xb08] sm:$0xf]  ;;  %v10275_v63 = vor.u32 %v13789_v53, %v10274_v52  ;;  %3860 = vmatpush.bf16.msrb.mxu3 %v11107_v58  ;;  %v9604_v53 = vld [vmem:[#allocation6 + $0x3e8] sm:$0xf0] }
 0x140   :  { %v13853_v55 = vld [vmem:[#allocation6 + $0xb24] sm:$0xf0] }
 0x141   :  { %v10818_v59 = vld [vmem:[#allocation6 + $0xd48] sm:$0xf]  ;;  %v10531_v2 = vor.u32 %v13853_v55, %v10530_v54  ;;  %3823 = vmatpush.bf16.msrb.mxu0 %v10275_v63  ;;  %v9351_v63 = vor.u32 %v13553_v49, %v9348_v50  ;;  %v13729_v50 = vld [vmem:[#allocation6 + $0x74c] sm:$0xf] }
 0x142   :  { %v13925_v60 = vld [vmem:[#allocation6 + $0xd64] sm:$0xf0] }
 0x143   :  { %v11074_v0 = vld [vmem:[#allocation6 + $0xf48] sm:$0xf]  ;;  %v10819_v6 = vor.u32 %v13925_v60, %v10818_v59  ;;  %3836 = vmatpush.bf16.msrb.mxu1 %v10531_v2 }
 0x144   :  { %v13989_v1 = vld [vmem:[#allocation6 + $0xf64] sm:$0xf0] }
 0x145   :  { %v10242_v3 = vld [vmem:[#allocation6 + $0x8c8] sm:$0xf]  ;;  %v11075_v9 = vor.u32 %v13989_v1, %v11074_v0  ;;  %3848 = vmatpush.bf16.msrb.mxu2 %v10819_v6  ;;  %v13545_v0 = vld [vmem:[#allocation6 + $0x18c] sm:$0xf]  ;;  %v9607_v1 = vor.u32 %v13617_v51, %v9604_v53 }
 0x146   :  { %v13781_v5 = vld [vmem:[#allocation6 + $0x8e4] sm:$0xf0]  ;;  %v9572_v6 = vld [vmem:[#allocation6 + $0x3a8] sm:$0xf0] }
 0x147   :  { %v10498_v7 = vld [vmem:[#allocation6 + $0xac8] sm:$0xf]  ;;  %v10243_v12 = vor.u32 %v13781_v5, %v10242_v3  ;;  %3861 = vmatpush.bf16.msrb.mxu3 %v11075_v9  ;;  %v9316_v3 = vld [vmem:[#allocation6 + $0x1a8] sm:$0xf0] }
 0x148   :  { %v13845_v8 = vld [vmem:[#allocation6 + $0xae4] sm:$0xf0]  ;;  %v13609_v5 = vld [vmem:[#allocation6 + $0x38c] sm:$0xf] }
 0x149   :  { %v10786_v10 = vld [vmem:[#allocation6 + $0xd08] sm:$0xf]  ;;  %v10499_v15 = vor.u32 %v13845_v8, %v10498_v7  ;;  %3824 = vmatpush.bf16.msrb.mxu0 %v10243_v12  ;;  %v13681_v12 = vld [vmem:[#allocation6 + $0x5cc] sm:$0xf] }
 0x14a   :  { %v13917_v11 = vld [vmem:[#allocation6 + $0xd24] sm:$0xf0]  ;;  %v10052_v51 = vld [vmem:[#allocation6 + $0x768] sm:$0xf0] }
 0x14b   :  { %v11042_v13 = vld [vmem:[#allocation6 + $0xf08] sm:$0xf]  ;;  %v10787_v18 = vor.u32 %v13917_v11, %v10786_v10  ;;  %3837 = vmatpush.bf16.msrb.mxu1 %v10499_v15  ;;  %v13745_v15 = vld [vmem:[#allocation6 + $0x7cc] sm:$0xf] }
 0x14c   :  { %v13981_v14 = vld [vmem:[#allocation6 + $0xf24] sm:$0xf0]  ;;  %v13521_v53 = vld [vmem:[#allocation6 + $0xcc] sm:$0xf] }
 0x14d   :  { %v10210_v57 = vld [vmem:[#allocation6 + $0x888] sm:$0xf]  ;;  %v11043_v21 = vor.u32 %v13981_v14, %v11042_v13  ;;  %3849 = vmatpush.bf16.msrb.mxu2 %v10787_v18  ;;  %v9860_v13 = vld [vmem:[#allocation6 + $0x5e8] sm:$0xf0]  ;;  %v9319_v14 = vor.u32 %v13545_v0, %v9316_v3 }
 0x14e   :  { %v13773_v16 = vld [vmem:[#allocation6 + $0x8a4] sm:$0xf0]  ;;  %v9764_v0 = vld [vmem:[#allocation6 + $0x528] sm:$0xf0] }
 0x14f   :  { %v10466_v19 = vld [vmem:[#allocation6 + $0xa88] sm:$0xf]  ;;  %v10211_v24 = vor.u32 %v13773_v16, %v10210_v57  ;;  %3862 = vmatpush.bf16.msrb.mxu3 %v11043_v21  ;;  %v10116_v57 = vld [vmem:[#allocation6 + $0x7e8] sm:$0xf0]  ;;  %v9575_v16 = vor.u32 %v13609_v5, %v9572_v6  ;;  %v14970_v21 = vld [vmem:[#allocation7] sm:$0xff] }
 0x150   :  { %v13837_v20 = vld [vmem:[#allocation6 + $0xaa4] sm:$0xf0]  ;;  %v10020_v3 = vld [vmem:[#allocation6 + $0x728] sm:$0xf0] }
 0x151   :  { %v10754_v22 = vld [vmem:[#allocation6 + $0xcc8] sm:$0xf]  ;;  %v10467_v29 = vor.u32 %v13837_v20, %v10466_v19  ;;  %3825 = vmatpush.bf16.msrb.mxu0 %v10211_v24  ;;  %v13537_v19 = vld [vmem:[#allocation6 + $0x14c] sm:$0xf] }
 0x152   :  { %v13909_v23 = vld [vmem:[#allocation6 + $0xce4] sm:$0xf0]  ;;  %v9284_v20 = vld [vmem:[#allocation6 + $0x168] sm:$0xf0] }
 0x153   :  { %v11010_v27 = vld [vmem:[#allocation6 + $0xec8] sm:$0xf]  ;;  %v10755_v33 = vor.u32 %v13909_v23, %v10754_v22  ;;  %3838 = vmatpush.bf16.msrb.mxu1 %v10467_v29  ;;  %v9863_v23 = vor.u32 %v13681_v12, %v9860_v13  ;;  %v13601_v24 = vld [vmem:[#allocation6 + $0x34c] sm:$0xf] }
 0x154   :  { %v13973_v28 = vld [vmem:[#allocation6 + $0xee4] sm:$0xf0]  ;;  %v13673_v29 = vld [vmem:[#allocation6 + $0x58c] sm:$0xf] }
 0x155   :  { %v10178_v30 = vld [vmem:[#allocation6 + $0x848] sm:$0xf]  ;;  %v11011_v37 = vor.u32 %v13973_v28, %v11010_v27  ;;  %3850 = vmatpush.bf16.msrb.mxu2 %v10755_v33  ;;  %v9540_v27 = vld [vmem:[#allocation6 + $0x368] sm:$0xf0]  ;;  %v10119_v28 = vor.u32 %v13745_v15, %v10116_v57  ;;  %v984_v33 = vperm.slane %v14970_v21, 0 }
 0x156   :  { %v13765_v32 = vld [vmem:[#allocation6 + $0x864] sm:$0xf0]  ;;  %v13513_v6 = vld [vmem:[#allocation6 + $0x8c] sm:$0xf] }
 0x157   :  { %v10434_v35 = vld [vmem:[#allocation6 + $0xa48] sm:$0xf]  ;;  %v10179_v40 = vor.u32 %v13765_v32, %v10178_v30  ;;  %3863 = vmatpush.bf16.msrb.mxu3 %v11011_v37  ;;  %v9828_v30 = vld [vmem:[#allocation6 + $0x5a8] sm:$0xf0]  ;;  %v9287_v32 = vor.u32 %v13537_v19, %v9284_v20  ;;  %v9543_v37 = vor.u32 %v13601_v24, %v9540_v27 }
 0x158   :  { %v13829_v36 = vld [vmem:[#allocation6 + $0xa64] sm:$0xf0]  ;;  %v13649_v13 = vld [vmem:[#allocation6 + $0x4cc] sm:$0xf] }
 0x159   :  { %v10722_v38 = vld [vmem:[#allocation6 + $0xc88] sm:$0xf]  ;;  %v10435_v44 = vor.u32 %v13829_v36, %v10434_v35  ;;  %3826 = vmatpush.bf16.msrb.mxu0 %v10179_v40  ;;  %v13737_v35 = vld [vmem:[#allocation6 + $0x78c] sm:$0xf]  ;;  %v9831_v40 = vor.u32 %v13673_v29, %v9828_v30 }
 0x15a   :  { %v13901_v39 = vld [vmem:[#allocation6 + $0xca4] sm:$0xf0]  ;;  %v10084_v36 = vld [vmem:[#allocation6 + $0x7a8] sm:$0xf0] }
 0x15b   :  { %v10978_v41 = vld [vmem:[#allocation6 + $0xe88] sm:$0xf]  ;;  %v10723_v48 = vor.u32 %v13901_v39, %v10722_v38  ;;  %3839 = vmatpush.bf16.msrb.mxu1 %v10435_v44  ;;  %v13529_v38 = vld [vmem:[#allocation6 + $0x10c] sm:$0xf]  ;;  %v10087_v44 = vor.u32 %v13737_v35, %v10084_v36 }
 0x15c   :  { %v13965_v42 = vld [vmem:[#allocation6 + $0xea4] sm:$0xf0]  ;;  %v9252_v39 = vld [vmem:[#allocation6 + $0x128] sm:$0xf0] }
 0x15d   :  { %v10146_v43 = vld [vmem:[#allocation6 + $0x808] sm:$0xf]  ;;  %v10979_v52 = vor.u32 %v13965_v42, %v10978_v41  ;;  %3851 = vmatpush.bf16.msrb.mxu2 %v10723_v48  ;;  %v13593_v41 = vld [vmem:[#allocation6 + $0x30c] sm:$0xf]  ;;  %v3582_v48 = vpop.f32.mrf.mxu1  ;;  %v9255_v49 = vor.u32 %v13529_v38, %v9252_v39  ;;  %v3608_v39 = vpop.f32.mrf.mxu3 }
 0x15e   :  { %v13757_v45 = vld [vmem:[#allocation6 + $0x824] sm:$0xf0]  ;;  %v9508_v42 = vld [vmem:[#allocation6 + $0x328] sm:$0xf0] }
 0x15f   :  { %v10402_v46 = vld [vmem:[#allocation6 + $0xa08] sm:$0xf]  ;;  %v10147_v55 = vor.u32 %v13757_v45, %v10146_v43  ;;  %3864 = vmatpush.bf16.msrb.mxu3 %v10979_v52  ;;  %v3569_v43 = vpop.f32.mrf.mxu0  ;;  %v13665_v45 = vld [vmem:[#allocation6 + $0x54c] sm:$0xf]  ;;  %v9511_v52 = vor.u32 %v13593_v41, %v9508_v42 }
 0x160   :  { %v13821_v47 = vld [vmem:[#allocation6 + $0xa24] sm:$0xf0]  ;;  %v13505_v20 = vld [vmem:[#allocation6 + $0x4c] sm:$0xf] }
 0x161   :  { %v10690_v34 = vld [vmem:[#allocation6 + $0xc48] sm:$0xf]  ;;  %v10403_v60 = vor.u32 %v13821_v47, %v10402_v46  ;;  %3827 = vmatpush.bf16.msrb.mxu0 %v10147_v55  ;;  %v9796_v46 = vld [vmem:[#allocation6 + $0x568] sm:$0xf0]  ;;  %v3570_v47 = vadd.f32 %v3569_v43, %v984_v33 }
 0x162   :  { %v13893_v54 = vld [vmem:[#allocation6 + $0xc64] sm:$0xf0]  ;;  %v9799_v55 = vor.u32 %v13665_v45, %v9796_v46  ;;  %v13569_v24 = vld [vmem:[#allocation6 + $0x24c] sm:$0xf] }
 0x163   :  { %v10946_v58 = vld [vmem:[#allocation6 + $0xe48] sm:$0xf]  ;;  %v10691_v2 = vor.u32 %v13893_v54, %v10690_v34  ;;  %3840 = vmatpush.bf16.msrb.mxu1 %v10403_v60  ;;  %v9220_v34 = vld [vmem:[#allocation6 + $0xe8] sm:$0xf0]  ;;  %v3583_v54 = vadd.f32 %v3582_v48, %v3570_v47  ;;  %v10055_v60 = vor.u32 %v13729_v50, %v10052_v51 }
 0x164   :  { %v13957_v59 = vld [vmem:[#allocation6 + $0xe64] sm:$0xf0]  ;;  %3828 = vmatmul.bf16.vlgmr.msrb.gmra.mxu0 %v14946_v62  ;;  %v9412_v27 = vld [vmem:[#allocation6 + $0x268] sm:$0xf0] }
 0x165   :  { %v10947_v7 = vor.u32 %v13957_v59, %v10946_v58  ;;  %v10658_v8 = vld [vmem:[#allocation6 + $0xc08] sm:$0xf]  ;;  %3872 = vmatpush.bf16.msra.mxu0 %v9351_v63  ;;  %3852 = vmatpush.bf16.msrb.mxu2 %v10691_v2  ;;  %v13585_v58 = vld [vmem:[#allocation6 + $0x2cc] sm:$0xf]  ;;  %v3584_v15 = vpop.f32.mrf.mxu1 }
 0x166   :  { %v13885_v9 = vld [vmem:[#allocation6 + $0xc24] sm:$0xf0]  ;;  %3841 = vmatmul.bf16.vlgmr.msrb.gmra.mxu1 %v14948_v4  ;;  %v9476_v59 = vld [vmem:[#allocation6 + $0x2e8] sm:$0xf0] }
 0x167   :  { %v10914_v10 = vld [vmem:[#allocation6 + $0xe08] sm:$0xf]  ;;  %3885 = vmatpush.bf16.msra.mxu1 %v9607_v1  ;;  %v10659_v18 = vor.u32 %v13885_v9, %v10658_v8  ;;  %3865 = vmatpush.bf16.msrb.mxu3 %v10947_v7  ;;  %v13657_v63 = vld [vmem:[#allocation6 + $0x50c] sm:$0xf]  ;;  %v9223_v1 = vor.u32 %v13521_v53, %v9220_v34  ;;  %v9479_v5 = vor.u32 %v13585_v58, %v9476_v59 }
 0x168   :  { %v13949_v11 = vld [vmem:[#allocation6 + $0xe24] sm:$0xf0]  ;;  %v13721_v2 = vld [vmem:[#allocation6 + $0x70c] sm:$0xf]  ;;  %v9767_v8 = vor.u32 %v13657_v63, %v9764_v0 }
 0x169   :  { %v10915_v22 = vor.u32 %v13949_v11, %v10914_v10  ;;  %3873 = vmatpush.bf16.msra.mxu0 %v9319_v14  ;;  %3853 = vmatpush.bf16.msrb.mxu2 %v10659_v18  ;;  %v9188_v7 = vld [vmem:[#allocation6 + $0xa8] sm:$0xf0]  ;;  %v3571_v11 = vpop.f32.mrf.mxu0  ;;  %v10023_v12 = vor.u32 %v13721_v2, %v10020_v3 }
 0x16a   :  { %v13577_v9 = vld [vmem:[#allocation6 + $0x28c] sm:$0xf]  ;;  %v9191_v57 = vor.u32 %v13513_v6, %v9188_v7 }
 0x16b   :  { %3886 = vmatpush.bf16.msra.mxu1 %v9575_v16  ;;  %3866 = vmatpush.bf16.msrb.mxu3 %v10915_v22  ;;  %v9444_v10 = vld [vmem:[#allocation6 + $0x2a8] sm:$0xf0] }
 0x16c   :  { %3854 = vmatmul.bf16.vlgmr.msrb.gmra.mxu2 %v14952_v26  ;;  %v9732_v14 = vld [vmem:[#allocation6 + $0x4e8] sm:$0xf0]  ;;  %v9447_v19 = vor.u32 %v13577_v9, %v9444_v10 }
 0x16d   :  { %3898 = vmatpush.bf16.msra.mxu2 %v9863_v23  ;;  %3874 = vmatpush.bf16.msra.mxu0 %v9287_v32  ;;  %v13713_v16 = vld [vmem:[#allocation6 + $0x6cc] sm:$0xf]  ;;  %v9735_v23 = vor.u32 %v13649_v13, %v9732_v14  ;;  %v3595_v32 = vpop.f32.mrf.mxu2  ;;  %v3634_v34 = vpop.f32.mrf.mxu1 }
 0x16e   :  { %3867 = vmatmul.bf16.vlgmr.msrb.gmra.mxu3 %v14954_v31  ;;  %v9988_v18 = vld [vmem:[#allocation6 + $0x6e8] sm:$0xf0]  ;;  %v3596_v38 = vadd.f32 %v3595_v32, %v3583_v54 }
 0x16f   :  { %3911 = vmatpush.bf16.msra.mxu3 %v10119_v28  ;;  %3887 = vmatpush.bf16.msra.mxu1 %v9543_v37  ;;  %v9156_v22 = vld [vmem:[#allocation6 + $0x68] sm:$0xf0]  ;;  %v9991_v28 = vor.u32 %v13713_v16, %v9988_v18 }
 0x170   :  { %v13641_v29 = vld [vmem:[#allocation6 + $0x48c] sm:$0xf]  ;;  %v9159_v33 = vor.u32 %v13505_v20, %v9156_v22  ;;  %v3609_v48 = vadd.f32 %v3608_v39, %v3596_v38 }
 0x171   :  { %3899 = vmatpush.bf16.msra.mxu2 %v9831_v40  ;;  %3875 = vmatpush.bf16.msra.mxu0 %v9255_v49  ;;  %v9700_v30 = vld [vmem:[#allocation6 + $0x4a8] sm:$0xf0]  ;;  %v9415_v40 = vor.u32 %v13569_v24, %v9412_v27  ;;  %v3621_v49 = vpop.f32.mrf.mxu0 }
 0x172   :  { %v13705_v35 = vld [vmem:[#allocation6 + $0x68c] sm:$0xf]  ;;  %v3622_v59 = vadd.f32 %v3621_v49, %v3609_v48 }
 0x173   :  { %3912 = vmatpush.bf16.msra.mxu3 %v10087_v44  ;;  %3888 = vmatpush.bf16.msra.mxu1 %v9511_v52  ;;  %v9956_v36 = vld [vmem:[#allocation6 + $0x6a8] sm:$0xf0]  ;;  %v9703_v44 = vor.u32 %v13641_v29, %v9700_v30 }
 0x174   :  { %v13497_v37 = vld [vmem:[#allocation6 + $0xc] sm:$0xf]  ;;  %v9959_v50 = vor.u32 %v13705_v35, %v9956_v36  ;;  %v3635_v7 = vadd.f32 %v3634_v34, %v3622_v59 }
 0x175   :  { %3900 = vmatpush.bf16.msra.mxu2 %v9799_v55  ;;  %3876 = vmatpush.bf16.msra.mxu0 %v9223_v1  ;;  %v9124_v41 = vld [vmem:[#allocation6 + $0x28] sm:$0xf0] }
 0x176   :  { %v13561_v42 = vld [vmem:[#allocation6 + $0x20c] sm:$0xf]  ;;  %v9127_v54 = vor.u32 %v13497_v37, %v9124_v41 }
 0x177   :  { %3913 = vmatpush.bf16.msra.mxu3 %v10055_v60  ;;  %3889 = vmatpush.bf16.msra.mxu1 %v9479_v5  ;;  %v9380_v43 = vld [vmem:[#allocation6 + $0x228] sm:$0xf0] }
 0x178   :  { %v13809_v45 = vld [vmem:[#allocation6 + $0x9cc] sm:$0xf]  ;;  %v9383_v60 = vor.u32 %v13561_v42, %v9380_v43 }
 0x179   :  { %3901 = vmatpush.bf16.msra.mxu2 %v9767_v8  ;;  %3877 = vmatpush.bf16.msra.mxu0 %v9191_v57  ;;  %v10372_v46 = vld [vmem:[#allocation6 + $0x9e8] sm:$0xf0]  ;;  %v3610_v57 = vpop.f32.mrf.mxu3  ;;  %v3623_v27 = vpop.f32.mrf.mxu0 }
 0x17a   :  { %v13873_v47 = vld [vmem:[#allocation6 + $0xbcc] sm:$0xf]  ;;  %v10375_v63 = vor.u32 %v13809_v45, %v10372_v46 }
 0x17b   :  { %3914 = vmatpush.bf16.msra.mxu3 %v10023_v12  ;;  %3890 = vmatpush.bf16.msra.mxu1 %v9447_v19  ;;  %v10628_v51 = vld [vmem:[#allocation6 + $0xbe8] sm:$0xf0]  ;;  %v3597_v12 = vpop.f32.mrf.mxu2 }
 0x17c   :  { %v13633_v52 = vld [vmem:[#allocation6 + $0x44c] sm:$0xf]  ;;  %v10631_v1 = vor.u32 %v13873_v47, %v10628_v51 }
 0x17d   :  { %3902 = vmatpush.bf16.msra.mxu2 %v9735_v23  ;;  %v9668_v53 = vld [vmem:[#allocation6 + $0x468] sm:$0xf0]  ;;  %3878 = vmatpush.bf16.msra.mxu0 %v9159_v33  ;;  %v3636_v33 = vpop.f32.mrf.mxu1 }
 0x17e   :  { %v13697_v55 = vld [vmem:[#allocation6 + $0x64c] sm:$0xf]  ;;  %v9671_v2 = vor.u32 %v13633_v52, %v9668_v53  ;;  %v985_v53 = vperm.slane %v14970_v21, 1 }
 0x17f   :  { %3915 = vmatpush.bf16.msra.mxu3 %v9991_v28  ;;  %v9924_v58 = vld [vmem:[#allocation6 + $0x668] sm:$0xf0]  ;;  %3891 = vmatpush.bf16.msra.mxu1 %v9415_v40 }
 0x180   :  { %v13801_v0 = vld [vmem:[#allocation6 + $0x98c] sm:$0xf]  ;;  %v9927_v8 = vor.u32 %v13697_v55, %v9924_v58 }
 0x181   :  { %3903 = vmatpush.bf16.msra.mxu2 %v9703_v44  ;;  %v10340_v3 = vld [vmem:[#allocation6 + $0x9a8] sm:$0xf0]  ;;  %3879 = vmatpush.bf16.msra.mxu0 %v9127_v54  ;;  %v3660_v52 = vpop.f32.mrf.mxu3 }
 0x182   :  { %v13865_v5 = vld [vmem:[#allocation6 + $0xb8c] sm:$0xf]  ;;  %v10343_v16 = vor.u32 %v13801_v0, %v10340_v3  ;;  %v3673_v3 = vpop.f32.mrf.mxu0 }
 0x183   :  { %v10596_v6 = vld [vmem:[#allocation6 + $0xba8] sm:$0xf0]  ;;  %3916 = vmatpush.bf16.msra.mxu3 %v9959_v50  ;;  %3892 = vmatpush.bf16.msra.mxu1 %v9383_v60  ;;  %v3647_v47 = vpop.f32.mrf.mxu2 }
 0x184   :  { %v13625_v9 = vld [vmem:[#allocation6 + $0x40c] sm:$0xf]  ;;  %v10599_v20 = vor.u32 %v13865_v5, %v10596_v6  ;;  %3880 = vmatmul.bf16.vlgmr.msra.gmra.mxu0 %v14930_v56  ;;  %v3648_v51 = vadd.f32 %v3647_v47, %v3635_v7 }
 0x185   :  { %v9636_v10 = vld [vmem:[#allocation6 + $0x428] sm:$0xf0]  ;;  %3924 = vmatpush.bf16.msrb.mxu0 %v10375_v63  ;;  %3904 = vmatpush.bf16.msra.mxu2 %v9671_v2 }
 0x186   :  { %v13689_v11 = vld [vmem:[#allocation6 + $0x60c] sm:$0xf]  ;;  %v9639_v22 = vor.u32 %v13625_v9, %v9636_v10  ;;  %3893 = vmatmul.bf16.vlgmr.msra.gmra.mxu1 %v14932_v61  ;;  %v14982_v63 = vadd.f32 %v3660_v52, %v3648_v51  ;;  %v3686_v9 = vpop.f32.mrf.mxu1 }
 0x187   :  { %v9892_v13 = vld [vmem:[#allocation6 + $0x628] sm:$0xf0]  ;;  %3937 = vmatpush.bf16.msrb.mxu1 %v10631_v1  ;;  %3917 = vmatpush.bf16.msra.mxu3 %v9927_v8  ;;  %v3674_v8 = vadd.f32 %v3673_v3, %v985_v53  ;;  %v9354_v53 = vld [vmem:[#allocation6 + $0x1d0] sm:$0xf] }
 0x188   :  { %v13937_v14 = vld [vmem:[#allocation6 + $0xdcc] sm:$0xf]  ;;  %v9895_v28 = vor.u32 %v13689_v11, %v9892_v13  ;;  %14610 = vtanh.f32 %v14982_v63  ;;  %v14012_v63 = vld [vmem:[#allocation9 + $0x1c] sm:$0xf0] }
 0x189   :  { %v10884_v15 = vld [vmem:[#allocation6 + $0xde8] sm:$0xf0]  ;;  %3925 = vmatpush.bf16.msrb.mxu0 %v10343_v16  ;;  %3905 = vmatpush.bf16.msra.mxu2 %v9639_v22  ;;  %v3687_v57 = vadd.f32 %v3686_v9, %v3674_v8  ;;  %v3662_v27 = vpop.f32.mrf.mxu3  ;;  %v9322_v9 = vld [vmem:[#allocation6 + $0x190] sm:$0xf] }
 0x18a   :  { %v14001_v18 = vld [vmem:[#allocation6 + $0xfcc] sm:$0xf]  ;;  %v10887_v29 = vor.u32 %v13937_v14, %v10884_v15  ;;  %v10122_v27 = vld [vmem:[#allocation6 + $0x7d0] sm:$0xf] }
 0x18b   :  { %v11140_v19 = vld [vmem:[#allocation6 + $0xfe8] sm:$0xf0]  ;;  %3938 = vmatpush.bf16.msrb.mxu1 %v10599_v20  ;;  %3918 = vmatpush.bf16.msra.mxu3 %v9895_v28  ;;  %v3649_v20 = vpop.f32.mrf.mxu2 }
 0x18c   :  { %v13793_v23 = vld [vmem:[#allocation6 + $0x94c] sm:$0xf]  ;;  %v11143_v35 = vor.u32 %v14001_v18, %v11140_v19  ;;  %3906 = vmatmul.bf16.vlgmr.msra.gmra.mxu2 %v14938_v17 }
 0x18d   :  { %v10308_v24 = vld [vmem:[#allocation6 + $0x968] sm:$0xf0]  ;;  %3950 = vmatpush.bf16.msrb.mxu2 %v10887_v29 }
 0x18e   :  { %v13857_v30 = vld [vmem:[#allocation6 + $0xb4c] sm:$0xf]  ;;  %v10311_v38 = vor.u32 %v13793_v23, %v10308_v24  ;;  %3919 = vmatmul.bf16.vlgmr.msra.gmra.mxu3 %v14940_v25 }
 0x18f   :  { %v10564_v32 = vld [vmem:[#allocation6 + $0xb68] sm:$0xf0]  ;;  %3963 = vmatpush.bf16.msrb.mxu3 %v11143_v35 }
 0x190   :  { %v13929_v36 = vld [vmem:[#allocation6 + $0xd8c] sm:$0xf]  ;;  %v10567_v41 = vor.u32 %v13857_v30, %v10564_v32  ;;  %3926 = vmatpush.bf16.msrb.mxu0 %v10311_v38 }
 0x191   :  { %v10852_v37 = vld [vmem:[#allocation6 + $0xda8] sm:$0xf0] }
 0x192   :  { %v13993_v39 = vld [vmem:[#allocation6 + $0xf8c] sm:$0xf]  ;;  %v10855_v44 = vor.u32 %v13929_v36, %v10852_v37  ;;  %3939 = vmatpush.bf16.msrb.mxu1 %v10567_v41 }
 0x193   :  { %v11108_v40 = vld [vmem:[#allocation6 + $0xfa8] sm:$0xf0] }
 0x194   :  { %v13785_v42 = vld [vmem:[#allocation6 + $0x90c] sm:$0xf]  ;;  %v11111_v48 = vor.u32 %v13993_v39, %v11108_v40  ;;  %3951 = vmatpush.bf16.msrb.mxu2 %v10855_v44  ;;  %v3675_v39 = vpop.f32.mrf.mxu0 }
 0x195   :  { %v10276_v43 = vld [vmem:[#allocation6 + $0x928] sm:$0xf0] }
 0x196   :  { %v13849_v45 = vld [vmem:[#allocation6 + $0xb0c] sm:$0xf]  ;;  %v10279_v34 = vor.u32 %v13785_v42, %v10276_v43  ;;  %3964 = vmatpush.bf16.msrb.mxu3 %v11111_v48  ;;  %v3688_v43 = vpop.f32.mrf.mxu1 }
 0x197   :  { %v10532_v46 = vld [vmem:[#allocation6 + $0xb28] sm:$0xf0]  ;;  %v13678_v43 = vld [vmem:[#allocation6 + $0x5ac] sm:$0xf0] }
 0x198   :  { %v13921_v49 = vld [vmem:[#allocation6 + $0xd4c] sm:$0xf]  ;;  %v10535_v58 = vor.u32 %v13849_v45, %v10532_v46  ;;  %3927 = vmatpush.bf16.msrb.mxu0 %v10279_v34  ;;  %v13558_v34 = vld [vmem:[#allocation6 + $0x1ec] sm:$0xf0] }
 0x199   :  { %v10820_v50 = vld [vmem:[#allocation6 + $0xd68] sm:$0xf0]  ;;  %v9355_v8 = vor.u32 %v13558_v34, %v9354_v53  ;;  %v9802_v34 = vld [vmem:[#allocation6 + $0x550] sm:$0xf] }
 0x19a   :  { %v13985_v54 = vld [vmem:[#allocation6 + $0xf4c] sm:$0xf]  ;;  %v10823_v0 = vor.u32 %v13921_v49, %v10820_v50  ;;  %3940 = vmatpush.bf16.msrb.mxu1 %v10535_v58  ;;  %v13622_v58 = vld [vmem:[#allocation6 + $0x3ec] sm:$0xf0] }
 0x19b   :  { %v11076_v55 = vld [vmem:[#allocation6 + $0xf68] sm:$0xf0] }
 0x19c   :  { %v13777_v59 = vld [vmem:[#allocation6 + $0x8cc] sm:$0xf]  ;;  %v11079_v5 = vor.u32 %v13985_v54, %v11076_v55  ;;  %3952 = vmatpush.bf16.msrb.mxu2 %v10823_v0  ;;  %v9610_v54 = vld [vmem:[#allocation6 + $0x3d0] sm:$0xf]  ;;  %v3699_v0 = vpop.f32.mrf.mxu2 }
 0x19d   :  { %v10244_v60 = vld [vmem:[#allocation6 + $0x8e8] sm:$0xf0] }
 0x19e   :  { %v13841_v1 = vld [vmem:[#allocation6 + $0xacc] sm:$0xf]  ;;  %v10247_v10 = vor.u32 %v13777_v59, %v10244_v60  ;;  %3965 = vmatpush.bf16.msrb.mxu3 %v11079_v5 }
 0x19f   :  { %v10500_v2 = vld [vmem:[#allocation6 + $0xae8] sm:$0xf0] }
 0x1a0   :  { %v13913_v6 = vld [vmem:[#allocation6 + $0xd0c] sm:$0xf]  ;;  %v10503_v13 = vor.u32 %v13841_v1, %v10500_v2  ;;  %3928 = vmatpush.bf16.msrb.mxu0 %v10247_v10  ;;  %v3712_v1 = vpop.f32.mrf.mxu3  ;;  %v9611_v10 = vor.u32 %v13622_v58, %v9610_v54  ;;  %v13670_v54 = vld [vmem:[#allocation6 + $0x56c] sm:$0xf0] }
 0x1a1   :  { %v10788_v7 = vld [vmem:[#allocation6 + $0xd28] sm:$0xf0]  ;;  %v10058_v58 = vld [vmem:[#allocation6 + $0x750] sm:$0xf] }
 0x1a2   :  { %v13977_v11 = vld [vmem:[#allocation6 + $0xf0c] sm:$0xf]  ;;  %v10791_v16 = vor.u32 %v13913_v6, %v10788_v7  ;;  %3941 = vmatpush.bf16.msrb.mxu1 %v10503_v13  ;;  %v3700_v6 = vadd.f32 %v3699_v0, %v3687_v57  ;;  %v9578_v13 = vld [vmem:[#allocation6 + $0x390] sm:$0xf] }
 0x1a3   :  { %v11044_v12 = vld [vmem:[#allocation6 + $0xf28] sm:$0xf0]  ;;  %v9866_v57 = vld [vmem:[#allocation6 + $0x5d0] sm:$0xf] }
 0x1a4   :  { %v13769_v14 = vld [vmem:[#allocation6 + $0x88c] sm:$0xf]  ;;  %v11047_v22 = vor.u32 %v13977_v11, %v11044_v12  ;;  %3953 = vmatpush.bf16.msrb.mxu2 %v10791_v16  ;;  %v13550_v12 = vld [vmem:[#allocation6 + $0x1ac] sm:$0xf0]  ;;  %v3701_v39 = vpop.f32.mrf.mxu2 }
 0x1a5   :  { %v10212_v15 = vld [vmem:[#allocation6 + $0x8a8] sm:$0xf0]  ;;  %v9226_v0 = vld [vmem:[#allocation6 + $0xd0] sm:$0xf] }
 0x1a6   :  { %v13833_v18 = vld [vmem:[#allocation6 + $0xa8c] sm:$0xf]  ;;  %v10215_v28 = vor.u32 %v13769_v14, %v10212_v15  ;;  %3966 = vmatpush.bf16.msrb.mxu3 %v11047_v22  ;;  %v13614_v14 = vld [vmem:[#allocation6 + $0x3ac] sm:$0xf0]  ;;  %v14984_v15 = vadd.f32 %v3712_v1, %v3700_v6  ;;  %v3725_v6 = vpop.f32.mrf.mxu0 }
 0x1a7   :  { %v10468_v19 = vld [vmem:[#allocation6 + $0xaa8] sm:$0xf0]  ;;  %v13526_v1 = vld [vmem:[#allocation6 + $0xec] sm:$0xf0] }
 0x1a8   :  { %v13905_v23 = vld [vmem:[#allocation6 + $0xccc] sm:$0xf]  ;;  %v10471_v32 = vor.u32 %v13833_v18, %v10468_v19  ;;  %3929 = vmatpush.bf16.msrb.mxu0 %v10215_v28  ;;  %v13750_v28 = vld [vmem:[#allocation6 + $0x7ec] sm:$0xf0] }
 0x1a9   :  { %v10756_v24 = vld [vmem:[#allocation6 + $0xce8] sm:$0xf0] }
 0x1aa   :  { %v13969_v29 = vld [vmem:[#allocation6 + $0xecc] sm:$0xf]  ;;  %v10759_v36 = vor.u32 %v13905_v23, %v10756_v24  ;;  %3942 = vmatpush.bf16.msrb.mxu1 %v10471_v32  ;;  %v13686_v23 = vld [vmem:[#allocation6 + $0x5ec] sm:$0xf0]  ;;  %v9323_v24 = vor.u32 %v13550_v12, %v9322_v9  ;;  %v9227_v12 = vor.u32 %v13526_v1, %v9226_v0 }
 0x1ab   :  { %v11012_v30 = vld [vmem:[#allocation6 + $0xee8] sm:$0xf0]  ;;  %v9290_v32 = vld [vmem:[#allocation6 + $0x150] sm:$0xf] }
 0x1ac   :  { %v13761_v33 = vld [vmem:[#allocation6 + $0x84c] sm:$0xf]  ;;  %v11015_v40 = vor.u32 %v13969_v29, %v11012_v30  ;;  %3954 = vmatpush.bf16.msrb.mxu2 %v10759_v36  ;;  %v9579_v29 = vor.u32 %v13614_v14, %v9578_v13  ;;  %v9867_v36 = vor.u32 %v13686_v23, %v9866_v57  ;;  %v13662_v9 = vld [vmem:[#allocation6 + $0x52c] sm:$0xf0] }
 0x1ad   :  { %v10180_v35 = vld [vmem:[#allocation6 + $0x868] sm:$0xf0]  ;;  %v10026_v13 = vld [vmem:[#allocation6 + $0x710] sm:$0xf] }
 0x1ae   :  { %v13825_v37 = vld [vmem:[#allocation6 + $0xa4c] sm:$0xf]  ;;  %v10183_v44 = vor.u32 %v13761_v33, %v10180_v35  ;;  %3967 = vmatpush.bf16.msrb.mxu3 %v11015_v40  ;;  %v13542_v33 = vld [vmem:[#allocation6 + $0x16c] sm:$0xf0]  ;;  %v3714_v40 = vpop.f32.mrf.mxu3  ;;  %v3727_v39 = vpop.f32.mrf.mxu0 }
 0x1af   :  { %v10436_v38 = vld [vmem:[#allocation6 + $0xa68] sm:$0xf0]  ;;  %v13726_v14 = vld [vmem:[#allocation6 + $0x72c] sm:$0xf0] }
 0x1b0   :  { %v13897_v41 = vld [vmem:[#allocation6 + $0xc8c] sm:$0xf]  ;;  %v10439_v48 = vor.u32 %v13825_v37, %v10436_v38  ;;  %3930 = vmatpush.bf16.msrb.mxu0 %v10183_v44  ;;  %v9546_v37 = vld [vmem:[#allocation6 + $0x350] sm:$0xf]  ;;  %v9291_v44 = vor.u32 %v13542_v33, %v9290_v32 }
 0x1b1   :  { %v10724_v42 = vld [vmem:[#allocation6 + $0xca8] sm:$0xf0]  ;;  %v13606_v38 = vld [vmem:[#allocation6 + $0x36c] sm:$0xf0] }
 0x1b2   :  { %v13961_v45 = vld [vmem:[#allocation6 + $0xe8c] sm:$0xf]  ;;  %v10727_v52 = vor.u32 %v13897_v41, %v10724_v42  ;;  %3943 = vmatpush.bf16.msrb.mxu1 %v10439_v48  ;;  %v10123_v41 = vor.u32 %v13750_v28, %v10122_v27  ;;  %v9834_v42 = vld [vmem:[#allocation6 + $0x590] sm:$0xf] }
 0x1b3   :  { %v10980_v46 = vld [vmem:[#allocation6 + $0xea8] sm:$0xf0]  ;;  %v9258_v48 = vld [vmem:[#allocation6 + $0x110] sm:$0xf] }
 0x1b4   :  { %v13753_v47 = vld [vmem:[#allocation6 + $0x80c] sm:$0xf]  ;;  %v10983_v55 = vor.u32 %v13961_v45, %v10980_v46  ;;  %3955 = vmatpush.bf16.msrb.mxu2 %v10727_v52  ;;  %v10090_v45 = vld [vmem:[#allocation6 + $0x790] sm:$0xf] }
 0x1b5   :  { %v10148_v49 = vld [vmem:[#allocation6 + $0x828] sm:$0xf0]  ;;  %v13742_v46 = vld [vmem:[#allocation6 + $0x7ac] sm:$0xf0] }
 0x1b6   :  { %v13817_v50 = vld [vmem:[#allocation6 + $0xa0c] sm:$0xf]  ;;  %v10151_v2 = vor.u32 %v13753_v47, %v10148_v49  ;;  %3968 = vmatpush.bf16.msrb.mxu3 %v10983_v55  ;;  %v9547_v47 = vor.u32 %v13606_v38, %v9546_v37  ;;  %v13534_v49 = vld [vmem:[#allocation6 + $0x12c] sm:$0xf0]  ;;  %v10091_v53 = vor.u32 %v13742_v46, %v10090_v45 }
 0x1b7   :  { %v10404_v51 = vld [vmem:[#allocation6 + $0xa28] sm:$0xf0]  ;;  %v13598_v52 = vld [vmem:[#allocation6 + $0x32c] sm:$0xf0]  ;;  %v9259_v55 = vor.u32 %v13534_v49, %v9258_v48 }
 0x1b8   :  { %v13889_v59 = vld [vmem:[#allocation6 + $0xc4c] sm:$0xf]  ;;  %v10407_v7 = vor.u32 %v13817_v50, %v10404_v51  ;;  %3931 = vmatpush.bf16.msrb.mxu0 %v10151_v2  ;;  %v9835_v50 = vor.u32 %v13678_v43, %v9834_v42  ;;  %v9514_v51 = vld [vmem:[#allocation6 + $0x310] sm:$0xf]  ;;  %v9803_v2 = vor.u32 %v13670_v54, %v9802_v34 }
 0x1b9   :  { %v10692_v60 = vld [vmem:[#allocation6 + $0xc68] sm:$0xf0]  ;;  %v9450_v57 = vld [vmem:[#allocation6 + $0x290] sm:$0xf] }
 0x1ba   :  { %v13953_v3 = vld [vmem:[#allocation6 + $0xe4c] sm:$0xf]  ;;  %v10695_v11 = vor.u32 %v13889_v59, %v10692_v60  ;;  %3944 = vmatpush.bf16.msrb.mxu1 %v10407_v7  ;;  %v13734_v59 = vld [vmem:[#allocation6 + $0x76c] sm:$0xf0]  ;;  %v9515_v60 = vor.u32 %v13598_v52, %v9514_v51 }
 0x1bb   :  { %v10948_v5 = vld [vmem:[#allocation6 + $0xe68] sm:$0xf0]  ;;  %3932 = vmatmul.bf16.vlgmr.msrb.gmra.mxu0 %v14946_v62  ;;  %v10059_v7 = vor.u32 %v13734_v59, %v10058_v58  ;;  %v13582_v23 = vld [vmem:[#allocation6 + $0x2ac] sm:$0xf0] }
 0x1bc   :  { %v10951_v16 = vor.u32 %v13953_v3, %v10948_v5  ;;  %v13881_v18 = vld [vmem:[#allocation6 + $0xc0c] sm:$0xf]  ;;  %3976 = vmatpush.bf16.msra.mxu0 %v9355_v8  ;;  %3956 = vmatpush.bf16.msrb.mxu2 %v10695_v11  ;;  %v9482_v3 = vld [vmem:[#allocation6 + $0x2d0] sm:$0xf]  ;;  %v3738_v11 = vpop.f32.mrf.mxu1  ;;  %v9451_v32 = vor.u32 %v13582_v23, %v9450_v57 }
 0x1bd   :  { %v10660_v19 = vld [vmem:[#allocation6 + $0xc28] sm:$0xf0]  ;;  %3945 = vmatmul.bf16.vlgmr.msrb.gmra.mxu1 %v14948_v4  ;;  %v13590_v5 = vld [vmem:[#allocation6 + $0x2ec] sm:$0xf0] }
 0x1be   :  { %v13945_v20 = vld [vmem:[#allocation6 + $0xe0c] sm:$0xf]  ;;  %3989 = vmatpush.bf16.msra.mxu1 %v9611_v10  ;;  %v10663_v30 = vor.u32 %v13881_v18, %v10660_v19  ;;  %3969 = vmatpush.bf16.msrb.mxu3 %v10951_v16  ;;  %v9770_v8 = vld [vmem:[#allocation6 + $0x510] sm:$0xf]  ;;  %v3726_v10 = vadd.f32 %v3725_v6, %v14984_v15  ;;  %v9483_v16 = vor.u32 %v13590_v5, %v9482_v3 }
 0x1bf   :  { %v10916_v22 = vld [vmem:[#allocation6 + $0xe28] sm:$0xf0]  ;;  %v9194_v18 = vld [vmem:[#allocation6 + $0x90] sm:$0xf] }
 0x1c0   :  { %v10919_v35 = vor.u32 %v13945_v20, %v10916_v22  ;;  %3977 = vmatpush.bf16.msra.mxu0 %v9323_v24  ;;  %3957 = vmatpush.bf16.msrb.mxu2 %v10663_v30  ;;  %v13518_v19 = vld [vmem:[#allocation6 + $0xac] sm:$0xf0]  ;;  %v3739_v20 = vadd.f32 %v3738_v11, %v3726_v10  ;;  %v9771_v22 = vor.u32 %v13662_v9, %v9770_v8 }
 0x1c1   :  { %v10027_v24 = vor.u32 %v13726_v14, %v10026_v13  ;;  %v9738_v27 = vld [vmem:[#allocation6 + $0x4d0] sm:$0xf]  ;;  %v9195_v15 = vor.u32 %v13518_v19, %v9194_v18 }
 0x1c2   :  { %3990 = vmatpush.bf16.msra.mxu1 %v9579_v29  ;;  %3970 = vmatpush.bf16.msrb.mxu3 %v10919_v35  ;;  %v13654_v28 = vld [vmem:[#allocation6 + $0x4ec] sm:$0xf0] }
 0x1c3   :  { %3958 = vmatmul.bf16.vlgmr.msrb.gmra.mxu2 %v14952_v26  ;;  %v9994_v29 = vld [vmem:[#allocation6 + $0x6d0] sm:$0xf] }
 0x1c4   :  { %4002 = vmatpush.bf16.msra.mxu2 %v9867_v36  ;;  %3978 = vmatpush.bf16.msra.mxu0 %v9291_v44  ;;  %v13718_v30 = vld [vmem:[#allocation6 + $0x6ec] sm:$0xf0]  ;;  %v9739_v36 = vor.u32 %v13654_v28, %v9738_v27  ;;  %v3740_v43 = vpop.f32.mrf.mxu1 }
 0x1c5   :  { %3971 = vmatmul.bf16.vlgmr.msrb.gmra.mxu3 %v14954_v31  ;;  %v9162_v33 = vld [vmem:[#allocation6 + $0x50] sm:$0xf]  ;;  %v9995_v40 = vor.u32 %v13718_v30, %v9994_v29 }
 0x1c6   :  { %4015 = vmatpush.bf16.msra.mxu3 %v10123_v41  ;;  %3991 = vmatpush.bf16.msra.mxu1 %v9547_v47  ;;  %v13510_v35 = vld [vmem:[#allocation6 + $0x6c] sm:$0xf0] }
 0x1c7   :  { %v9418_v37 = vld [vmem:[#allocation6 + $0x250] sm:$0xf]  ;;  %v9163_v44 = vor.u32 %v13510_v35, %v9162_v33 }
 0x1c8   :  { %4003 = vmatpush.bf16.msra.mxu2 %v9835_v50  ;;  %3979 = vmatpush.bf16.msra.mxu0 %v9259_v55  ;;  %v13574_v38 = vld [vmem:[#allocation6 + $0x26c] sm:$0xf0]  ;;  %v3751_v55 = vpop.f32.mrf.mxu2 }
 0x1c9   :  { %v9706_v41 = vld [vmem:[#allocation6 + $0x490] sm:$0xf]  ;;  %v9419_v48 = vor.u32 %v13574_v38, %v9418_v37  ;;  %v3752_v1 = vadd.f32 %v3751_v55, %v3739_v20  ;;  %v986_v55 = vperm.slane %v14970_v21, 2 }
 0x1ca   :  { %4016 = vmatpush.bf16.msra.mxu3 %v10091_v53  ;;  %3992 = vmatpush.bf16.msra.mxu1 %v9515_v60  ;;  %v13646_v42 = vld [vmem:[#allocation6 + $0x4ac] sm:$0xf0] }
 0x1cb   :  { %v9962_v45 = vld [vmem:[#allocation6 + $0x690] sm:$0xf]  ;;  %v9707_v52 = vor.u32 %v13646_v42, %v9706_v41 }
 0x1cc   :  { %4004 = vmatpush.bf16.msra.mxu2 %v9803_v2  ;;  %3980 = vmatpush.bf16.msra.mxu0 %v9227_v12  ;;  %v13710_v46 = vld [vmem:[#allocation6 + $0x6ac] sm:$0xf0]  ;;  %v3764_v2 = vpop.f32.mrf.mxu3  ;;  %v3790_v21 = vpop.f32.mrf.mxu1 }
 0x1cd   :  { %v9130_v47 = vld [vmem:[#allocation6 + $0x10] sm:$0xf]  ;;  %v9963_v58 = vor.u32 %v13710_v46, %v9962_v45  ;;  %v14991_v10 = vadd.f32 %v3764_v2, %v3752_v1 }
 0x1ce   :  { %4017 = vmatpush.bf16.msra.mxu3 %v10059_v7  ;;  %3993 = vmatpush.bf16.msra.mxu1 %v9483_v16  ;;  %v13502_v49 = vld [vmem:[#allocation6 + $0x2c] sm:$0xf0] }
 0x1cf   :  { %v9386_v50 = vld [vmem:[#allocation6 + $0x210] sm:$0xf]  ;;  %v9131_v3 = vor.u32 %v13502_v49, %v9130_v47  ;;  %14612 = vtanh.f32 %v14991_v10 }
 0x1d0   :  { %4005 = vmatpush.bf16.msra.mxu2 %v9771_v22  ;;  %3981 = vmatpush.bf16.msra.mxu0 %v9195_v15  ;;  %v13566_v51 = vld [vmem:[#allocation6 + $0x22c] sm:$0xf0]  ;;  %v3753_v35 = vpop.f32.mrf.mxu2 }
 0x1d1   :  { %v10378_v53 = vld [vmem:[#allocation6 + $0x9d0] sm:$0xf]  ;;  %v9387_v7 = vor.u32 %v13566_v51, %v9386_v50 }
 0x1d2   :  { %4018 = vmatpush.bf16.msra.mxu3 %v10027_v24  ;;  %3994 = vmatpush.bf16.msra.mxu1 %v9451_v32  ;;  %v13814_v34 = vld [vmem:[#allocation6 + $0x9ec] sm:$0xf0] }
 0x1d3   :  { %v10634_v54 = vld [vmem:[#allocation6 + $0xbd0] sm:$0xf]  ;;  %v10379_v8 = vor.u32 %v13814_v34, %v10378_v53 }
 0x1d4   :  { %4006 = vmatpush.bf16.msra.mxu2 %v9739_v36  ;;  %v13878_v59 = vld [vmem:[#allocation6 + $0xbec] sm:$0xf0]  ;;  %3982 = vmatpush.bf16.msra.mxu0 %v9163_v44 }
 0x1d5   :  { %v9674_v60 = vld [vmem:[#allocation6 + $0x450] sm:$0xf]  ;;  %v10635_v11 = vor.u32 %v13878_v59, %v10634_v54 }
 0x1d6   :  { %4019 = vmatpush.bf16.msra.mxu3 %v9995_v40  ;;  %v13638_v0 = vld [vmem:[#allocation6 + $0x46c] sm:$0xf0]  ;;  %3995 = vmatpush.bf16.msra.mxu1 %v9419_v48  ;;  %v3766_v40 = vpop.f32.mrf.mxu3 }
 0x1d7   :  { %v9930_v5 = vld [vmem:[#allocation6 + $0x650] sm:$0xf]  ;;  %v9675_v12 = vor.u32 %v13638_v0, %v9674_v60 }
 0x1d8   :  { %v13702_v6 = vld [vmem:[#allocation6 + $0x66c] sm:$0xf0]  ;;  %4007 = vmatpush.bf16.msra.mxu2 %v9707_v52  ;;  %3983 = vmatpush.bf16.msra.mxu0 %v9131_v3 }
 0x1d9   :  { %v10346_v9 = vld [vmem:[#allocation6 + $0x990] sm:$0xf]  ;;  %v9931_v18 = vor.u32 %v13702_v6, %v9930_v5 }
 0x1da   :  { %v13806_v13 = vld [vmem:[#allocation6 + $0x9ac] sm:$0xf0]  ;;  %4020 = vmatpush.bf16.msra.mxu3 %v9963_v58  ;;  %3996 = vmatpush.bf16.msra.mxu1 %v9387_v7  ;;  %v3777_v7 = vpop.f32.mrf.mxu0 }
 0x1db   :  { %v10602_v14 = vld [vmem:[#allocation6 + $0xb90] sm:$0xf]  ;;  %v10347_v27 = vor.u32 %v13806_v13, %v10346_v9  ;;  %3984 = vmatmul.bf16.vlgmr.msra.gmra.mxu0 %v14930_v56 }
 0x1dc   :  { %v13870_v16 = vld [vmem:[#allocation6 + $0xbac] sm:$0xf0]  ;;  %4028 = vmatpush.bf16.msrb.mxu0 %v10379_v8  ;;  %4008 = vmatpush.bf16.msra.mxu2 %v9675_v12  ;;  %v3778_v12 = vadd.f32 %v3777_v7, %v986_v55  ;;  %v13618_v55 = vld [vmem:[#allocation6 + $0x3d4] sm:$0xf] }
 0x1dd   :  { %v9642_v19 = vld [vmem:[#allocation6 + $0x410] sm:$0xf]  ;;  %v10603_v29 = vor.u32 %v13870_v16, %v10602_v14  ;;  %3997 = vmatmul.bf16.vlgmr.msra.gmra.mxu1 %v14932_v61 }
 0x1de   :  { %v13630_v20 = vld [vmem:[#allocation6 + $0x42c] sm:$0xf0]  ;;  %4041 = vmatpush.bf16.msrb.mxu1 %v10635_v11  ;;  %4021 = vmatpush.bf16.msra.mxu3 %v9931_v18 }
 0x1df   :  { %v9898_v22 = vld [vmem:[#allocation6 + $0x610] sm:$0xf]  ;;  %v9643_v30 = vor.u32 %v13630_v20, %v9642_v19 }
 0x1e0   :  { %v13694_v57 = vld [vmem:[#allocation6 + $0x62c] sm:$0xf0]  ;;  %4029 = vmatpush.bf16.msrb.mxu0 %v10347_v27 }
 0x1e1   :  { %v10890_v23 = vld [vmem:[#allocation6 + $0xdd0] sm:$0xf]  ;;  %v9899_v36 = vor.u32 %v13694_v57, %v9898_v22  ;;  %4009 = vmatpush.bf16.msra.mxu2 %v9643_v30  ;;  %v3791_v22 = vadd.f32 %v3790_v21, %v3778_v12 }
 0x1e2   :  { %v13942_v24 = vld [vmem:[#allocation6 + $0xdec] sm:$0xf0]  ;;  %4042 = vmatpush.bf16.msrb.mxu1 %v10603_v29  ;;  %v3779_v40 = vpop.f32.mrf.mxu0 }
 0x1e3   :  { %v11146_v28 = vld [vmem:[#allocation6 + $0xfd0] sm:$0xf]  ;;  %v10891_v37 = vor.u32 %v13942_v24, %v10890_v23  ;;  %4022 = vmatpush.bf16.msra.mxu3 %v9899_v36  ;;  %v9548_v40 = vld [vmem:[#allocation6 + $0x370] sm:$0xf0] }
 0x1e4   :  { %v14006_v15 = vld [vmem:[#allocation6 + $0xfec] sm:$0xf0]  ;;  %4010 = vmatmul.bf16.vlgmr.msra.gmra.mxu2 %v14938_v17 }
 0x1e5   :  { %v10314_v32 = vld [vmem:[#allocation6 + $0x950] sm:$0xf]  ;;  %v11147_v41 = vor.u32 %v14006_v15, %v11146_v28  ;;  %4054 = vmatpush.bf16.msrb.mxu2 %v10891_v37 }
 0x1e6   :  { %v13798_v33 = vld [vmem:[#allocation6 + $0x96c] sm:$0xf0]  ;;  %4023 = vmatmul.bf16.vlgmr.msra.gmra.mxu3 %v14940_v25 }
 0x1e7   :  { %v10570_v38 = vld [vmem:[#allocation6 + $0xb50] sm:$0xf]  ;;  %v10315_v44 = vor.u32 %v13798_v33, %v10314_v32  ;;  %4067 = vmatpush.bf16.msrb.mxu3 %v11147_v41 }
 0x1e8   :  { %v13862_v39 = vld [vmem:[#allocation6 + $0xb6c] sm:$0xf0] }
 0x1e9   :  { %v10858_v42 = vld [vmem:[#allocation6 + $0xd90] sm:$0xf]  ;;  %v10571_v47 = vor.u32 %v13862_v39, %v10570_v38  ;;  %4030 = vmatpush.bf16.msrb.mxu0 %v10315_v44  ;;  %v3792_v44 = vpop.f32.mrf.mxu1 }
 0x1ea   :  { %v13934_v43 = vld [vmem:[#allocation6 + $0xdac] sm:$0xf0]  ;;  %v9836_v44 = vld [vmem:[#allocation6 + $0x5b0] sm:$0xf0] }
 0x1eb   :  { %v11114_v45 = vld [vmem:[#allocation6 + $0xf90] sm:$0xf]  ;;  %v10859_v50 = vor.u32 %v13934_v43, %v10858_v42  ;;  %4043 = vmatpush.bf16.msrb.mxu1 %v10571_v47 }
 0x1ec   :  { %v13998_v46 = vld [vmem:[#allocation6 + $0xfac] sm:$0xf0] }
 0x1ed   :  { %v10282_v48 = vld [vmem:[#allocation6 + $0x910] sm:$0xf]  ;;  %v11115_v53 = vor.u32 %v13998_v46, %v11114_v45  ;;  %4055 = vmatpush.bf16.msrb.mxu2 %v10859_v50 }
 0x1ee   :  { %v13790_v49 = vld [vmem:[#allocation6 + $0x92c] sm:$0xf0] }
 0x1ef   :  { %v10538_v51 = vld [vmem:[#allocation6 + $0xb10] sm:$0xf]  ;;  %v10283_v58 = vor.u32 %v13790_v49, %v10282_v48  ;;  %4068 = vmatpush.bf16.msrb.mxu3 %v11115_v53 }
 0x1f0   :  { %v13854_v52 = vld [vmem:[#allocation6 + $0xb2c] sm:$0xf0] }
 0x1f1   :  { %v10826_v34 = vld [vmem:[#allocation6 + $0xd50] sm:$0xf]  ;;  %v10539_v0 = vor.u32 %v13854_v52, %v10538_v51  ;;  %4031 = vmatpush.bf16.msrb.mxu0 %v10283_v58  ;;  %v3803_v58 = vpop.f32.mrf.mxu2 }
 0x1f2   :  { %v13926_v54 = vld [vmem:[#allocation6 + $0xd6c] sm:$0xf0] }
 0x1f3   :  { %v11082_v59 = vld [vmem:[#allocation6 + $0xf50] sm:$0xf]  ;;  %v10827_v3 = vor.u32 %v13926_v54, %v10826_v34  ;;  %4044 = vmatpush.bf16.msrb.mxu1 %v10539_v0  ;;  %v13554_v34 = vld [vmem:[#allocation6 + $0x1d4] sm:$0xf] }
 0x1f4   :  { %v13990_v60 = vld [vmem:[#allocation6 + $0xf6c] sm:$0xf0]  ;;  %v9356_v54 = vld [vmem:[#allocation6 + $0x1f0] sm:$0xf0] }
 0x1f5   :  { %v10250_v1 = vld [vmem:[#allocation6 + $0x8d0] sm:$0xf]  ;;  %v11083_v8 = vor.u32 %v13990_v60, %v11082_v59  ;;  %4056 = vmatpush.bf16.msrb.mxu2 %v10827_v3  ;;  %v9612_v60 = vld [vmem:[#allocation6 + $0x3f0] sm:$0xf0]  ;;  %v3816_v3 = vpop.f32.mrf.mxu3 }
 0x1f6   :  { %v13782_v2 = vld [vmem:[#allocation6 + $0x8ec] sm:$0xf0]  ;;  %v9615_v21 = vor.u32 %v13618_v55, %v9612_v60  ;;  %v9804_v55 = vld [vmem:[#allocation6 + $0x570] sm:$0xf0] }
 0x1f7   :  { %v10506_v5 = vld [vmem:[#allocation6 + $0xad0] sm:$0xf]  ;;  %v10251_v13 = vor.u32 %v13782_v2, %v10250_v1  ;;  %4069 = vmatpush.bf16.msrb.mxu3 %v11083_v8  ;;  %v3804_v2 = vadd.f32 %v3803_v58, %v3791_v22  ;;  %v10060_v60 = vld [vmem:[#allocation6 + $0x770] sm:$0xf0] }
 0x1f8   :  { %v13846_v6 = vld [vmem:[#allocation6 + $0xaec] sm:$0xf0] }
 0x1f9   :  { %v10794_v9 = vld [vmem:[#allocation6 + $0xd10] sm:$0xf]  ;;  %v10507_v18 = vor.u32 %v13846_v6, %v10506_v5  ;;  %4032 = vmatpush.bf16.msrb.mxu0 %v10251_v13  ;;  %v14998_v12 = vadd.f32 %v3816_v3, %v3804_v2  ;;  %v9228_v2 = vld [vmem:[#allocation6 + $0xf0] sm:$0xf0] }
 0x1fa   :  { %v13918_v11 = vld [vmem:[#allocation6 + $0xd2c] sm:$0xf0] }
 0x1fb   :  { %v11050_v14 = vld [vmem:[#allocation6 + $0xf10] sm:$0xf]  ;;  %v10795_v57 = vor.u32 %v13918_v11, %v10794_v9  ;;  %4045 = vmatpush.bf16.msrb.mxu1 %v10507_v18  ;;  %v9359_v9 = vor.u32 %v13554_v34, %v9356_v54  ;;  %v13546_v11 = vld [vmem:[#allocation6 + $0x194] sm:$0xf] }
 0x1fc   :  { %v13982_v16 = vld [vmem:[#allocation6 + $0xf2c] sm:$0xf0]  ;;  %v9580_v18 = vld [vmem:[#allocation6 + $0x3b0] sm:$0xf0] }
 0x1fd   :  { %v10218_v19 = vld [vmem:[#allocation6 + $0x890] sm:$0xf]  ;;  %v11051_v27 = vor.u32 %v13982_v16, %v11050_v14  ;;  %4057 = vmatpush.bf16.msrb.mxu2 %v10795_v57  ;;  %v9324_v14 = vld [vmem:[#allocation6 + $0x1b0] sm:$0xf0] }
 0x1fe   :  { %v13774_v20 = vld [vmem:[#allocation6 + $0x8ac] sm:$0xf0]  ;;  %v13610_v16 = vld [vmem:[#allocation6 + $0x394] sm:$0xf] }
 0x1ff   :  { %v10474_v23 = vld [vmem:[#allocation6 + $0xa90] sm:$0xf]  ;;  %v10219_v29 = vor.u32 %v13774_v20, %v10218_v19  ;;  %4070 = vmatpush.bf16.msrb.mxu3 %v11051_v27  ;;  %v9868_v27 = vld [vmem:[#allocation6 + $0x5f0] sm:$0xf0] }
 0x200   :  { %v13838_v24 = vld [vmem:[#allocation6 + $0xaac] sm:$0xf0]  ;;  %v13666_v54 = vld [vmem:[#allocation6 + $0x554] sm:$0xf] }
 0x201   :  { %v10762_v28 = vld [vmem:[#allocation6 + $0xcd0] sm:$0xf]  ;;  %v10475_v33 = vor.u32 %v13838_v24, %v10474_v23  ;;  %4033 = vmatpush.bf16.msrb.mxu0 %v10219_v29  ;;  %v13682_v24 = vld [vmem:[#allocation6 + $0x5d4] sm:$0xf]  ;;  %v9807_v3 = vor.u32 %v13666_v54, %v9804_v55 }
 0x202   :  { %v13910_v15 = vld [vmem:[#allocation6 + $0xcec] sm:$0xf0]  ;;  %v10124_v29 = vld [vmem:[#allocation6 + $0x7f0] sm:$0xf0] }
 0x203   :  { %v11018_v30 = vld [vmem:[#allocation6 + $0xed0] sm:$0xf]  ;;  %v10763_v37 = vor.u32 %v13910_v15, %v10762_v28  ;;  %4046 = vmatpush.bf16.msrb.mxu1 %v10475_v33  ;;  %v9327_v28 = vor.u32 %v13546_v11, %v9324_v14  ;;  %v13746_v15 = vld [vmem:[#allocation6 + $0x7d4] sm:$0xf] }
 0x204   :  { %v13974_v32 = vld [vmem:[#allocation6 + $0xeec] sm:$0xf0]  ;;  %v13538_v33 = vld [vmem:[#allocation6 + $0x154] sm:$0xf] }
 0x205   :  { %v10186_v35 = vld [vmem:[#allocation6 + $0x850] sm:$0xf]  ;;  %v11019_v41 = vor.u32 %v13974_v32, %v11018_v30  ;;  %4058 = vmatpush.bf16.msrb.mxu2 %v10763_v37  ;;  %v9583_v30 = vor.u32 %v13610_v16, %v9580_v18  ;;  %v9772_v11 = vld [vmem:[#allocation6 + $0x530] sm:$0xf0] }
 0x206   :  { %v13766_v36 = vld [vmem:[#allocation6 + $0x86c] sm:$0xf0]  ;;  %v13722_v16 = vld [vmem:[#allocation6 + $0x714] sm:$0xf] }
 0x207   :  { %v10442_v38 = vld [vmem:[#allocation6 + $0xa50] sm:$0xf]  ;;  %v10187_v45 = vor.u32 %v13766_v36, %v10186_v35  ;;  %4071 = vmatpush.bf16.msrb.mxu3 %v11019_v41  ;;  %v9292_v35 = vld [vmem:[#allocation6 + $0x170] sm:$0xf0]  ;;  %v3805_v36 = vpop.f32.mrf.mxu2  ;;  %v3818_v41 = vpop.f32.mrf.mxu3 }
 0x208   :  { %v13830_v39 = vld [vmem:[#allocation6 + $0xa6c] sm:$0xf0]  ;;  %v10028_v18 = vld [vmem:[#allocation6 + $0x730] sm:$0xf0] }
 0x209   :  { %v10730_v42 = vld [vmem:[#allocation6 + $0xc90] sm:$0xf]  ;;  %v10443_v49 = vor.u32 %v13830_v39, %v10442_v38  ;;  %4034 = vmatpush.bf16.msrb.mxu0 %v10187_v45  ;;  %v9871_v38 = vor.u32 %v13682_v24, %v9868_v27  ;;  %v13602_v39 = vld [vmem:[#allocation6 + $0x354] sm:$0xf]  ;;  %v9295_v45 = vor.u32 %v13538_v33, %v9292_v35 }
 0x20a   :  { %v13902_v43 = vld [vmem:[#allocation6 + $0xcac] sm:$0xf0]  ;;  %v13578_v24 = vld [vmem:[#allocation6 + $0x294] sm:$0xf] }
 0x20b   :  { %v10986_v46 = vld [vmem:[#allocation6 + $0xe90] sm:$0xf]  ;;  %v10731_v53 = vor.u32 %v13902_v43, %v10730_v42  ;;  %4047 = vmatpush.bf16.msrb.mxu1 %v10443_v49  ;;  %v10127_v42 = vor.u32 %v13746_v15, %v10124_v29  ;;  %v13674_v43 = vld [vmem:[#allocation6 + $0x594] sm:$0xf] }
 0x20c   :  { %v13966_v47 = vld [vmem:[#allocation6 + $0xeac] sm:$0xf0]  ;;  %v13530_v49 = vld [vmem:[#allocation6 + $0x114] sm:$0xf] }
 0x20d   :  { %v10154_v48 = vld [vmem:[#allocation6 + $0x810] sm:$0xf]  ;;  %v10987_v59 = vor.u32 %v13966_v47, %v10986_v46  ;;  %4059 = vmatpush.bf16.msrb.mxu2 %v10731_v53  ;;  %v13738_v46 = vld [vmem:[#allocation6 + $0x794] sm:$0xf] }
 0x20e   :  { %v13758_v50 = vld [vmem:[#allocation6 + $0x82c] sm:$0xf0]  ;;  %v10092_v47 = vld [vmem:[#allocation6 + $0x7b0] sm:$0xf0] }
 0x20f   :  { %v10410_v51 = vld [vmem:[#allocation6 + $0xa10] sm:$0xf]  ;;  %v10155_v5 = vor.u32 %v13758_v50, %v10154_v48  ;;  %4072 = vmatpush.bf16.msrb.mxu3 %v10987_v59  ;;  %v9551_v48 = vor.u32 %v13602_v39, %v9548_v40  ;;  %v9260_v50 = vld [vmem:[#allocation6 + $0x130] sm:$0xf0]  ;;  %v10095_v34 = vor.u32 %v13738_v46, %v10092_v47 }
 0x210   :  { %v13822_v52 = vld [vmem:[#allocation6 + $0xa2c] sm:$0xf0]  ;;  %v9516_v53 = vld [vmem:[#allocation6 + $0x330] sm:$0xf0]  ;;  %v9263_v58 = vor.u32 %v13530_v49, %v9260_v50 }
 0x211   :  { %v10698_v0 = vld [vmem:[#allocation6 + $0xc50] sm:$0xf]  ;;  %v10411_v8 = vor.u32 %v13822_v52, %v10410_v51  ;;  %4035 = vmatpush.bf16.msrb.mxu0 %v10155_v5  ;;  %v9839_v51 = vor.u32 %v13674_v43, %v9836_v44  ;;  %v13594_v52 = vld [vmem:[#allocation6 + $0x314] sm:$0xf] }
 0x212   :  { %v13894_v1 = vld [vmem:[#allocation6 + $0xc6c] sm:$0xf0]  ;;  %v13730_v59 = vld [vmem:[#allocation6 + $0x754] sm:$0xf] }
 0x213   :  { %v10954_v6 = vld [vmem:[#allocation6 + $0xe50] sm:$0xf]  ;;  %v10699_v13 = vor.u32 %v13894_v1, %v10698_v0  ;;  %4048 = vmatpush.bf16.msrb.mxu1 %v10411_v8  ;;  %v9519_v0 = vor.u32 %v13594_v52, %v9516_v53  ;;  %v13522_v1 = vld [vmem:[#allocation6 + $0xd4] sm:$0xf]  ;;  %v10063_v8 = vor.u32 %v13730_v59, %v10060_v60 }
 0x214   :  { %v13958_v7 = vld [vmem:[#allocation6 + $0xe6c] sm:$0xf0]  ;;  %4036 = vmatmul.bf16.vlgmr.msrb.gmra.mxu0 %v14946_v62  ;;  %v13586_v5 = vld [vmem:[#allocation6 + $0x2d4] sm:$0xf]  ;;  %v9231_v14 = vor.u32 %v13522_v1, %v9228_v2 }
 0x215   :  { %v10955_v19 = vor.u32 %v13958_v7, %v10954_v6  ;;  %v10666_v20 = vld [vmem:[#allocation6 + $0xc10] sm:$0xf]  ;;  %4080 = vmatpush.bf16.msra.mxu0 %v9359_v9  ;;  %4060 = vmatpush.bf16.msrb.mxu2 %v10699_v13  ;;  %v9484_v6 = vld [vmem:[#allocation6 + $0x2f0] sm:$0xf0]  ;;  %v3829_v7 = vpop.f32.mrf.mxu0  ;;  %v3842_v13 = vpop.f32.mrf.mxu1 }
 0x216   :  { %v13886_v22 = vld [vmem:[#allocation6 + $0xc2c] sm:$0xf0]  ;;  %4049 = vmatmul.bf16.vlgmr.msrb.gmra.mxu1 %v14948_v4  ;;  %v13658_v9 = vld [vmem:[#allocation6 + $0x514] sm:$0xf] }
 0x217   :  { %v10922_v57 = vld [vmem:[#allocation6 + $0xe10] sm:$0xf]  ;;  %4093 = vmatpush.bf16.msra.mxu1 %v9615_v21  ;;  %v10667_v32 = vor.u32 %v13886_v22, %v10666_v20  ;;  %4073 = vmatpush.bf16.msrb.mxu3 %v10955_v19  ;;  %v3830_v21 = vadd.f32 %v3829_v7, %v14998_v12  ;;  %v9487_v19 = vor.u32 %v13586_v5, %v9484_v6  ;;  %v13514_v20 = vld [vmem:[#allocation6 + $0x94] sm:$0xf] }
 0x218   :  { %v13950_v23 = vld [vmem:[#allocation6 + $0xe2c] sm:$0xf0]  ;;  %v9196_v22 = vld [vmem:[#allocation6 + $0xb0] sm:$0xf0] }
 0x219   :  { %v10923_v37 = vor.u32 %v13950_v23, %v10922_v57  ;;  %4081 = vmatpush.bf16.msra.mxu0 %v9327_v28  ;;  %4061 = vmatpush.bf16.msrb.mxu2 %v10667_v32  ;;  %v3843_v57 = vadd.f32 %v3842_v13, %v3830_v21  ;;  %v9775_v23 = vor.u32 %v13658_v9, %v9772_v11  ;;  %v9452_v27 = vld [vmem:[#allocation6 + $0x2b0] sm:$0xf0] }
 0x21a   :  { %v10031_v28 = vor.u32 %v13722_v16, %v10028_v18  ;;  %v13650_v15 = vld [vmem:[#allocation6 + $0x4d4] sm:$0xf]  ;;  %v9199_v12 = vor.u32 %v13514_v20, %v9196_v22  ;;  %v9455_v33 = vor.u32 %v13578_v24, %v9452_v27 }
 0x21b   :  { %4094 = vmatpush.bf16.msra.mxu1 %v9583_v30  ;;  %4074 = vmatpush.bf16.msrb.mxu3 %v10923_v37  ;;  %v9740_v29 = vld [vmem:[#allocation6 + $0x4f0] sm:$0xf0] }
 0x21c   :  { %4062 = vmatmul.bf16.vlgmr.msrb.gmra.mxu2 %v14952_v26  ;;  %v13714_v30 = vld [vmem:[#allocation6 + $0x6d4] sm:$0xf]  ;;  %v9743_v37 = vor.u32 %v13650_v15, %v9740_v29 }
 0x21d   :  { %4106 = vmatpush.bf16.msra.mxu2 %v9871_v38  ;;  %4082 = vmatpush.bf16.msra.mxu0 %v9295_v45  ;;  %v9996_v32 = vld [vmem:[#allocation6 + $0x6f0] sm:$0xf0]  ;;  %v3831_v40 = vpop.f32.mrf.mxu0  ;;  %v3844_v44 = vpop.f32.mrf.mxu1 }
 0x21e   :  { %4075 = vmatmul.bf16.vlgmr.msrb.gmra.mxu3 %v14954_v31  ;;  %v13506_v35 = vld [vmem:[#allocation6 + $0x54] sm:$0xf]  ;;  %v9999_v41 = vor.u32 %v13714_v30, %v9996_v32 }
 0x21f   :  { %4119 = vmatpush.bf16.msra.mxu3 %v10127_v42  ;;  %4095 = vmatpush.bf16.msra.mxu1 %v9551_v48  ;;  %v9164_v36 = vld [vmem:[#allocation6 + $0x70] sm:$0xf0] }
 0x220   :  { %v13570_v38 = vld [vmem:[#allocation6 + $0x254] sm:$0xf]  ;;  %v9167_v45 = vor.u32 %v13506_v35, %v9164_v36 }
 0x221   :  { %4107 = vmatpush.bf16.msra.mxu2 %v9839_v51  ;;  %4083 = vmatpush.bf16.msra.mxu0 %v9263_v58  ;;  %v9420_v39 = vld [vmem:[#allocation6 + $0x270] sm:$0xf0]  ;;  %v3855_v58 = vpop.f32.mrf.mxu2 }
 0x222   :  { %v13642_v42 = vld [vmem:[#allocation6 + $0x494] sm:$0xf]  ;;  %v9423_v49 = vor.u32 %v13570_v38, %v9420_v39  ;;  %v3856_v2 = vadd.f32 %v3855_v58, %v3843_v57  ;;  %v15010_v58 = vld [vmem:[#allocation7] sm:$0xff] }
 0x223   :  { %4120 = vmatpush.bf16.msra.mxu3 %v10095_v34  ;;  %4096 = vmatpush.bf16.msra.mxu1 %v9519_v0  ;;  %v9708_v43 = vld [vmem:[#allocation6 + $0x4b0] sm:$0xf0] }
 0x224   :  { %v13706_v46 = vld [vmem:[#allocation6 + $0x694] sm:$0xf]  ;;  %v9711_v53 = vor.u32 %v13642_v42, %v9708_v43 }
 0x225   :  { %4108 = vmatpush.bf16.msra.mxu2 %v9807_v3  ;;  %4084 = vmatpush.bf16.msra.mxu0 %v9231_v14  ;;  %v9964_v47 = vld [vmem:[#allocation6 + $0x6b0] sm:$0xf0]  ;;  %v3868_v3 = vpop.f32.mrf.mxu3 }
 0x226   :  { %v13498_v48 = vld [vmem:[#allocation6 + $0x14] sm:$0xf]  ;;  %v9967_v59 = vor.u32 %v13706_v46, %v9964_v47  ;;  %v15005_v21 = vadd.f32 %v3868_v3, %v3856_v2 }
 0x227   :  { %4121 = vmatpush.bf16.msra.mxu3 %v10063_v8  ;;  %4097 = vmatpush.bf16.msra.mxu1 %v9487_v19  ;;  %v9132_v50 = vld [vmem:[#allocation6 + $0x30] sm:$0xf0] }
 0x228   :  { %v13562_v51 = vld [vmem:[#allocation6 + $0x214] sm:$0xf]  ;;  %v9135_v5 = vor.u32 %v13498_v48, %v9132_v50  ;;  %14614 = vtanh.f32 %v15005_v21 }
 0x229   :  { %4109 = vmatpush.bf16.msra.mxu2 %v9775_v23  ;;  %4085 = vmatpush.bf16.msra.mxu0 %v9199_v12  ;;  %v9388_v52 = vld [vmem:[#allocation6 + $0x230] sm:$0xf0]  ;;  %v3857_v36 = vpop.f32.mrf.mxu2 }
 0x22a   :  { %v13810_v34 = vld [vmem:[#allocation6 + $0x9d4] sm:$0xf]  ;;  %v9391_v8 = vor.u32 %v13562_v51, %v9388_v52 }
 0x22b   :  { %4122 = vmatpush.bf16.msra.mxu3 %v10031_v28  ;;  %4098 = vmatpush.bf16.msra.mxu1 %v9455_v33  ;;  %v10380_v54 = vld [vmem:[#allocation6 + $0x9f0] sm:$0xf0] }
 0x22c   :  { %v13874_v55 = vld [vmem:[#allocation6 + $0xbd4] sm:$0xf]  ;;  %v10383_v9 = vor.u32 %v13810_v34, %v10380_v54 }
 0x22d   :  { %4110 = vmatpush.bf16.msra.mxu2 %v9743_v37  ;;  %v10636_v60 = vld [vmem:[#allocation6 + $0xbf0] sm:$0xf0]  ;;  %4086 = vmatpush.bf16.msra.mxu0 %v9167_v45 }
 0x22e   :  { %v13634_v0 = vld [vmem:[#allocation6 + $0x454] sm:$0xf]  ;;  %v10639_v13 = vor.u32 %v13874_v55, %v10636_v60 }
 0x22f   :  { %4123 = vmatpush.bf16.msra.mxu3 %v9999_v41  ;;  %v9676_v1 = vld [vmem:[#allocation6 + $0x470] sm:$0xf0]  ;;  %4099 = vmatpush.bf16.msra.mxu1 %v9423_v49  ;;  %v3870_v41 = vpop.f32.mrf.mxu3 }
 0x230   :  { %v13698_v6 = vld [vmem:[#allocation6 + $0x654] sm:$0xf]  ;;  %v9679_v14 = vor.u32 %v13634_v0, %v9676_v1 }
 0x231   :  { %v9932_v7 = vld [vmem:[#allocation6 + $0x670] sm:$0xf0]  ;;  %4111 = vmatpush.bf16.msra.mxu2 %v9711_v53  ;;  %4087 = vmatpush.bf16.msra.mxu0 %v9135_v5 }
 0x232   :  { %v13802_v11 = vld [vmem:[#allocation6 + $0x994] sm:$0xf]  ;;  %v9935_v20 = vor.u32 %v13698_v6, %v9932_v7 }
 0x233   :  { %v10348_v16 = vld [vmem:[#allocation6 + $0x9b0] sm:$0xf0]  ;;  %4124 = vmatpush.bf16.msra.mxu3 %v9967_v59  ;;  %4100 = vmatpush.bf16.msra.mxu1 %v9391_v8  ;;  %v987_v59 = vperm.slane %v15010_v58, 3 }
 0x234   :  { %v13866_v18 = vld [vmem:[#allocation6 + $0xb94] sm:$0xf]  ;;  %v10351_v15 = vor.u32 %v13802_v11, %v10348_v16  ;;  %4088 = vmatmul.bf16.vlgmr.msra.gmra.mxu0 %v14930_v56 }
 0x235   :  { %v10604_v19 = vld [vmem:[#allocation6 + $0xbb0] sm:$0xf0]  ;;  %4132 = vmatpush.bf16.msrb.mxu0 %v10383_v9  ;;  %4112 = vmatpush.bf16.msra.mxu2 %v9679_v14  ;;  %v3881_v9 = vpop.f32.mrf.mxu0 }
 0x236   :  { %v13626_v22 = vld [vmem:[#allocation6 + $0x414] sm:$0xf]  ;;  %v10607_v30 = vor.u32 %v13866_v18, %v10604_v19  ;;  %4101 = vmatmul.bf16.vlgmr.msra.gmra.mxu1 %v14932_v61  ;;  %v3882_v16 = vadd.f32 %v3881_v9, %v987_v59  ;;  %v3894_v18 = vpop.f32.mrf.mxu1  ;;  %v9362_v59 = vld [vmem:[#allocation6 + $0x1d8] sm:$0xf] }
 0x237   :  { %v9644_v57 = vld [vmem:[#allocation6 + $0x430] sm:$0xf0]  ;;  %4145 = vmatpush.bf16.msrb.mxu1 %v10639_v13  ;;  %4125 = vmatpush.bf16.msra.mxu3 %v9935_v20 }
 0x238   :  { %v13690_v23 = vld [vmem:[#allocation6 + $0x614] sm:$0xf]  ;;  %v9647_v32 = vor.u32 %v13626_v22, %v9644_v57 }
 0x239   :  { %v9900_v24 = vld [vmem:[#allocation6 + $0x630] sm:$0xf0]  ;;  %4133 = vmatpush.bf16.msrb.mxu0 %v10351_v15 }
 0x23a   :  { %v13938_v27 = vld [vmem:[#allocation6 + $0xdd4] sm:$0xf]  ;;  %v9903_v37 = vor.u32 %v13690_v23, %v9900_v24  ;;  %4113 = vmatpush.bf16.msra.mxu2 %v9647_v32 }
 0x23b   :  { %v10892_v28 = vld [vmem:[#allocation6 + $0xdf0] sm:$0xf0]  ;;  %4146 = vmatpush.bf16.msrb.mxu1 %v10607_v30 }
 0x23c   :  { %v14002_v29 = vld [vmem:[#allocation6 + $0xfd4] sm:$0xf]  ;;  %v10895_v38 = vor.u32 %v13938_v27, %v10892_v28  ;;  %4126 = vmatpush.bf16.msra.mxu3 %v9903_v37  ;;  %v3895_v27 = vadd.f32 %v3894_v18, %v3882_v16  ;;  %v9330_v18 = vld [vmem:[#allocation6 + $0x198] sm:$0xf] }
 0x23d   :  { %v11148_v12 = vld [vmem:[#allocation6 + $0xff0] sm:$0xf0]  ;;  %4114 = vmatmul.bf16.vlgmr.msra.gmra.mxu2 %v14938_v17 }
 0x23e   :  { %v13794_v33 = vld [vmem:[#allocation6 + $0x954] sm:$0xf]  ;;  %v11151_v42 = vor.u32 %v14002_v29, %v11148_v12  ;;  %4158 = vmatpush.bf16.msrb.mxu2 %v10895_v38 }
 0x23f   :  { %v10316_v35 = vld [vmem:[#allocation6 + $0x970] sm:$0xf0]  ;;  %4127 = vmatmul.bf16.vlgmr.msra.gmra.mxu3 %v14940_v25 }
 0x240   :  { %v13858_v39 = vld [vmem:[#allocation6 + $0xb54] sm:$0xf]  ;;  %v10319_v45 = vor.u32 %v13794_v33, %v10316_v35  ;;  %4171 = vmatpush.bf16.msrb.mxu3 %v11151_v42 }
 0x241   :  { %v10572_v40 = vld [vmem:[#allocation6 + $0xb70] sm:$0xf0] }
 0x242   :  { %v13930_v43 = vld [vmem:[#allocation6 + $0xd94] sm:$0xf]  ;;  %v10575_v48 = vor.u32 %v13858_v39, %v10572_v40  ;;  %4134 = vmatpush.bf16.msrb.mxu0 %v10319_v45 }
 0x243   :  { %v10860_v44 = vld [vmem:[#allocation6 + $0xdb0] sm:$0xf0] }
 0x244   :  { %v13994_v46 = vld [vmem:[#allocation6 + $0xf94] sm:$0xf]  ;;  %v10863_v51 = vor.u32 %v13930_v43, %v10860_v44  ;;  %4147 = vmatpush.bf16.msrb.mxu1 %v10575_v48  ;;  %v3883_v43 = vpop.f32.mrf.mxu0 }
 0x245   :  { %v11116_v47 = vld [vmem:[#allocation6 + $0xfb0] sm:$0xf0] }
 0x246   :  { %v13786_v49 = vld [vmem:[#allocation6 + $0x914] sm:$0xf]  ;;  %v11119_v34 = vor.u32 %v13994_v46, %v11116_v47  ;;  %4159 = vmatpush.bf16.msrb.mxu2 %v10863_v51  ;;  %v3896_v47 = vpop.f32.mrf.mxu1 }
 0x247   :  { %v10284_v50 = vld [vmem:[#allocation6 + $0x930] sm:$0xf0] }
 0x248   :  { %v13850_v52 = vld [vmem:[#allocation6 + $0xb14] sm:$0xf]  ;;  %v10287_v60 = vor.u32 %v13786_v49, %v10284_v50  ;;  %4172 = vmatpush.bf16.msrb.mxu3 %v11119_v34 }
 0x249   :  { %v10540_v53 = vld [vmem:[#allocation6 + $0xb30] sm:$0xf0] }
 0x24a   :  { %v13922_v54 = vld [vmem:[#allocation6 + $0xd54] sm:$0xf]  ;;  %v10543_v2 = vor.u32 %v13850_v52, %v10540_v53  ;;  %4135 = vmatpush.bf16.msrb.mxu0 %v10287_v60  ;;  %v13559_v60 = vld [vmem:[#allocation6 + $0x1f4] sm:$0xf0] }
 0x24b   :  { %v10828_v55 = vld [vmem:[#allocation6 + $0xd70] sm:$0xf0]  ;;  %v9363_v16 = vor.u32 %v13559_v60, %v9362_v59  ;;  %v9522_v59 = vld [vmem:[#allocation6 + $0x318] sm:$0xf] }
 0x24c   :  { %v13986_v0 = vld [vmem:[#allocation6 + $0xf54] sm:$0xf]  ;;  %v10831_v6 = vor.u32 %v13922_v54, %v10828_v55  ;;  %4148 = vmatpush.bf16.msrb.mxu1 %v10543_v2  ;;  %v13599_v60 = vld [vmem:[#allocation6 + $0x334] sm:$0xf0] }
 0x24d   :  { %v11084_v1 = vld [vmem:[#allocation6 + $0xf70] sm:$0xf0] }
 0x24e   :  { %v13778_v3 = vld [vmem:[#allocation6 + $0x8d4] sm:$0xf]  ;;  %v11087_v11 = vor.u32 %v13986_v0, %v11084_v1  ;;  %4160 = vmatpush.bf16.msrb.mxu2 %v10831_v6  ;;  %v9618_v0 = vld [vmem:[#allocation6 + $0x3d8] sm:$0xf]  ;;  %v3907_v1 = vpop.f32.mrf.mxu2 }
 0x24f   :  { %v10252_v5 = vld [vmem:[#allocation6 + $0x8f0] sm:$0xf0] }
 0x250   :  { %v13842_v7 = vld [vmem:[#allocation6 + $0xad4] sm:$0xf]  ;;  %v10255_v19 = vor.u32 %v13778_v3, %v10252_v5  ;;  %4173 = vmatpush.bf16.msrb.mxu3 %v11087_v11  ;;  %v13623_v3 = vld [vmem:[#allocation6 + $0x3f4] sm:$0xf0] }
 0x251   :  { %v10508_v8 = vld [vmem:[#allocation6 + $0xaf0] sm:$0xf0] }
 0x252   :  { %v13914_v13 = vld [vmem:[#allocation6 + $0xd14] sm:$0xf]  ;;  %v10511_v57 = vor.u32 %v13842_v7, %v10508_v8  ;;  %4136 = vmatpush.bf16.msrb.mxu0 %v10255_v19  ;;  %v3908_v7 = vadd.f32 %v3907_v1, %v3895_v27  ;;  %v3920_v8 = vpop.f32.mrf.mxu3  ;;  %v9810_v1 = vld [vmem:[#allocation6 + $0x558] sm:$0xf] }
 0x253   :  { %v10796_v14 = vld [vmem:[#allocation6 + $0xd30] sm:$0xf0] }
 0x254   :  { %v13978_v20 = vld [vmem:[#allocation6 + $0xf14] sm:$0xf]  ;;  %v10799_v28 = vor.u32 %v13914_v13, %v10796_v14  ;;  %4149 = vmatpush.bf16.msrb.mxu1 %v10511_v57  ;;  %v15014_v19 = vadd.f32 %v3920_v8, %v3908_v7  ;;  %v13551_v57 = vld [vmem:[#allocation6 + $0x1b4] sm:$0xf0]  ;;  %v9523_v7 = vor.u32 %v13599_v60, %v9522_v59 }
 0x255   :  { %v11052_v22 = vld [vmem:[#allocation6 + $0xf30] sm:$0xf0]  ;;  %v9234_v8 = vld [vmem:[#allocation6 + $0xd8] sm:$0xf] }
 0x256   :  { %v13770_v23 = vld [vmem:[#allocation6 + $0x894] sm:$0xf]  ;;  %v11055_v12 = vor.u32 %v13978_v20, %v11052_v22  ;;  %4161 = vmatpush.bf16.msrb.mxu2 %v10799_v28  ;;  %v9619_v20 = vor.u32 %v13623_v3, %v9618_v0  ;;  %v13503_v59 = vld [vmem:[#allocation6 + $0x34] sm:$0xf0] }
 0x257   :  { %v10220_v24 = vld [vmem:[#allocation6 + $0x8b0] sm:$0xf0]  ;;  %v9394_v60 = vld [vmem:[#allocation6 + $0x218] sm:$0xf] }
 0x258   :  { %v13834_v15 = vld [vmem:[#allocation6 + $0xa94] sm:$0xf]  ;;  %v10223_v33 = vor.u32 %v13770_v23, %v10220_v24  ;;  %4174 = vmatpush.bf16.msrb.mxu3 %v11055_v12  ;;  %v9586_v23 = vld [vmem:[#allocation6 + $0x398] sm:$0xf] }
 0x259   :  { %v10476_v29 = vld [vmem:[#allocation6 + $0xab0] sm:$0xf0]  ;;  %v13615_v24 = vld [vmem:[#allocation6 + $0x3b4] sm:$0xf0] }
 0x25a   :  { %v13906_v30 = vld [vmem:[#allocation6 + $0xcd4] sm:$0xf]  ;;  %v10479_v37 = vor.u32 %v13834_v15, %v10476_v29  ;;  %4137 = vmatpush.bf16.msrb.mxu0 %v10223_v33  ;;  %v9331_v33 = vor.u32 %v13551_v57, %v9330_v18 }
 0x25b   :  { %v10764_v32 = vld [vmem:[#allocation6 + $0xcf0] sm:$0xf0] }
 0x25c   :  { %v13970_v35 = vld [vmem:[#allocation6 + $0xed4] sm:$0xf]  ;;  %v10767_v40 = vor.u32 %v13906_v30, %v10764_v32  ;;  %4150 = vmatpush.bf16.msrb.mxu1 %v10479_v37  ;;  %v9874_v30 = vld [vmem:[#allocation6 + $0x5d8] sm:$0xf]  ;;  %v9587_v37 = vor.u32 %v13615_v24, %v9586_v23  ;;  %v3946_v23 = vpop.f32.mrf.mxu1 }
 0x25d   :  { %v11020_v36 = vld [vmem:[#allocation6 + $0xef0] sm:$0xf0]  ;;  %v13687_v32 = vld [vmem:[#allocation6 + $0x5f4] sm:$0xf0] }
 0x25e   :  { %v13762_v38 = vld [vmem:[#allocation6 + $0x854] sm:$0xf]  ;;  %v11023_v44 = vor.u32 %v13970_v35, %v11020_v36  ;;  %4162 = vmatpush.bf16.msrb.mxu2 %v10767_v40  ;;  %v10130_v35 = vld [vmem:[#allocation6 + $0x7d8] sm:$0xf]  ;;  %v9875_v43 = vor.u32 %v13687_v32, %v9874_v30 }
 0x25f   :  { %v10188_v39 = vld [vmem:[#allocation6 + $0x870] sm:$0xf0]  ;;  %v13751_v36 = vld [vmem:[#allocation6 + $0x7f4] sm:$0xf0] }
 0x260   :  { %v13826_v41 = vld [vmem:[#allocation6 + $0xa54] sm:$0xf]  ;;  %v10191_v48 = vor.u32 %v13762_v38, %v10188_v39  ;;  %4175 = vmatpush.bf16.msrb.mxu3 %v11023_v44  ;;  %v9298_v39 = vld [vmem:[#allocation6 + $0x158] sm:$0xf]  ;;  %v10131_v47 = vor.u32 %v13751_v36, %v10130_v35 }
 0x261   :  { %v10444_v42 = vld [vmem:[#allocation6 + $0xa70] sm:$0xf0]  ;;  %v13543_v40 = vld [vmem:[#allocation6 + $0x174] sm:$0xf0] }
 0x262   :  { %v13898_v45 = vld [vmem:[#allocation6 + $0xc94] sm:$0xf]  ;;  %v10447_v52 = vor.u32 %v13826_v41, %v10444_v42  ;;  %4138 = vmatpush.bf16.msrb.mxu0 %v10191_v48  ;;  %v3909_v41 = vpop.f32.mrf.mxu2  ;;  %v9554_v44 = vld [vmem:[#allocation6 + $0x358] sm:$0xf] }
 0x263   :  { %v10732_v46 = vld [vmem:[#allocation6 + $0xcb0] sm:$0xf0]  ;;  %v9842_v48 = vld [vmem:[#allocation6 + $0x598] sm:$0xf] }
 0x264   :  { %v13962_v49 = vld [vmem:[#allocation6 + $0xe94] sm:$0xf]  ;;  %v10735_v55 = vor.u32 %v13898_v45, %v10732_v46  ;;  %4151 = vmatpush.bf16.msrb.mxu1 %v10447_v52  ;;  %v13607_v45 = vld [vmem:[#allocation6 + $0x374] sm:$0xf0]  ;;  %v3922_v46 = vpop.f32.mrf.mxu3 }
 0x265   :  { %v10988_v50 = vld [vmem:[#allocation6 + $0xeb0] sm:$0xf0]  ;;  %v13743_v52 = vld [vmem:[#allocation6 + $0x7b4] sm:$0xf0] }
 0x266   :  { %v13754_v51 = vld [vmem:[#allocation6 + $0x814] sm:$0xf]  ;;  %v10991_v2 = vor.u32 %v13962_v49, %v10988_v50  ;;  %4163 = vmatpush.bf16.msrb.mxu2 %v10735_v55  ;;  %v13679_v49 = vld [vmem:[#allocation6 + $0x5b4] sm:$0xf0]  ;;  %v9299_v50 = vor.u32 %v13543_v40, %v9298_v39 }
 0x267   :  { %v10156_v53 = vld [vmem:[#allocation6 + $0x830] sm:$0xf0]  ;;  %v9843_v55 = vor.u32 %v13679_v49, %v9842_v48  ;;  %v13583_v35 = vld [vmem:[#allocation6 + $0x2b4] sm:$0xf0] }
 0x268   :  { %v13818_v34 = vld [vmem:[#allocation6 + $0xa14] sm:$0xf]  ;;  %v10159_v9 = vor.u32 %v13754_v51, %v10156_v53  ;;  %4176 = vmatpush.bf16.msrb.mxu3 %v10991_v2  ;;  %v10098_v51 = vld [vmem:[#allocation6 + $0x798] sm:$0xf]  ;;  %v9555_v53 = vor.u32 %v13607_v45, %v9554_v44 }
 0x269   :  { %v10412_v54 = vld [vmem:[#allocation6 + $0xa30] sm:$0xf0]  ;;  %v10099_v0 = vor.u32 %v13743_v52, %v10098_v51  ;;  %v13671_v2 = vld [vmem:[#allocation6 + $0x574] sm:$0xf0]  ;;  %v3948_v51 = vpop.f32.mrf.mxu1 }
 0x26a   :  { %v13890_v5 = vld [vmem:[#allocation6 + $0xc54] sm:$0xf]  ;;  %v10415_v14 = vor.u32 %v13818_v34, %v10412_v54  ;;  %4139 = vmatpush.bf16.msrb.mxu0 %v10159_v9  ;;  %v9266_v34 = vld [vmem:[#allocation6 + $0x118] sm:$0xf] }
 0x26b   :  { %v10700_v6 = vld [vmem:[#allocation6 + $0xc70] sm:$0xf0]  ;;  %v13535_v54 = vld [vmem:[#allocation6 + $0x134] sm:$0xf0] }
 0x26c   :  { %v13954_v11 = vld [vmem:[#allocation6 + $0xe54] sm:$0xf]  ;;  %v10703_v22 = vor.u32 %v13890_v5, %v10700_v6  ;;  %4152 = vmatpush.bf16.msrb.mxu1 %v10415_v14  ;;  %v9267_v3 = vor.u32 %v13535_v54, %v9266_v34  ;;  %v10066_v5 = vld [vmem:[#allocation6 + $0x758] sm:$0xf] }
 0x26d   :  { %v10956_v13 = vld [vmem:[#allocation6 + $0xe70] sm:$0xf0]  ;;  %4140 = vmatmul.bf16.vlgmr.msrb.gmra.mxu0 %v14946_v62  ;;  %v13735_v6 = vld [vmem:[#allocation6 + $0x774] sm:$0xf0] }
 0x26e   :  { %v10959_v28 = vor.u32 %v13954_v11, %v10956_v13  ;;  %v13882_v27 = vld [vmem:[#allocation6 + $0xc14] sm:$0xf]  ;;  %4184 = vmatpush.bf16.msra.mxu0 %v9363_v16  ;;  %4164 = vmatpush.bf16.msrb.mxu2 %v10703_v22  ;;  %v13527_v9 = vld [vmem:[#allocation6 + $0xf4] sm:$0xf0]  ;;  %v9811_v11 = vor.u32 %v13671_v2, %v9810_v1  ;;  %v3933_v16 = vpop.f32.mrf.mxu0  ;;  %v10067_v18 = vor.u32 %v13735_v6, %v10066_v5  ;;  %v3959_v6 = vpop.f32.mrf.mxu2 }
 0x26f   :  { %v10668_v15 = vld [vmem:[#allocation6 + $0xc30] sm:$0xf0]  ;;  %4153 = vmatmul.bf16.vlgmr.msrb.gmra.mxu1 %v14948_v4  ;;  %v9490_v13 = vld [vmem:[#allocation6 + $0x2d8] sm:$0xf]  ;;  %v3934_v57 = vadd.f32 %v3933_v16, %v15014_v19  ;;  %v9235_v24 = vor.u32 %v13527_v9, %v9234_v8 }
 0x270   :  { %v13946_v29 = vld [vmem:[#allocation6 + $0xe14] sm:$0xf]  ;;  %4197 = vmatpush.bf16.msra.mxu1 %v9619_v20  ;;  %v10671_v38 = vor.u32 %v13882_v27, %v10668_v15  ;;  %4177 = vmatpush.bf16.msrb.mxu3 %v10959_v28  ;;  %v13591_v14 = vld [vmem:[#allocation6 + $0x2f4] sm:$0xf0] }
 0x271   :  { %v10924_v12 = vld [vmem:[#allocation6 + $0xe30] sm:$0xf0]  ;;  %v9778_v20 = vld [vmem:[#allocation6 + $0x518] sm:$0xf]  ;;  %v9491_v15 = vor.u32 %v13591_v14, %v9490_v13  ;;  %v3947_v30 = vadd.f32 %v3946_v23, %v3934_v57  ;;  %v3972_v14 = vpop.f32.mrf.mxu3 }
 0x272   :  { %v10927_v42 = vor.u32 %v13946_v29, %v10924_v12  ;;  %4185 = vmatpush.bf16.msra.mxu0 %v9331_v33  ;;  %4165 = vmatpush.bf16.msrb.mxu2 %v10671_v38  ;;  %v13663_v22 = vld [vmem:[#allocation6 + $0x534] sm:$0xf0] }
 0x273   :  { %v10034_v28 = vld [vmem:[#allocation6 + $0x718] sm:$0xf]  ;;  %v9779_v32 = vor.u32 %v13663_v22, %v9778_v20  ;;  %v3960_v13 = vadd.f32 %v3959_v6, %v3947_v30 }
 0x274   :  { %4198 = vmatpush.bf16.msra.mxu1 %v9587_v37  ;;  %4178 = vmatpush.bf16.msrb.mxu3 %v10927_v42  ;;  %v13727_v27 = vld [vmem:[#allocation6 + $0x734] sm:$0xf0] }
 0x275   :  { %4166 = vmatmul.bf16.vlgmr.msrb.gmra.mxu2 %v14952_v26  ;;  %v9202_v29 = vld [vmem:[#allocation6 + $0x98] sm:$0xf]  ;;  %v10035_v36 = vor.u32 %v13727_v27, %v10034_v28 }
 0x276   :  { %4210 = vmatpush.bf16.msra.mxu2 %v9875_v43  ;;  %4186 = vmatpush.bf16.msra.mxu0 %v9299_v50  ;;  %v13519_v12 = vld [vmem:[#allocation6 + $0xb4] sm:$0xf0] }
 0x277   :  { %4179 = vmatmul.bf16.vlgmr.msrb.gmra.mxu3 %v14954_v31  ;;  %v9458_v33 = vld [vmem:[#allocation6 + $0x298] sm:$0xf]  ;;  %v9203_v19 = vor.u32 %v13519_v12, %v9202_v29 }
 0x278   :  { %4223 = vmatpush.bf16.msra.mxu3 %v10131_v47  ;;  %4199 = vmatpush.bf16.msra.mxu1 %v9555_v53  ;;  %v9746_v37 = vld [vmem:[#allocation6 + $0x4d8] sm:$0xf]  ;;  %v9459_v41 = vor.u32 %v13583_v35, %v9458_v33  ;;  %v3935_v47 = vpop.f32.mrf.mxu0 }
 0x279   :  { %v13655_v38 = vld [vmem:[#allocation6 + $0x4f4] sm:$0xf0] }
 0x27a   :  { %4211 = vmatpush.bf16.msra.mxu2 %v9843_v55  ;;  %4187 = vmatpush.bf16.msra.mxu0 %v9267_v3  ;;  %v10002_v39 = vld [vmem:[#allocation6 + $0x6d8] sm:$0xf]  ;;  %v9747_v44 = vor.u32 %v13655_v38, %v9746_v37 }
 0x27b   :  { %v13719_v40 = vld [vmem:[#allocation6 + $0x6f4] sm:$0xf0] }
 0x27c   :  { %4224 = vmatpush.bf16.msra.mxu3 %v10099_v0  ;;  %4200 = vmatpush.bf16.msra.mxu1 %v9523_v7  ;;  %v9170_v42 = vld [vmem:[#allocation6 + $0x58] sm:$0xf]  ;;  %v10003_v48 = vor.u32 %v13719_v40, %v10002_v39 }
 0x27d   :  { %v13511_v43 = vld [vmem:[#allocation6 + $0x74] sm:$0xf0] }
 0x27e   :  { %4212 = vmatpush.bf16.msra.mxu2 %v9811_v11  ;;  %4188 = vmatpush.bf16.msra.mxu0 %v9235_v24  ;;  %v9426_v45 = vld [vmem:[#allocation6 + $0x258] sm:$0xf]  ;;  %v9171_v52 = vor.u32 %v13511_v43, %v9170_v42  ;;  %v15021_v24 = vadd.f32 %v3972_v14, %v3960_v13 }
 0x27f   :  { %v13575_v46 = vld [vmem:[#allocation6 + $0x274] sm:$0xf0] }
 0x280   :  { %4225 = vmatpush.bf16.msra.mxu3 %v10067_v18  ;;  %4201 = vmatpush.bf16.msra.mxu1 %v9491_v15  ;;  %v9714_v49 = vld [vmem:[#allocation6 + $0x498] sm:$0xf]  ;;  %v9427_v55 = vor.u32 %v13575_v46, %v9426_v45  ;;  %v3961_v45 = vpop.f32.mrf.mxu2  ;;  %14616 = vtanh.f32 %v15021_v24 }
 0x281   :  { %v13647_v50 = vld [vmem:[#allocation6 + $0x4b4] sm:$0xf0] }
 0x282   :  { %4213 = vmatpush.bf16.msra.mxu2 %v9779_v32  ;;  %4189 = vmatpush.bf16.msra.mxu0 %v9203_v19  ;;  %v9970_v53 = vld [vmem:[#allocation6 + $0x698] sm:$0xf]  ;;  %v9715_v1 = vor.u32 %v13647_v50, %v9714_v49  ;;  %v3974_v50 = vpop.f32.mrf.mxu3 }
 0x283   :  { %v13711_v34 = vld [vmem:[#allocation6 + $0x6b4] sm:$0xf0] }
 0x284   :  { %4226 = vmatpush.bf16.msra.mxu3 %v10035_v36  ;;  %v9138_v54 = vld [vmem:[#allocation6 + $0x18] sm:$0xf]  ;;  %4202 = vmatpush.bf16.msra.mxu1 %v9459_v41  ;;  %v9971_v7 = vor.u32 %v13711_v34, %v9970_v53 }
 0x285   :  { %v13567_v0 = vld [vmem:[#allocation6 + $0x234] sm:$0xf0]  ;;  %v9139_v16 = vor.u32 %v13503_v59, %v9138_v54 }
 0x286   :  { %4214 = vmatpush.bf16.msra.mxu2 %v9747_v44  ;;  %v10386_v2 = vld [vmem:[#allocation6 + $0x9d8] sm:$0xf]  ;;  %4190 = vmatpush.bf16.msra.mxu0 %v9171_v52  ;;  %v9395_v22 = vor.u32 %v13567_v0, %v9394_v60 }
 0x287   :  { %v13815_v3 = vld [vmem:[#allocation6 + $0x9f4] sm:$0xf0] }
 0x288   :  { %v10642_v5 = vld [vmem:[#allocation6 + $0xbd8] sm:$0xf]  ;;  %4227 = vmatpush.bf16.msra.mxu3 %v10003_v48  ;;  %4203 = vmatpush.bf16.msra.mxu1 %v9427_v55  ;;  %v10387_v57 = vor.u32 %v13815_v3, %v10386_v2 }
 0x289   :  { %v13879_v8 = vld [vmem:[#allocation6 + $0xbf4] sm:$0xf0] }
 0x28a   :  { %v9682_v9 = vld [vmem:[#allocation6 + $0x458] sm:$0xf]  ;;  %4215 = vmatpush.bf16.msra.mxu2 %v9715_v1  ;;  %v10643_v28 = vor.u32 %v13879_v8, %v10642_v5  ;;  %4191 = vmatpush.bf16.msra.mxu0 %v9139_v16  ;;  %v988_v8 = vperm.slane %v15010_v58, 4  ;;  %v3998_v58 = vpop.f32.mrf.mxu1 }
 0x28b   :  { %v13639_v11 = vld [vmem:[#allocation6 + $0x474] sm:$0xf0] }
 0x28c   :  { %v9938_v18 = vld [vmem:[#allocation6 + $0x658] sm:$0xf]  ;;  %v9683_v27 = vor.u32 %v13639_v11, %v9682_v9  ;;  %4228 = vmatpush.bf16.msra.mxu3 %v9971_v7  ;;  %4204 = vmatpush.bf16.msra.mxu1 %v9395_v22 }
 0x28d   :  { %v13703_v20 = vld [vmem:[#allocation6 + $0x674] sm:$0xf0]  ;;  %4192 = vmatmul.bf16.vlgmr.msra.gmra.mxu0 %v14930_v56 }
 0x28e   :  { %v10354_v23 = vld [vmem:[#allocation6 + $0x998] sm:$0xf]  ;;  %v9939_v32 = vor.u32 %v13703_v20, %v9938_v18  ;;  %4236 = vmatpush.bf16.msrb.mxu0 %v10387_v57  ;;  %4216 = vmatpush.bf16.msra.mxu2 %v9683_v27 }
 0x28f   :  { %v13807_v15 = vld [vmem:[#allocation6 + $0x9b4] sm:$0xf0]  ;;  %4205 = vmatmul.bf16.vlgmr.msra.gmra.mxu1 %v14932_v61 }
 0x290   :  { %v10610_v29 = vld [vmem:[#allocation6 + $0xb98] sm:$0xf]  ;;  %v10355_v19 = vor.u32 %v13807_v15, %v10354_v23  ;;  %4249 = vmatpush.bf16.msrb.mxu1 %v10643_v28  ;;  %4229 = vmatpush.bf16.msra.mxu3 %v9939_v32  ;;  %v3985_v23 = vpop.f32.mrf.mxu0 }
 0x291   :  { %v13871_v12 = vld [vmem:[#allocation6 + $0xbb4] sm:$0xf0] }
 0x292   :  { %v9650_v30 = vld [vmem:[#allocation6 + $0x418] sm:$0xf]  ;;  %v10611_v41 = vor.u32 %v13871_v12, %v10610_v29  ;;  %4237 = vmatpush.bf16.msrb.mxu0 %v10355_v19  ;;  %v3986_v29 = vadd.f32 %v3985_v23, %v988_v8  ;;  %v13555_v8 = vld [vmem:[#allocation6 + $0x1dc] sm:$0xf] }
 0x293   :  { %v13631_v33 = vld [vmem:[#allocation6 + $0x434] sm:$0xf0] }
 0x294   :  { %v9906_v35 = vld [vmem:[#allocation6 + $0x618] sm:$0xf]  ;;  %v9651_v42 = vor.u32 %v13631_v33, %v9650_v30  ;;  %4250 = vmatpush.bf16.msrb.mxu1 %v10611_v41 }
 0x295   :  { %v13695_v36 = vld [vmem:[#allocation6 + $0x634] sm:$0xf0] }
 0x296   :  { %v10898_v37 = vld [vmem:[#allocation6 + $0xdd8] sm:$0xf]  ;;  %v9907_v46 = vor.u32 %v13695_v36, %v9906_v35  ;;  %4217 = vmatpush.bf16.msra.mxu2 %v9651_v42 }
 0x297   :  { %v13943_v38 = vld [vmem:[#allocation6 + $0xdf4] sm:$0xf0] }
 0x298   :  { %v11154_v39 = vld [vmem:[#allocation6 + $0xfd8] sm:$0xf]  ;;  %v10899_v47 = vor.u32 %v13943_v38, %v10898_v37  ;;  %4230 = vmatpush.bf16.msra.mxu3 %v9907_v46  ;;  %v3999_v37 = vadd.f32 %v3998_v58, %v3986_v29  ;;  %v13547_v58 = vld [vmem:[#allocation6 + $0x19c] sm:$0xf] }
 0x299   :  { %v14007_v40 = vld [vmem:[#allocation6 + $0xff4] sm:$0xf0]  ;;  %4218 = vmatmul.bf16.vlgmr.msra.gmra.mxu2 %v14938_v17 }
 0x29a   :  { %v10322_v43 = vld [vmem:[#allocation6 + $0x958] sm:$0xf]  ;;  %v11155_v51 = vor.u32 %v14007_v40, %v11154_v39  ;;  %4262 = vmatpush.bf16.msrb.mxu2 %v10899_v47 }
 0x29b   :  { %v13799_v44 = vld [vmem:[#allocation6 + $0x974] sm:$0xf0]  ;;  %4231 = vmatmul.bf16.vlgmr.msra.gmra.mxu3 %v14940_v25 }
 0x29c   :  { %v10578_v48 = vld [vmem:[#allocation6 + $0xb58] sm:$0xf]  ;;  %v10323_v34 = vor.u32 %v13799_v44, %v10322_v43  ;;  %4275 = vmatpush.bf16.msrb.mxu3 %v11155_v51 }
 0x29d   :  { %v13863_v49 = vld [vmem:[#allocation6 + $0xb74] sm:$0xf0] }
 0x29e   :  { %v10866_v52 = vld [vmem:[#allocation6 + $0xd98] sm:$0xf]  ;;  %v10579_v59 = vor.u32 %v13863_v49, %v10578_v48  ;;  %4238 = vmatpush.bf16.msrb.mxu0 %v10323_v34 }
 0x29f   :  { %v13935_v53 = vld [vmem:[#allocation6 + $0xdb4] sm:$0xf0] }
 0x2a0   :  { %v11122_v54 = vld [vmem:[#allocation6 + $0xf98] sm:$0xf]  ;;  %v10867_v1 = vor.u32 %v13935_v53, %v10866_v52  ;;  %4251 = vmatpush.bf16.msrb.mxu1 %v10579_v59  ;;  %v3987_v52 = vpop.f32.mrf.mxu0 }
 0x2a1   :  { %v13999_v55 = vld [vmem:[#allocation6 + $0xfb4] sm:$0xf0] }
 0x2a2   :  { %v10290_v60 = vld [vmem:[#allocation6 + $0x918] sm:$0xf]  ;;  %v11123_v5 = vor.u32 %v13999_v55, %v11122_v54  ;;  %4263 = vmatpush.bf16.msrb.mxu2 %v10867_v1  ;;  %v4000_v55 = vpop.f32.mrf.mxu1 }
 0x2a3   :  { %v13791_v0 = vld [vmem:[#allocation6 + $0x934] sm:$0xf0] }
 0x2a4   :  { %v10546_v2 = vld [vmem:[#allocation6 + $0xb18] sm:$0xf]  ;;  %v10291_v9 = vor.u32 %v13791_v0, %v10290_v60  ;;  %4276 = vmatpush.bf16.msrb.mxu3 %v11123_v5 }
 0x2a5   :  { %v13855_v3 = vld [vmem:[#allocation6 + $0xb34] sm:$0xf0] }
 0x2a6   :  { %v10834_v6 = vld [vmem:[#allocation6 + $0xd58] sm:$0xf]  ;;  %v10547_v14 = vor.u32 %v13855_v3, %v10546_v2  ;;  %4239 = vmatpush.bf16.msrb.mxu0 %v10291_v9  ;;  %v9364_v9 = vld [vmem:[#allocation6 + $0x1f8] sm:$0xf0] }
 0x2a7   :  { %v13927_v7 = vld [vmem:[#allocation6 + $0xd74] sm:$0xf0]  ;;  %v9367_v29 = vor.u32 %v13555_v8, %v9364_v9  ;;  %v13595_v8 = vld [vmem:[#allocation6 + $0x31c] sm:$0xf] }
 0x2a8   :  { %v11090_v11 = vld [vmem:[#allocation6 + $0xf58] sm:$0xf]  ;;  %v10835_v20 = vor.u32 %v13927_v7, %v10834_v6  ;;  %4252 = vmatpush.bf16.msrb.mxu1 %v10547_v14  ;;  %v9524_v9 = vld [vmem:[#allocation6 + $0x338] sm:$0xf0] }
 0x2a9   :  { %v13991_v13 = vld [vmem:[#allocation6 + $0xf74] sm:$0xf0] }
 0x2aa   :  { %v10258_v16 = vld [vmem:[#allocation6 + $0x8d8] sm:$0xf]  ;;  %v11091_v28 = vor.u32 %v13991_v13, %v11090_v11  ;;  %4264 = vmatpush.bf16.msrb.mxu2 %v10835_v20  ;;  %v13619_v11 = vld [vmem:[#allocation6 + $0x3dc] sm:$0xf]  ;;  %v4011_v13 = vpop.f32.mrf.mxu2 }
 0x2ab   :  { %v13783_v18 = vld [vmem:[#allocation6 + $0x8f4] sm:$0xf0] }
 0x2ac   :  { %v10514_v22 = vld [vmem:[#allocation6 + $0xad8] sm:$0xf]  ;;  %v10259_v12 = vor.u32 %v13783_v18, %v10258_v16  ;;  %4277 = vmatpush.bf16.msrb.mxu3 %v11091_v28  ;;  %v9620_v16 = vld [vmem:[#allocation6 + $0x3f8] sm:$0xf0] }
 0x2ad   :  { %v13847_v57 = vld [vmem:[#allocation6 + $0xaf4] sm:$0xf0] }
 0x2ae   :  { %v10802_v27 = vld [vmem:[#allocation6 + $0xd18] sm:$0xf]  ;;  %v10515_v33 = vor.u32 %v13847_v57, %v10514_v22  ;;  %4240 = vmatpush.bf16.msrb.mxu0 %v10259_v12  ;;  %v4012_v22 = vadd.f32 %v4011_v13, %v3999_v37  ;;  %v4024_v57 = vpop.f32.mrf.mxu3  ;;  %v13667_v13 = vld [vmem:[#allocation6 + $0x55c] sm:$0xf] }
 0x2af   :  { %v13919_v15 = vld [vmem:[#allocation6 + $0xd34] sm:$0xf0] }
 0x2b0   :  { %v11058_v32 = vld [vmem:[#allocation6 + $0xf18] sm:$0xf]  ;;  %v10803_v38 = vor.u32 %v13919_v15, %v10802_v27  ;;  %4253 = vmatpush.bf16.msrb.mxu1 %v10515_v33  ;;  %v15028_v12 = vadd.f32 %v4024_v57, %v4012_v22  ;;  %v9332_v33 = vld [vmem:[#allocation6 + $0x1b8] sm:$0xf0]  ;;  %v9527_v22 = vor.u32 %v13595_v8, %v9524_v9 }
 0x2b1   :  { %v13983_v30 = vld [vmem:[#allocation6 + $0xf34] sm:$0xf0]  ;;  %v13523_v57 = vld [vmem:[#allocation6 + $0xdc] sm:$0xf] }
 0x2b2   :  { %v10226_v35 = vld [vmem:[#allocation6 + $0x898] sm:$0xf]  ;;  %v11059_v40 = vor.u32 %v13983_v30, %v11058_v32  ;;  %4265 = vmatpush.bf16.msrb.mxu2 %v10803_v38  ;;  %v9623_v32 = vor.u32 %v13619_v11, %v9620_v16  ;;  %v9140_v8 = vld [vmem:[#allocation6 + $0x38] sm:$0xf0] }
 0x2b3   :  { %v13775_v36 = vld [vmem:[#allocation6 + $0x8b4] sm:$0xf0]  ;;  %v13563_v9 = vld [vmem:[#allocation6 + $0x21c] sm:$0xf] }
 0x2b4   :  { %v10482_v19 = vld [vmem:[#allocation6 + $0xa98] sm:$0xf]  ;;  %v10227_v43 = vor.u32 %v13775_v36, %v10226_v35  ;;  %4278 = vmatpush.bf16.msrb.mxu3 %v11059_v40  ;;  %v13611_v35 = vld [vmem:[#allocation6 + $0x39c] sm:$0xf] }
 0x2b5   :  { %v13839_v39 = vld [vmem:[#allocation6 + $0xab4] sm:$0xf0]  ;;  %v9588_v36 = vld [vmem:[#allocation6 + $0x3b8] sm:$0xf0] }
 0x2b6   :  { %v10770_v41 = vld [vmem:[#allocation6 + $0xcd8] sm:$0xf]  ;;  %v10483_v46 = vor.u32 %v13839_v39, %v10482_v19  ;;  %4241 = vmatpush.bf16.msrb.mxu0 %v10227_v43  ;;  %v9335_v43 = vor.u32 %v13547_v58, %v9332_v33 }
 0x2b7   :  { %v13911_v42 = vld [vmem:[#allocation6 + $0xcf4] sm:$0xf0] }
 0x2b8   :  { %v11026_v44 = vld [vmem:[#allocation6 + $0xed8] sm:$0xf]  ;;  %v10771_v49 = vor.u32 %v13911_v42, %v10770_v41  ;;  %4254 = vmatpush.bf16.msrb.mxu1 %v10483_v46  ;;  %v13683_v41 = vld [vmem:[#allocation6 + $0x5dc] sm:$0xf]  ;;  %v9591_v46 = vor.u32 %v13611_v35, %v9588_v36  ;;  %v4050_v35 = vpop.f32.mrf.mxu1 }
 0x2b9   :  { %v13975_v45 = vld [vmem:[#allocation6 + $0xef4] sm:$0xf0]  ;;  %v9876_v42 = vld [vmem:[#allocation6 + $0x5f8] sm:$0xf0] }
 0x2ba   :  { %v10194_v47 = vld [vmem:[#allocation6 + $0x858] sm:$0xf]  ;;  %v11027_v53 = vor.u32 %v13975_v45, %v11026_v44  ;;  %4266 = vmatpush.bf16.msrb.mxu2 %v10771_v49  ;;  %v13747_v44 = vld [vmem:[#allocation6 + $0x7dc] sm:$0xf]  ;;  %v9879_v52 = vor.u32 %v13683_v41, %v9876_v42 }
 0x2bb   :  { %v13767_v48 = vld [vmem:[#allocation6 + $0x874] sm:$0xf0]  ;;  %v10132_v45 = vld [vmem:[#allocation6 + $0x7f8] sm:$0xf0] }
 0x2bc   :  { %v10450_v50 = vld [vmem:[#allocation6 + $0xa58] sm:$0xf]  ;;  %v10195_v59 = vor.u32 %v13767_v48, %v10194_v47  ;;  %4279 = vmatpush.bf16.msrb.mxu3 %v11027_v53  ;;  %v13539_v48 = vld [vmem:[#allocation6 + $0x15c] sm:$0xf]  ;;  %v10135_v55 = vor.u32 %v13747_v44, %v10132_v45 }
 0x2bd   :  { %v13831_v51 = vld [vmem:[#allocation6 + $0xa74] sm:$0xf0]  ;;  %v9300_v49 = vld [vmem:[#allocation6 + $0x178] sm:$0xf0] }
 0x2be   :  { %v10738_v34 = vld [vmem:[#allocation6 + $0xc98] sm:$0xf]  ;;  %v10451_v2 = vor.u32 %v13831_v51, %v10450_v50  ;;  %4242 = vmatpush.bf16.msrb.mxu0 %v10195_v59  ;;  %v4013_v50 = vpop.f32.mrf.mxu2  ;;  %v13603_v53 = vld [vmem:[#allocation6 + $0x35c] sm:$0xf] }
 0x2bf   :  { %v13903_v54 = vld [vmem:[#allocation6 + $0xcb4] sm:$0xf0]  ;;  %v13675_v59 = vld [vmem:[#allocation6 + $0x59c] sm:$0xf] }
 0x2c0   :  { %v10994_v60 = vld [vmem:[#allocation6 + $0xe98] sm:$0xf]  ;;  %v10739_v7 = vor.u32 %v13903_v54, %v10738_v34  ;;  %4255 = vmatpush.bf16.msrb.mxu1 %v10451_v2  ;;  %v9556_v34 = vld [vmem:[#allocation6 + $0x378] sm:$0xf0]  ;;  %v4026_v54 = vpop.f32.mrf.mxu3 }
 0x2c1   :  { %v13967_v0 = vld [vmem:[#allocation6 + $0xeb4] sm:$0xf0]  ;;  %v10100_v2 = vld [vmem:[#allocation6 + $0x7b8] sm:$0xf0] }
 0x2c2   :  { %v10162_v1 = vld [vmem:[#allocation6 + $0x818] sm:$0xf]  ;;  %v10995_v14 = vor.u32 %v13967_v0, %v10994_v60  ;;  %4267 = vmatpush.bf16.msrb.mxu2 %v10739_v7  ;;  %v9844_v60 = vld [vmem:[#allocation6 + $0x5b8] sm:$0xf0]  ;;  %v9303_v0 = vor.u32 %v13539_v48, %v9300_v49 }
 0x2c3   :  { %v13759_v3 = vld [vmem:[#allocation6 + $0x834] sm:$0xf0]  ;;  %v9847_v7 = vor.u32 %v13675_v59, %v9844_v60  ;;  %v9460_v44 = vld [vmem:[#allocation6 + $0x2b8] sm:$0xf0] }
 0x2c4   :  { %v10418_v5 = vld [vmem:[#allocation6 + $0xa18] sm:$0xf]  ;;  %v10163_v23 = vor.u32 %v13759_v3, %v10162_v1  ;;  %4280 = vmatpush.bf16.msrb.mxu3 %v10995_v14  ;;  %v13739_v1 = vld [vmem:[#allocation6 + $0x79c] sm:$0xf]  ;;  %v9559_v3 = vor.u32 %v13603_v53, %v9556_v34 }
 0x2c5   :  { %v13823_v6 = vld [vmem:[#allocation6 + $0xa34] sm:$0xf0]  ;;  %v10103_v11 = vor.u32 %v13739_v1, %v10100_v2  ;;  %v9812_v14 = vld [vmem:[#allocation6 + $0x578] sm:$0xf0]  ;;  %v4052_v1 = vpop.f32.mrf.mxu1 }
 0x2c6   :  { %v10706_v18 = vld [vmem:[#allocation6 + $0xc58] sm:$0xf]  ;;  %v10419_v15 = vor.u32 %v13823_v6, %v10418_v5  ;;  %4243 = vmatpush.bf16.msrb.mxu0 %v10163_v23  ;;  %v13531_v5 = vld [vmem:[#allocation6 + $0x11c] sm:$0xf] }
 0x2c7   :  { %v13895_v20 = vld [vmem:[#allocation6 + $0xc74] sm:$0xf0]  ;;  %v9268_v6 = vld [vmem:[#allocation6 + $0x138] sm:$0xf0] }
 0x2c8   :  { %v10962_v28 = vld [vmem:[#allocation6 + $0xe58] sm:$0xf]  ;;  %v10707_v30 = vor.u32 %v13895_v20, %v10706_v18  ;;  %4256 = vmatpush.bf16.msrb.mxu1 %v10419_v15  ;;  %v9271_v16 = vor.u32 %v13531_v5, %v9268_v6  ;;  %v13731_v18 = vld [vmem:[#allocation6 + $0x75c] sm:$0xf] }
 0x2c9   :  { %v13959_v27 = vld [vmem:[#allocation6 + $0xe74] sm:$0xf0]  ;;  %4244 = vmatmul.bf16.vlgmr.msrb.gmra.mxu0 %v14946_v62  ;;  %v10068_v20 = vld [vmem:[#allocation6 + $0x778] sm:$0xf0] }
 0x2ca   :  { %v10963_v38 = vor.u32 %v13959_v27, %v10962_v28  ;;  %v10674_v37 = vld [vmem:[#allocation6 + $0xc18] sm:$0xf]  ;;  %4288 = vmatpush.bf16.msra.mxu0 %v9367_v29  ;;  %4268 = vmatpush.bf16.msrb.mxu2 %v10707_v30  ;;  %v9236_v23 = vld [vmem:[#allocation6 + $0xf8] sm:$0xf0]  ;;  %v9815_v28 = vor.u32 %v13667_v13, %v9812_v14  ;;  %v4037_v29 = vpop.f32.mrf.mxu0  ;;  %v10071_v58 = vor.u32 %v13731_v18, %v10068_v20  ;;  %v4063_v20 = vpop.f32.mrf.mxu2 }
 0x2cb   :  { %v13887_v19 = vld [vmem:[#allocation6 + $0xc34] sm:$0xf0]  ;;  %4257 = vmatmul.bf16.vlgmr.msrb.gmra.mxu1 %v14948_v4  ;;  %v13587_v27 = vld [vmem:[#allocation6 + $0x2dc] sm:$0xf]  ;;  %v4038_v33 = vadd.f32 %v4037_v29, %v15028_v12  ;;  %v9239_v36 = vor.u32 %v13523_v57, %v9236_v23 }
 0x2cc   :  { %v10930_v39 = vld [vmem:[#allocation6 + $0xe18] sm:$0xf]  ;;  %4301 = vmatpush.bf16.msra.mxu1 %v9623_v32  ;;  %v10675_v47 = vor.u32 %v13887_v19, %v10674_v37  ;;  %4281 = vmatpush.bf16.msrb.mxu3 %v10963_v38  ;;  %v9492_v15 = vld [vmem:[#allocation6 + $0x2f8] sm:$0xf0] }
 0x2cd   :  { %v13951_v40 = vld [vmem:[#allocation6 + $0xe34] sm:$0xf0]  ;;  %v13659_v32 = vld [vmem:[#allocation6 + $0x51c] sm:$0xf]  ;;  %v9495_v19 = vor.u32 %v13587_v27, %v9492_v15  ;;  %v4051_v41 = vadd.f32 %v4050_v35, %v4038_v33  ;;  %v4076_v15 = vpop.f32.mrf.mxu3 }
 0x2ce   :  { %v10931_v51 = vor.u32 %v13951_v40, %v10930_v39  ;;  %4289 = vmatpush.bf16.msra.mxu0 %v9335_v43  ;;  %4269 = vmatpush.bf16.msrb.mxu2 %v10675_v47  ;;  %v9780_v30 = vld [vmem:[#allocation6 + $0x538] sm:$0xf0] }
 0x2cf   :  { %v13723_v38 = vld [vmem:[#allocation6 + $0x71c] sm:$0xf]  ;;  %v9783_v42 = vor.u32 %v13659_v32, %v9780_v30  ;;  %v4064_v27 = vadd.f32 %v4063_v20, %v4051_v41 }
 0x2d0   :  { %4302 = vmatpush.bf16.msra.mxu1 %v9591_v46  ;;  %4282 = vmatpush.bf16.msrb.mxu3 %v10931_v51  ;;  %v10036_v37 = vld [vmem:[#allocation6 + $0x738] sm:$0xf0] }
 0x2d1   :  { %4270 = vmatmul.bf16.vlgmr.msrb.gmra.mxu2 %v14952_v26  ;;  %v13515_v39 = vld [vmem:[#allocation6 + $0x9c] sm:$0xf]  ;;  %v10039_v45 = vor.u32 %v13723_v38, %v10036_v37 }
 0x2d2   :  { %4314 = vmatpush.bf16.msra.mxu2 %v9879_v52  ;;  %4290 = vmatpush.bf16.msra.mxu0 %v9303_v0  ;;  %v9204_v40 = vld [vmem:[#allocation6 + $0xb8] sm:$0xf0] }
 0x2d3   :  { %4283 = vmatmul.bf16.vlgmr.msrb.gmra.mxu3 %v14954_v31  ;;  %v13579_v43 = vld [vmem:[#allocation6 + $0x29c] sm:$0xf]  ;;  %v9207_v12 = vor.u32 %v13515_v39, %v9204_v40 }
 0x2d4   :  { %4327 = vmatpush.bf16.msra.mxu3 %v10135_v55  ;;  %4303 = vmatpush.bf16.msra.mxu1 %v9559_v3  ;;  %v13651_v46 = vld [vmem:[#allocation6 + $0x4dc] sm:$0xf]  ;;  %v9463_v50 = vor.u32 %v13579_v43, %v9460_v44  ;;  %v4039_v55 = vpop.f32.mrf.mxu0 }
 0x2d5   :  { %v9748_v47 = vld [vmem:[#allocation6 + $0x4f8] sm:$0xf0] }
 0x2d6   :  { %4315 = vmatpush.bf16.msra.mxu2 %v9847_v7  ;;  %4291 = vmatpush.bf16.msra.mxu0 %v9271_v16  ;;  %v13715_v48 = vld [vmem:[#allocation6 + $0x6dc] sm:$0xf]  ;;  %v9751_v53 = vor.u32 %v13651_v46, %v9748_v47 }
 0x2d7   :  { %v10004_v49 = vld [vmem:[#allocation6 + $0x6f8] sm:$0xf0] }
 0x2d8   :  { %4328 = vmatpush.bf16.msra.mxu3 %v10103_v11  ;;  %4304 = vmatpush.bf16.msra.mxu1 %v9527_v22  ;;  %v13507_v51 = vld [vmem:[#allocation6 + $0x5c] sm:$0xf]  ;;  %v10007_v59 = vor.u32 %v13715_v48, %v10004_v49 }
 0x2d9   :  { %v9172_v52 = vld [vmem:[#allocation6 + $0x78] sm:$0xf0] }
 0x2da   :  { %4316 = vmatpush.bf16.msra.mxu2 %v9815_v28  ;;  %4292 = vmatpush.bf16.msra.mxu0 %v9239_v36  ;;  %v13571_v34 = vld [vmem:[#allocation6 + $0x25c] sm:$0xf]  ;;  %v9175_v2 = vor.u32 %v13507_v51, %v9172_v52  ;;  %v15035_v36 = vadd.f32 %v4076_v15, %v4064_v27 }
 0x2db   :  { %v9428_v54 = vld [vmem:[#allocation6 + $0x278] sm:$0xf0] }
 0x2dc   :  { %4329 = vmatpush.bf16.msra.mxu3 %v10071_v58  ;;  %4305 = vmatpush.bf16.msra.mxu1 %v9495_v19  ;;  %v13643_v60 = vld [vmem:[#allocation6 + $0x49c] sm:$0xf]  ;;  %v9431_v7 = vor.u32 %v13571_v34, %v9428_v54  ;;  %v4065_v34 = vpop.f32.mrf.mxu2  ;;  %14618 = vtanh.f32 %v15035_v36  ;;  %v14404_v36 = vld [vmem:[#allocation9 + $0xc5c] sm:$0xf0] }
 0x2dd   :  { %v9716_v0 = vld [vmem:[#allocation6 + $0x4b8] sm:$0xf0] }
 0x2de   :  { %4317 = vmatpush.bf16.msra.mxu2 %v9783_v42  ;;  %4293 = vmatpush.bf16.msra.mxu0 %v9207_v12  ;;  %v13707_v3 = vld [vmem:[#allocation6 + $0x69c] sm:$0xf]  ;;  %v9719_v13 = vor.u32 %v13643_v60, %v9716_v0  ;;  %v4078_v0 = vpop.f32.mrf.mxu3 }
 0x2df   :  { %v9972_v5 = vld [vmem:[#allocation6 + $0x6b8] sm:$0xf0] }
 0x2e0   :  { %4330 = vmatpush.bf16.msra.mxu3 %v10039_v45  ;;  %v13499_v6 = vld [vmem:[#allocation6 + $0x1c] sm:$0xf]  ;;  %4306 = vmatpush.bf16.msra.mxu1 %v9463_v50  ;;  %v9975_v22 = vor.u32 %v13707_v3, %v9972_v5 }
 0x2e1   :  { %v9396_v11 = vld [vmem:[#allocation6 + $0x238] sm:$0xf0]  ;;  %v9143_v29 = vor.u32 %v13499_v6, %v9140_v8 }
 0x2e2   :  { %4318 = vmatpush.bf16.msra.mxu2 %v9751_v53  ;;  %v13811_v14 = vld [vmem:[#allocation6 + $0x9dc] sm:$0xf]  ;;  %4294 = vmatpush.bf16.msra.mxu0 %v9175_v2  ;;  %v9399_v30 = vor.u32 %v13563_v9, %v9396_v11 }
 0x2e3   :  { %v10388_v16 = vld [vmem:[#allocation6 + $0x9f8] sm:$0xf0] }
 0x2e4   :  { %v13875_v18 = vld [vmem:[#allocation6 + $0xbdc] sm:$0xf]  ;;  %4331 = vmatpush.bf16.msra.mxu3 %v10007_v59  ;;  %4307 = vmatpush.bf16.msra.mxu1 %v9431_v7  ;;  %v10391_v33 = vor.u32 %v13811_v14, %v10388_v16 }
 0x2e5   :  { %v10644_v57 = vld [vmem:[#allocation6 + $0xbf8] sm:$0xf0] }
 0x2e6   :  { %v13635_v23 = vld [vmem:[#allocation6 + $0x45c] sm:$0xf]  ;;  %4319 = vmatpush.bf16.msra.mxu2 %v9719_v13  ;;  %v10647_v38 = vor.u32 %v13875_v18, %v10644_v57  ;;  %4295 = vmatpush.bf16.msra.mxu0 %v9143_v29 }
 0x2e7   :  { %v9684_v28 = vld [vmem:[#allocation6 + $0x478] sm:$0xf0] }
 0x2e8   :  { %v13699_v58 = vld [vmem:[#allocation6 + $0x65c] sm:$0xf]  ;;  %v9687_v37 = vor.u32 %v13635_v23, %v9684_v28  ;;  %4332 = vmatpush.bf16.msra.mxu3 %v9975_v22  ;;  %4308 = vmatpush.bf16.msra.mxu1 %v9399_v30 }
 0x2e9   :  { %v9940_v32 = vld [vmem:[#allocation6 + $0x678] sm:$0xf0]  ;;  %4296 = vmatmul.bf16.vlgmr.msra.gmra.mxu0 %v14930_v56 }
 0x2ea   :  { %v13803_v35 = vld [vmem:[#allocation6 + $0x99c] sm:$0xf]  ;;  %v9943_v42 = vor.u32 %v13699_v58, %v9940_v32  ;;  %4340 = vmatpush.bf16.msrb.mxu0 %v10391_v33  ;;  %4320 = vmatpush.bf16.msra.mxu2 %v9687_v37  ;;  %v15041_v32 = vpop.f32.mrf.mxu0 }
 0x2eb   :  { %v10356_v19 = vld [vmem:[#allocation6 + $0x9b8] sm:$0xf0]  ;;  %4309 = vmatmul.bf16.vlgmr.msra.gmra.mxu1 %v14932_v61 }
 0x2ec   :  { %v13867_v39 = vld [vmem:[#allocation6 + $0xb9c] sm:$0xf]  ;;  %v10359_v12 = vor.u32 %v13803_v35, %v10356_v19  ;;  %4353 = vmatpush.bf16.msrb.mxu1 %v10647_v38  ;;  %4333 = vmatpush.bf16.msra.mxu3 %v9943_v42  ;;  %v15043_v35 = vpop.f32.mrf.mxu1 }
 0x2ed   :  { %v10612_v40 = vld [vmem:[#allocation6 + $0xbb8] sm:$0xf0] }
 0x2ee   :  { %v13627_v41 = vld [vmem:[#allocation6 + $0x41c] sm:$0xf]  ;;  %v10615_v50 = vor.u32 %v13867_v39, %v10612_v40  ;;  %4341 = vmatpush.bf16.msrb.mxu0 %v10359_v12 }
 0x2ef   :  { %v9652_v43 = vld [vmem:[#allocation6 + $0x438] sm:$0xf0] }
 0x2f0   :  { %v13691_v44 = vld [vmem:[#allocation6 + $0x61c] sm:$0xf]  ;;  %v9655_v51 = vor.u32 %v13627_v41, %v9652_v43  ;;  %4354 = vmatpush.bf16.msrb.mxu1 %v10615_v50 }
 0x2f1   :  { %v9908_v45 = vld [vmem:[#allocation6 + $0x638] sm:$0xf0] }
 0x2f2   :  { %v13939_v46 = vld [vmem:[#allocation6 + $0xddc] sm:$0xf]  ;;  %v9911_v54 = vor.u32 %v13691_v44, %v9908_v45  ;;  %4321 = vmatpush.bf16.msra.mxu2 %v9655_v51 }
 0x2f3   :  { %v10900_v47 = vld [vmem:[#allocation6 + $0xdf8] sm:$0xf0] }
 0x2f4   :  { %v14003_v48 = vld [vmem:[#allocation6 + $0xfdc] sm:$0xf]  ;;  %v10903_v55 = vor.u32 %v13939_v46, %v10900_v47  ;;  %4334 = vmatpush.bf16.msra.mxu3 %v9911_v54  ;;  %v4091_v54 = vpop.f32.mrf.mxu0  ;;  %v4104_v0 = vpop.f32.mrf.mxu1 }
 0x2f5   :  { %v11156_v49 = vld [vmem:[#allocation6 + $0xff8] sm:$0xf0]  ;;  %4322 = vmatmul.bf16.vlgmr.msra.gmra.mxu2 %v14938_v17 }
 0x2f6   :  { %v13795_v52 = vld [vmem:[#allocation6 + $0x95c] sm:$0xf]  ;;  %v11159_v1 = vor.u32 %v14003_v48, %v11156_v49  ;;  %4366 = vmatpush.bf16.msrb.mxu2 %v10903_v55 }
 0x2f7   :  { %v10324_v53 = vld [vmem:[#allocation6 + $0x978] sm:$0xf0]  ;;  %4335 = vmatmul.bf16.vlgmr.msra.gmra.mxu3 %v14940_v25 }
 0x2f8   :  { %v13859_v59 = vld [vmem:[#allocation6 + $0xb5c] sm:$0xf]  ;;  %v10327_v5 = vor.u32 %v13795_v52, %v10324_v53  ;;  %4379 = vmatpush.bf16.msrb.mxu3 %v11159_v1 }
 0x2f9   :  { %v10580_v60 = vld [vmem:[#allocation6 + $0xb78] sm:$0xf0] }
 0x2fa   :  { %v13931_v2 = vld [vmem:[#allocation6 + $0xd9c] sm:$0xf]  ;;  %v10583_v8 = vor.u32 %v13859_v59, %v10580_v60  ;;  %4342 = vmatpush.bf16.msrb.mxu0 %v10327_v5 }
 0x2fb   :  { %v10868_v3 = vld [vmem:[#allocation6 + $0xdb8] sm:$0xf0] }
 0x2fc   :  { %v13995_v6 = vld [vmem:[#allocation6 + $0xf9c] sm:$0xf]  ;;  %v10871_v56 = vor.u32 %v13931_v2, %v10868_v3  ;;  %4355 = vmatpush.bf16.msrb.mxu1 %v10583_v8 }
 0x2fd   :  { %v11124_v7 = vld [vmem:[#allocation6 + $0xfb8] sm:$0xf0] }
 0x2fe   :  { %v13787_v9 = vld [vmem:[#allocation6 + $0x91c] sm:$0xf]  ;;  %v11127_v16 = vor.u32 %v13995_v6, %v11124_v7  ;;  %4367 = vmatpush.bf16.msrb.mxu2 %v10871_v56  ;;  %v11386_v56 = vld [vmem:[#allocation9 + $0x1c0] sm:$0xf] }
 0x2ff   :  { %v10292_v11 = vld [vmem:[#allocation6 + $0x938] sm:$0xf0] }
 0x300   :  { %v13851_v13 = vld [vmem:[#allocation6 + $0xb1c] sm:$0xf]  ;;  %v10295_v20 = vor.u32 %v13787_v9, %v10292_v11  ;;  %4380 = vmatpush.bf16.msrb.mxu3 %v11127_v16  ;;  %v15045_v16 = vpop.f32.mrf.mxu2 }
 0x301   :  { %v10548_v14 = vld [vmem:[#allocation6 + $0xb38] sm:$0xf0] }
 0x302   :  { %v13923_v61 = vld [vmem:[#allocation6 + $0xd5c] sm:$0xf]  ;;  %v10551_v23 = vor.u32 %v13851_v13, %v10548_v14  ;;  %4343 = vmatpush.bf16.msrb.mxu0 %v10295_v20  ;;  %v14068_v13 = vld [vmem:[#allocation9 + $0x1dc] sm:$0xf0] }
 0x303   :  { %v10836_v18 = vld [vmem:[#allocation6 + $0xd78] sm:$0xf0]  ;;  %v11642_v14 = vld [vmem:[#allocation9 + $0x3c0] sm:$0xf] }
 0x304   :  { %v13987_v22 = vld [vmem:[#allocation6 + $0xf5c] sm:$0xf]  ;;  %v10839_v15 = vor.u32 %v13923_v61, %v10836_v18  ;;  %4356 = vmatpush.bf16.msrb.mxu1 %v10551_v23  ;;  %v14132_v18 = vld [vmem:[#allocation9 + $0x3dc] sm:$0xf0] }
 0x305   :  { %v11092_v57 = vld [vmem:[#allocation6 + $0xf78] sm:$0xf0] }
 0x306   :  { %v13779_v28 = vld [vmem:[#allocation6 + $0x8dc] sm:$0xf]  ;;  %v11095_v30 = vor.u32 %v13987_v22, %v11092_v57  ;;  %4368 = vmatpush.bf16.msrb.mxu2 %v10839_v15  ;;  %v15047_v57 = vpop.f32.mrf.mxu3 }
 0x307   :  { %v10260_v27 = vld [vmem:[#allocation6 + $0x8f8] sm:$0xf0] }
 0x308   :  { %v13843_v29 = vld [vmem:[#allocation6 + $0xadc] sm:$0xf]  ;;  %v10263_v38 = vor.u32 %v13779_v28, %v10260_v27  ;;  %4381 = vmatpush.bf16.msrb.mxu3 %v11095_v30  ;;  %v11643_v30 = vor.u32 %v14132_v18, %v11642_v14  ;;  %v14244_v14 = vld [vmem:[#allocation9 + $0x75c] sm:$0xf0] }
 0x309   :  { %v10516_v58 = vld [vmem:[#allocation6 + $0xaf8] sm:$0xf0]  ;;  %v11258_v18 = vld [vmem:[#allocation9 + $0xc0] sm:$0xf] }
 0x30a   :  { %v13915_v33 = vld [vmem:[#allocation6 + $0xd1c] sm:$0xf]  ;;  %v10519_v19 = vor.u32 %v13843_v29, %v10516_v58  ;;  %4344 = vmatpush.bf16.msrb.mxu0 %v10263_v38  ;;  %v11387_v29 = vor.u32 %v14068_v13, %v11386_v56  ;;  %v11354_v58 = vld [vmem:[#allocation9 + $0x180] sm:$0xf] }
 0x30b   :  { %v10804_v17 = vld [vmem:[#allocation6 + $0xd38] sm:$0xf0]  ;;  %v11610_v38 = vld [vmem:[#allocation9 + $0x380] sm:$0xf] }
 0x30c   :  { %v13979_v37 = vld [vmem:[#allocation6 + $0xf1c] sm:$0xf]  ;;  %v10807_v42 = vor.u32 %v13915_v33, %v10804_v17  ;;  %4357 = vmatpush.bf16.msrb.mxu1 %v10519_v19  ;;  %v14060_v17 = vld [vmem:[#allocation9 + $0x19c] sm:$0xf0] }
 0x30d   :  { %v11060_v25 = vld [vmem:[#allocation6 + $0xf38] sm:$0xf0]  ;;  %v12090_v13 = vld [vmem:[#allocation9 + $0x740] sm:$0xf] }
 0x30e   :  { %v13771_v39 = vld [vmem:[#allocation6 + $0x89c] sm:$0xf]  ;;  %v11063_v44 = vor.u32 %v13979_v37, %v11060_v25  ;;  %4369 = vmatpush.bf16.msrb.mxu2 %v10807_v42  ;;  %v14124_v37 = vld [vmem:[#allocation9 + $0x39c] sm:$0xf0]  ;;  %v4130_v54 = vpop.f32.mrf.mxu3 }
 0x30f   :  { %v10228_v40 = vld [vmem:[#allocation6 + $0x8b8] sm:$0xf0]  ;;  %v11738_v54 = vld [vmem:[#allocation9 + $0x480] sm:$0xf] }
 0x310   :  { %v13835_v41 = vld [vmem:[#allocation6 + $0xa9c] sm:$0xf]  ;;  %v10231_v47 = vor.u32 %v13771_v39, %v10228_v40  ;;  %4382 = vmatpush.bf16.msrb.mxu3 %v11063_v44  ;;  %v11355_v44 = vor.u32 %v14060_v17, %v11354_v58  ;;  %v15055_v58 = vpop.f32.mrf.mxu1 }
 0x311   :  { %v10484_v43 = vld [vmem:[#allocation6 + $0xab8] sm:$0xf0] }
 0x312   :  { %v13907_v45 = vld [vmem:[#allocation6 + $0xcdc] sm:$0xf]  ;;  %v10487_v49 = vor.u32 %v13835_v41, %v10484_v43  ;;  %4345 = vmatpush.bf16.msrb.mxu0 %v10231_v47  ;;  %v11898_v41 = vld [vmem:[#allocation9 + $0x5c0] sm:$0xf]  ;;  %v11611_v47 = vor.u32 %v14124_v37, %v11610_v38 }
 0x313   :  { %v10772_v46 = vld [vmem:[#allocation6 + $0xcf8] sm:$0xf0]  ;;  %v14196_v43 = vld [vmem:[#allocation9 + $0x5dc] sm:$0xf0] }
 0x314   :  { %v13971_v12 = vld [vmem:[#allocation6 + $0xedc] sm:$0xf]  ;;  %v10775_v52 = vor.u32 %v13907_v45, %v10772_v46  ;;  %4358 = vmatpush.bf16.msrb.mxu1 %v10487_v49  ;;  %v12154_v45 = vld [vmem:[#allocation9 + $0x7c0] sm:$0xf] }
 0x315   :  { %v11028_v48 = vld [vmem:[#allocation6 + $0xef8] sm:$0xf0]  ;;  %v14260_v46 = vld [vmem:[#allocation9 + $0x7dc] sm:$0xf0] }
 0x316   :  { %v13763_v50 = vld [vmem:[#allocation6 + $0x85c] sm:$0xf]  ;;  %v11031_v55 = vor.u32 %v13971_v12, %v11028_v48  ;;  %4370 = vmatpush.bf16.msrb.mxu2 %v10775_v52  ;;  %v11322_v48 = vld [vmem:[#allocation9 + $0x140] sm:$0xf]  ;;  %v11899_v52 = vor.u32 %v14196_v43, %v11898_v41 }
 0x317   :  { %v10196_v51 = vld [vmem:[#allocation6 + $0x878] sm:$0xf0]  ;;  %v14052_v49 = vld [vmem:[#allocation9 + $0x15c] sm:$0xf0] }
 0x318   :  { %v13827_v53 = vld [vmem:[#allocation6 + $0xa5c] sm:$0xf]  ;;  %v10199_v1 = vor.u32 %v13763_v50, %v10196_v51  ;;  %4383 = vmatpush.bf16.msrb.mxu3 %v11031_v55  ;;  %v4117_v50 = vpop.f32.mrf.mxu2  ;;  %v12155_v55 = vor.u32 %v14260_v46, %v12154_v45  ;;  %v11323_v0 = vor.u32 %v14052_v49, %v11322_v48  ;;  %v11226_v38 = vld [vmem:[#allocation9 + $0x80] sm:$0xf] }
 0x319   :  { %v10452_v34 = vld [vmem:[#allocation6 + $0xa78] sm:$0xf0]  ;;  %v14028_v37 = vld [vmem:[#allocation9 + $0x9c] sm:$0xf0] }
 0x31a   :  { %v13899_v59 = vld [vmem:[#allocation6 + $0xc9c] sm:$0xf]  ;;  %v10455_v6 = vor.u32 %v13827_v53, %v10452_v34  ;;  %4346 = vmatpush.bf16.msrb.mxu0 %v10199_v1  ;;  %v11578_v53 = vld [vmem:[#allocation9 + $0x340] sm:$0xf]  ;;  %v11227_v43 = vor.u32 %v14028_v37, %v11226_v38 }
 0x31b   :  { %v10740_v60 = vld [vmem:[#allocation6 + $0xcb8] sm:$0xf0]  ;;  %v14116_v34 = vld [vmem:[#allocation9 + $0x35c] sm:$0xf0] }
 0x31c   :  { %v13963_v2 = vld [vmem:[#allocation6 + $0xe9c] sm:$0xf]  ;;  %v10743_v11 = vor.u32 %v13899_v59, %v10740_v60  ;;  %4359 = vmatpush.bf16.msrb.mxu1 %v10455_v6  ;;  %v11866_v59 = vld [vmem:[#allocation9 + $0x580] sm:$0xf] }
 0x31d   :  { %v10996_v3 = vld [vmem:[#allocation6 + $0xeb8] sm:$0xf0]  ;;  %v14188_v60 = vld [vmem:[#allocation9 + $0x59c] sm:$0xf0] }
 0x31e   :  { %v13755_v5 = vld [vmem:[#allocation6 + $0x81c] sm:$0xf]  ;;  %v10999_v61 = vor.u32 %v13963_v2, %v10996_v3  ;;  %4371 = vmatpush.bf16.msrb.mxu2 %v10743_v11  ;;  %v12122_v1 = vld [vmem:[#allocation9 + $0x780] sm:$0xf]  ;;  %v11579_v3 = vor.u32 %v14116_v34, %v11578_v53 }
 0x31f   :  { %v10164_v7 = vld [vmem:[#allocation6 + $0x838] sm:$0xf0]  ;;  %v14252_v2 = vld [vmem:[#allocation9 + $0x79c] sm:$0xf0] }
 0x320   :  { %v13819_v8 = vld [vmem:[#allocation6 + $0xa1c] sm:$0xf]  ;;  %v10167_v23 = vor.u32 %v13755_v5, %v10164_v7  ;;  %4384 = vmatpush.bf16.msrb.mxu3 %v10999_v61  ;;  %v11290_v5 = vld [vmem:[#allocation9 + $0x100] sm:$0xf] }
 0x321   :  { %v10420_v9 = vld [vmem:[#allocation6 + $0xa38] sm:$0xf0]  ;;  %v14044_v6 = vld [vmem:[#allocation9 + $0x11c] sm:$0xf0] }
 0x322   :  { %v13891_v20 = vld [vmem:[#allocation6 + $0xc5c] sm:$0xf]  ;;  %v10423_v15 = vor.u32 %v13819_v8, %v10420_v9  ;;  %4347 = vmatpush.bf16.msrb.mxu0 %v10167_v23  ;;  %v11546_v7 = vld [vmem:[#allocation9 + $0x300] sm:$0xf]  ;;  %v12123_v9 = vor.u32 %v14252_v2, %v12122_v1  ;;  %v11291_v56 = vor.u32 %v14044_v6, %v11290_v5 }
 0x323   :  { %v10708_v22 = vld [vmem:[#allocation6 + $0xc78] sm:$0xf0]  ;;  %v14108_v8 = vld [vmem:[#allocation9 + $0x31c] sm:$0xf0] }
 0x324   :  { %v13955_v28 = vld [vmem:[#allocation6 + $0xe5c] sm:$0xf]  ;;  %v10711_v33 = vor.u32 %v13891_v20, %v10708_v22  ;;  %4360 = vmatpush.bf16.msrb.mxu1 %v10423_v15  ;;  %v14180_v11 = vld [vmem:[#allocation9 + $0x55c] sm:$0xf0]  ;;  %v11547_v61 = vor.u32 %v14108_v8, %v11546_v7  ;;  %v12091_v15 = vor.u32 %v14244_v14, %v12090_v13 }
 0x325   :  { %v10964_v27 = vld [vmem:[#allocation6 + $0xe78] sm:$0xf0]  ;;  %4348 = vmatmul.bf16.vlgmr.msrb.gmra.mxu0 %v14946_v62  ;;  %v11867_v62 = vor.u32 %v14188_v60, %v11866_v59  ;;  %v14036_v20 = vld [vmem:[#allocation9 + $0xdc] sm:$0xf0]  ;;  %v4156_v59 = vpop.f32.mrf.mxu1 }
 0x326   :  { %v10967_v25 = vor.u32 %v13955_v28, %v10964_v27  ;;  %v13883_v19 = vld [vmem:[#allocation6 + $0xc1c] sm:$0xf]  ;;  %7498 = vmatpush.bf16.msra.mxu0 %v11387_v29  ;;  %4372 = vmatpush.bf16.msrb.mxu2 %v10711_v33  ;;  %v11514_v23 = vld [vmem:[#allocation9 + $0x2c0] sm:$0xf]  ;;  %v15053_v27 = vpop.f32.mrf.mxu0 }
 0x327   :  { %v10676_v39 = vld [vmem:[#allocation6 + $0xc38] sm:$0xf0]  ;;  %4361 = vmatmul.bf16.vlgmr.msrb.gmra.mxu1 %v14948_v4  ;;  %v11834_v4 = vld [vmem:[#allocation9 + $0x540] sm:$0xf] }
 0x328   :  { %v13947_v40 = vld [vmem:[#allocation6 + $0xe1c] sm:$0xf]  ;;  %7511 = vmatpush.bf16.msra.mxu1 %v11643_v30  ;;  %v10679_v12 = vor.u32 %v13883_v19, %v10676_v39  ;;  %4385 = vmatpush.bf16.msrb.mxu3 %v10967_v25  ;;  %v11835_v22 = vor.u32 %v14180_v11, %v11834_v4  ;;  %v14100_v28 = vld [vmem:[#allocation9 + $0x2dc] sm:$0xf0]  ;;  %v11259_v30 = vor.u32 %v14036_v20, %v11258_v18  ;;  %v15062_v4 = vpop.f32.mrf.mxu2 }
 0x329   :  { %v10932_v42 = vld [vmem:[#allocation6 + $0xe38] sm:$0xf0]  ;;  %v11802_v29 = vld [vmem:[#allocation9 + $0x500] sm:$0xf]  ;;  %v11515_v17 = vor.u32 %v14100_v28, %v11514_v23  ;;  %v14611_v23 = vpop.eup %14610 }
 0x32a   :  { %v10935_v51 = vor.u32 %v13947_v40, %v10932_v42  ;;  %7499 = vmatpush.bf16.msra.mxu0 %v11355_v44  ;;  %4373 = vmatpush.bf16.msrb.mxu2 %v10679_v12  ;;  %v12058_v33 = vld [vmem:[#allocation9 + $0x700] sm:$0xf]  ;;  %v15070_v21 = vpack.c.bf16 %v14611_v23, %v14611_v23 }
 0x32b   :  { %v11482_v19 = vld [vmem:[#allocation9 + $0x280] sm:$0xf] }
 0x32c   :  { %7512 = vmatpush.bf16.msra.mxu1 %v11611_v47  ;;  %4386 = vmatpush.bf16.msrb.mxu3 %v10935_v51  ;;  %v14092_v39 = vld [vmem:[#allocation9 + $0x29c] sm:$0xf0]  ;;  %v15058_v51 = vld [vmem:[#allocation7] sm:$0xff] }
 0x32d   :  { %4374 = vmatmul.bf16.vlgmr.msrb.gmra.mxu2 %v14952_v26  ;;  %v14172_v26 = vld [vmem:[#allocation9 + $0x51c] sm:$0xf0]  ;;  %v11483_v46 = vor.u32 %v14092_v39, %v11482_v19 }
 0x32e   :  { %7524 = vmatpush.bf16.msra.mxu2 %v11899_v52  ;;  %7500 = vmatpush.bf16.msra.mxu0 %v11323_v0  ;;  %v11803_v25 = vor.u32 %v14172_v26, %v11802_v29  ;;  %v11770_v42 = vld [vmem:[#allocation9 + $0x4c0] sm:$0xf]  ;;  %v989_v52 = vperm.slane %v15058_v51, 5  ;;  %v4143_v53 = vpop.f32.mrf.mxu0  ;;  %v14613_v26 = vpop.eup %14612 }
 0x32f   :  { %4387 = vmatmul.bf16.vlgmr.msrb.gmra.mxu3 %v14954_v31  ;;  %v14236_v31 = vld [vmem:[#allocation9 + $0x71c] sm:$0xf0]  ;;  %v14615_v53 = vpop.eup %14614 }
 0x330   :  { %7537 = vmatpush.bf16.msra.mxu3 %v12155_v55  ;;  %7513 = vmatpush.bf16.msra.mxu1 %v11579_v3  ;;  %v12059_v40 = vor.u32 %v14236_v31, %v12058_v33  ;;  %v14164_v41 = vld [vmem:[#allocation9 + $0x4dc] sm:$0xf0]  ;;  %v4090_v14 = vadd.f32 %v15041_v32, %v989_v52 }
 0x331   :  { %v12026_v44 = vld [vmem:[#allocation9 + $0x6c0] sm:$0xf]  ;;  %v11771_v48 = vor.u32 %v14164_v41, %v11770_v42 }
 0x332   :  { %7525 = vmatpush.bf16.msra.mxu2 %v11867_v62  ;;  %7501 = vmatpush.bf16.msra.mxu0 %v11291_v56  ;;  %v14228_v45 = vld [vmem:[#allocation9 + $0x6dc] sm:$0xf0]  ;;  %v4103_v39 = vadd.f32 %v15043_v35, %v4090_v14  ;;  %v4169_v35 = vpop.f32.mrf.mxu2 }
 0x333   :  { %v11194_v47 = vld [vmem:[#allocation9 + $0x40] sm:$0xf]  ;;  %v12027_v34 = vor.u32 %v14228_v45, %v12026_v44 }
 0x334   :  { %7538 = vmatpush.bf16.msra.mxu3 %v12123_v9  ;;  %7514 = vmatpush.bf16.msra.mxu1 %v11547_v61  ;;  %v14020_v12 = vld [vmem:[#allocation9 + $0x5c] sm:$0xf0]  ;;  %v15065_v61 = vpop.f32.mrf.mxu3  ;;  %v4116_v24 = vadd.f32 %v15045_v16, %v4103_v39 }
 0x335   :  { %v11450_v49 = vld [vmem:[#allocation9 + $0x240] sm:$0xf]  ;;  %v11195_v60 = vor.u32 %v14020_v12, %v11194_v47 }
 0x336   :  { %7526 = vmatpush.bf16.msra.mxu2 %v11835_v22  ;;  %7502 = vmatpush.bf16.msra.mxu0 %v11259_v30  ;;  %v14084_v50 = vld [vmem:[#allocation9 + $0x25c] sm:$0xf0] }
 0x337   :  { %v14156_v55 = vld [vmem:[#allocation9 + $0x49c] sm:$0xf0]  ;;  %v11451_v3 = vor.u32 %v14084_v50, %v11450_v49 }
 0x338   :  { %7539 = vmatpush.bf16.msra.mxu3 %v12091_v15  ;;  %7515 = vmatpush.bf16.msra.mxu1 %v11515_v17  ;;  %v11994_v0 = vld [vmem:[#allocation9 + $0x680] sm:$0xf]  ;;  %v11739_v62 = vor.u32 %v14156_v55, %v11738_v54  ;;  %v14617_v55 = vpop.eup %14616 }
 0x339   :  { %v14220_v1 = vld [vmem:[#allocation9 + $0x69c] sm:$0xf0] }
 0x33a   :  { %7527 = vmatpush.bf16.msra.mxu2 %v11803_v25  ;;  %7503 = vmatpush.bf16.msra.mxu0 %v11227_v43  ;;  %v11162_v2 = vld [vmem:[#allocation9] sm:$0xf]  ;;  %v11995_v10 = vor.u32 %v14220_v1, %v11994_v0  ;;  %v15072_v43 = vpack.c.bf16 %v14613_v26, %v14613_v26 }
 0x33b   :  { %v11418_v5 = vld [vmem:[#allocation9 + $0x200] sm:$0xf]  ;;  %v11163_v18 = vor.u32 %v14012_v63, %v11162_v2 }
 0x33c   :  { %7540 = vmatpush.bf16.msra.mxu3 %v12059_v40  ;;  %7516 = vmatpush.bf16.msra.mxu1 %v11483_v46  ;;  %v14076_v6 = vld [vmem:[#allocation9 + $0x21c] sm:$0xf0] }
 0x33d   :  { %v12410_v7 = vld [vmem:[#allocation9 + $0x9c0] sm:$0xf]  ;;  %v11419_v28 = vor.u32 %v14076_v6, %v11418_v5 }
 0x33e   :  { %7528 = vmatpush.bf16.msra.mxu2 %v11771_v48  ;;  %v14324_v8 = vld [vmem:[#allocation9 + $0x9dc] sm:$0xf0]  ;;  %7504 = vmatpush.bf16.msra.mxu0 %v11195_v60  ;;  %v4129_v60 = vadd.f32 %v15047_v57, %v4116_v24 }
 0x33f   :  { %v12666_v9 = vld [vmem:[#allocation9 + $0xbc0] sm:$0xf]  ;;  %v12411_v15 = vor.u32 %v14324_v8, %v12410_v7 }
 0x340   :  { %7541 = vmatpush.bf16.msra.mxu3 %v12027_v34  ;;  %v14388_v11 = vld [vmem:[#allocation9 + $0xbdc] sm:$0xf0]  ;;  %7517 = vmatpush.bf16.msra.mxu1 %v11451_v3  ;;  %v4182_v34 = vpop.f32.mrf.mxu3  ;;  %v15078_v3 = vpack.c.bf16 %v14615_v53, %v14615_v53  ;;  %v4142_v7 = vadd.f32 %v15053_v27, %v4129_v60  ;;  %v11388_v53 = vld [vmem:[#allocation9 + $0x1e0] sm:$0xf0] }
 0x341   :  { %v11706_v56 = vld [vmem:[#allocation9 + $0x440] sm:$0xf]  ;;  %v12667_v30 = vor.u32 %v14388_v11, %v12666_v9  ;;  %v14128_v34 = vld [vmem:[#allocation9 + $0x3c4] sm:$0xf] }
 0x342   :  { %v14148_v13 = vld [vmem:[#allocation9 + $0x45c] sm:$0xf0]  ;;  %7529 = vmatpush.bf16.msra.mxu2 %v11739_v62  ;;  %7505 = vmatpush.bf16.msra.mxu0 %v11163_v18  ;;  %v15080_v62 = vpack.c.bf16 %v14617_v55, %v14617_v55 }
 0x343   :  { %v11962_v20 = vld [vmem:[#allocation9 + $0x640] sm:$0xf]  ;;  %v11707_v33 = vor.u32 %v14148_v13, %v11706_v56 }
 0x344   :  { %v14212_v22 = vld [vmem:[#allocation9 + $0x65c] sm:$0xf0]  ;;  %7542 = vmatpush.bf16.msra.mxu3 %v11995_v10  ;;  %7518 = vmatpush.bf16.msra.mxu1 %v11419_v28  ;;  %v15088_v28 = vpop.f32.mrf.mxu1 }
 0x345   :  { %v12378_v29 = vld [vmem:[#allocation9 + $0x980] sm:$0xf]  ;;  %v11963_v38 = vor.u32 %v14212_v22, %v11962_v20  ;;  %7506 = vmatmul.bf16.vlgmr.msra.gmra.mxu0 %v15070_v21  ;;  %v4155_v20 = vadd.f32 %v15055_v58, %v4142_v7  ;;  %v15086_v22 = vpop.f32.mrf.mxu0  ;;  %v11356_v7 = vld [vmem:[#allocation9 + $0x1a0] sm:$0xf0] }
 0x346   :  { %v14316_v31 = vld [vmem:[#allocation9 + $0x99c] sm:$0xf0]  ;;  %7550 = vmatpush.bf16.msrb.mxu0 %v12411_v15  ;;  %7530 = vmatpush.bf16.msra.mxu2 %v11707_v33 }
 0x347   :  { %v12634_v17 = vld [vmem:[#allocation9 + $0xb80] sm:$0xf]  ;;  %v12379_v44 = vor.u32 %v14316_v31, %v12378_v29  ;;  %7519 = vmatmul.bf16.vlgmr.msra.gmra.mxu1 %v15072_v43  ;;  %v4168_v29 = vadd.f32 %v15062_v4, %v4155_v20 }
 0x348   :  { %v14380_v32 = vld [vmem:[#allocation9 + $0xb9c] sm:$0xf0]  ;;  %7563 = vmatpush.bf16.msrb.mxu1 %v12667_v30  ;;  %7543 = vmatpush.bf16.msra.mxu3 %v11963_v38 }
 0x349   :  { %v11674_v37 = vld [vmem:[#allocation9 + $0x400] sm:$0xf]  ;;  %v12635_v45 = vor.u32 %v14380_v32, %v12634_v17 }
 0x34a   :  { %v14140_v25 = vld [vmem:[#allocation9 + $0x41c] sm:$0xf0]  ;;  %7551 = vmatpush.bf16.msrb.mxu0 %v12379_v44 }
 0x34b   :  { %v11930_v19 = vld [vmem:[#allocation9 + $0x600] sm:$0xf]  ;;  %v11675_v46 = vor.u32 %v14140_v25, %v11674_v37  ;;  %v4181_v25 = vadd.f32 %v15065_v61, %v4168_v29  ;;  %v14048_v29 = vld [vmem:[#allocation9 + $0x144] sm:$0xf] }
 0x34c   :  { %v14204_v40 = vld [vmem:[#allocation9 + $0x61c] sm:$0xf0]  ;;  %7564 = vmatpush.bf16.msrb.mxu1 %v12635_v45 }
 0x34d   :  { %v12922_v42 = vld [vmem:[#allocation9 + $0xdc0] sm:$0xf]  ;;  %v11931_v48 = vor.u32 %v14204_v40, %v11930_v19  ;;  %7531 = vmatpush.bf16.msra.mxu2 %v11675_v46  ;;  %v4195_v44 = vpop.f32.mrf.mxu0  ;;  %v4208_v46 = vpop.f32.mrf.mxu1  ;;  %14620 = vtanh.f32 %v4181_v25 }
 0x34e   :  { %v14452_v41 = vld [vmem:[#allocation9 + $0xddc] sm:$0xf0]  ;;  %v14104_v44 = vld [vmem:[#allocation9 + $0x304] sm:$0xf] }
 0x34f   :  { %v12346_v47 = vld [vmem:[#allocation9 + $0x940] sm:$0xf]  ;;  %v12923_v52 = vor.u32 %v14452_v41, %v12922_v42  ;;  %7544 = vmatpush.bf16.msra.mxu3 %v11931_v48  ;;  %v14176_v46 = vld [vmem:[#allocation9 + $0x544] sm:$0xf] }
 0x350   :  { %v14308_v12 = vld [vmem:[#allocation9 + $0x95c] sm:$0xf0]  ;;  %7532 = vmatmul.bf16.vlgmr.msra.gmra.mxu2 %v15078_v3 }
 0x351   :  { %v12602_v49 = vld [vmem:[#allocation9 + $0xb40] sm:$0xf]  ;;  %v12347_v59 = vor.u32 %v14308_v12, %v12346_v47  ;;  %7576 = vmatpush.bf16.msrb.mxu2 %v12923_v52  ;;  %v14064_v52 = vld [vmem:[#allocation9 + $0x1c4] sm:$0xf] }
 0x352   :  { %v14372_v50 = vld [vmem:[#allocation9 + $0xb5c] sm:$0xf0]  ;;  %7545 = vmatmul.bf16.vlgmr.msra.gmra.mxu3 %v15080_v62 }
 0x353   :  { %v12890_v54 = vld [vmem:[#allocation9 + $0xd80] sm:$0xf]  ;;  %v12603_v0 = vor.u32 %v14372_v50, %v12602_v49  ;;  %7552 = vmatpush.bf16.msrb.mxu0 %v12347_v59  ;;  %v15095_v59 = vpop.f32.mrf.mxu3 }
 0x354   :  { %v14444_v16 = vld [vmem:[#allocation9 + $0xd9c] sm:$0xf0] }
 0x355   :  { %v12314_v1 = vld [vmem:[#allocation9 + $0x900] sm:$0xf]  ;;  %v12891_v6 = vor.u32 %v14444_v16, %v12890_v54  ;;  %7565 = vmatpush.bf16.msrb.mxu1 %v12603_v0  ;;  %v15093_v54 = vpop.f32.mrf.mxu2  ;;  %v11644_v16 = vld [vmem:[#allocation9 + $0x3e0] sm:$0xf0] }
 0x356   :  { %v14300_v2 = vld [vmem:[#allocation9 + $0x91c] sm:$0xf0] }
 0x357   :  { %v12570_v63 = vld [vmem:[#allocation9 + $0xb00] sm:$0xf]  ;;  %v12315_v57 = vor.u32 %v14300_v2, %v12314_v1  ;;  %7577 = vmatpush.bf16.msrb.mxu2 %v12891_v6  ;;  %v11391_v1 = vor.u32 %v14064_v52, %v11388_v53  ;;  %v14619_v2 = vpop.eup %14618  ;;  %v14056_v6 = vld [vmem:[#allocation9 + $0x184] sm:$0xf] }
 0x358   :  { %v14364_v5 = vld [vmem:[#allocation9 + $0xb1c] sm:$0xf0]  ;;  %v11260_v52 = vld [vmem:[#allocation9 + $0xe0] sm:$0xf0] }
 0x359   :  { %v12858_v8 = vld [vmem:[#allocation9 + $0xd40] sm:$0xf]  ;;  %v12571_v10 = vor.u32 %v14364_v5, %v12570_v63  ;;  %7553 = vmatpush.bf16.msrb.mxu0 %v12315_v57  ;;  %v11647_v63 = vor.u32 %v14128_v34, %v11644_v16  ;;  %v11612_v57 = vld [vmem:[#allocation9 + $0x3a0] sm:$0xf0] }
 0x35a   :  { %v14436_v9 = vld [vmem:[#allocation9 + $0xd5c] sm:$0xf0]  ;;  %v11516_v34 = vld [vmem:[#allocation9 + $0x2e0] sm:$0xf0] }
 0x35b   :  { %v12282_v11 = vld [vmem:[#allocation9 + $0x8c0] sm:$0xf]  ;;  %v12859_v18 = vor.u32 %v14436_v9, %v12858_v8  ;;  %7566 = vmatpush.bf16.msrb.mxu1 %v12571_v10  ;;  %v14120_v8 = vld [vmem:[#allocation9 + $0x384] sm:$0xf]  ;;  %v14621_v9 = vpop.eup %14620 }
 0x35c   :  { %v14292_v56 = vld [vmem:[#allocation9 + $0x8dc] sm:$0xf0]  ;;  %v15099_v20 = vpack.c.bf16 %v14621_v9, %v14621_v9  ;;  %v14088_v9 = vld [vmem:[#allocation9 + $0x284] sm:$0xf] }
 0x35d   :  { %v12538_v13 = vld [vmem:[#allocation9 + $0xac0] sm:$0xf]  ;;  %v12283_v15 = vor.u32 %v14292_v56, %v12282_v11  ;;  %7578 = vmatpush.bf16.msrb.mxu2 %v12859_v18  ;;  %v14192_v56 = vld [vmem:[#allocation9 + $0x5c4] sm:$0xf]  ;;  %v11359_v18 = vor.u32 %v14056_v6, %v11356_v7 }
 0x35e   :  { %v14356_v14 = vld [vmem:[#allocation9 + $0xadc] sm:$0xf0] }
 0x35f   :  { %v12826_v27 = vld [vmem:[#allocation9 + $0xd00] sm:$0xf]  ;;  %v12539_v26 = vor.u32 %v14356_v14, %v12538_v13  ;;  %7554 = vmatpush.bf16.msrb.mxu0 %v12283_v15  ;;  %v11900_v13 = vld [vmem:[#allocation9 + $0x5e0] sm:$0xf0]  ;;  %v15097_v14 = vpack.c.bf16 %v14619_v2, %v14619_v2 }
 0x360   :  { %v14428_v23 = vld [vmem:[#allocation9 + $0xd1c] sm:$0xf0] }
 0x361   :  { %v12250_v30 = vld [vmem:[#allocation9 + $0x880] sm:$0xf]  ;;  %v12827_v32 = vor.u32 %v14428_v23, %v12826_v27  ;;  %7567 = vmatpush.bf16.msrb.mxu1 %v12539_v26  ;;  %v990_v27 = vperm.slane %v15058_v51, 6  ;;  %v11615_v23 = vor.u32 %v14120_v8, %v11612_v57  ;;  %v11324_v26 = vld [vmem:[#allocation9 + $0x160] sm:$0xf0] }
 0x362   :  { %v14284_v33 = vld [vmem:[#allocation9 + $0x89c] sm:$0xf0]  ;;  %v14024_v8 = vld [vmem:[#allocation9 + $0x84] sm:$0xf] }
 0x363   :  { %v12506_v31 = vld [vmem:[#allocation9 + $0xa80] sm:$0xf]  ;;  %v12251_v37 = vor.u32 %v14284_v33, %v12250_v30  ;;  %7579 = vmatpush.bf16.msrb.mxu2 %v12827_v32  ;;  %v4221_v30 = vpop.f32.mrf.mxu2  ;;  %v14112_v33 = vld [vmem:[#allocation9 + $0x344] sm:$0xf] }
 0x364   :  { %v14348_v17 = vld [vmem:[#allocation9 + $0xa9c] sm:$0xf0]  ;;  %v14184_v32 = vld [vmem:[#allocation9 + $0x584] sm:$0xf] }
 0x365   :  { %v12794_v38 = vld [vmem:[#allocation9 + $0xcc0] sm:$0xf]  ;;  %v12507_v19 = vor.u32 %v14348_v17, %v12506_v31  ;;  %7555 = vmatpush.bf16.msrb.mxu0 %v12251_v37  ;;  %v11580_v31 = vld [vmem:[#allocation9 + $0x360] sm:$0xf0]  ;;  %v11903_v17 = vor.u32 %v14192_v56, %v11900_v13 }
 0x366   :  { %v14420_v58 = vld [vmem:[#allocation9 + $0xcdc] sm:$0xf0]  ;;  %v11484_v57 = vld [vmem:[#allocation9 + $0x2a0] sm:$0xf0] }
 0x367   :  { %v12218_v39 = vld [vmem:[#allocation9 + $0x840] sm:$0xf]  ;;  %v12795_v41 = vor.u32 %v14420_v58, %v12794_v38  ;;  %7568 = vmatpush.bf16.msrb.mxu1 %v12507_v19  ;;  %v4234_v38 = vpop.f32.mrf.mxu3  ;;  %v11868_v58 = vld [vmem:[#allocation9 + $0x5a0] sm:$0xf0]  ;;  %v11327_v19 = vor.u32 %v14048_v29, %v11324_v26 }
 0x368   :  { %v14276_v40 = vld [vmem:[#allocation9 + $0x85c] sm:$0xf0]  ;;  %v11772_v56 = vld [vmem:[#allocation9 + $0x4e0] sm:$0xf0] }
 0x369   :  { %v12474_v4 = vld [vmem:[#allocation9 + $0xa40] sm:$0xf]  ;;  %v12219_v47 = vor.u32 %v14276_v40, %v12218_v39  ;;  %7580 = vmatpush.bf16.msrb.mxu2 %v12795_v41  ;;  %v11583_v40 = vor.u32 %v14112_v33, %v11580_v31  ;;  %v4194_v41 = vadd.f32 %v15086_v22, %v990_v27  ;;  %v14096_v22 = vld [vmem:[#allocation9 + $0x2c4] sm:$0xf] }
 0x36a   :  { %v14340_v42 = vld [vmem:[#allocation9 + $0xa5c] sm:$0xf0]  ;;  %v11519_v7 = vor.u32 %v14096_v22, %v11516_v34  ;;  %v14016_v29 = vld [vmem:[#allocation9 + $0x44] sm:$0xf] }
 0x36b   :  { %v12762_v24 = vld [vmem:[#allocation9 + $0xc80] sm:$0xf]  ;;  %v12475_v61 = vor.u32 %v14340_v42, %v12474_v4  ;;  %7556 = vmatpush.bf16.msrb.mxu0 %v12219_v47  ;;  %v14040_v4 = vld [vmem:[#allocation9 + $0x104] sm:$0xf]  ;;  %v4207_v53 = vadd.f32 %v15088_v28, %v4194_v41 }
 0x36c   :  { %v14412_v45 = vld [vmem:[#allocation9 + $0xc9c] sm:$0xf0]  ;;  %v11292_v42 = vld [vmem:[#allocation9 + $0x120] sm:$0xf0] }
 0x36d   :  { %v12186_v12 = vld [vmem:[#allocation9 + $0x800] sm:$0xf]  ;;  %v12763_v50 = vor.u32 %v14412_v45, %v12762_v24  ;;  %7569 = vmatpush.bf16.msrb.mxu1 %v12475_v61  ;;  %v11548_v24 = vld [vmem:[#allocation9 + $0x320] sm:$0xf0]  ;;  %v11871_v45 = vor.u32 %v14184_v32, %v11868_v58  ;;  %v4220_v2 = vadd.f32 %v15093_v54, %v4207_v53 }
 0x36e   :  { %v14268_v35 = vld [vmem:[#allocation9 + $0x81c] sm:$0xf0]  ;;  %v11836_v47 = vld [vmem:[#allocation9 + $0x560] sm:$0xf0] }
 0x36f   :  { %v12442_v48 = vld [vmem:[#allocation9 + $0xa00] sm:$0xf]  ;;  %v12187_v60 = vor.u32 %v14268_v35, %v12186_v12  ;;  %7581 = vmatpush.bf16.msrb.mxu2 %v12763_v50  ;;  %v11295_v35 = vor.u32 %v14040_v4, %v11292_v42  ;;  %v14032_v50 = vld [vmem:[#allocation9 + $0xc4] sm:$0xf]  ;;  %v11839_v16 = vor.u32 %v14176_v46, %v11836_v47  ;;  %v4233_v27 = vadd.f32 %v15095_v59, %v4220_v2  ;;  %v4284_v22 = vpop.f32.mrf.mxu3 }
 0x370   :  { %v14332_v49 = vld [vmem:[#allocation9 + $0xa1c] sm:$0xf0]  ;;  %v11228_v28 = vld [vmem:[#allocation9 + $0xa0] sm:$0xf0] }
 0x371   :  { %v12730_v55 = vld [vmem:[#allocation9 + $0xc40] sm:$0xf]  ;;  %v12443_v0 = vor.u32 %v14332_v49, %v12442_v48  ;;  %7557 = vmatpush.bf16.msrb.mxu0 %v12187_v60  ;;  %v11551_v49 = vor.u32 %v14104_v44, %v11548_v24  ;;  %v11804_v60 = vld [vmem:[#allocation9 + $0x520] sm:$0xf0]  ;;  %v11231_v54 = vor.u32 %v14024_v8, %v11228_v28 }
 0x372   :  { %v12731_v5 = vor.u32 %v14404_v36, %v12730_v55  ;;  %v12698_v10 = vld [vmem:[#allocation9 + $0xc00] sm:$0xf]  ;;  %v14168_v55 = vld [vmem:[#allocation9 + $0x504] sm:$0xf]  ;;  %v4245_v36 = vpop.f32.mrf.mxu0 }
 0x373   :  { %v14396_v11 = vld [vmem:[#allocation9 + $0xc1c] sm:$0xf0]  ;;  %7570 = vmatpush.bf16.msrb.mxu1 %v12443_v0  ;;  %v11196_v26 = vld [vmem:[#allocation9 + $0x60] sm:$0xf0]  ;;  %v4246_v30 = vadd.f32 %v4245_v36, %v4233_v27 }
 0x374   :  { %7582 = vmatpush.bf16.msrb.mxu2 %v12731_v5  ;;  %v12699_v15 = vor.u32 %v14396_v11, %v12698_v10  ;;  %7558 = vmatmul.bf16.vlgmr.msrb.gmra.mxu0 %v15097_v14  ;;  %v13178_v37 = vld [vmem:[#allocation9 + $0xfc0] sm:$0xf]  ;;  %v11263_v5 = vor.u32 %v14032_v50, %v11260_v52  ;;  %v11807_v10 = vor.u32 %v14168_v55, %v11804_v60  ;;  %v14160_v11 = vld [vmem:[#allocation9 + $0x4c4] sm:$0xf] }
 0x375   :  { %7602 = vmatpush.bf16.msra.mxu0 %v11391_v1  ;;  %v14516_v25 = vld [vmem:[#allocation9 + $0xfdc] sm:$0xf0]  ;;  %v14080_v33 = vld [vmem:[#allocation9 + $0x244] sm:$0xf]  ;;  %v11199_v59 = vor.u32 %v14016_v29, %v11196_v26 }
 0x376   :  { %7571 = vmatmul.bf16.vlgmr.msrb.gmra.mxu1 %v15099_v20  ;;  %v13179_v39 = vor.u32 %v14516_v25, %v13178_v37  ;;  %v13146_v12 = vld [vmem:[#allocation9 + $0xf80] sm:$0xf]  ;;  %v11452_v31 = vld [vmem:[#allocation9 + $0x260] sm:$0xf0] }
 0x377   :  { %7615 = vmatpush.bf16.msra.mxu1 %v11647_v63  ;;  %v14508_v61 = vld [vmem:[#allocation9 + $0xf9c] sm:$0xf0]  ;;  %v4258_v63 = vpop.f32.mrf.mxu1  ;;  %v14152_v32 = vld [vmem:[#allocation9 + $0x484] sm:$0xf]  ;;  %v11455_v41 = vor.u32 %v14080_v33, %v11452_v31  ;;  %v4286_v33 = vpop.f32.mrf.mxu3 }
 0x378   :  { %7583 = vmatpush.bf16.msrb.mxu2 %v12699_v15  ;;  %7589 = vmatpush.bf16.msrb.mxu3 %v13179_v39  ;;  %v13147_v48 = vor.u32 %v14508_v61, %v13146_v12  ;;  %v13114_v0 = vld [vmem:[#allocation9 + $0xf40] sm:$0xf]  ;;  %v11487_v15 = vor.u32 %v14088_v9, %v11484_v57  ;;  %v11740_v58 = vld [vmem:[#allocation9 + $0x4a0] sm:$0xf0]  ;;  %v4259_v46 = vadd.f32 %v4258_v63, %v4246_v30 }
 0x379   :  { %7603 = vmatpush.bf16.msra.mxu0 %v11359_v18  ;;  %v14500_v1 = vld [vmem:[#allocation9 + $0xf5c] sm:$0xf0]  ;;  %v14008_v39 = vld [vmem:[#allocation9 + $0x4] sm:$0xf]  ;;  %v11743_v47 = vor.u32 %v14152_v32, %v11740_v58 }
 0x37a   :  { %v13115_v6 = vor.u32 %v14500_v1, %v13114_v0  ;;  %v13082_v13 = vld [vmem:[#allocation9 + $0xf00] sm:$0xf]  ;;  %v4247_v38 = vpop.f32.mrf.mxu0  ;;  %v14072_v4 = vld [vmem:[#allocation9 + $0x204] sm:$0xf] }
 0x37b   :  { %7616 = vmatpush.bf16.msra.mxu1 %v11615_v23  ;;  %v14492_v18 = vld [vmem:[#allocation9 + $0xf1c] sm:$0xf0]  ;;  %v11420_v44 = vld [vmem:[#allocation9 + $0x220] sm:$0xf0] }
 0x37c   :  { %7628 = vmatpush.bf16.msra.mxu2 %v11903_v17  ;;  %7590 = vmatpush.bf16.msrb.mxu3 %v13147_v48  ;;  %v13083_v23 = vor.u32 %v14492_v18, %v13082_v13  ;;  %v11775_v17 = vor.u32 %v14160_v11, %v11772_v56  ;;  %v13050_v37 = vld [vmem:[#allocation9 + $0xec0] sm:$0xf]  ;;  %v14320_v24 = vld [vmem:[#allocation9 + $0x9c4] sm:$0xf]  ;;  %v4271_v48 = vpop.f32.mrf.mxu2  ;;  %v11423_v55 = vor.u32 %v14072_v4, %v11420_v44 }
 0x37d   :  { %7604 = vmatpush.bf16.msra.mxu0 %v11327_v19  ;;  %v14484_v25 = vld [vmem:[#allocation9 + $0xedc] sm:$0xf0]  ;;  %v14384_v12 = vld [vmem:[#allocation9 + $0xbc4] sm:$0xf]  ;;  %v4272_v53 = vadd.f32 %v4271_v48, %v4259_v46 }
 0x37e   :  { %v13051_v42 = vor.u32 %v14484_v25, %v13050_v37  ;;  %v12668_v61 = vld [vmem:[#allocation9 + $0xbe0] sm:$0xf0]  ;;  %v13018_v50 = vld [vmem:[#allocation9 + $0xe80] sm:$0xf] }
 0x37f   :  { %7617 = vmatpush.bf16.msra.mxu1 %v11583_v40  ;;  %v4260_v19 = vpop.f32.mrf.mxu1  ;;  %v11164_v40 = vld [vmem:[#allocation9 + $0x20] sm:$0xf0]  ;;  %v14476_v52 = vld [vmem:[#allocation9 + $0xe9c] sm:$0xf0]  ;;  %v4285_v1 = vadd.f32 %v4284_v22, %v4272_v53  ;;  %v12671_v2 = vor.u32 %v14384_v12, %v12668_v61 }
 0x380   :  { %7629 = vmatpush.bf16.msra.mxu2 %v11871_v45  ;;  %7591 = vmatpush.bf16.msrb.mxu3 %v13115_v6  ;;  %v12412_v45 = vld [vmem:[#allocation9 + $0x9e0] sm:$0xf0]  ;;  %v11167_v34 = vor.u32 %v14008_v39, %v11164_v40  ;;  %v12986_v28 = vld [vmem:[#allocation9 + $0xe40] sm:$0xf] }
 0x381   :  { %7605 = vmatpush.bf16.msra.mxu0 %v11295_v35  ;;  %v14144_v35 = vld [vmem:[#allocation9 + $0x444] sm:$0xf]  ;;  %v12415_v36 = vor.u32 %v14320_v24, %v12412_v45  ;;  %v14468_v9 = vld [vmem:[#allocation9 + $0xe5c] sm:$0xf0]  ;;  %14622 = vtanh.f32 %v4285_v1 }
 0x382   :  { %v14312_v60 = vld [vmem:[#allocation9 + $0x984] sm:$0xf]  ;;  %v12987_v57 = vor.u32 %v14468_v9, %v12986_v28  ;;  %v12954_v26 = vld [vmem:[#allocation9 + $0xe00] sm:$0xf]  ;;  %v15113_v22 = vpop.f32.mrf.mxu0 }
 0x383   :  { %7618 = vmatpush.bf16.msra.mxu1 %v11551_v49  ;;  %v11708_v49 = vld [vmem:[#allocation9 + $0x460] sm:$0xf0]  ;;  %v14460_v30 = vld [vmem:[#allocation9 + $0xe1c] sm:$0xf0] }
 0x384   :  { %7630 = vmatpush.bf16.msra.mxu2 %v11839_v16  ;;  %7592 = vmatpush.bf16.msrb.mxu3 %v13083_v23  ;;  %v13019_v16 = vor.u32 %v14476_v52, %v13018_v50  ;;  %v12380_v0 = vld [vmem:[#allocation9 + $0x9a0] sm:$0xf0]  ;;  %v11711_v63 = vor.u32 %v14144_v35, %v11708_v49  ;;  %v12955_v31 = vor.u32 %v14460_v30, %v12954_v26 }
 0x385   :  { %7606 = vmatpush.bf16.msra.mxu0 %v11263_v5  ;;  %v14376_v5 = vld [vmem:[#allocation9 + $0xb84] sm:$0xf] }
 0x386   :  { %v12636_v6 = vld [vmem:[#allocation9 + $0xba0] sm:$0xf0] }
 0x387   :  { %7619 = vmatpush.bf16.msra.mxu1 %v11519_v7  ;;  %v14136_v7 = vld [vmem:[#allocation9 + $0x404] sm:$0xf]  ;;  %v12639_v13 = vor.u32 %v14376_v5, %v12636_v6  ;;  %v14623_v37 = vpop.eup %14622 }
 0x388   :  { %7631 = vmatpush.bf16.msra.mxu2 %v11807_v10  ;;  %7593 = vmatpush.bf16.msrb.mxu3 %v13051_v42  ;;  %v11676_v8 = vld [vmem:[#allocation9 + $0x420] sm:$0xf0]  ;;  %v12383_v10 = vor.u32 %v14312_v60, %v12380_v0  ;;  %v15110_v4 = vpack.c.bf16 %v14623_v37, %v14623_v37 }
 0x389   :  { %7607 = vmatpush.bf16.msra.mxu0 %v11231_v54  ;;  %v14304_v11 = vld [vmem:[#allocation9 + $0x944] sm:$0xf]  ;;  %v11679_v18 = vor.u32 %v14136_v7, %v11676_v8 }
 0x38a   :  { %v12348_v56 = vld [vmem:[#allocation9 + $0x960] sm:$0xf0]  ;;  %7584 = vmatmul.bf16.vlgmr.msrb.gmra.mxu2 %v15110_v4 }
 0x38b   :  { %7620 = vmatpush.bf16.msra.mxu1 %v11487_v15  ;;  %v14368_v27 = vld [vmem:[#allocation9 + $0xb44] sm:$0xf]  ;;  %v4273_v15 = vpop.f32.mrf.mxu2  ;;  %v12351_v38 = vor.u32 %v14304_v11, %v12348_v56 }
 0x38c   :  { %7632 = vmatpush.bf16.msra.mxu2 %v11775_v17  ;;  %7594 = vmatpush.bf16.msrb.mxu3 %v13019_v16  ;;  %v12604_v54 = vld [vmem:[#allocation9 + $0xb60] sm:$0xf0] }
 0x38d   :  { %7608 = vmatpush.bf16.msra.mxu0 %v11199_v59  ;;  %v14448_v23 = vld [vmem:[#allocation9 + $0xdc4] sm:$0xf]  ;;  %v12607_v25 = vor.u32 %v14368_v27, %v12604_v54 }
 0x38e   :  { %v12924_v29 = vld [vmem:[#allocation9 + $0xde0] sm:$0xf0] }
 0x38f   :  { %7621 = vmatpush.bf16.msra.mxu1 %v11455_v41  ;;  %v14256_v17 = vld [vmem:[#allocation9 + $0x7c4] sm:$0xf]  ;;  %v12927_v19 = vor.u32 %v14448_v23, %v12924_v29  ;;  %v4299_v29 = vpop.f32.mrf.mxu0 }
 0x390   :  { %7633 = vmatpush.bf16.msra.mxu2 %v11743_v47  ;;  %7595 = vmatpush.bf16.msrb.mxu3 %v12987_v57  ;;  %v12156_v32 = vld [vmem:[#allocation9 + $0x7e0] sm:$0xf0] }
 0x391   :  { %7609 = vmatpush.bf16.msra.mxu0 %v11167_v34  ;;  %v12159_v58 = vor.u32 %v14256_v17, %v12156_v32  ;;  %v14296_v59 = vld [vmem:[#allocation9 + $0x904] sm:$0xf] }
 0x392   :  { %v12316_v39 = vld [vmem:[#allocation9 + $0x920] sm:$0xf0] }
 0x393   :  { %7622 = vmatpush.bf16.msra.mxu1 %v11423_v55  ;;  %v14360_v40 = vld [vmem:[#allocation9 + $0xb04] sm:$0xf]  ;;  %v12319_v24 = vor.u32 %v14296_v59, %v12316_v39  ;;  %v15115_v55 = vpop.f32.mrf.mxu1 }
 0x394   :  { %7634 = vmatpush.bf16.msra.mxu2 %v11711_v63  ;;  %7610 = vmatmul.bf16.vlgmr.msra.gmra.mxu0 %v15070_v21  ;;  %v12572_v42 = vld [vmem:[#allocation9 + $0xb20] sm:$0xf0] }
 0x395   :  { %7654 = vmatpush.bf16.msrb.mxu0 %v12415_v36  ;;  %v14440_v41 = vld [vmem:[#allocation9 + $0xd84] sm:$0xf]  ;;  %7596 = vmatpush.bf16.msrb.mxu3 %v12955_v31  ;;  %v12575_v47 = vor.u32 %v14360_v40, %v12572_v42  ;;  %v11394_v40 = vld [vmem:[#allocation9 + $0x1c8] sm:$0xf]  ;;  %v15117_v42 = vpop.f32.mrf.mxu2 }
 0x396   :  { %7623 = vmatmul.bf16.vlgmr.msra.gmra.mxu1 %v15072_v43  ;;  %v12892_v44 = vld [vmem:[#allocation9 + $0xda0] sm:$0xf0] }
 0x397   :  { %7667 = vmatpush.bf16.msrb.mxu1 %v12671_v2  ;;  %v14248_v45 = vld [vmem:[#allocation9 + $0x784] sm:$0xf]  ;;  %v12895_v12 = vor.u32 %v14440_v41, %v12892_v44  ;;  %v14069_v41 = vld [vmem:[#allocation9 + $0x1e4] sm:$0xf0] }
 0x398   :  { %7635 = vmatpush.bf16.msra.mxu2 %v11679_v18  ;;  %v12124_v46 = vld [vmem:[#allocation9 + $0x7a0] sm:$0xf0]  ;;  %v11650_v44 = vld [vmem:[#allocation9 + $0x3c8] sm:$0xf] }
 0x399   :  { %7655 = vmatpush.bf16.msrb.mxu0 %v12383_v10  ;;  %7641 = vmatpush.bf16.msra.mxu3 %v12159_v58  ;;  %v14288_v61 = vld [vmem:[#allocation9 + $0x8c4] sm:$0xf]  ;;  %v12127_v49 = vor.u32 %v14248_v45, %v12124_v46  ;;  %v15119_v45 = vpop.f32.mrf.mxu3 }
 0x39a   :  { %v12284_v35 = vld [vmem:[#allocation9 + $0x8e0] sm:$0xf0] }
 0x39b   :  { %7668 = vmatpush.bf16.msrb.mxu1 %v12639_v13  ;;  %v14352_v48 = vld [vmem:[#allocation9 + $0xac4] sm:$0xf]  ;;  %v12287_v36 = vor.u32 %v14288_v61, %v12284_v35  ;;  %v4312_v26 = vpop.f32.mrf.mxu1  ;;  %7636 = vmatmul.bf16.vlgmr.msra.gmra.mxu2 %v15078_v3 }
 0x39c   :  { %7680 = vmatpush.bf16.msrb.mxu2 %v12927_v19  ;;  %v12540_v50 = vld [vmem:[#allocation9 + $0xae0] sm:$0xf0] }
 0x39d   :  { %7656 = vmatpush.bf16.msrb.mxu0 %v12351_v38  ;;  %v14432_v52 = vld [vmem:[#allocation9 + $0xd44] sm:$0xf]  ;;  %7642 = vmatpush.bf16.msra.mxu3 %v12127_v49  ;;  %v12543_v0 = vor.u32 %v14352_v48, %v12540_v50  ;;  %v11395_v49 = vor.u32 %v14069_v41, %v11394_v40  ;;  %v14037_v41 = vld [vmem:[#allocation9 + $0xe4] sm:$0xf0] }
 0x39e   :  { %v12860_v53 = vld [vmem:[#allocation9 + $0xd60] sm:$0xf0] }
 0x39f   :  { %7669 = vmatpush.bf16.msrb.mxu1 %v12607_v25  ;;  %v14240_v34 = vld [vmem:[#allocation9 + $0x744] sm:$0xf]  ;;  %v12863_v1 = vor.u32 %v14432_v52, %v12860_v53 }
 0x3a0   :  { %v12092_v16 = vld [vmem:[#allocation9 + $0x760] sm:$0xf0]  ;;  %7681 = vmatpush.bf16.msrb.mxu2 %v12895_v12 }
 0x3a1   :  { %7657 = vmatpush.bf16.msrb.mxu0 %v12319_v24  ;;  %v12095_v60 = vor.u32 %v14240_v34, %v12092_v16  ;;  %v14280_v2 = vld [vmem:[#allocation9 + $0x884] sm:$0xf]  ;;  %v14133_v24 = vld [vmem:[#allocation9 + $0x3e4] sm:$0xf0] }
 0x3a2   :  { %v12252_v63 = vld [vmem:[#allocation9 + $0x8a0] sm:$0xf0]  ;;  %v11651_v50 = vor.u32 %v14133_v24, %v11650_v44  ;;  %v11362_v34 = vld [vmem:[#allocation9 + $0x188] sm:$0xf]  ;;  %v4349_v24 = vpop.f32.mrf.mxu0 }
 0x3a3   :  { %7670 = vmatpush.bf16.msrb.mxu1 %v12575_v47  ;;  %v14344_v5 = vld [vmem:[#allocation9 + $0xa84] sm:$0xf]  ;;  %7643 = vmatpush.bf16.msra.mxu3 %v12095_v60  ;;  %v12255_v28 = vor.u32 %v14280_v2, %v12252_v63  ;;  %v14061_v16 = vld [vmem:[#allocation9 + $0x1a4] sm:$0xf0]  ;;  %v991_v2 = vperm.slane %v15058_v51, 7  ;;  %v4338_v51 = vpop.f32.mrf.mxu3 }
 0x3a4   :  { %v12508_v6 = vld [vmem:[#allocation9 + $0xaa0] sm:$0xf0]  ;;  %7682 = vmatpush.bf16.msrb.mxu2 %v12863_v1  ;;  %v14125_v60 = vld [vmem:[#allocation9 + $0x3a4] sm:$0xf0] }
 0x3a5   :  { %v14424_v7 = vld [vmem:[#allocation9 + $0xd04] sm:$0xf]  ;;  %7658 = vmatpush.bf16.msrb.mxu0 %v12287_v36  ;;  %v12511_v10 = vor.u32 %v14344_v5, %v12508_v6  ;;  %v11618_v36 = vld [vmem:[#allocation9 + $0x388] sm:$0xf] }
 0x3a6   :  { %v12828_v8 = vld [vmem:[#allocation9 + $0xd20] sm:$0xf0]  ;;  %v11522_v44 = vld [vmem:[#allocation9 + $0x2c8] sm:$0xf] }
 0x3a7   :  { %v14232_v9 = vld [vmem:[#allocation9 + $0x704] sm:$0xf]  ;;  %7671 = vmatpush.bf16.msrb.mxu1 %v12543_v0  ;;  %v12831_v11 = vor.u32 %v14424_v7, %v12828_v8  ;;  %v11363_v7 = vor.u32 %v14061_v16, %v11362_v34  ;;  %v11619_v8 = vor.u32 %v14125_v60, %v11618_v36  ;;  %v11810_v34 = vld [vmem:[#allocation9 + $0x508] sm:$0xf] }
 0x3a8   :  { %v12060_v57 = vld [vmem:[#allocation9 + $0x720] sm:$0xf0]  ;;  %v14173_v16 = vld [vmem:[#allocation9 + $0x524] sm:$0xf0] }
 0x3a9   :  { %v14272_v56 = vld [vmem:[#allocation9 + $0x844] sm:$0xf]  ;;  %v12063_v27 = vor.u32 %v14232_v9, %v12060_v57  ;;  %7659 = vmatpush.bf16.msrb.mxu0 %v12255_v28  ;;  %7683 = vmatpush.bf16.msrb.mxu2 %v12831_v11  ;;  %v11330_v9 = vld [vmem:[#allocation9 + $0x148] sm:$0xf] }
 0x3aa   :  { %v12220_v13 = vld [vmem:[#allocation9 + $0x860] sm:$0xf0]  ;;  %v14053_v57 = vld [vmem:[#allocation9 + $0x164] sm:$0xf0] }
 0x3ab   :  { %v14336_v18 = vld [vmem:[#allocation9 + $0xa44] sm:$0xf]  ;;  %7644 = vmatpush.bf16.msra.mxu3 %v12063_v27  ;;  %v12223_v30 = vor.u32 %v14272_v56, %v12220_v13  ;;  %7672 = vmatpush.bf16.msrb.mxu1 %v12511_v10  ;;  %v4325_v10 = vpop.f32.mrf.mxu2  ;;  %v11586_v11 = vld [vmem:[#allocation9 + $0x348] sm:$0xf]  ;;  %v11331_v29 = vor.u32 %v14053_v57, %v11330_v9 }
 0x3ac   :  { %v12476_v54 = vld [vmem:[#allocation9 + $0xa60] sm:$0xf0]  ;;  %v14117_v56 = vld [vmem:[#allocation9 + $0x364] sm:$0xf0] }
 0x3ad   :  { %v14416_v23 = vld [vmem:[#allocation9 + $0xcc4] sm:$0xf]  ;;  %v12479_v32 = vor.u32 %v14336_v18, %v12476_v54  ;;  %7660 = vmatpush.bf16.msrb.mxu0 %v12223_v30  ;;  %v11906_v13 = vld [vmem:[#allocation9 + $0x5c8] sm:$0xf]  ;;  %v11587_v26 = vor.u32 %v14117_v56, %v11586_v11 }
 0x3ae   :  { %v12796_v15 = vld [vmem:[#allocation9 + $0xce0] sm:$0xf0]  ;;  %v14197_v18 = vld [vmem:[#allocation9 + $0x5e4] sm:$0xf0] }
 0x3af   :  { %v14264_v33 = vld [vmem:[#allocation9 + $0x804] sm:$0xf]  ;;  %v12799_v38 = vor.u32 %v14416_v23, %v12796_v15  ;;  %7673 = vmatpush.bf16.msrb.mxu1 %v12479_v32  ;;  %v11298_v30 = vld [vmem:[#allocation9 + $0x108] sm:$0xf] }
 0x3b0   :  { %v14224_v31 = vld [vmem:[#allocation9 + $0x6c4] sm:$0xf]  ;;  %v11554_v32 = vld [vmem:[#allocation9 + $0x308] sm:$0xf] }
 0x3b1   :  { %v12028_v17 = vld [vmem:[#allocation9 + $0x6e0] sm:$0xf0]  ;;  %7684 = vmatpush.bf16.msrb.mxu2 %v12799_v38  ;;  %v14109_v38 = vld [vmem:[#allocation9 + $0x324] sm:$0xf0] }
 0x3b2   :  { %v12188_v58 = vld [vmem:[#allocation9 + $0x820] sm:$0xf0]  ;;  %v12031_v19 = vor.u32 %v14224_v31, %v12028_v17  ;;  %v11907_v31 = vor.u32 %v14197_v18, %v11906_v13  ;;  %v14045_v17 = vld [vmem:[#allocation9 + $0x124] sm:$0xf0] }
 0x3b3   :  { %v14328_v37 = vld [vmem:[#allocation9 + $0xa04] sm:$0xf]  ;;  %v12191_v46 = vor.u32 %v14264_v33, %v12188_v58  ;;  %v4298_v33 = vadd.f32 %v15113_v22, %v991_v2  ;;  %v11874_v58 = vld [vmem:[#allocation9 + $0x588] sm:$0xf]  ;;  %v11811_v2 = vor.u32 %v14173_v16, %v11810_v34 }
 0x3b4   :  { %v12444_v25 = vld [vmem:[#allocation9 + $0xa20] sm:$0xf0]  ;;  %7645 = vmatpush.bf16.msra.mxu3 %v12031_v19  ;;  %v11555_v19 = vor.u32 %v14109_v38, %v11554_v32  ;;  %v14101_v22 = vld [vmem:[#allocation9 + $0x2e4] sm:$0xf0] }
 0x3b5   :  { %v14408_v59 = vld [vmem:[#allocation9 + $0xc84] sm:$0xf]  ;;  %v12447_v61 = vor.u32 %v14328_v37, %v12444_v25  ;;  %7661 = vmatpush.bf16.msrb.mxu0 %v12191_v46  ;;  %v14189_v37 = vld [vmem:[#allocation9 + $0x5a4] sm:$0xf0]  ;;  %v11299_v25 = vor.u32 %v14045_v17, %v11298_v30  ;;  %v4388_v30 = vpop.f32.mrf.mxu3 }
 0x3b6   :  { %v12764_v39 = vld [vmem:[#allocation9 + $0xca0] sm:$0xf0]  ;;  %v11875_v40 = vor.u32 %v14189_v37, %v11874_v58  ;;  %v11842_v46 = vld [vmem:[#allocation9 + $0x548] sm:$0xf] }
 0x3b7   :  { %v14216_v47 = vld [vmem:[#allocation9 + $0x684] sm:$0xf]  ;;  %v12767_v35 = vor.u32 %v14408_v59, %v12764_v39  ;;  %7674 = vmatpush.bf16.msrb.mxu1 %v12447_v61  ;;  %v11266_v59 = vld [vmem:[#allocation9 + $0xc8] sm:$0xf]  ;;  %v4311_v39 = vadd.f32 %v15115_v55, %v4298_v33  ;;  %v4362_v61 = vpop.f32.mrf.mxu1 }
 0x3b8   :  { %v11996_v12 = vld [vmem:[#allocation9 + $0x6a0] sm:$0xf0]  ;;  %7662 = vmatmul.bf16.vlgmr.msrb.gmra.mxu0 %v15097_v14  ;;  %v14013_v11 = vld [vmem:[#allocation9 + $0x24] sm:$0xf0] }
 0x3b9   :  { %v11999_v48 = vor.u32 %v14216_v47, %v11996_v12  ;;  %v14400_v52 = vld [vmem:[#allocation9 + $0xc44] sm:$0xf]  ;;  %7685 = vmatpush.bf16.msrb.mxu2 %v12767_v35  ;;  %7706 = vmatpush.bf16.msra.mxu0 %v11395_v49  ;;  %v14181_v47 = vld [vmem:[#allocation9 + $0x564] sm:$0xf0]  ;;  %v4324_v12 = vadd.f32 %v15117_v42, %v4311_v39  ;;  %v11267_v35 = vor.u32 %v14037_v41, %v11266_v59 }
 0x3ba   :  { %v12732_v53 = vld [vmem:[#allocation9 + $0xc60] sm:$0xf0]  ;;  %7675 = vmatmul.bf16.vlgmr.msrb.gmra.mxu1 %v15099_v20  ;;  %v11234_v49 = vld [vmem:[#allocation9 + $0x88] sm:$0xf]  ;;  %v11843_v55 = vor.u32 %v14181_v47, %v11842_v46 }
 0x3bb   :  { %7646 = vmatpush.bf16.msra.mxu3 %v11999_v48  ;;  %v14208_v0 = vld [vmem:[#allocation9 + $0x644] sm:$0xf]  ;;  %v12735_v63 = vor.u32 %v14400_v52, %v12732_v53  ;;  %7719 = vmatpush.bf16.msra.mxu1 %v11651_v50  ;;  %v11523_v48 = vor.u32 %v14101_v22, %v11522_v44  ;;  %v14029_v50 = vld [vmem:[#allocation9 + $0xa4] sm:$0xf0]  ;;  %v4337_v36 = vadd.f32 %v15119_v45, %v4324_v12 }
 0x3bc   :  { %v11964_v1 = vld [vmem:[#allocation9 + $0x660] sm:$0xf0]  ;;  %v11490_v52 = vld [vmem:[#allocation9 + $0x288] sm:$0xf]  ;;  %v11235_v60 = vor.u32 %v14029_v50, %v11234_v49 }
 0x3bd   :  { %v14392_v5 = vld [vmem:[#allocation9 + $0xc04] sm:$0xf]  ;;  %v11967_v6 = vor.u32 %v14208_v0, %v11964_v1  ;;  %7686 = vmatpush.bf16.msrb.mxu2 %v12735_v63  ;;  %7707 = vmatpush.bf16.msra.mxu0 %v11363_v7  ;;  %v14093_v53 = vld [vmem:[#allocation9 + $0x2a4] sm:$0xf0]  ;;  %v4350_v1 = vadd.f32 %v4349_v24, %v4337_v36  ;;  %v4351_v7 = vpop.f32.mrf.mxu0 }
 0x3be   :  { %v12700_v28 = vld [vmem:[#allocation9 + $0xc20] sm:$0xf0]  ;;  %v11491_v0 = vor.u32 %v14093_v53, %v11490_v52  ;;  %v11202_v42 = vld [vmem:[#allocation9 + $0x48] sm:$0xf] }
 0x3bf   :  { %7647 = vmatpush.bf16.msra.mxu3 %v11967_v6  ;;  %v14200_v27 = vld [vmem:[#allocation9 + $0x604] sm:$0xf]  ;;  %v12703_v23 = vor.u32 %v14392_v5, %v12700_v28  ;;  %7720 = vmatpush.bf16.msra.mxu1 %v11619_v8  ;;  %v14021_v63 = vld [vmem:[#allocation9 + $0x64] sm:$0xf0]  ;;  %v4364_v9 = vpop.f32.mrf.mxu1  ;;  %v4363_v56 = vadd.f32 %v4362_v61, %v4350_v1 }
 0x3c0   :  { %v11932_v54 = vld [vmem:[#allocation9 + $0x620] sm:$0xf0]  ;;  %v11458_v5 = vld [vmem:[#allocation9 + $0x248] sm:$0xf]  ;;  %v11203_v57 = vor.u32 %v14021_v63, %v11202_v42 }
 0x3c1   :  { %v11935_v15 = vor.u32 %v14200_v27, %v11932_v54  ;;  %7687 = vmatpush.bf16.msrb.mxu2 %v12703_v23  ;;  %7708 = vmatpush.bf16.msra.mxu0 %v11331_v29  ;;  %v14085_v6 = vld [vmem:[#allocation9 + $0x264] sm:$0xf0]  ;;  %v4375_v54 = vpop.f32.mrf.mxu2  ;;  %v15132_v42 = vld [vmem:[#allocation10] sm:$0xff] }
 0x3c2   :  { %v11778_v8 = vld [vmem:[#allocation9 + $0x4c8] sm:$0xf]  ;;  %v11459_v10 = vor.u32 %v14085_v6, %v11458_v5  ;;  %v14504_v5 = vld [vmem:[#allocation9 + $0xf84] sm:$0xf] }
 0x3c3   :  { %7648 = vmatpush.bf16.msra.mxu3 %v11935_v15  ;;  %7721 = vmatpush.bf16.msra.mxu1 %v11587_v26  ;;  %v14165_v28 = vld [vmem:[#allocation9 + $0x4e4] sm:$0xf0]  ;;  %v4376_v26 = vadd.f32 %v4375_v54, %v4363_v56  ;;  %v13148_v6 = vld [vmem:[#allocation9 + $0xfa0] sm:$0xf0] }
 0x3c4   :  { %7688 = vmatmul.bf16.vlgmr.msrb.gmra.mxu2 %v15110_v4  ;;  %v11170_v45 = vld [vmem:[#allocation9 + $0x8] sm:$0xf]  ;;  %v11779_v13 = vor.u32 %v14165_v28, %v11778_v8  ;;  %v13151_v56 = vor.u32 %v14504_v5, %v13148_v6  ;;  %v13020_v6 = vld [vmem:[#allocation9 + $0xea0] sm:$0xf0] }
 0x3c5   :  { %7732 = vmatpush.bf16.msra.mxu2 %v11907_v31  ;;  %7709 = vmatpush.bf16.msra.mxu0 %v11299_v25  ;;  %v11426_v51 = vld [vmem:[#allocation9 + $0x208] sm:$0xf]  ;;  %v11171_v17 = vor.u32 %v14013_v11, %v11170_v45  ;;  %v4389_v38 = vadd.f32 %v4388_v30, %v4376_v26 }
 0x3c6   :  { %v14077_v18 = vld [vmem:[#allocation9 + $0x224] sm:$0xf0] }
 0x3c7   :  { %7722 = vmatpush.bf16.msra.mxu1 %v11555_v19  ;;  %v11746_v27 = vld [vmem:[#allocation9 + $0x488] sm:$0xf]  ;;  %v11427_v32 = vor.u32 %v14077_v18, %v11426_v51  ;;  %14624 = vtanh.f32 %v4389_v38  ;;  %v14496_v18 = vld [vmem:[#allocation9 + $0xf44] sm:$0xf] }
 0x3c8   :  { %v14157_v23 = vld [vmem:[#allocation9 + $0x4a4] sm:$0xf0] }
 0x3c9   :  { %7733 = vmatpush.bf16.msra.mxu2 %v11875_v40  ;;  %7710 = vmatpush.bf16.msra.mxu0 %v11267_v35  ;;  %v12418_v15 = vld [vmem:[#allocation9 + $0x9c8] sm:$0xf]  ;;  %v11747_v58 = vor.u32 %v14157_v23, %v11746_v27  ;;  %v4377_v12 = vpop.f32.mrf.mxu2  ;;  %v14512_v35 = vld [vmem:[#allocation9 + $0xfc4] sm:$0xf]  ;;  %v7507_v23 = vpop.f32.mrf.mxu0 }
 0x3ca   :  { %v14325_v29 = vld [vmem:[#allocation9 + $0x9e4] sm:$0xf0]  ;;  %v13116_v27 = vld [vmem:[#allocation9 + $0xf60] sm:$0xf0] }
 0x3cb   :  { %7723 = vmatpush.bf16.msra.mxu1 %v11523_v48  ;;  %v12674_v33 = vld [vmem:[#allocation9 + $0xbc8] sm:$0xf]  ;;  %v12419_v37 = vor.u32 %v14325_v29, %v12418_v15  ;;  %v13180_v48 = vld [vmem:[#allocation9 + $0xfe0] sm:$0xf0]  ;;  %v13119_v38 = vor.u32 %v14496_v18, %v13116_v27  ;;  %v11396_v18 = vld [vmem:[#allocation9 + $0x1e8] sm:$0xf0] }
 0x3cc   :  { %v14389_v31 = vld [vmem:[#allocation9 + $0xbe4] sm:$0xf0] }
 0x3cd   :  { %7734 = vmatpush.bf16.msra.mxu2 %v11843_v55  ;;  %7711 = vmatpush.bf16.msra.mxu0 %v11235_v60  ;;  %v11714_v25 = vld [vmem:[#allocation9 + $0x448] sm:$0xf]  ;;  %v12675_v19 = vor.u32 %v14389_v31, %v12674_v33  ;;  %v4390_v55 = vpop.f32.mrf.mxu3  ;;  %v14625_v36 = vpop.eup %14624 }
 0x3ce   :  { %v14149_v59 = vld [vmem:[#allocation9 + $0x464] sm:$0xf0]  ;;  %v15134_v1 = vpack.c.bf16 %v14625_v36, %v14625_v36  ;;  %v7520_v31 = vpop.f32.mrf.mxu1 }
 0x3cf   :  { %7724 = vmatpush.bf16.msra.mxu1 %v11491_v0  ;;  %v12386_v39 = vld [vmem:[#allocation9 + $0x988] sm:$0xf]  ;;  %v11715_v22 = vor.u32 %v14149_v59, %v11714_v25  ;;  %v13183_v0 = vor.u32 %v14512_v35, %v13180_v48  ;;  %v13084_v59 = vld [vmem:[#allocation9 + $0xf20] sm:$0xf0] }
 0x3d0   :  { %v14317_v40 = vld [vmem:[#allocation9 + $0x9a4] sm:$0xf0]  ;;  %7597 = vmatmul.bf16.vlgmr.msrb.gmra.mxu3 %v15134_v1  ;;  %v14480_v35 = vld [vmem:[#allocation9 + $0xec4] sm:$0xf] }
 0x3d1   :  { %7735 = vmatpush.bf16.msra.mxu2 %v11811_v2  ;;  %7712 = vmatpush.bf16.msra.mxu0 %v11203_v57  ;;  %v12642_v41 = vld [vmem:[#allocation9 + $0xb88] sm:$0xf]  ;;  %v12387_v24 = vor.u32 %v14317_v40, %v12386_v39  ;;  %v13052_v48 = vld [vmem:[#allocation9 + $0xee0] sm:$0xf0]  ;;  %v7509_v55 = vpop.f32.mrf.mxu0 }
 0x3d2   :  { %v14381_v44 = vld [vmem:[#allocation9 + $0xba4] sm:$0xf0]  ;;  %7693 = vmatpush.bf16.msrb.mxu3 %v13183_v0  ;;  %v13055_v0 = vor.u32 %v14480_v35, %v13052_v48  ;;  %v11332_v55 = vld [vmem:[#allocation9 + $0x168] sm:$0xf0] }
 0x3d3   :  { %7725 = vmatpush.bf16.msra.mxu1 %v11459_v10  ;;  %v11682_v46 = vld [vmem:[#allocation9 + $0x408] sm:$0xf]  ;;  %v12643_v61 = vor.u32 %v14381_v44, %v12642_v41  ;;  %v4922_v10 = vperm.slane %v15132_v42, 0 }
 0x3d4   :  { %v14141_v47 = vld [vmem:[#allocation9 + $0x424] sm:$0xf0] }
 0x3d5   :  { %7736 = vmatpush.bf16.msra.mxu2 %v11779_v13  ;;  %7713 = vmatpush.bf16.msra.mxu0 %v11171_v17  ;;  %v12354_v49 = vld [vmem:[#allocation9 + $0x948] sm:$0xf]  ;;  %v11683_v60 = vor.u32 %v14141_v47, %v11682_v46  ;;  %v7508_v33 = vadd.f32 %v7507_v23, %v4922_v10  ;;  %v11652_v23 = vld [vmem:[#allocation9 + $0x3e8] sm:$0xf0] }
 0x3d6   :  { %v14309_v50 = vld [vmem:[#allocation9 + $0x964] sm:$0xf0]  ;;  %7694 = vmatpush.bf16.msrb.mxu3 %v13151_v56  ;;  %v7546_v56 = vpop.f32.mrf.mxu3 }
 0x3d7   :  { %7726 = vmatpush.bf16.msra.mxu1 %v11427_v32  ;;  %v12610_v52 = vld [vmem:[#allocation9 + $0xb48] sm:$0xf]  ;;  %v12355_v2 = vor.u32 %v14309_v50, %v12354_v49 }
 0x3d8   :  { %7714 = vmatmul.bf16.vlgmr.msra.gmra.mxu0 %v15070_v21  ;;  %v14373_v53 = vld [vmem:[#allocation9 + $0xb64] sm:$0xf0] }
 0x3d9   :  { %7737 = vmatpush.bf16.msra.mxu2 %v11747_v58  ;;  %7758 = vmatpush.bf16.msrb.mxu0 %v12419_v37  ;;  %v12930_v34 = vld [vmem:[#allocation9 + $0xdc8] sm:$0xf]  ;;  %v12611_v63 = vor.u32 %v14373_v53, %v12610_v52  ;;  %v7521_v58 = vadd.f32 %v7520_v31, %v7508_v33  ;;  %v14464_v31 = vld [vmem:[#allocation9 + $0xe44] sm:$0xf] }
 0x3da   :  { %7727 = vmatmul.bf16.vlgmr.msra.gmra.mxu1 %v15072_v43  ;;  %v14453_v16 = vld [vmem:[#allocation9 + $0xde4] sm:$0xf0]  ;;  %7695 = vmatpush.bf16.msrb.mxu3 %v13119_v38 }
 0x3db   :  { %7771 = vmatpush.bf16.msrb.mxu1 %v12675_v19  ;;  %v12322_v7 = vld [vmem:[#allocation9 + $0x908] sm:$0xf]  ;;  %v12931_v8 = vor.u32 %v14453_v16, %v12930_v34  ;;  %v14488_v19 = vld [vmem:[#allocation9 + $0xf04] sm:$0xf]  ;;  %v7522_v16 = vpop.f32.mrf.mxu1 }
 0x3dc   :  { %v14301_v28 = vld [vmem:[#allocation9 + $0x924] sm:$0xf0]  ;;  %v13087_v47 = vor.u32 %v14488_v19, %v13084_v59  ;;  %v14121_v19 = vld [vmem:[#allocation9 + $0x38c] sm:$0xf] }
 0x3dd   :  { %7738 = vmatpush.bf16.msra.mxu2 %v11715_v22  ;;  %7759 = vmatpush.bf16.msrb.mxu0 %v12387_v24  ;;  %v12578_v9 = vld [vmem:[#allocation9 + $0xb08] sm:$0xf]  ;;  %v12323_v13 = vor.u32 %v14301_v28, %v12322_v7  ;;  %v7533_v28 = vpop.f32.mrf.mxu2  ;;  %v11620_v59 = vld [vmem:[#allocation9 + $0x3a8] sm:$0xf0] }
 0x3de   :  { %v14365_v57 = vld [vmem:[#allocation9 + $0xb24] sm:$0xf0]  ;;  %7696 = vmatpush.bf16.msrb.mxu3 %v13087_v47  ;;  %v11908_v16 = vld [vmem:[#allocation9 + $0x5e8] sm:$0xf0] }
 0x3df   :  { %7772 = vmatpush.bf16.msrb.mxu1 %v12643_v61  ;;  %v12898_v45 = vld [vmem:[#allocation9 + $0xd88] sm:$0xf]  ;;  %v12579_v51 = vor.u32 %v14365_v57, %v12578_v9 }
 0x3e0   :  { %v14445_v11 = vld [vmem:[#allocation9 + $0xda4] sm:$0xf0]  ;;  %7649 = vmatmul.bf16.vlgmr.msra.gmra.mxu3 %v15080_v62 }
 0x3e1   :  { %7739 = vmatpush.bf16.msra.mxu2 %v11683_v60  ;;  %7760 = vmatpush.bf16.msrb.mxu0 %v12355_v2  ;;  %v12290_v54 = vld [vmem:[#allocation9 + $0x8c8] sm:$0xf]  ;;  %v12899_v15 = vor.u32 %v14445_v11, %v12898_v45  ;;  %v14472_v2 = vld [vmem:[#allocation9 + $0xe84] sm:$0xf]  ;;  %v7534_v11 = vadd.f32 %v7533_v28, %v7521_v58  ;;  %v14105_v28 = vld [vmem:[#allocation9 + $0x30c] sm:$0xf] }
 0x3e2   :  { %v14293_v29 = vld [vmem:[#allocation9 + $0x8e4] sm:$0xf0]  ;;  %7697 = vmatpush.bf16.msrb.mxu3 %v13055_v0  ;;  %v13023_v27 = vor.u32 %v14472_v2, %v13020_v6  ;;  %v14041_v6 = vld [vmem:[#allocation9 + $0x10c] sm:$0xf] }
 0x3e3   :  { %7773 = vmatpush.bf16.msrb.mxu1 %v12611_v63  ;;  %v12546_v26 = vld [vmem:[#allocation9 + $0xac8] sm:$0xf]  ;;  %v12291_v37 = vor.u32 %v14293_v29, %v12290_v54  ;;  %v14129_v54 = vld [vmem:[#allocation9 + $0x3cc] sm:$0xf] }
 0x3e4   :  { %v14357_v30 = vld [vmem:[#allocation9 + $0xae4] sm:$0xf0]  ;;  %7740 = vmatmul.bf16.vlgmr.msra.gmra.mxu2 %v15078_v3  ;;  %v11655_v38 = vor.u32 %v14129_v54, %v11652_v23 }
 0x3e5   :  { %7784 = vmatpush.bf16.msrb.mxu2 %v12931_v8  ;;  %v12866_v17 = vld [vmem:[#allocation9 + $0xd48] sm:$0xf]  ;;  %7761 = vmatpush.bf16.msrb.mxu0 %v12323_v13  ;;  %v12547_v25 = vor.u32 %v14357_v30, %v12546_v26 }
 0x3e6   :  { %v14437_v32 = vld [vmem:[#allocation9 + $0xd64] sm:$0xf0]  ;;  %7698 = vmatpush.bf16.msrb.mxu3 %v13023_v27  ;;  %v14033_v27 = vld [vmem:[#allocation9 + $0xcc] sm:$0xf] }
 0x3e7   :  { %7774 = vmatpush.bf16.msrb.mxu1 %v12579_v51  ;;  %v12258_v39 = vld [vmem:[#allocation9 + $0x888] sm:$0xf]  ;;  %v12867_v40 = vor.u32 %v14437_v32, %v12866_v17  ;;  %v14065_v51 = vld [vmem:[#allocation9 + $0x1cc] sm:$0xf]  ;;  %v12988_v17 = vld [vmem:[#allocation9 + $0xe60] sm:$0xf0] }
 0x3e8   :  { %v14285_v41 = vld [vmem:[#allocation9 + $0x8a4] sm:$0xf0]  ;;  %v11399_v33 = vor.u32 %v14065_v51, %v11396_v18 }
 0x3e9   :  { %7785 = vmatpush.bf16.msrb.mxu2 %v12899_v15  ;;  %v12514_v44 = vld [vmem:[#allocation9 + $0xa88] sm:$0xf]  ;;  %7762 = vmatpush.bf16.msrb.mxu0 %v12291_v37  ;;  %v12259_v12 = vor.u32 %v14285_v41, %v12258_v39  ;;  %v15140_v15 = vadd.f32 %v7546_v56, %v7534_v11  ;;  %v14057_v37 = vld [vmem:[#allocation9 + $0x18c] sm:$0xf]  ;;  %v12991_v39 = vor.u32 %v14464_v31, %v12988_v17  ;;  %v7535_v41 = vpop.f32.mrf.mxu2 }
 0x3ea   :  { %v14349_v22 = vld [vmem:[#allocation9 + $0xaa4] sm:$0xf0]  ;;  %v14177_v31 = vld [vmem:[#allocation9 + $0x54c] sm:$0xf] }
 0x3eb   :  { %v12834_v24 = vld [vmem:[#allocation9 + $0xd08] sm:$0xf]  ;;  %7775 = vmatpush.bf16.msrb.mxu1 %v12547_v25  ;;  %v12515_v61 = vor.u32 %v14349_v22, %v12514_v44  ;;  %v11364_v25 = vld [vmem:[#allocation9 + $0x1a8] sm:$0xf0]  ;;  %7699 = vmatpush.bf16.msrb.mxu3 %v12991_v39 }
 0x3ec   :  { %v14429_v46 = vld [vmem:[#allocation9 + $0xd24] sm:$0xf0]  ;;  %v11367_v22 = vor.u32 %v14057_v37, %v11364_v25  ;;  %v11844_v17 = vld [vmem:[#allocation9 + $0x568] sm:$0xf0] }
 0x3ed   :  { %v12226_v49 = vld [vmem:[#allocation9 + $0x848] sm:$0xf]  ;;  %7786 = vmatpush.bf16.msrb.mxu2 %v12867_v40  ;;  %v12835_v50 = vor.u32 %v14429_v46, %v12834_v24  ;;  %7763 = vmatpush.bf16.msrb.mxu0 %v12259_v12  ;;  %v14456_v40 = vld [vmem:[#allocation9 + $0xe04] sm:$0xf]  ;;  %v7548_v12 = vpop.f32.mrf.mxu3  ;;  %v11236_v39 = vld [vmem:[#allocation9 + $0xa8] sm:$0xf0] }
 0x3ee   :  { %v14277_v52 = vld [vmem:[#allocation9 + $0x864] sm:$0xf0]  ;;  %v12956_v24 = vld [vmem:[#allocation9 + $0xe20] sm:$0xf0]  ;;  %v11492_v41 = vld [vmem:[#allocation9 + $0x2a8] sm:$0xf0] }
 0x3ef   :  { %v12482_v53 = vld [vmem:[#allocation9 + $0xa48] sm:$0xf]  ;;  %7776 = vmatpush.bf16.msrb.mxu1 %v12515_v61  ;;  %v12227_v63 = vor.u32 %v14277_v52, %v12226_v49  ;;  %v11623_v61 = vor.u32 %v14121_v19, %v11620_v59  ;;  %v14049_v49 = vld [vmem:[#allocation9 + $0x14c] sm:$0xf]  ;;  %v11847_v59 = vor.u32 %v14177_v31, %v11844_v17 }
 0x3f0   :  { %v14341_v34 = vld [vmem:[#allocation9 + $0xa64] sm:$0xf0]  ;;  %v11588_v52 = vld [vmem:[#allocation9 + $0x368] sm:$0xf0]  ;;  %v11335_v0 = vor.u32 %v14049_v49, %v11332_v55 }
 0x3f1   :  { %v12802_v36 = vld [vmem:[#allocation9 + $0xcc8] sm:$0xf]  ;;  %v12483_v5 = vor.u32 %v14341_v34, %v12482_v53  ;;  %7787 = vmatpush.bf16.msrb.mxu2 %v12835_v50  ;;  %7764 = vmatpush.bf16.msrb.mxu0 %v12227_v63  ;;  %v14113_v50 = vld [vmem:[#allocation9 + $0x34c] sm:$0xf]  ;;  %v12959_v53 = vor.u32 %v14456_v40, %v12956_v24  ;;  %v7559_v11 = vpop.f32.mrf.mxu0 }
 0x3f2   :  { %v14421_v60 = vld [vmem:[#allocation9 + $0xce4] sm:$0xf0]  ;;  %v14193_v34 = vld [vmem:[#allocation9 + $0x5cc] sm:$0xf]  ;;  %v11591_v2 = vor.u32 %v14113_v50, %v11588_v52  ;;  %v7560_v54 = vadd.f32 %v7559_v11, %v15140_v15 }
 0x3f3   :  { %v12194_v7 = vld [vmem:[#allocation9 + $0x808] sm:$0xf]  ;;  %v12803_v9 = vor.u32 %v14421_v60, %v12802_v36  ;;  %7777 = vmatpush.bf16.msrb.mxu1 %v12483_v5  ;;  %7700 = vmatpush.bf16.msrb.mxu3 %v12959_v53  ;;  %v7572_v23 = vpop.f32.mrf.mxu1  ;;  %v14025_v19 = vld [vmem:[#allocation9 + $0x8c] sm:$0xf] }
 0x3f4   :  { %v14269_v8 = vld [vmem:[#allocation9 + $0x824] sm:$0xf0]  ;;  %v14089_v40 = vld [vmem:[#allocation9 + $0x28c] sm:$0xf] }
 0x3f5   :  { %v12450_v57 = vld [vmem:[#allocation9 + $0xa08] sm:$0xf]  ;;  %v12195_v29 = vor.u32 %v14269_v8, %v12194_v7  ;;  %7788 = vmatpush.bf16.msrb.mxu2 %v12803_v9  ;;  %v11911_v7 = vor.u32 %v14193_v34, %v11908_v16  ;;  %v11300_v8 = vld [vmem:[#allocation9 + $0x128] sm:$0xf0]  ;;  %v11495_v12 = vor.u32 %v14089_v40, %v11492_v41 }
 0x3f6   :  { %v14333_v10 = vld [vmem:[#allocation9 + $0xa24] sm:$0xf0]  ;;  %v11556_v9 = vld [vmem:[#allocation9 + $0x328] sm:$0xf0]  ;;  %v11303_v56 = vor.u32 %v14041_v6, %v11300_v8  ;;  %7701 = vmatmul.bf16.vlgmr.msrb.gmra.mxu3 %v15134_v1 }
 0x3f7   :  { %v12770_v45 = vld [vmem:[#allocation9 + $0xc88] sm:$0xf]  ;;  %v12451_v26 = vor.u32 %v14333_v10, %v12450_v57  ;;  %7765 = vmatpush.bf16.msrb.mxu0 %v12195_v29  ;;  %v14185_v57 = vld [vmem:[#allocation9 + $0x58c] sm:$0xf] }
 0x3f8   :  { %v14413_v13 = vld [vmem:[#allocation9 + $0xca4] sm:$0xf0]  ;;  %v11876_v10 = vld [vmem:[#allocation9 + $0x5a8] sm:$0xf0] }
 0x3f9   :  { %v12771_v30 = vor.u32 %v14413_v13, %v12770_v45  ;;  %v12738_v32 = vld [vmem:[#allocation9 + $0xc48] sm:$0xf]  ;;  %7778 = vmatpush.bf16.msrb.mxu1 %v12451_v26  ;;  %v11559_v13 = vor.u32 %v14105_v28, %v11556_v9  ;;  %v11879_v29 = vor.u32 %v14185_v57, %v11876_v10  ;;  %v11268_v26 = vld [vmem:[#allocation9 + $0xe8] sm:$0xf0] }
 0x3fa   :  { %v14405_v58 = vld [vmem:[#allocation9 + $0xc64] sm:$0xf0]  ;;  %7766 = vmatmul.bf16.vlgmr.msrb.gmra.mxu0 %v15097_v14  ;;  %v11204_v50 = vld [vmem:[#allocation9 + $0x68] sm:$0xf0] }
 0x3fb   :  { %7789 = vmatpush.bf16.msrb.mxu2 %v12771_v30  ;;  %7810 = vmatpush.bf16.msra.mxu0 %v11399_v33  ;;  %v12739_v44 = vor.u32 %v14405_v58, %v12738_v32  ;;  %v12706_v46 = vld [vmem:[#allocation9 + $0xc08] sm:$0xf]  ;;  %v14097_v30 = vld [vmem:[#allocation9 + $0x2cc] sm:$0xf]  ;;  %v15147_v32 = vadd.f32 %v7572_v23, %v7560_v54  ;;  %v11271_v58 = vor.u32 %v14033_v27, %v11268_v26  ;;  %v7574_v49 = vpop.f32.mrf.mxu1 }
 0x3fc   :  { %v14397_v47 = vld [vmem:[#allocation9 + $0xc24] sm:$0xf0]  ;;  %7779 = vmatmul.bf16.vlgmr.msrb.gmra.mxu1 %v15099_v20  ;;  %v11524_v33 = vld [vmem:[#allocation9 + $0x2e8] sm:$0xf0] }
 0x3fd   :  { %7823 = vmatpush.bf16.msra.mxu1 %v11655_v38  ;;  %v12162_v35 = vld [vmem:[#allocation9 + $0x7c8] sm:$0xf]  ;;  %v12707_v36 = vor.u32 %v14397_v47, %v12706_v46  ;;  %v11527_v37 = vor.u32 %v14097_v30, %v11524_v33  ;;  %v7561_v46 = vpop.f32.mrf.mxu0  ;;  %v11239_v47 = vor.u32 %v14025_v19, %v11236_v39  ;;  %v14081_v52 = vld [vmem:[#allocation9 + $0x24c] sm:$0xf] }
 0x3fe   :  { %v14261_v48 = vld [vmem:[#allocation9 + $0x7e4] sm:$0xf0]  ;;  %v11460_v53 = vld [vmem:[#allocation9 + $0x268] sm:$0xf0] }
 0x3ff   :  { %7790 = vmatpush.bf16.msrb.mxu2 %v12739_v44  ;;  %7811 = vmatpush.bf16.msra.mxu0 %v11367_v22  ;;  %v12163_v60 = vor.u32 %v14261_v48, %v12162_v35  ;;  %v12130_v63 = vld [vmem:[#allocation9 + $0x788] sm:$0xf]  ;;  %v14169_v44 = vld [vmem:[#allocation9 + $0x50c] sm:$0xf] }
 0x400   :  { %v14253_v5 = vld [vmem:[#allocation9 + $0x7a4] sm:$0xf0]  ;;  %v11812_v22 = vld [vmem:[#allocation9 + $0x528] sm:$0xf0] }
 0x401   :  { %7824 = vmatpush.bf16.msra.mxu1 %v11623_v61  ;;  %7745 = vmatpush.bf16.msra.mxu3 %v12163_v60  ;;  %v12131_v45 = vor.u32 %v14253_v5, %v12130_v63  ;;  %v12098_v51 = vld [vmem:[#allocation9 + $0x748] sm:$0xf]  ;;  %v14017_v48 = vld [vmem:[#allocation9 + $0x4c] sm:$0xf]  ;;  %v11815_v55 = vor.u32 %v14169_v44, %v11812_v22 }
 0x402   :  { %v14245_v18 = vld [vmem:[#allocation9 + $0x764] sm:$0xf0]  ;;  %v14161_v34 = vld [vmem:[#allocation9 + $0x4cc] sm:$0xf] }
 0x403   :  { %7791 = vmatpush.bf16.msrb.mxu2 %v12707_v36  ;;  %7812 = vmatpush.bf16.msra.mxu0 %v11335_v0  ;;  %v12099_v38 = vor.u32 %v14245_v18, %v12098_v51  ;;  %v12066_v15 = vld [vmem:[#allocation9 + $0x708] sm:$0xf]  ;;  %v11780_v16 = vld [vmem:[#allocation9 + $0x4e8] sm:$0xf0]  ;;  %v11207_v0 = vor.u32 %v14017_v48, %v11204_v50  ;;  %v4923_v50 = vperm.slane %v15132_v42, 1 }
 0x404   :  { %v14237_v25 = vld [vmem:[#allocation9 + $0x724] sm:$0xf0]  ;;  %v14009_v5 = vld [vmem:[#allocation9 + $0xc] sm:$0xf] }
 0x405   :  { %7825 = vmatpush.bf16.msra.mxu1 %v11591_v2  ;;  %7746 = vmatpush.bf16.msra.mxu3 %v12131_v45  ;;  %v12067_v24 = vor.u32 %v14237_v25, %v12066_v15  ;;  %v12034_v61 = vld [vmem:[#allocation9 + $0x6c8] sm:$0xf]  ;;  %v11463_v2 = vor.u32 %v14081_v52, %v11460_v53  ;;  %v11172_v6 = vld [vmem:[#allocation9 + $0x28] sm:$0xf0] }
 0x406   :  { %7792 = vmatmul.bf16.vlgmr.msrb.gmra.mxu2 %v15110_v4  ;;  %v14229_v35 = vld [vmem:[#allocation9 + $0x6e4] sm:$0xf0]  ;;  %v14073_v8 = vld [vmem:[#allocation9 + $0x20c] sm:$0xf]  ;;  %v11175_v51 = vor.u32 %v14009_v5, %v11172_v6 }
 0x407   :  { %7836 = vmatpush.bf16.msra.mxu2 %v11911_v7  ;;  %7813 = vmatpush.bf16.msra.mxu0 %v11303_v56  ;;  %v12035_v36 = vor.u32 %v14229_v35, %v12034_v61  ;;  %v12002_v60 = vld [vmem:[#allocation9 + $0x688] sm:$0xf]  ;;  %v11783_v7 = vor.u32 %v14161_v34, %v11780_v16  ;;  %v11428_v28 = vld [vmem:[#allocation9 + $0x228] sm:$0xf0] }
 0x408   :  { %v14221_v63 = vld [vmem:[#allocation9 + $0x6a4] sm:$0xf0]  ;;  %v14153_v9 = vld [vmem:[#allocation9 + $0x48c] sm:$0xf]  ;;  %v11431_v18 = vor.u32 %v14073_v8, %v11428_v28 }
 0x409   :  { %7826 = vmatpush.bf16.msra.mxu1 %v11559_v13  ;;  %7747 = vmatpush.bf16.msra.mxu3 %v12099_v38  ;;  %v11748_v57 = vld [vmem:[#allocation9 + $0x4a8] sm:$0xf0]  ;;  %v12003_v11 = vor.u32 %v14221_v63, %v12002_v60  ;;  %v11970_v23 = vld [vmem:[#allocation9 + $0x648] sm:$0xf] }
 0x40a   :  { %v14321_v10 = vld [vmem:[#allocation9 + $0x9cc] sm:$0xf]  ;;  %v11751_v27 = vor.u32 %v14153_v9, %v11748_v57  ;;  %v11938_v15 = vld [vmem:[#allocation9 + $0x608] sm:$0xf] }
 0x40b   :  { %7837 = vmatpush.bf16.msra.mxu2 %v11879_v29  ;;  %7814 = vmatpush.bf16.msra.mxu0 %v11271_v58  ;;  %v12420_v45 = vld [vmem:[#allocation9 + $0x9e8] sm:$0xf0]  ;;  %v14213_v29 = vld [vmem:[#allocation9 + $0x664] sm:$0xf0] }
 0x40c   :  { %v14385_v56 = vld [vmem:[#allocation9 + $0xbcc] sm:$0xf]  ;;  %v12423_v54 = vor.u32 %v14321_v10, %v12420_v45  ;;  %v13186_v44 = vld [vmem:[#allocation9 + $0xfc8] sm:$0xf] }
 0x40d   :  { %7827 = vmatpush.bf16.msra.mxu1 %v11527_v37  ;;  %7748 = vmatpush.bf16.msra.mxu3 %v12067_v24  ;;  %v12676_v13 = vld [vmem:[#allocation9 + $0xbe8] sm:$0xf0]  ;;  %v11971_v37 = vor.u32 %v14213_v29, %v11970_v23  ;;  %v14517_v22 = vld [vmem:[#allocation9 + $0xfe4] sm:$0xf0] }
 0x40e   :  { %v14145_v26 = vld [vmem:[#allocation9 + $0x44c] sm:$0xf]  ;;  %v12679_v30 = vor.u32 %v14385_v56, %v12676_v13  ;;  %v13154_v34 = vld [vmem:[#allocation9 + $0xf88] sm:$0xf] }
 0x40f   :  { %7838 = vmatpush.bf16.msra.mxu2 %v11847_v59  ;;  %7815 = vmatpush.bf16.msra.mxu0 %v11239_v47  ;;  %v11716_v33 = vld [vmem:[#allocation9 + $0x468] sm:$0xf0]  ;;  %v14205_v59 = vld [vmem:[#allocation9 + $0x624] sm:$0xf0] }
 0x410   :  { %v14313_v31 = vld [vmem:[#allocation9 + $0x98c] sm:$0xf]  ;;  %v11719_v25 = vor.u32 %v14145_v26, %v11716_v33  ;;  %v11939_v61 = vor.u32 %v14205_v59, %v11938_v15  ;;  %v14509_v16 = vld [vmem:[#allocation9 + $0xfa4] sm:$0xf0] }
 0x411   :  { %7828 = vmatpush.bf16.msra.mxu1 %v11495_v12  ;;  %7749 = vmatpush.bf16.msra.mxu3 %v12035_v36  ;;  %v12388_v17 = vld [vmem:[#allocation9 + $0x9a8] sm:$0xf0]  ;;  %v13155_v8 = vor.u32 %v14509_v16, %v13154_v34  ;;  %v13122_v10 = vld [vmem:[#allocation9 + $0xf48] sm:$0xf] }
 0x412   :  { %v14377_v38 = vld [vmem:[#allocation9 + $0xb8c] sm:$0xf]  ;;  %v12391_v19 = vor.u32 %v14313_v31, %v12388_v17  ;;  %v14501_v45 = vld [vmem:[#allocation9 + $0xf64] sm:$0xf0] }
 0x413   :  { %7839 = vmatpush.bf16.msra.mxu2 %v11815_v55  ;;  %7816 = vmatpush.bf16.msra.mxu0 %v11207_v0  ;;  %v12644_v58 = vld [vmem:[#allocation9 + $0xba8] sm:$0xf0]  ;;  %v13187_v55 = vor.u32 %v14517_v22, %v13186_v44  ;;  %v7624_v28 = vpop.f32.mrf.mxu1  ;;  %v13123_v29 = vor.u32 %v14501_v45, %v13122_v10  ;;  %v13090_v33 = vld [vmem:[#allocation9 + $0xf08] sm:$0xf] }
 0x414   :  { %v14137_v39 = vld [vmem:[#allocation9 + $0x40c] sm:$0xf]  ;;  %v12647_v41 = vor.u32 %v14377_v38, %v12644_v58  ;;  %v14493_v31 = vld [vmem:[#allocation9 + $0xf24] sm:$0xf0] }
 0x415   :  { %7829 = vmatpush.bf16.msra.mxu1 %v11463_v2  ;;  %7750 = vmatpush.bf16.msra.mxu3 %v12003_v11  ;;  %v11684_v40 = vld [vmem:[#allocation9 + $0x428] sm:$0xf0]  ;;  %v13058_v22 = vld [vmem:[#allocation9 + $0xec8] sm:$0xf] }
 0x416   :  { %v14305_v24 = vld [vmem:[#allocation9 + $0x94c] sm:$0xf]  ;;  %v11687_v49 = vor.u32 %v14137_v39, %v11684_v40  ;;  %v13091_v39 = vor.u32 %v14493_v31, %v13090_v33  ;;  %v14126_v33 = vld [vmem:[#allocation9 + $0x3ac] sm:$0xf0] }
 0x417   :  { %7840 = vmatpush.bf16.msra.mxu2 %v11783_v7  ;;  %7817 = vmatpush.bf16.msra.mxu0 %v11175_v51  ;;  %v12356_v46 = vld [vmem:[#allocation9 + $0x968] sm:$0xf0]  ;;  %v7611_v7 = vpop.f32.mrf.mxu0 }
 0x418   :  { %v14369_v47 = vld [vmem:[#allocation9 + $0xb4c] sm:$0xf]  ;;  %v12359_v52 = vor.u32 %v14305_v24, %v12356_v46  ;;  %v7612_v42 = vadd.f32 %v7611_v7, %v4923_v50  ;;  %v14485_v24 = vld [vmem:[#allocation9 + $0xee4] sm:$0xf0] }
 0x419   :  { %7830 = vmatpush.bf16.msra.mxu1 %v11431_v18  ;;  %v12612_v12 = vld [vmem:[#allocation9 + $0xb68] sm:$0xf0]  ;;  %7751 = vmatpush.bf16.msra.mxu3 %v11971_v37  ;;  %v13059_v50 = vor.u32 %v14485_v24, %v13058_v22  ;;  %v14118_v22 = vld [vmem:[#allocation9 + $0x36c] sm:$0xf0] }
 0x41a   :  { %7818 = vmatmul.bf16.vlgmr.msra.gmra.mxu0 %v15070_v21  ;;  %v14449_v35 = vld [vmem:[#allocation9 + $0xdcc] sm:$0xf]  ;;  %v12615_v53 = vor.u32 %v14369_v47, %v12612_v12 }
 0x41b   :  { %7841 = vmatpush.bf16.msra.mxu2 %v11751_v27  ;;  %7862 = vmatpush.bf16.msrb.mxu0 %v12423_v54  ;;  %v12932_v48 = vld [vmem:[#allocation9 + $0xde8] sm:$0xf0]  ;;  %v15154_v27 = vadd.f32 %v7624_v28, %v7612_v42  ;;  %v7626_v40 = vpop.f32.mrf.mxu1  ;;  %v14070_v42 = vld [vmem:[#allocation9 + $0x1ec] sm:$0xf0] }
 0x41c   :  { %7831 = vmatmul.bf16.vlgmr.msra.gmra.mxu1 %v15072_v43  ;;  %v14297_v36 = vld [vmem:[#allocation9 + $0x90c] sm:$0xf]  ;;  %v12935_v60 = vor.u32 %v14449_v35, %v12932_v48  ;;  %v11338_v40 = vld [vmem:[#allocation9 + $0x150] sm:$0xf] }
 0x41d   :  { %7875 = vmatpush.bf16.msrb.mxu1 %v12679_v30  ;;  %v12324_v0 = vld [vmem:[#allocation9 + $0x928] sm:$0xf0]  ;;  %7752 = vmatpush.bf16.msra.mxu3 %v11939_v61 }
 0x41e   :  { %v14361_v2 = vld [vmem:[#allocation9 + $0xb0c] sm:$0xf]  ;;  %v12327_v9 = vor.u32 %v14297_v36, %v12324_v0  ;;  %v14477_v36 = vld [vmem:[#allocation9 + $0xea4] sm:$0xf0] }
 0x41f   :  { %7842 = vmatpush.bf16.msra.mxu2 %v11719_v25  ;;  %7863 = vmatpush.bf16.msrb.mxu0 %v12391_v19  ;;  %v12580_v63 = vld [vmem:[#allocation9 + $0xb28] sm:$0xf0]  ;;  %v7613_v59 = vpop.f32.mrf.mxu0 }
 0x420   :  { %v14441_v5 = vld [vmem:[#allocation9 + $0xd8c] sm:$0xf]  ;;  %v12583_v57 = vor.u32 %v14361_v2, %v12580_v63  ;;  %7753 = vmatmul.bf16.vlgmr.msra.gmra.mxu3 %v15080_v62 }
 0x421   :  { %7876 = vmatpush.bf16.msrb.mxu1 %v12647_v41  ;;  %v12900_v6 = vld [vmem:[#allocation9 + $0xda8] sm:$0xf0]  ;;  %7797 = vmatpush.bf16.msrb.mxu3 %v13187_v55  ;;  %v7585_v55 = vpop.f32.mrf.mxu2 }
 0x422   :  { %v14289_v11 = vld [vmem:[#allocation9 + $0x8cc] sm:$0xf]  ;;  %v12903_v56 = vor.u32 %v14441_v5, %v12900_v6 }
 0x423   :  { %7843 = vmatpush.bf16.msra.mxu2 %v11687_v49  ;;  %7864 = vmatpush.bf16.msrb.mxu0 %v12359_v52  ;;  %v12292_v13 = vld [vmem:[#allocation9 + $0x8e8] sm:$0xf0]  ;;  %v13026_v52 = vld [vmem:[#allocation9 + $0xe88] sm:$0xf] }
 0x424   :  { %v14353_v51 = vld [vmem:[#allocation9 + $0xacc] sm:$0xf]  ;;  %v12295_v26 = vor.u32 %v14289_v11, %v12292_v13  ;;  %v13027_v28 = vor.u32 %v14477_v36, %v13026_v52  ;;  %v14469_v13 = vld [vmem:[#allocation9 + $0xe64] sm:$0xf0]  ;;  %v11562_v36 = vld [vmem:[#allocation9 + $0x310] sm:$0xf] }
 0x425   :  { %7877 = vmatpush.bf16.msrb.mxu1 %v12615_v53  ;;  %v12548_v18 = vld [vmem:[#allocation9 + $0xae8] sm:$0xf0]  ;;  %7798 = vmatpush.bf16.msrb.mxu3 %v13155_v8  ;;  %v15157_v53 = vadd.f32 %v7585_v55, %v15147_v32  ;;  %v11402_v8 = vld [vmem:[#allocation9 + $0x1d0] sm:$0xf] }
 0x426   :  { %7844 = vmatmul.bf16.vlgmr.msra.gmra.mxu2 %v15078_v3  ;;  %v14433_v54 = vld [vmem:[#allocation9 + $0xd4c] sm:$0xf]  ;;  %v12551_v30 = vor.u32 %v14353_v51, %v12548_v18  ;;  %v11403_v11 = vor.u32 %v14070_v42, %v11402_v8 }
 0x427   :  { %7888 = vmatpush.bf16.msrb.mxu2 %v12935_v60  ;;  %v12868_v23 = vld [vmem:[#allocation9 + $0xd68] sm:$0xf0]  ;;  %7865 = vmatpush.bf16.msrb.mxu0 %v12327_v9  ;;  %v11658_v9 = vld [vmem:[#allocation9 + $0x3d0] sm:$0xf] }
 0x428   :  { %v14281_v17 = vld [vmem:[#allocation9 + $0x88c] sm:$0xf]  ;;  %v12871_v38 = vor.u32 %v14433_v54, %v12868_v23  ;;  %v11370_v23 = vld [vmem:[#allocation9 + $0x190] sm:$0xf] }
 0x429   :  { %7878 = vmatpush.bf16.msrb.mxu1 %v12583_v57  ;;  %v12260_v58 = vld [vmem:[#allocation9 + $0x8a8] sm:$0xf0]  ;;  %7799 = vmatpush.bf16.msrb.mxu3 %v13123_v29  ;;  %v14134_v57 = vld [vmem:[#allocation9 + $0x3ec] sm:$0xf0] }
 0x42a   :  { %v14345_v37 = vld [vmem:[#allocation9 + $0xa8c] sm:$0xf]  ;;  %v12263_v41 = vor.u32 %v14281_v17, %v12260_v58  ;;  %v11659_v18 = vor.u32 %v14134_v57, %v11658_v9  ;;  %v14062_v29 = vld [vmem:[#allocation9 + $0x1ac] sm:$0xf0]  ;;  %v12962_v17 = vld [vmem:[#allocation9 + $0xe08] sm:$0xf] }
 0x42b   :  { %7889 = vmatpush.bf16.msrb.mxu2 %v12903_v56  ;;  %v12516_v15 = vld [vmem:[#allocation9 + $0xaa8] sm:$0xf0]  ;;  %7866 = vmatpush.bf16.msrb.mxu0 %v12295_v26  ;;  %v12994_v56 = vld [vmem:[#allocation9 + $0xe48] sm:$0xf]  ;;  %v7587_v26 = vpop.f32.mrf.mxu2  ;;  %v11371_v58 = vor.u32 %v14062_v29, %v11370_v23  ;;  %v11274_v57 = vld [vmem:[#allocation9 + $0xd0] sm:$0xf] }
 0x42c   :  { %v14425_v25 = vld [vmem:[#allocation9 + $0xd0c] sm:$0xf]  ;;  %v12519_v44 = vor.u32 %v14345_v37, %v12516_v15  ;;  %v12995_v31 = vor.u32 %v14469_v13, %v12994_v56  ;;  %v14461_v37 = vld [vmem:[#allocation9 + $0xe24] sm:$0xf0]  ;;  %v14182_v56 = vld [vmem:[#allocation9 + $0x56c] sm:$0xf0] }
 0x42d   :  { %v12836_v19 = vld [vmem:[#allocation9 + $0xd28] sm:$0xf0]  ;;  %7879 = vmatpush.bf16.msrb.mxu1 %v12551_v30  ;;  %7800 = vmatpush.bf16.msrb.mxu3 %v13091_v39  ;;  %v11626_v30 = vld [vmem:[#allocation9 + $0x390] sm:$0xf]  ;;  %v12963_v24 = vor.u32 %v14461_v37, %v12962_v17 }
 0x42e   :  { %v14273_v46 = vld [vmem:[#allocation9 + $0x84c] sm:$0xf]  ;;  %v12839_v47 = vor.u32 %v14425_v25, %v12836_v19  ;;  %v11627_v19 = vor.u32 %v14126_v33, %v11626_v30  ;;  %v11242_v29 = vld [vmem:[#allocation9 + $0x90] sm:$0xf] }
 0x42f   :  { %7890 = vmatpush.bf16.msrb.mxu2 %v12871_v38  ;;  %v12228_v12 = vld [vmem:[#allocation9 + $0x868] sm:$0xf0]  ;;  %7867 = vmatpush.bf16.msrb.mxu0 %v12263_v41  ;;  %v14054_v41 = vld [vmem:[#allocation9 + $0x16c] sm:$0xf0] }
 0x430   :  { %v14337_v61 = vld [vmem:[#allocation9 + $0xa4c] sm:$0xf]  ;;  %v12231_v34 = vor.u32 %v14273_v46, %v12228_v12  ;;  %v11914_v46 = vld [vmem:[#allocation9 + $0x5d0] sm:$0xf] }
 0x431   :  { %v12484_v35 = vld [vmem:[#allocation9 + $0xa68] sm:$0xf0]  ;;  %7880 = vmatpush.bf16.msrb.mxu1 %v12519_v44  ;;  %7801 = vmatpush.bf16.msrb.mxu3 %v13059_v50  ;;  %v11594_v44 = vld [vmem:[#allocation9 + $0x350] sm:$0xf] }
 0x432   :  { %v14417_v48 = vld [vmem:[#allocation9 + $0xccc] sm:$0xf]  ;;  %v12487_v16 = vor.u32 %v14337_v61, %v12484_v35  ;;  %v11339_v35 = vor.u32 %v14054_v41, %v11338_v40  ;;  %v11306_v50 = vld [vmem:[#allocation9 + $0x110] sm:$0xf] }
 0x433   :  { %v12804_v49 = vld [vmem:[#allocation9 + $0xce8] sm:$0xf0]  ;;  %7891 = vmatpush.bf16.msrb.mxu2 %v12839_v47  ;;  %7868 = vmatpush.bf16.msrb.mxu0 %v12231_v34  ;;  %v14198_v47 = vld [vmem:[#allocation9 + $0x5ec] sm:$0xf0]  ;;  %v7637_v34 = vpop.f32.mrf.mxu2 }
 0x434   :  { %v14265_v60 = vld [vmem:[#allocation9 + $0x80c] sm:$0xf]  ;;  %v12807_v2 = vor.u32 %v14417_v48, %v12804_v49  ;;  %v11595_v48 = vor.u32 %v14118_v22, %v11594_v44  ;;  %v11915_v52 = vor.u32 %v14198_v47, %v11914_v46  ;;  %v14030_v33 = vld [vmem:[#allocation9 + $0xac] sm:$0xf0] }
 0x435   :  { %v12196_v0 = vld [vmem:[#allocation9 + $0x828] sm:$0xf0]  ;;  %7881 = vmatpush.bf16.msrb.mxu1 %v12487_v16  ;;  %7802 = vmatpush.bf16.msrb.mxu3 %v13027_v28  ;;  %v14046_v16 = vld [vmem:[#allocation9 + $0x12c] sm:$0xf0] }
 0x436   :  { %v14329_v63 = vld [vmem:[#allocation9 + $0xa0c] sm:$0xf]  ;;  %v12199_v32 = vor.u32 %v14265_v60, %v12196_v0  ;;  %v14110_v60 = vld [vmem:[#allocation9 + $0x32c] sm:$0xf0]  ;;  %v15162_v0 = vadd.f32 %v7637_v34, %v15154_v27  ;;  %v11307_v8 = vor.u32 %v14046_v16, %v11306_v50 }
 0x437   :  { %v12452_v5 = vld [vmem:[#allocation9 + $0xa28] sm:$0xf0]  ;;  %7892 = vmatpush.bf16.msrb.mxu2 %v12807_v2  ;;  %v15164_v2 = vpop.f32.mrf.mxu0  ;;  %v11563_v42 = vor.u32 %v14110_v60, %v11562_v36  ;;  %v14094_v17 = vld [vmem:[#allocation9 + $0x2ac] sm:$0xf0] }
 0x438   :  { %v14409_v6 = vld [vmem:[#allocation9 + $0xc8c] sm:$0xf]  ;;  %v12455_v10 = vor.u32 %v14329_v63, %v12452_v5  ;;  %7869 = vmatpush.bf16.msrb.mxu0 %v12199_v32  ;;  %v11882_v63 = vld [vmem:[#allocation9 + $0x590] sm:$0xf] }
 0x439   :  { %v12772_v7 = vld [vmem:[#allocation9 + $0xca8] sm:$0xf0]  ;;  %7803 = vmatpush.bf16.msrb.mxu3 %v12995_v31  ;;  %v14190_v5 = vld [vmem:[#allocation9 + $0x5ac] sm:$0xf0] }
 0x43a   :  { %v12775_v45 = vor.u32 %v14409_v6, %v12772_v7  ;;  %v14401_v51 = vld [vmem:[#allocation9 + $0xc4c] sm:$0xf]  ;;  %7882 = vmatpush.bf16.msrb.mxu1 %v12455_v10  ;;  %v15166_v6 = vpop.f32.mrf.mxu1  ;;  %v11883_v27 = vor.u32 %v14190_v5, %v11882_v63  ;;  %v14038_v32 = vld [vmem:[#allocation9 + $0xec] sm:$0xf0] }
 0x43b   :  { %v12740_v54 = vld [vmem:[#allocation9 + $0xc68] sm:$0xf0]  ;;  %7870 = vmatmul.bf16.vlgmr.msrb.gmra.mxu0 %v15097_v14  ;;  %v11530_v10 = vld [vmem:[#allocation9 + $0x2d0] sm:$0xf]  ;;  %v7639_v30 = vpop.f32.mrf.mxu2 }
 0x43c   :  { %7893 = vmatpush.bf16.msrb.mxu2 %v12775_v45  ;;  %7914 = vmatpush.bf16.msra.mxu0 %v11403_v11  ;;  %v12743_v38 = vor.u32 %v14401_v51, %v12740_v54  ;;  %v14393_v15 = vld [vmem:[#allocation9 + $0xc0c] sm:$0xf]  ;;  %v14102_v45 = vld [vmem:[#allocation9 + $0x2ec] sm:$0xf0]  ;;  %v11275_v51 = vor.u32 %v14038_v32, %v11274_v57 }
 0x43d   :  { %v12708_v25 = vld [vmem:[#allocation9 + $0xc28] sm:$0xf0]  ;;  %7883 = vmatmul.bf16.vlgmr.msrb.gmra.mxu1 %v15099_v20  ;;  %7804 = vmatpush.bf16.msrb.mxu3 %v12963_v24  ;;  %v11850_v11 = vld [vmem:[#allocation9 + $0x550] sm:$0xf] }
 0x43e   :  { %7927 = vmatpush.bf16.msra.mxu1 %v11659_v18  ;;  %v14257_v59 = vld [vmem:[#allocation9 + $0x7cc] sm:$0xf]  ;;  %v12711_v12 = vor.u32 %v14393_v15, %v12708_v25  ;;  %v11531_v18 = vor.u32 %v14102_v45, %v11530_v10  ;;  %v11851_v26 = vor.u32 %v14182_v56, %v11850_v11  ;;  %v11498_v31 = vld [vmem:[#allocation9 + $0x290] sm:$0xf] }
 0x43f   :  { %v12164_v39 = vld [vmem:[#allocation9 + $0x7e8] sm:$0xf0]  ;;  %v14174_v37 = vld [vmem:[#allocation9 + $0x52c] sm:$0xf0] }
 0x440   :  { %7894 = vmatpush.bf16.msrb.mxu2 %v12743_v38  ;;  %7915 = vmatpush.bf16.msra.mxu0 %v11371_v58  ;;  %v12167_v61 = vor.u32 %v14257_v59, %v12164_v39  ;;  %v14249_v49 = vld [vmem:[#allocation9 + $0x78c] sm:$0xf]  ;;  %v7665_v38 = vpop.f32.mrf.mxu0  ;;  %v11818_v58 = vld [vmem:[#allocation9 + $0x510] sm:$0xf]  ;;  %v11499_v59 = vor.u32 %v14094_v17, %v11498_v31 }
 0x441   :  { %v12132_v55 = vld [vmem:[#allocation9 + $0x7a8] sm:$0xf0]  ;;  %7805 = vmatmul.bf16.vlgmr.msrb.gmra.mxu3 %v15134_v1  ;;  %v11210_v41 = vld [vmem:[#allocation9 + $0x50] sm:$0xf]  ;;  %v11819_v44 = vor.u32 %v14174_v37, %v11818_v58 }
 0x442   :  { %7928 = vmatpush.bf16.msra.mxu1 %v11627_v19  ;;  %7849 = vmatpush.bf16.msra.mxu3 %v12167_v61  ;;  %v12135_v7 = vor.u32 %v14249_v49, %v12132_v55  ;;  %v14241_v28 = vld [vmem:[#allocation9 + $0x74c] sm:$0xf]  ;;  %v7678_v15 = vpop.f32.mrf.mxu1  ;;  %v11243_v19 = vor.u32 %v14030_v33, %v11242_v29  ;;  %v14022_v22 = vld [vmem:[#allocation9 + $0x6c] sm:$0xf0] }
 0x443   :  { %v12100_v9 = vld [vmem:[#allocation9 + $0x768] sm:$0xf0]  ;;  %v11466_v24 = vld [vmem:[#allocation9 + $0x250] sm:$0xf] }
 0x444   :  { %7895 = vmatpush.bf16.msrb.mxu2 %v12711_v12  ;;  %7916 = vmatpush.bf16.msra.mxu0 %v11339_v35  ;;  %v12103_v13 = vor.u32 %v14241_v28, %v12100_v9  ;;  %v14233_v54 = vld [vmem:[#allocation9 + $0x70c] sm:$0xf]  ;;  %v14086_v46 = vld [vmem:[#allocation9 + $0x26c] sm:$0xf0] }
 0x445   :  { %v12068_v23 = vld [vmem:[#allocation9 + $0x728] sm:$0xf0]  ;;  %v11786_v47 = vld [vmem:[#allocation9 + $0x4d0] sm:$0xf]  ;;  %v11467_v49 = vor.u32 %v14086_v46, %v11466_v24 }
 0x446   :  { %7929 = vmatpush.bf16.msra.mxu1 %v11595_v48  ;;  %7850 = vmatpush.bf16.msra.mxu3 %v12135_v7  ;;  %v12071_v25 = vor.u32 %v14233_v54, %v12068_v23  ;;  %v14225_v39 = vld [vmem:[#allocation9 + $0x6cc] sm:$0xf]  ;;  %v14166_v12 = vld [vmem:[#allocation9 + $0x4ec] sm:$0xf0]  ;;  %v11211_v48 = vor.u32 %v14022_v22, %v11210_v41 }
 0x447   :  { %7896 = vmatmul.bf16.vlgmr.msrb.gmra.mxu2 %v15110_v4  ;;  %v12036_v40 = vld [vmem:[#allocation9 + $0x6e8] sm:$0xf0]  ;;  %v11178_v50 = vld [vmem:[#allocation9 + $0x10] sm:$0xf]  ;;  %v11787_v34 = vor.u32 %v14166_v12, %v11786_v47  ;;  %v15170_v16 = vpop.f32.mrf.mxu2  ;;  %v15174_v12 = vld [vmem:[#allocation10] sm:$0xff] }
 0x448   :  { %7940 = vmatpush.bf16.msra.mxu2 %v11915_v52  ;;  %7917 = vmatpush.bf16.msra.mxu0 %v11307_v8  ;;  %v12039_v61 = vor.u32 %v14225_v39, %v12036_v40  ;;  %v14217_v35 = vld [vmem:[#allocation9 + $0x68c] sm:$0xf]  ;;  %v14014_v52 = vld [vmem:[#allocation9 + $0x2c] sm:$0xf0] }
 0x449   :  { %v12004_v55 = vld [vmem:[#allocation9 + $0x6a8] sm:$0xf0]  ;;  %v11434_v36 = vld [vmem:[#allocation9 + $0x210] sm:$0xf]  ;;  %v11179_v57 = vor.u32 %v14014_v52, %v11178_v50 }
 0x44a   :  { %7930 = vmatpush.bf16.msra.mxu1 %v11563_v42  ;;  %7851 = vmatpush.bf16.msra.mxu3 %v12103_v13  ;;  %v14078_v60 = vld [vmem:[#allocation9 + $0x22c] sm:$0xf0]  ;;  %v12007_v42 = vor.u32 %v14217_v35, %v12004_v55  ;;  %v14209_v45 = vld [vmem:[#allocation9 + $0x64c] sm:$0xf] }
 0x44b   :  { %v11754_v63 = vld [vmem:[#allocation9 + $0x490] sm:$0xf]  ;;  %v11972_v11 = vld [vmem:[#allocation9 + $0x668] sm:$0xf0] }
 0x44c   :  { %7941 = vmatpush.bf16.msra.mxu2 %v11883_v27  ;;  %7918 = vmatpush.bf16.msra.mxu0 %v11275_v51  ;;  %v14158_v5 = vld [vmem:[#allocation9 + $0x4ac] sm:$0xf0]  ;;  %v11435_v27 = vor.u32 %v14078_v60, %v11434_v36  ;;  %v14201_v30 = vld [vmem:[#allocation9 + $0x60c] sm:$0xf] }
 0x44d   :  { %v12426_v7 = vld [vmem:[#allocation9 + $0x9d0] sm:$0xf]  ;;  %v11755_v32 = vor.u32 %v14158_v5, %v11754_v63  ;;  %v11940_v38 = vld [vmem:[#allocation9 + $0x628] sm:$0xf0] }
 0x44e   :  { %7931 = vmatpush.bf16.msra.mxu1 %v11531_v18  ;;  %7852 = vmatpush.bf16.msra.mxu3 %v12071_v25  ;;  %v14326_v8 = vld [vmem:[#allocation9 + $0x9ec] sm:$0xf0]  ;;  %v14513_v25 = vld [vmem:[#allocation9 + $0xfcc] sm:$0xf] }
 0x44f   :  { %v12682_v28 = vld [vmem:[#allocation9 + $0xbd0] sm:$0xf]  ;;  %v12427_v10 = vor.u32 %v14326_v8, %v12426_v7  ;;  %v7691_v17 = vpop.f32.mrf.mxu2  ;;  %v13156_v55 = vld [vmem:[#allocation9 + $0xfa8] sm:$0xf0] }
 0x450   :  { %7942 = vmatpush.bf16.msra.mxu2 %v11851_v26  ;;  %7919 = vmatpush.bf16.msra.mxu0 %v11243_v19  ;;  %v14390_v9 = vld [vmem:[#allocation9 + $0xbec] sm:$0xf0]  ;;  %v11975_v26 = vor.u32 %v14209_v45, %v11972_v11  ;;  %v13188_v19 = vld [vmem:[#allocation9 + $0xfe8] sm:$0xf0] }
 0x451   :  { %v11722_v56 = vld [vmem:[#allocation9 + $0x450] sm:$0xf]  ;;  %v12683_v13 = vor.u32 %v14390_v9, %v12682_v28  ;;  %v13191_v47 = vor.u32 %v14513_v25, %v13188_v19 }
 0x452   :  { %7932 = vmatpush.bf16.msra.mxu1 %v11499_v59  ;;  %7853 = vmatpush.bf16.msra.mxu3 %v12039_v61  ;;  %v14150_v51 = vld [vmem:[#allocation9 + $0x46c] sm:$0xf0]  ;;  %v4924_v61 = vperm.slane %v15174_v12, 2 }
 0x453   :  { %v12394_v18 = vld [vmem:[#allocation9 + $0x990] sm:$0xf]  ;;  %v11723_v33 = vor.u32 %v14150_v51, %v11722_v56 }
 0x454   :  { %7943 = vmatpush.bf16.msra.mxu2 %v11819_v44  ;;  %7920 = vmatpush.bf16.msra.mxu0 %v11211_v48  ;;  %v14318_v54 = vld [vmem:[#allocation9 + $0x9ac] sm:$0xf0]  ;;  %v11943_v44 = vor.u32 %v14201_v30, %v11940_v38  ;;  %v14489_v30 = vld [vmem:[#allocation9 + $0xf0c] sm:$0xf] }
 0x455   :  { %v12650_v23 = vld [vmem:[#allocation9 + $0xb90] sm:$0xf]  ;;  %v12395_v31 = vor.u32 %v14318_v54, %v12394_v18  ;;  %v7715_v63 = vpop.f32.mrf.mxu0 }
 0x456   :  { %7933 = vmatpush.bf16.msra.mxu1 %v11467_v49  ;;  %7854 = vmatpush.bf16.msra.mxu3 %v12007_v42  ;;  %v14382_v29 = vld [vmem:[#allocation9 + $0xbac] sm:$0xf0]  ;;  %v14505_v49 = vld [vmem:[#allocation9 + $0xf8c] sm:$0xf]  ;;  %v7716_v42 = vadd.f32 %v7715_v63, %v4924_v61 }
 0x457   :  { %v11690_v58 = vld [vmem:[#allocation9 + $0x410] sm:$0xf]  ;;  %v12651_v15 = vor.u32 %v14382_v29, %v12650_v23  ;;  %v7728_v5 = vpop.f32.mrf.mxu1  ;;  %v13159_v28 = vor.u32 %v14505_v49, %v13156_v55  ;;  %v13028_v63 = vld [vmem:[#allocation9 + $0xea8] sm:$0xf0] }
 0x458   :  { %7944 = vmatpush.bf16.msra.mxu2 %v11787_v34  ;;  %7921 = vmatpush.bf16.msra.mxu0 %v11179_v57  ;;  %v14142_v37 = vld [vmem:[#allocation9 + $0x42c] sm:$0xf0]  ;;  %v7729_v45 = vadd.f32 %v7728_v5, %v7716_v42 }
 0x459   :  { %v12362_v59 = vld [vmem:[#allocation9 + $0x950] sm:$0xf]  ;;  %v11691_v46 = vor.u32 %v14142_v37, %v11690_v58 }
 0x45a   :  { %7934 = vmatpush.bf16.msra.mxu1 %v11435_v27  ;;  %v14310_v39 = vld [vmem:[#allocation9 + $0x96c] sm:$0xf0]  ;;  %7855 = vmatpush.bf16.msra.mxu3 %v11975_v26  ;;  %v14497_v27 = vld [vmem:[#allocation9 + $0xf4c] sm:$0xf] }
 0x45b   :  { %7922 = vmatmul.bf16.vlgmr.msra.gmra.mxu0 %v15070_v21  ;;  %v12618_v40 = vld [vmem:[#allocation9 + $0xb50] sm:$0xf]  ;;  %v12363_v35 = vor.u32 %v14310_v39, %v12362_v59 }
 0x45c   :  { %7945 = vmatpush.bf16.msra.mxu2 %v11755_v32  ;;  %7966 = vmatpush.bf16.msrb.mxu0 %v12427_v10  ;;  %v14374_v41 = vld [vmem:[#allocation9 + $0xb6c] sm:$0xf0]  ;;  %v13124_v32 = vld [vmem:[#allocation9 + $0xf68] sm:$0xf0] }
 0x45d   :  { %7935 = vmatmul.bf16.vlgmr.msra.gmra.mxu1 %v15072_v43  ;;  %v12938_v22 = vld [vmem:[#allocation9 + $0xdd0] sm:$0xf]  ;;  %v12619_v48 = vor.u32 %v14374_v41, %v12618_v40  ;;  %v13127_v23 = vor.u32 %v14497_v27, %v13124_v32  ;;  %v14066_v32 = vld [vmem:[#allocation9 + $0x1d4] sm:$0xf] }
 0x45e   :  { %7979 = vmatpush.bf16.msrb.mxu1 %v12683_v13  ;;  %v14454_v24 = vld [vmem:[#allocation9 + $0xdec] sm:$0xf0]  ;;  %7856 = vmatpush.bf16.msra.mxu3 %v11943_v44  ;;  %v14481_v44 = vld [vmem:[#allocation9 + $0xecc] sm:$0xf] }
 0x45f   :  { %v12330_v50 = vld [vmem:[#allocation9 + $0x910] sm:$0xf]  ;;  %v12939_v52 = vor.u32 %v14454_v24, %v12938_v22  ;;  %v7730_v25 = vpop.f32.mrf.mxu1  ;;  %v13060_v22 = vld [vmem:[#allocation9 + $0xee8] sm:$0xf0] }
 0x460   :  { %7946 = vmatpush.bf16.msra.mxu2 %v11723_v33  ;;  %7967 = vmatpush.bf16.msrb.mxu0 %v12395_v31  ;;  %v14302_v34 = vld [vmem:[#allocation9 + $0x92c] sm:$0xf0]  ;;  %v13092_v33 = vld [vmem:[#allocation9 + $0xf28] sm:$0xf0] }
 0x461   :  { %v12586_v36 = vld [vmem:[#allocation9 + $0xb10] sm:$0xf]  ;;  %v12331_v9 = vor.u32 %v14302_v34, %v12330_v50  ;;  %7857 = vmatmul.bf16.vlgmr.msra.gmra.mxu3 %v15080_v62  ;;  %v13095_v39 = vor.u32 %v14489_v30, %v13092_v33  ;;  %v14473_v34 = vld [vmem:[#allocation9 + $0xe8c] sm:$0xf] }
 0x462   :  { %7980 = vmatpush.bf16.msrb.mxu1 %v12651_v15  ;;  %v14366_v60 = vld [vmem:[#allocation9 + $0xb2c] sm:$0xf0]  ;;  %7901 = vmatpush.bf16.msrb.mxu3 %v13191_v47  ;;  %v7717_v15 = vpop.f32.mrf.mxu0  ;;  %v7598_v47 = vpop.f32.mrf.mxu3  ;;  %v12996_v30 = vld [vmem:[#allocation9 + $0xe68] sm:$0xf0] }
 0x463   :  { %v12906_v7 = vld [vmem:[#allocation9 + $0xd90] sm:$0xf]  ;;  %v12587_v57 = vor.u32 %v14366_v60, %v12586_v36  ;;  %v15180_v49 = vadd.f32 %v7598_v47, %v15157_v53  ;;  %v14457_v25 = vld [vmem:[#allocation9 + $0xe0c] sm:$0xf]  ;;  %v14050_v47 = vld [vmem:[#allocation9 + $0x154] sm:$0xf] }
 0x464   :  { %v14446_v8 = vld [vmem:[#allocation9 + $0xdac] sm:$0xf0]  ;;  %7947 = vmatpush.bf16.msra.mxu2 %v11691_v46  ;;  %7968 = vmatpush.bf16.msrb.mxu0 %v12363_v35 }
 0x465   :  { %v12298_v10 = vld [vmem:[#allocation9 + $0x8d0] sm:$0xf]  ;;  %v12907_v11 = vor.u32 %v14446_v8, %v12906_v7  ;;  %14626 = vtanh.f32 %v15180_v49  ;;  %v14539_v49 = vld [vmem:[%s15500_s7 + $0x98] sm:$0xff] }
 0x466   :  { %7981 = vmatpush.bf16.msrb.mxu1 %v12619_v48  ;;  %v14294_v56 = vld [vmem:[#allocation9 + $0x8ec] sm:$0xf0]  ;;  %7902 = vmatpush.bf16.msrb.mxu3 %v13159_v28 }
 0x467   :  { %v12554_v13 = vld [vmem:[#allocation9 + $0xad0] sm:$0xf]  ;;  %7948 = vmatmul.bf16.vlgmr.msra.gmra.mxu2 %v15078_v3  ;;  %v12299_v29 = vor.u32 %v14294_v56, %v12298_v10  ;;  %v7741_v42 = vpop.f32.mrf.mxu2  ;;  %v11404_v10 = vld [vmem:[#allocation9 + $0x1f0] sm:$0xf0] }
 0x468   :  { %7992 = vmatpush.bf16.msrb.mxu2 %v12939_v52  ;;  %v14358_v51 = vld [vmem:[#allocation9 + $0xaec] sm:$0xf0]  ;;  %7969 = vmatpush.bf16.msrb.mxu0 %v12331_v9  ;;  %v13063_v52 = vor.u32 %v14481_v44, %v13060_v22  ;;  %v15182_v53 = vadd.f32 %v7741_v42, %v7729_v45  ;;  %v14130_v56 = vld [vmem:[#allocation9 + $0x3d4] sm:$0xf] }
 0x469   :  { %v12874_v18 = vld [vmem:[#allocation9 + $0xd50] sm:$0xf]  ;;  %v12555_v26 = vor.u32 %v14358_v51, %v12554_v13  ;;  %v11660_v13 = vld [vmem:[#allocation9 + $0x3f0] sm:$0xf0] }
 0x46a   :  { %v14438_v54 = vld [vmem:[#allocation9 + $0xd6c] sm:$0xf0]  ;;  %7982 = vmatpush.bf16.msrb.mxu1 %v12587_v57  ;;  %7903 = vmatpush.bf16.msrb.mxu3 %v13127_v23  ;;  %v11407_v23 = vor.u32 %v14066_v32, %v11404_v10  ;;  %v11663_v45 = vor.u32 %v14130_v56, %v11660_v13  ;;  %v11564_v32 = vld [vmem:[#allocation9 + $0x330] sm:$0xf0] }
 0x46b   :  { %v12266_v31 = vld [vmem:[#allocation9 + $0x890] sm:$0xf]  ;;  %v12875_v17 = vor.u32 %v14438_v54, %v12874_v18  ;;  %v14186_v13 = vld [vmem:[#allocation9 + $0x594] sm:$0xf] }
 0x46c   :  { %7993 = vmatpush.bf16.msrb.mxu2 %v12907_v11  ;;  %v14286_v38 = vld [vmem:[#allocation9 + $0x8ac] sm:$0xf0]  ;;  %7970 = vmatpush.bf16.msrb.mxu0 %v12299_v29  ;;  %v13031_v11 = vor.u32 %v14473_v34, %v13028_v63  ;;  %v7600_v29 = vpop.f32.mrf.mxu3 }
 0x46d   :  { %v12522_v58 = vld [vmem:[#allocation9 + $0xa90] sm:$0xf]  ;;  %v12267_v40 = vor.u32 %v14286_v38, %v12266_v31  ;;  %v11372_v38 = vld [vmem:[#allocation9 + $0x1b0] sm:$0xf0] }
 0x46e   :  { %v14350_v37 = vld [vmem:[#allocation9 + $0xaac] sm:$0xf0]  ;;  %7983 = vmatpush.bf16.msrb.mxu1 %v12555_v26  ;;  %7904 = vmatpush.bf16.msrb.mxu3 %v13095_v39  ;;  %v14465_v26 = vld [vmem:[#allocation9 + $0xe4c] sm:$0xf] }
 0x46f   :  { %v12842_v19 = vld [vmem:[#allocation9 + $0xd10] sm:$0xf]  ;;  %v12523_v41 = vor.u32 %v14350_v37, %v12522_v58  ;;  %v14122_v58 = vld [vmem:[#allocation9 + $0x394] sm:$0xf]  ;;  %v12999_v15 = vor.u32 %v14465_v26, %v12996_v30 }
 0x470   :  { %v14430_v59 = vld [vmem:[#allocation9 + $0xd2c] sm:$0xf0]  ;;  %7994 = vmatpush.bf16.msrb.mxu2 %v12875_v17  ;;  %7971 = vmatpush.bf16.msrb.mxu0 %v12267_v40  ;;  %v14058_v17 = vld [vmem:[#allocation9 + $0x194] sm:$0xf]  ;;  %v12964_v40 = vld [vmem:[#allocation9 + $0xe28] sm:$0xf0] }
 0x471   :  { %v12234_v24 = vld [vmem:[#allocation9 + $0x850] sm:$0xf]  ;;  %v12843_v46 = vor.u32 %v14430_v59, %v12842_v19  ;;  %v11628_v37 = vld [vmem:[#allocation9 + $0x3b0] sm:$0xf0]  ;;  %v7743_v59 = vpop.f32.mrf.mxu2  ;;  %v11375_v39 = vor.u32 %v14058_v17, %v11372_v38 }
 0x472   :  { %v14278_v61 = vld [vmem:[#allocation9 + $0x86c] sm:$0xf0]  ;;  %7984 = vmatpush.bf16.msrb.mxu1 %v12523_v41  ;;  %7905 = vmatpush.bf16.msrb.mxu3 %v13063_v52  ;;  %v11631_v22 = vor.u32 %v14122_v58, %v11628_v37  ;;  %v11916_v52 = vld [vmem:[#allocation9 + $0x5f0] sm:$0xf0] }
 0x473   :  { %v12490_v35 = vld [vmem:[#allocation9 + $0xa50] sm:$0xf]  ;;  %v12235_v36 = vor.u32 %v14278_v61, %v12234_v24  ;;  %v11340_v61 = vld [vmem:[#allocation9 + $0x170] sm:$0xf0] }
 0x474   :  { %v14342_v48 = vld [vmem:[#allocation9 + $0xa6c] sm:$0xf0]  ;;  %7995 = vmatpush.bf16.msrb.mxu2 %v12843_v46  ;;  %v11343_v63 = vor.u32 %v14050_v47, %v11340_v61  ;;  %v14034_v26 = vld [vmem:[#allocation9 + $0xd4] sm:$0xf] }
 0x475   :  { %v12810_v55 = vld [vmem:[#allocation9 + $0xcd0] sm:$0xf]  ;;  %v12491_v60 = vor.u32 %v14342_v48, %v12490_v35  ;;  %7972 = vmatpush.bf16.msrb.mxu0 %v12235_v36  ;;  %v14114_v35 = vld [vmem:[#allocation9 + $0x354] sm:$0xf] }
 0x476   :  { %v14422_v50 = vld [vmem:[#allocation9 + $0xcec] sm:$0xf0]  ;;  %7906 = vmatpush.bf16.msrb.mxu3 %v13031_v11  ;;  %v11596_v48 = vld [vmem:[#allocation9 + $0x370] sm:$0xf0] }
 0x477   :  { %v12202_v5 = vld [vmem:[#allocation9 + $0x810] sm:$0xf]  ;;  %v12811_v8 = vor.u32 %v14422_v50, %v12810_v55  ;;  %7985 = vmatpush.bf16.msrb.mxu1 %v12491_v60  ;;  %v12967_v55 = vor.u32 %v14457_v25, %v12964_v40  ;;  %v14194_v50 = vld [vmem:[#allocation9 + $0x5d4] sm:$0xf]  ;;  %v7650_v60 = vpop.f32.mrf.mxu3  ;;  %v15188_v11 = vpop.f32.mrf.mxu0 }
 0x478   :  { %v14270_v7 = vld [vmem:[#allocation9 + $0x82c] sm:$0xf0]  ;;  %v14178_v17 = vld [vmem:[#allocation9 + $0x554] sm:$0xf] }
 0x479   :  { %v12458_v28 = vld [vmem:[#allocation9 + $0xa10] sm:$0xf]  ;;  %v12203_v51 = vor.u32 %v14270_v7, %v12202_v5  ;;  %7996 = vmatpush.bf16.msrb.mxu2 %v12811_v8  ;;  %v11599_v5 = vor.u32 %v14114_v35, %v11596_v48  ;;  %v7651_v7 = vadd.f32 %v7650_v60, %v15162_v0  ;;  %v15190_v56 = vpop.f32.mrf.mxu1  ;;  %v11852_v38 = vld [vmem:[#allocation9 + $0x570] sm:$0xf0] }
 0x47a   :  { %v14334_v9 = vld [vmem:[#allocation9 + $0xa2c] sm:$0xf0]  ;;  %7907 = vmatpush.bf16.msrb.mxu3 %v12999_v15  ;;  %v11855_v40 = vor.u32 %v14178_v17, %v11852_v38  ;;  %v14170_v47 = vld [vmem:[#allocation9 + $0x514] sm:$0xf] }
 0x47b   :  { %v12778_v57 = vld [vmem:[#allocation9 + $0xc90] sm:$0xf]  ;;  %v12459_v18 = vor.u32 %v14334_v9, %v12458_v28  ;;  %7973 = vmatpush.bf16.msrb.mxu0 %v12203_v51  ;;  %v14042_v28 = vld [vmem:[#allocation9 + $0x114] sm:$0xf]  ;;  %v11919_v9 = vor.u32 %v14194_v50, %v11916_v52  ;;  %v7664_v10 = vadd.f32 %v15164_v2, %v7651_v7 }
 0x47c   :  { %v14414_v27 = vld [vmem:[#allocation9 + $0xcac] sm:$0xf0]  ;;  %v11884_v51 = vld [vmem:[#allocation9 + $0x5b0] sm:$0xf0] }
 0x47d   :  { %v12779_v54 = vor.u32 %v14414_v27, %v12778_v57  ;;  %v12746_v33 = vld [vmem:[#allocation9 + $0xc50] sm:$0xf]  ;;  %7986 = vmatpush.bf16.msrb.mxu1 %v12459_v18  ;;  %v11308_v57 = vld [vmem:[#allocation9 + $0x130] sm:$0xf0]  ;;  %v7677_v30 = vadd.f32 %v15166_v6, %v7664_v10  ;;  %v11887_v2 = vor.u32 %v14186_v13, %v11884_v51 }
 0x47e   :  { %v14406_v31 = vld [vmem:[#allocation9 + $0xc6c] sm:$0xf0]  ;;  %7974 = vmatmul.bf16.vlgmr.msrb.gmra.mxu0 %v15097_v14  ;;  %v14106_v27 = vld [vmem:[#allocation9 + $0x314] sm:$0xf]  ;;  %7908 = vmatpush.bf16.msrb.mxu3 %v12967_v55  ;;  %v11311_v0 = vor.u32 %v14042_v28, %v11308_v57 }
 0x47f   :  { %7997 = vmatpush.bf16.msrb.mxu2 %v12779_v54  ;;  %8018 = vmatpush.bf16.msra.mxu0 %v11407_v23  ;;  %v12747_v19 = vor.u32 %v14406_v31, %v12746_v33  ;;  %v12714_v41 = vld [vmem:[#allocation9 + $0xc10] sm:$0xf]  ;;  %v11567_v54 = vor.u32 %v14106_v27, %v11564_v32  ;;  %v11276_v33 = vld [vmem:[#allocation9 + $0xf0] sm:$0xf0]  ;;  %v7690_v58 = vadd.f32 %v15170_v16, %v7677_v30  ;;  %v7652_v15 = vpop.f32.mrf.mxu3 }
 0x480   :  { %v14398_v44 = vld [vmem:[#allocation9 + $0xc2c] sm:$0xf0]  ;;  %7987 = vmatmul.bf16.vlgmr.msrb.gmra.mxu1 %v15099_v20  ;;  %v11532_v31 = vld [vmem:[#allocation9 + $0x2f0] sm:$0xf0]  ;;  %v11279_v25 = vor.u32 %v14034_v26, %v11276_v33 }
 0x481   :  { %8031 = vmatpush.bf16.msra.mxu1 %v11663_v45  ;;  %v12170_v24 = vld [vmem:[#allocation9 + $0x7d0] sm:$0xf]  ;;  %v12715_v34 = vor.u32 %v14398_v44, %v12714_v41  ;;  %7909 = vmatmul.bf16.vlgmr.msrb.gmra.mxu3 %v15134_v1  ;;  %v14098_v45 = vld [vmem:[#allocation9 + $0x2d4] sm:$0xf] }
 0x482   :  { %v14262_v46 = vld [vmem:[#allocation9 + $0x7ec] sm:$0xf0]  ;;  %v11535_v6 = vor.u32 %v14098_v45, %v11532_v31  ;;  %v11244_v41 = vld [vmem:[#allocation9 + $0xb0] sm:$0xf0] }
 0x483   :  { %7998 = vmatpush.bf16.msrb.mxu2 %v12747_v19  ;;  %8019 = vmatpush.bf16.msra.mxu0 %v11375_v39  ;;  %v12171_v36 = vor.u32 %v14262_v46, %v12170_v24  ;;  %v12138_v8 = vld [vmem:[#allocation9 + $0x790] sm:$0xf]  ;;  %v14026_v39 = vld [vmem:[#allocation9 + $0x94] sm:$0xf]  ;;  %v7769_v24 = vpop.f32.mrf.mxu0  ;;  %v7782_v46 = vpop.f32.mrf.mxu1 }
 0x484   :  { %v14254_v42 = vld [vmem:[#allocation9 + $0x7ac] sm:$0xf0]  ;;  %v14090_v44 = vld [vmem:[#allocation9 + $0x294] sm:$0xf]  ;;  %v11247_v35 = vor.u32 %v14026_v39, %v11244_v41 }
 0x485   :  { %8032 = vmatpush.bf16.msra.mxu1 %v11631_v22  ;;  %7953 = vmatpush.bf16.msra.mxu3 %v12171_v36  ;;  %v12139_v18 = vor.u32 %v14254_v42, %v12138_v8  ;;  %v12106_v23 = vld [vmem:[#allocation9 + $0x750] sm:$0xf]  ;;  %v11500_v22 = vld [vmem:[#allocation9 + $0x2b0] sm:$0xf0] }
 0x486   :  { %v14246_v29 = vld [vmem:[#allocation9 + $0x76c] sm:$0xf0]  ;;  %v11820_v61 = vld [vmem:[#allocation9 + $0x530] sm:$0xf0]  ;;  %v11503_v48 = vor.u32 %v14090_v44, %v11500_v22 }
 0x487   :  { %7999 = vmatpush.bf16.msrb.mxu2 %v12715_v34  ;;  %8020 = vmatpush.bf16.msra.mxu0 %v11343_v63  ;;  %v12107_v37 = vor.u32 %v14246_v29, %v12106_v23  ;;  %v12074_v19 = vld [vmem:[#allocation9 + $0x710] sm:$0xf]  ;;  %v14018_v52 = vld [vmem:[#allocation9 + $0x54] sm:$0xf]  ;;  %v11823_v34 = vor.u32 %v14170_v47, %v11820_v61  ;;  %v7702_v57 = vpop.f32.mrf.mxu3 }
 0x488   :  { %v14238_v59 = vld [vmem:[#allocation9 + $0x72c] sm:$0xf0]  ;;  %v11212_v36 = vld [vmem:[#allocation9 + $0x70] sm:$0xf0] }
 0x489   :  { %8033 = vmatpush.bf16.msra.mxu1 %v11599_v5  ;;  %7954 = vmatpush.bf16.msra.mxu3 %v12139_v18  ;;  %v12075_v16 = vor.u32 %v14238_v59, %v12074_v19  ;;  %v12042_v55 = vld [vmem:[#allocation9 + $0x6d0] sm:$0xf]  ;;  %v14082_v60 = vld [vmem:[#allocation9 + $0x254] sm:$0xf]  ;;  %v11215_v28 = vor.u32 %v14018_v52, %v11212_v36  ;;  %v15196_v51 = vpop.f32.mrf.mxu2  ;;  %v15198_v18 = vadd.f32 %v7702_v57, %v7690_v58 }
 0x48a   :  { %8000 = vmatmul.bf16.vlgmr.msrb.gmra.mxu2 %v15110_v4  ;;  %v14230_v50 = vld [vmem:[#allocation9 + $0x6ec] sm:$0xf0]  ;;  %v11468_v63 = vld [vmem:[#allocation9 + $0x270] sm:$0xf0] }
 0x48b   :  { %8044 = vmatpush.bf16.msra.mxu2 %v11919_v9  ;;  %8021 = vmatpush.bf16.msra.mxu0 %v11311_v0  ;;  %v14162_v5 = vld [vmem:[#allocation9 + $0x4d4] sm:$0xf]  ;;  %v12043_v8 = vor.u32 %v14230_v50, %v12042_v55  ;;  %v12010_v42 = vld [vmem:[#allocation9 + $0x690] sm:$0xf]  ;;  %v11471_v9 = vor.u32 %v14082_v60, %v11468_v63  ;;  %14628 = vtanh.f32 %v15198_v18 }
 0x48c   :  { %v11788_v7 = vld [vmem:[#allocation9 + $0x4f0] sm:$0xf0]  ;;  %v14222_v27 = vld [vmem:[#allocation9 + $0x6ac] sm:$0xf0] }
 0x48d   :  { %8034 = vmatpush.bf16.msra.mxu1 %v11567_v54  ;;  %7955 = vmatpush.bf16.msra.mxu3 %v12107_v37  ;;  %v14010_v32 = vld [vmem:[#allocation9 + $0x14] sm:$0xf]  ;;  %v11791_v13 = vor.u32 %v14162_v5, %v11788_v7  ;;  %v11978_v15 = vld [vmem:[#allocation9 + $0x650] sm:$0xf] }
 0x48e   :  { %v11180_v10 = vld [vmem:[#allocation9 + $0x30] sm:$0xf0]  ;;  %v14214_v58 = vld [vmem:[#allocation9 + $0x66c] sm:$0xf0] }
 0x48f   :  { %8045 = vmatpush.bf16.msra.mxu2 %v11887_v2  ;;  %8022 = vmatpush.bf16.msra.mxu0 %v11279_v25  ;;  %v14074_v0 = vld [vmem:[#allocation9 + $0x214] sm:$0xf]  ;;  %v12011_v2 = vor.u32 %v14222_v27, %v12010_v42  ;;  %v11183_v31 = vor.u32 %v14010_v32, %v11180_v10  ;;  %v11979_v44 = vor.u32 %v14214_v58, %v11978_v15  ;;  %v7704_v22 = vpop.f32.mrf.mxu3  ;;  %v11946_v24 = vld [vmem:[#allocation9 + $0x610] sm:$0xf] }
 0x490   :  { %v11436_v54 = vld [vmem:[#allocation9 + $0x230] sm:$0xf0]  ;;  %v13194_v50 = vld [vmem:[#allocation9 + $0xfd0] sm:$0xf] }
 0x491   :  { %8035 = vmatpush.bf16.msra.mxu1 %v11535_v6  ;;  %7956 = vmatpush.bf16.msra.mxu3 %v12075_v16  ;;  %v14154_v23 = vld [vmem:[#allocation9 + $0x494] sm:$0xf]  ;;  %v11439_v17 = vor.u32 %v14074_v0, %v11436_v54  ;;  %v7795_v47 = vpop.f32.mrf.mxu2  ;;  %v14206_v16 = vld [vmem:[#allocation9 + $0x62c] sm:$0xf0] }
 0x492   :  { %v11756_v29 = vld [vmem:[#allocation9 + $0x4b0] sm:$0xf0]  ;;  %v14518_v52 = vld [vmem:[#allocation9 + $0xfec] sm:$0xf0]  ;;  %v11947_v5 = vor.u32 %v14206_v16, %v11946_v24 }
 0x493   :  { %8046 = vmatpush.bf16.msra.mxu2 %v11855_v40  ;;  %8023 = vmatpush.bf16.msra.mxu0 %v11247_v35  ;;  %v14322_v26 = vld [vmem:[#allocation9 + $0x9d4] sm:$0xf]  ;;  %v11759_v38 = vor.u32 %v14154_v23, %v11756_v29  ;;  %v13162_v32 = vld [vmem:[#allocation9 + $0xf90] sm:$0xf] }
 0x494   :  { %v12428_v30 = vld [vmem:[#allocation9 + $0x9f0] sm:$0xf0]  ;;  %v14510_v10 = vld [vmem:[#allocation9 + $0xfac] sm:$0xf0] }
 0x495   :  { %8036 = vmatpush.bf16.msra.mxu1 %v11503_v48  ;;  %7957 = vmatpush.bf16.msra.mxu3 %v12043_v8  ;;  %v14386_v33 = vld [vmem:[#allocation9 + $0xbd4] sm:$0xf]  ;;  %v12431_v37 = vor.u32 %v14322_v26, %v12428_v30  ;;  %v13098_v24 = vld [vmem:[#allocation9 + $0xf10] sm:$0xf] }
 0x496   :  { %v12684_v45 = vld [vmem:[#allocation9 + $0xbf0] sm:$0xf0] }
 0x497   :  { %8047 = vmatpush.bf16.msra.mxu2 %v11823_v34  ;;  %8024 = vmatpush.bf16.msra.mxu0 %v11215_v28  ;;  %v14146_v25 = vld [vmem:[#allocation9 + $0x454] sm:$0xf]  ;;  %v12687_v6 = vor.u32 %v14386_v33, %v12684_v45  ;;  %v13195_v28 = vor.u32 %v14518_v52, %v13194_v50  ;;  %v7819_v26 = vpop.f32.mrf.mxu0 }
 0x498   :  { %v11724_v19 = vld [vmem:[#allocation9 + $0x470] sm:$0xf0] }
 0x499   :  { %8037 = vmatpush.bf16.msra.mxu1 %v11471_v9  ;;  %v14314_v59 = vld [vmem:[#allocation9 + $0x994] sm:$0xf]  ;;  %7958 = vmatpush.bf16.msra.mxu3 %v12011_v2  ;;  %v11727_v46 = vor.u32 %v14146_v25, %v11724_v19  ;;  %v4925_v9 = vperm.slane %v15174_v12, 3  ;;  %v7832_v30 = vpop.f32.mrf.mxu1 }
 0x49a   :  { %v12396_v39 = vld [vmem:[#allocation9 + $0x9b0] sm:$0xf0] }
 0x49b   :  { %8048 = vmatpush.bf16.msra.mxu2 %v11791_v13  ;;  %v14378_v40 = vld [vmem:[#allocation9 + $0xb94] sm:$0xf]  ;;  %8025 = vmatpush.bf16.msra.mxu0 %v11183_v31  ;;  %v12399_v61 = vor.u32 %v14314_v59, %v12396_v39  ;;  %v7820_v45 = vadd.f32 %v7819_v26, %v4925_v9  ;;  %v13163_v31 = vor.u32 %v14510_v10, %v13162_v32 }
 0x49c   :  { %v12652_v41 = vld [vmem:[#allocation9 + $0xbb0] sm:$0xf0] }
 0x49d   :  { %8038 = vmatpush.bf16.msra.mxu1 %v11439_v17  ;;  %v14138_v35 = vld [vmem:[#allocation9 + $0x414] sm:$0xf]  ;;  %v12655_v55 = vor.u32 %v14378_v40, %v12652_v41  ;;  %7959 = vmatpush.bf16.msra.mxu3 %v11979_v44  ;;  %v7833_v58 = vadd.f32 %v7832_v30, %v7820_v45 }
 0x49e   :  { %v11692_v48 = vld [vmem:[#allocation9 + $0x430] sm:$0xf0]  ;;  %8026 = vmatmul.bf16.vlgmr.msra.gmra.mxu0 %v15070_v21 }
 0x49f   :  { %8049 = vmatpush.bf16.msra.mxu2 %v11759_v38  ;;  %8070 = vmatpush.bf16.msrb.mxu0 %v12431_v37  ;;  %v14306_v34 = vld [vmem:[#allocation9 + $0x954] sm:$0xf]  ;;  %v11695_v42 = vor.u32 %v14138_v35, %v11692_v48  ;;  %v13130_v38 = vld [vmem:[#allocation9 + $0xf50] sm:$0xf] }
 0x4a0   :  { %8039 = vmatmul.bf16.vlgmr.msra.gmra.mxu1 %v15072_v43  ;;  %v12364_v36 = vld [vmem:[#allocation9 + $0x970] sm:$0xf0]  ;;  %v14502_v37 = vld [vmem:[#allocation9 + $0xf6c] sm:$0xf0] }
 0x4a1   :  { %8083 = vmatpush.bf16.msrb.mxu1 %v12687_v6  ;;  %v14370_v60 = vld [vmem:[#allocation9 + $0xb54] sm:$0xf]  ;;  %v12367_v57 = vor.u32 %v14306_v34, %v12364_v36  ;;  %7960 = vmatpush.bf16.msra.mxu3 %v11947_v5  ;;  %v13131_v41 = vor.u32 %v14502_v37, %v13130_v38  ;;  %v7834_v50 = vpop.f32.mrf.mxu1  ;;  %v13066_v5 = vld [vmem:[#allocation9 + $0xed0] sm:$0xf] }
 0x4a2   :  { %v12620_v63 = vld [vmem:[#allocation9 + $0xb70] sm:$0xf0] }
 0x4a3   :  { %v14450_v7 = vld [vmem:[#allocation9 + $0xdd4] sm:$0xf]  ;;  %8050 = vmatpush.bf16.msra.mxu2 %v11727_v46  ;;  %8071 = vmatpush.bf16.msrb.mxu0 %v12399_v61  ;;  %v12623_v27 = vor.u32 %v14370_v60, %v12620_v63  ;;  %v14494_v46 = vld [vmem:[#allocation9 + $0xf2c] sm:$0xf0] }
 0x4a4   :  { %v12940_v8 = vld [vmem:[#allocation9 + $0xdf0] sm:$0xf0]  ;;  %7961 = vmatmul.bf16.vlgmr.msra.gmra.mxu3 %v15080_v62  ;;  %v13099_v36 = vor.u32 %v14494_v46, %v13098_v24  ;;  %v14470_v24 = vld [vmem:[#allocation9 + $0xe6c] sm:$0xf0] }
 0x4a5   :  { %8084 = vmatpush.bf16.msrb.mxu1 %v12655_v55  ;;  %v14298_v13 = vld [vmem:[#allocation9 + $0x914] sm:$0xf]  ;;  %v12943_v0 = vor.u32 %v14450_v7, %v12940_v8  ;;  %8005 = vmatpush.bf16.msrb.mxu3 %v13195_v28  ;;  %v7821_v55 = vpop.f32.mrf.mxu0  ;;  %v14486_v7 = vld [vmem:[#allocation9 + $0xeec] sm:$0xf0] }
 0x4a6   :  { %v12332_v54 = vld [vmem:[#allocation9 + $0x930] sm:$0xf0]  ;;  %v13067_v10 = vor.u32 %v14486_v7, %v13066_v5 }
 0x4a7   :  { %v14362_v23 = vld [vmem:[#allocation9 + $0xb14] sm:$0xf]  ;;  %8051 = vmatpush.bf16.msra.mxu2 %v11695_v42  ;;  %8072 = vmatpush.bf16.msrb.mxu0 %v12367_v57  ;;  %v12335_v12 = vor.u32 %v14298_v13, %v12332_v54  ;;  %v13034_v13 = vld [vmem:[#allocation9 + $0xe90] sm:$0xf] }
 0x4a8   :  { %v12588_v29 = vld [vmem:[#allocation9 + $0xb30] sm:$0xf0] }
 0x4a9   :  { %v14442_v2 = vld [vmem:[#allocation9 + $0xd94] sm:$0xf]  ;;  %8085 = vmatpush.bf16.msrb.mxu1 %v12623_v27  ;;  %v12591_v17 = vor.u32 %v14362_v23, %v12588_v29  ;;  %8006 = vmatpush.bf16.msrb.mxu3 %v13163_v31  ;;  %v7754_v23 = vpop.f32.mrf.mxu3  ;;  %v14478_v29 = vld [vmem:[#allocation9 + $0xeac] sm:$0xf0]  ;;  %v7845_v45 = vpop.f32.mrf.mxu2 }
 0x4aa   :  { %v12908_v33 = vld [vmem:[#allocation9 + $0xdb0] sm:$0xf0]  ;;  %8052 = vmatmul.bf16.vlgmr.msra.gmra.mxu2 %v15078_v3  ;;  %v15206_v38 = vadd.f32 %v7845_v45, %v7833_v58  ;;  %v14047_v45 = vld [vmem:[#allocation9 + $0x134] sm:$0xf0] }
 0x4ab   :  { %v14290_v15 = vld [vmem:[#allocation9 + $0x8d4] sm:$0xf]  ;;  %8096 = vmatpush.bf16.msrb.mxu2 %v12943_v0  ;;  %v12911_v25 = vor.u32 %v14442_v2, %v12908_v33  ;;  %8073 = vmatpush.bf16.msrb.mxu0 %v12335_v12  ;;  %v7755_v33 = vadd.f32 %v7754_v23, %v15182_v53 }
 0x4ac   :  { %v12300_v6 = vld [vmem:[#allocation9 + $0x8f0] sm:$0xf0] }
 0x4ad   :  { %v14354_v19 = vld [vmem:[#allocation9 + $0xad4] sm:$0xf]  ;;  %8086 = vmatpush.bf16.msrb.mxu1 %v12591_v17  ;;  %v12303_v44 = vor.u32 %v14290_v15, %v12300_v6  ;;  %8007 = vmatpush.bf16.msrb.mxu3 %v13131_v41  ;;  %v11410_v15 = vld [vmem:[#allocation9 + $0x1d8] sm:$0xf]  ;;  %v7768_v6 = vadd.f32 %v15188_v11, %v7755_v33 }
 0x4ae   :  { %v12556_v59 = vld [vmem:[#allocation9 + $0xaf0] sm:$0xf0]  ;;  %v11634_v11 = vld [vmem:[#allocation9 + $0x398] sm:$0xf] }
 0x4af   :  { %v14434_v39 = vld [vmem:[#allocation9 + $0xd54] sm:$0xf]  ;;  %v12559_v22 = vor.u32 %v14354_v19, %v12556_v59  ;;  %8097 = vmatpush.bf16.msrb.mxu2 %v12911_v25  ;;  %8074 = vmatpush.bf16.msrb.mxu0 %v12303_v44  ;;  %v14071_v25 = vld [vmem:[#allocation9 + $0x1f4] sm:$0xf0]  ;;  %v13035_v19 = vor.u32 %v14478_v29, %v13034_v13  ;;  %v7781_v46 = vadd.f32 %v15190_v56, %v7768_v6 }
 0x4b0   :  { %v12876_v40 = vld [vmem:[#allocation9 + $0xd70] sm:$0xf0]  ;;  %v11666_v59 = vld [vmem:[#allocation9 + $0x3d8] sm:$0xf]  ;;  %v11411_v44 = vor.u32 %v14071_v25, %v11410_v15 }
 0x4b1   :  { %v14282_v47 = vld [vmem:[#allocation9 + $0x894] sm:$0xf]  ;;  %v12879_v61 = vor.u32 %v14434_v39, %v12876_v40  ;;  %8087 = vmatpush.bf16.msrb.mxu1 %v12559_v22  ;;  %8008 = vmatpush.bf16.msrb.mxu3 %v13099_v36  ;;  %v14135_v39 = vld [vmem:[#allocation9 + $0x3f4] sm:$0xf0]  ;;  %v13002_v22 = vld [vmem:[#allocation9 + $0xe50] sm:$0xf]  ;;  %v15211_v55 = vadd.f32 %v15196_v51, %v7781_v46 }
 0x4b2   :  { %v12268_v16 = vld [vmem:[#allocation9 + $0x8b0] sm:$0xf0]  ;;  %v13003_v50 = vor.u32 %v14470_v24, %v13002_v22  ;;  %v14055_v51 = vld [vmem:[#allocation9 + $0x174] sm:$0xf0] }
 0x4b3   :  { %v14346_v35 = vld [vmem:[#allocation9 + $0xa94] sm:$0xf]  ;;  %v12271_v60 = vor.u32 %v14282_v47, %v12268_v16  ;;  %8098 = vmatpush.bf16.msrb.mxu2 %v12879_v61  ;;  %v11667_v47 = vor.u32 %v14135_v39, %v11666_v59  ;;  %v11378_v16 = vld [vmem:[#allocation9 + $0x198] sm:$0xf] }
 0x4b4   :  { %v12524_v48 = vld [vmem:[#allocation9 + $0xab0] sm:$0xf0]  ;;  %v14199_v13 = vld [vmem:[#allocation9 + $0x5f4] sm:$0xf0] }
 0x4b5   :  { %v14426_v52 = vld [vmem:[#allocation9 + $0xd14] sm:$0xf]  ;;  %v12527_v63 = vor.u32 %v14346_v35, %v12524_v48  ;;  %8075 = vmatpush.bf16.msrb.mxu0 %v12271_v60  ;;  %8009 = vmatpush.bf16.msrb.mxu3 %v13067_v10  ;;  %v14063_v35 = vld [vmem:[#allocation9 + $0x1b4] sm:$0xf0]  ;;  %v7847_v60 = vpop.f32.mrf.mxu2 }
 0x4b6   :  { %v12844_v34 = vld [vmem:[#allocation9 + $0xd30] sm:$0xf0]  ;;  %v14127_v48 = vld [vmem:[#allocation9 + $0x3b4] sm:$0xf0]  ;;  %v11379_v56 = vor.u32 %v14063_v35, %v11378_v16 }
 0x4b7   :  { %v14274_v8 = vld [vmem:[#allocation9 + $0x854] sm:$0xf]  ;;  %v12847_v42 = vor.u32 %v14426_v52, %v12844_v34  ;;  %8088 = vmatpush.bf16.msrb.mxu1 %v12527_v63  ;;  %v7756_v52 = vpop.f32.mrf.mxu3  ;;  %v12970_v34 = vld [vmem:[#allocation9 + $0xe10] sm:$0xf]  ;;  %v11922_v10 = vld [vmem:[#allocation9 + $0x5d8] sm:$0xf] }
 0x4b8   :  { %v12236_v28 = vld [vmem:[#allocation9 + $0x870] sm:$0xf0]  ;;  %v14462_v63 = vld [vmem:[#allocation9 + $0xe2c] sm:$0xf0]  ;;  %v11923_v33 = vor.u32 %v14199_v13, %v11922_v10  ;;  %v11890_v15 = vld [vmem:[#allocation9 + $0x598] sm:$0xf] }
 0x4b9   :  { %v14338_v9 = vld [vmem:[#allocation9 + $0xa54] sm:$0xf]  ;;  %v12239_v0 = vor.u32 %v14274_v8, %v12236_v28  ;;  %8099 = vmatpush.bf16.msrb.mxu2 %v12847_v42  ;;  %8010 = vmatpush.bf16.msrb.mxu3 %v13035_v19  ;;  %v11635_v8 = vor.u32 %v14127_v48, %v11634_v11  ;;  %v14191_v25 = vld [vmem:[#allocation9 + $0x5b4] sm:$0xf0] }
 0x4ba   :  { %v12492_v57 = vld [vmem:[#allocation9 + $0xa70] sm:$0xf0]  ;;  %v11538_v22 = vld [vmem:[#allocation9 + $0x2d8] sm:$0xf] }
 0x4bb   :  { %v14418_v27 = vld [vmem:[#allocation9 + $0xcd4] sm:$0xf]  ;;  %v12495_v54 = vor.u32 %v14338_v9, %v12492_v57  ;;  %8076 = vmatpush.bf16.msrb.mxu0 %v12239_v0  ;;  %v11346_v9 = vld [vmem:[#allocation9 + $0x158] sm:$0xf] }
 0x4bc   :  { %v12812_v32 = vld [vmem:[#allocation9 + $0xcf0] sm:$0xf0]  ;;  %v11602_v57 = vld [vmem:[#allocation9 + $0x358] sm:$0xf]  ;;  %v11347_v23 = vor.u32 %v14055_v51, %v11346_v9 }
 0x4bd   :  { %v14266_v26 = vld [vmem:[#allocation9 + $0x814] sm:$0xf]  ;;  %v12815_v2 = vor.u32 %v14418_v27, %v12812_v32  ;;  %8089 = vmatpush.bf16.msrb.mxu1 %v12495_v54  ;;  %v14119_v27 = vld [vmem:[#allocation9 + $0x374] sm:$0xf0]  ;;  %8011 = vmatpush.bf16.msrb.mxu3 %v13003_v50  ;;  %v12971_v32 = vor.u32 %v14462_v63, %v12970_v34 }
 0x4be   :  { %v12204_v30 = vld [vmem:[#allocation9 + $0x830] sm:$0xf0]  ;;  %v11603_v29 = vor.u32 %v14119_v27, %v11602_v57  ;;  %v14103_v24 = vld [vmem:[#allocation9 + $0x2f4] sm:$0xf0] }
 0x4bf   :  { %v14330_v31 = vld [vmem:[#allocation9 + $0xa14] sm:$0xf]  ;;  %v12207_v40 = vor.u32 %v14266_v26, %v12204_v30  ;;  %8100 = vmatpush.bf16.msrb.mxu2 %v12815_v2  ;;  %v11314_v2 = vld [vmem:[#allocation9 + $0x118] sm:$0xf]  ;;  %v11539_v16 = vor.u32 %v14103_v24, %v11538_v22 }
 0x4c0   :  { %v12460_v12 = vld [vmem:[#allocation9 + $0xa30] sm:$0xf0]  ;;  %v11315_v19 = vor.u32 %v14047_v45, %v11314_v2  ;;  %v14183_v46 = vld [vmem:[#allocation9 + $0x574] sm:$0xf0] }
 0x4c1   :  { %v14410_v17 = vld [vmem:[#allocation9 + $0xc94] sm:$0xf]  ;;  %v12463_v41 = vor.u32 %v14330_v31, %v12460_v12  ;;  %8077 = vmatpush.bf16.msrb.mxu0 %v12207_v40  ;;  %v11570_v31 = vld [vmem:[#allocation9 + $0x318] sm:$0xf]  ;;  %8012 = vmatpush.bf16.msrb.mxu3 %v12971_v32 }
 0x4c2   :  { %v12780_v37 = vld [vmem:[#allocation9 + $0xcb0] sm:$0xf0]  ;;  %v14111_v12 = vld [vmem:[#allocation9 + $0x334] sm:$0xf0] }
 0x4c3   :  { %v12783_v53 = vor.u32 %v14410_v17, %v12780_v37  ;;  %v14402_v58 = vld [vmem:[#allocation9 + $0xc54] sm:$0xf]  ;;  %8090 = vmatpush.bf16.msrb.mxu1 %v12463_v41  ;;  %v15215_v17 = vpop.f32.mrf.mxu0  ;;  %v15217_v37 = vpop.f32.mrf.mxu1  ;;  %v11571_v59 = vor.u32 %v14111_v12, %v11570_v31  ;;  %v11282_v41 = vld [vmem:[#allocation9 + $0xd8] sm:$0xf] }
 0x4c4   :  { %v12748_v61 = vld [vmem:[#allocation9 + $0xc70] sm:$0xf0]  ;;  %8078 = vmatmul.bf16.vlgmr.msrb.gmra.mxu0 %v15097_v14  ;;  %8013 = vmatmul.bf16.vlgmr.msrb.gmra.mxu3 %v15134_v1  ;;  %v11250_v48 = vld [vmem:[#allocation9 + $0x98] sm:$0xf] }
 0x4c5   :  { %8101 = vmatpush.bf16.msrb.mxu2 %v12783_v53  ;;  %8122 = vmatpush.bf16.msra.mxu0 %v11411_v44  ;;  %v12751_v36 = vor.u32 %v14402_v58, %v12748_v61  ;;  %v14394_v5 = vld [vmem:[#allocation9 + $0xc14] sm:$0xf]  ;;  %v11891_v53 = vor.u32 %v14191_v25, %v11890_v15  ;;  %v14039_v44 = vld [vmem:[#allocation9 + $0xf4] sm:$0xf0] }
 0x4c6   :  { %v12716_v7 = vld [vmem:[#allocation9 + $0xc30] sm:$0xf0]  ;;  %8091 = vmatmul.bf16.vlgmr.msrb.gmra.mxu1 %v15099_v20  ;;  %v11858_v58 = vld [vmem:[#allocation9 + $0x558] sm:$0xf]  ;;  %v11283_v61 = vor.u32 %v14039_v44, %v11282_v41 }
 0x4c7   :  { %8135 = vmatpush.bf16.msra.mxu1 %v11667_v47  ;;  %v14258_v42 = vld [vmem:[#allocation9 + $0x7d4] sm:$0xf]  ;;  %v12719_v0 = vor.u32 %v14394_v5, %v12716_v7  ;;  %v11859_v50 = vor.u32 %v14183_v46, %v11858_v58  ;;  %v14031_v52 = vld [vmem:[#allocation9 + $0xb4] sm:$0xf0] }
 0x4c8   :  { %v12172_v28 = vld [vmem:[#allocation9 + $0x7f0] sm:$0xf0]  ;;  %v11506_v34 = vld [vmem:[#allocation9 + $0x298] sm:$0xf] }
 0x4c9   :  { %8102 = vmatpush.bf16.msrb.mxu2 %v12751_v36  ;;  %8123 = vmatpush.bf16.msra.mxu0 %v11379_v56  ;;  %v12175_v54 = vor.u32 %v14258_v42, %v12172_v28  ;;  %v14250_v26 = vld [vmem:[#allocation9 + $0x794] sm:$0xf]  ;;  %v14095_v36 = vld [vmem:[#allocation9 + $0x2b4] sm:$0xf0] }
 0x4ca   :  { %v12140_v30 = vld [vmem:[#allocation9 + $0x7b0] sm:$0xf0]  ;;  %v11826_v63 = vld [vmem:[#allocation9 + $0x518] sm:$0xf]  ;;  %v11507_v42 = vor.u32 %v14095_v36, %v11506_v34  ;;  %v15224_v15 = vpop.f32.mrf.mxu2 }
 0x4cb   :  { %8136 = vmatpush.bf16.msra.mxu1 %v11635_v8  ;;  %8057 = vmatpush.bf16.msra.mxu3 %v12175_v54  ;;  %v12143_v6 = vor.u32 %v14250_v26, %v12140_v30  ;;  %v14242_v39 = vld [vmem:[#allocation9 + $0x754] sm:$0xf]  ;;  %v7873_v60 = vpop.f32.mrf.mxu0  ;;  %v7886_v56 = vpop.f32.mrf.mxu1  ;;  %v14175_v5 = vld [vmem:[#allocation9 + $0x534] sm:$0xf0]  ;;  %v11251_v8 = vor.u32 %v14031_v52, %v11250_v48 }
 0x4cc   :  { %v12108_v40 = vld [vmem:[#allocation9 + $0x770] sm:$0xf0]  ;;  %v11218_v51 = vld [vmem:[#allocation9 + $0x58] sm:$0xf]  ;;  %v11827_v57 = vor.u32 %v14175_v5, %v11826_v63  ;;  %v7806_v30 = vpop.f32.mrf.mxu3 }
 0x4cd   :  { %8103 = vmatpush.bf16.msrb.mxu2 %v12719_v0  ;;  %8124 = vmatpush.bf16.msra.mxu0 %v11347_v23  ;;  %v12111_v47 = vor.u32 %v14242_v39, %v12108_v40  ;;  %v14234_v35 = vld [vmem:[#allocation9 + $0x714] sm:$0xf]  ;;  %v14023_v27 = vld [vmem:[#allocation9 + $0x74] sm:$0xf0]  ;;  %v15222_v12 = vadd.f32 %v7806_v30, %v15211_v55 }
 0x4ce   :  { %v12076_v11 = vld [vmem:[#allocation9 + $0x730] sm:$0xf0]  ;;  %v11474_v32 = vld [vmem:[#allocation9 + $0x258] sm:$0xf] }
 0x4cf   :  { %8137 = vmatpush.bf16.msra.mxu1 %v11603_v29  ;;  %8058 = vmatpush.bf16.msra.mxu3 %v12143_v6  ;;  %v12079_v7 = vor.u32 %v14234_v35, %v12076_v11  ;;  %v14226_v28 = vld [vmem:[#allocation9 + $0x6d4] sm:$0xf]  ;;  %v14087_v10 = vld [vmem:[#allocation9 + $0x274] sm:$0xf0]  ;;  %v11219_v29 = vor.u32 %v14023_v27, %v11218_v51  ;;  %14630 = vtanh.f32 %v15222_v12 }
 0x4d0   :  { %8104 = vmatmul.bf16.vlgmr.msrb.gmra.mxu2 %v15110_v4  ;;  %v12044_v9 = vld [vmem:[#allocation9 + $0x6f0] sm:$0xf0]  ;;  %v11794_v13 = vld [vmem:[#allocation9 + $0x4d8] sm:$0xf]  ;;  %v11475_v26 = vor.u32 %v14087_v10, %v11474_v32 }
 0x4d1   :  { %8148 = vmatpush.bf16.msra.mxu2 %v11923_v33  ;;  %8125 = vmatpush.bf16.msra.mxu0 %v11315_v19  ;;  %v14167_v0 = vld [vmem:[#allocation9 + $0x4f4] sm:$0xf0]  ;;  %v12047_v54 = vor.u32 %v14226_v28, %v12044_v9  ;;  %v14218_v23 = vld [vmem:[#allocation9 + $0x694] sm:$0xf] }
 0x4d2   :  { %v12012_v2 = vld [vmem:[#allocation9 + $0x6b0] sm:$0xf0]  ;;  %v11186_v33 = vld [vmem:[#allocation9 + $0x18] sm:$0xf]  ;;  %v11795_v31 = vor.u32 %v14167_v0, %v11794_v13  ;;  %v7899_v63 = vpop.f32.mrf.mxu2 }
 0x4d3   :  { %8138 = vmatpush.bf16.msra.mxu1 %v11571_v59  ;;  %8059 = vmatpush.bf16.msra.mxu3 %v12111_v47  ;;  %v14015_v45 = vld [vmem:[#allocation9 + $0x34] sm:$0xf0]  ;;  %v12015_v41 = vor.u32 %v14218_v23, %v12012_v2  ;;  %v14210_v46 = vld [vmem:[#allocation9 + $0x654] sm:$0xf] }
 0x4d4   :  { %v11442_v25 = vld [vmem:[#allocation9 + $0x218] sm:$0xf]  ;;  %v11187_v22 = vor.u32 %v14015_v45, %v11186_v33  ;;  %v11980_v47 = vld [vmem:[#allocation9 + $0x670] sm:$0xf0]  ;;  %v7808_v36 = vpop.f32.mrf.mxu3 }
 0x4d5   :  { %8149 = vmatpush.bf16.msra.mxu2 %v11891_v53  ;;  %8126 = vmatpush.bf16.msra.mxu0 %v11283_v61  ;;  %v14079_v6 = vld [vmem:[#allocation9 + $0x234] sm:$0xf0]  ;;  %v11983_v34 = vor.u32 %v14210_v46, %v11980_v47  ;;  %v14202_v60 = vld [vmem:[#allocation9 + $0x614] sm:$0xf] }
 0x4d6   :  { %v11762_v19 = vld [vmem:[#allocation9 + $0x498] sm:$0xf]  ;;  %v11443_v24 = vor.u32 %v14079_v6, %v11442_v25  ;;  %v14514_v9 = vld [vmem:[#allocation9 + $0xfd4] sm:$0xf] }
 0x4d7   :  { %8139 = vmatpush.bf16.msra.mxu1 %v11539_v16  ;;  %8060 = vmatpush.bf16.msra.mxu3 %v12079_v7  ;;  %v14159_v59 = vld [vmem:[#allocation9 + $0x4b4] sm:$0xf0]  ;;  %v11948_v7 = vld [vmem:[#allocation9 + $0x630] sm:$0xf0] }
 0x4d8   :  { %v12434_v39 = vld [vmem:[#allocation9 + $0x9d8] sm:$0xf]  ;;  %v11763_v58 = vor.u32 %v14159_v59, %v11762_v19  ;;  %v13196_v51 = vld [vmem:[#allocation9 + $0xff0] sm:$0xf0]  ;;  %v11951_v13 = vor.u32 %v14202_v60, %v11948_v7 }
 0x4d9   :  { %8150 = vmatpush.bf16.msra.mxu2 %v11859_v50  ;;  %8127 = vmatpush.bf16.msra.mxu0 %v11251_v8  ;;  %v14327_v40 = vld [vmem:[#allocation9 + $0x9f4] sm:$0xf0]  ;;  %v14506_v45 = vld [vmem:[#allocation9 + $0xf94] sm:$0xf] }
 0x4da   :  { %v12690_v53 = vld [vmem:[#allocation9 + $0xbd8] sm:$0xf]  ;;  %v12435_v55 = vor.u32 %v14327_v40, %v12434_v39  ;;  %v7923_v40 = vpop.f32.mrf.mxu0  ;;  %v14498_v46 = vld [vmem:[#allocation9 + $0xf54] sm:$0xf] }
 0x4db   :  { %8140 = vmatpush.bf16.msra.mxu1 %v11507_v42  ;;  %8061 = vmatpush.bf16.msra.mxu3 %v12047_v54  ;;  %v14391_v44 = vld [vmem:[#allocation9 + $0xbf4] sm:$0xf0]  ;;  %v13132_v47 = vld [vmem:[#allocation9 + $0xf70] sm:$0xf0] }
 0x4dc   :  { %v11730_v61 = vld [vmem:[#allocation9 + $0x458] sm:$0xf]  ;;  %v12691_v16 = vor.u32 %v14391_v44, %v12690_v53  ;;  %v13135_v36 = vor.u32 %v14498_v46, %v13132_v47  ;;  %v14490_v63 = vld [vmem:[#allocation9 + $0xf14] sm:$0xf] }
 0x4dd   :  { %8151 = vmatpush.bf16.msra.mxu2 %v11827_v57  ;;  %8128 = vmatpush.bf16.msra.mxu0 %v11219_v29  ;;  %v14151_v35 = vld [vmem:[#allocation9 + $0x474] sm:$0xf0]  ;;  %v13199_v29 = vor.u32 %v14514_v9, %v13196_v51  ;;  %v14520_v18 = vld [vmem:[%s15500_s7] sm:$0xff] }
 0x4de   :  { %v12402_v11 = vld [vmem:[#allocation9 + $0x998] sm:$0xf]  ;;  %v11731_v56 = vor.u32 %v14151_v35, %v11730_v61  ;;  %v14536_v12 = vld [vmem:[%s15500_s7 + $0x80] sm:$0xff] }
 0x4df   :  { %8141 = vmatpush.bf16.msra.mxu1 %v11475_v26  ;;  %v14319_v48 = vld [vmem:[#allocation9 + $0x9b4] sm:$0xf0]  ;;  %8062 = vmatpush.bf16.msra.mxu3 %v12015_v41  ;;  %v15228_v26 = vld [vmem:[#allocation10] sm:$0xff]  ;;  %v7936_v41 = vpop.f32.mrf.mxu1 }
 0x4e0   :  { %v12658_v50 = vld [vmem:[#allocation9 + $0xb98] sm:$0xf]  ;;  %v12403_v5 = vor.u32 %v14319_v48, %v12402_v11  ;;  %v4926_v30 = vperm.slane %v15228_v26, 4 }
 0x4e1   :  { %8152 = vmatpush.bf16.msra.mxu2 %v11795_v31  ;;  %v14383_v52 = vld [vmem:[#allocation9 + $0xbb4] sm:$0xf0]  ;;  %8129 = vmatpush.bf16.msra.mxu0 %v11187_v22  ;;  %v13164_v31 = vld [vmem:[#allocation9 + $0xfb0] sm:$0xf0] }
 0x4e2   :  { %v11698_v8 = vld [vmem:[#allocation9 + $0x418] sm:$0xf]  ;;  %v12659_v28 = vor.u32 %v14383_v52, %v12658_v50  ;;  %v7924_v22 = vadd.f32 %v7923_v40, %v4926_v30  ;;  %v7925_v51 = vpop.f32.mrf.mxu0 }
 0x4e3   :  { %8142 = vmatpush.bf16.msra.mxu1 %v11443_v24  ;;  %v14143_v42 = vld [vmem:[#allocation9 + $0x434] sm:$0xf0]  ;;  %8063 = vmatpush.bf16.msra.mxu3 %v11983_v34  ;;  %v13167_v24 = vor.u32 %v14506_v45, %v13164_v31  ;;  %v11380_v51 = vld [vmem:[#allocation9 + $0x1b8] sm:$0xf0] }
 0x4e4   :  { %v12370_v57 = vld [vmem:[#allocation9 + $0x958] sm:$0xf]  ;;  %8130 = vmatmul.bf16.vlgmr.msra.gmra.mxu0 %v15070_v21  ;;  %v11699_v23 = vor.u32 %v14143_v42, %v11698_v8  ;;  %v7858_v40 = vpop.f32.mrf.mxu3 }
 0x4e5   :  { %8153 = vmatpush.bf16.msra.mxu2 %v11763_v58  ;;  %8174 = vmatpush.bf16.msrb.mxu0 %v12435_v55  ;;  %v14311_v27 = vld [vmem:[#allocation9 + $0x974] sm:$0xf0] }
 0x4e6   :  { %8143 = vmatmul.bf16.vlgmr.msra.gmra.mxu1 %v15072_v43  ;;  %v12626_v32 = vld [vmem:[#allocation9 + $0xb58] sm:$0xf]  ;;  %v12371_v2 = vor.u32 %v14311_v27, %v12370_v57 }
 0x4e7   :  { %8187 = vmatpush.bf16.msrb.mxu1 %v12691_v16  ;;  %v14375_v10 = vld [vmem:[#allocation9 + $0xb74] sm:$0xf0]  ;;  %8064 = vmatpush.bf16.msra.mxu3 %v11951_v13  ;;  %v7937_v16 = vadd.f32 %v7936_v41, %v7924_v22  ;;  %v7938_v57 = vpop.f32.mrf.mxu1  ;;  %v13036_v41 = vld [vmem:[#allocation9 + $0xeb0] sm:$0xf0] }
 0x4e8   :  { %v12946_v0 = vld [vmem:[#allocation9 + $0xdd8] sm:$0xf]  ;;  %v12627_v33 = vor.u32 %v14375_v10, %v12626_v32  ;;  %v11636_v57 = vld [vmem:[#allocation9 + $0x3b8] sm:$0xf0] }
 0x4e9   :  { %v14455_v54 = vld [vmem:[#allocation9 + $0xdf4] sm:$0xf0]  ;;  %8154 = vmatpush.bf16.msra.mxu2 %v11731_v56  ;;  %8175 = vmatpush.bf16.msrb.mxu0 %v12403_v5  ;;  %v13100_v5 = vld [vmem:[#allocation9 + $0xf30] sm:$0xf0] }
 0x4ea   :  { %v12338_v25 = vld [vmem:[#allocation9 + $0x918] sm:$0xf]  ;;  %v12947_v6 = vor.u32 %v14455_v54, %v12946_v0  ;;  %8065 = vmatmul.bf16.vlgmr.msra.gmra.mxu3 %v15080_v62  ;;  %v13103_v10 = vor.u32 %v14490_v63, %v13100_v5  ;;  %v14482_v54 = vld [vmem:[#allocation9 + $0xed4] sm:$0xf] }
 0x4eb   :  { %8188 = vmatpush.bf16.msrb.mxu1 %v12659_v28  ;;  %v14303_v19 = vld [vmem:[#allocation9 + $0x934] sm:$0xf0]  ;;  %8109 = vmatpush.bf16.msrb.mxu3 %v13199_v29  ;;  %v14466_v5 = vld [vmem:[#allocation9 + $0xe54] sm:$0xf] }
 0x4ec   :  { %v12594_v59 = vld [vmem:[#allocation9 + $0xb18] sm:$0xf]  ;;  %v12339_v58 = vor.u32 %v14303_v19, %v12338_v25  ;;  %v14474_v19 = vld [vmem:[#allocation9 + $0xe94] sm:$0xf] }
 0x4ed   :  { %v14367_v39 = vld [vmem:[#allocation9 + $0xb34] sm:$0xf0]  ;;  %8155 = vmatpush.bf16.msra.mxu2 %v11699_v23  ;;  %8176 = vmatpush.bf16.msrb.mxu0 %v12371_v2  ;;  %v13068_v23 = vld [vmem:[#allocation9 + $0xef0] sm:$0xf0] }
 0x4ee   :  { %v12914_v53 = vld [vmem:[#allocation9 + $0xd98] sm:$0xf]  ;;  %v12595_v55 = vor.u32 %v14367_v39, %v12594_v59 }
 0x4ef   :  { %v14447_v44 = vld [vmem:[#allocation9 + $0xdb4] sm:$0xf0]  ;;  %8189 = vmatpush.bf16.msrb.mxu1 %v12627_v33  ;;  %8110 = vmatpush.bf16.msrb.mxu3 %v13167_v24  ;;  %v7859_v24 = vadd.f32 %v7858_v40, %v15206_v38 }
 0x4f0   :  { %v12306_v61 = vld [vmem:[#allocation9 + $0x8d8] sm:$0xf]  ;;  %v12915_v35 = vor.u32 %v14447_v44, %v12914_v53  ;;  %8156 = vmatmul.bf16.vlgmr.msra.gmra.mxu2 %v15078_v3 }
 0x4f1   :  { %8200 = vmatpush.bf16.msrb.mxu2 %v12947_v6  ;;  %v14295_v11 = vld [vmem:[#allocation9 + $0x8f4] sm:$0xf0]  ;;  %8177 = vmatpush.bf16.msrb.mxu0 %v12339_v58  ;;  %v13071_v6 = vor.u32 %v14482_v54, %v13068_v23  ;;  %v7949_v58 = vpop.f32.mrf.mxu2  ;;  %v12972_v23 = vld [vmem:[#allocation9 + $0xe30] sm:$0xf0] }
 0x4f2   :  { %v12562_v48 = vld [vmem:[#allocation9 + $0xad8] sm:$0xf]  ;;  %v12307_v60 = vor.u32 %v14295_v11, %v12306_v61  ;;  %v15234_v61 = vadd.f32 %v7949_v58, %v7937_v16  ;;  %v14067_v11 = vld [vmem:[#allocation9 + $0x1dc] sm:$0xf] }
 0x4f3   :  { %v14359_v50 = vld [vmem:[#allocation9 + $0xaf4] sm:$0xf0]  ;;  %8190 = vmatpush.bf16.msrb.mxu1 %v12595_v55  ;;  %8111 = vmatpush.bf16.msrb.mxu3 %v13135_v36  ;;  %v11668_v36 = vld [vmem:[#allocation9 + $0x3f8] sm:$0xf0] }
 0x4f4   :  { %v12882_v52 = vld [vmem:[#allocation9 + $0xd58] sm:$0xf]  ;;  %v12563_v56 = vor.u32 %v14359_v50, %v12562_v48  ;;  %v11412_v48 = vld [vmem:[#allocation9 + $0x1f8] sm:$0xf0]  ;;  %v7872_v50 = vadd.f32 %v15215_v17, %v7859_v24 }
 0x4f5   :  { %v14439_v34 = vld [vmem:[#allocation9 + $0xd74] sm:$0xf0]  ;;  %8201 = vmatpush.bf16.msrb.mxu2 %v12915_v35  ;;  %8178 = vmatpush.bf16.msrb.mxu0 %v12307_v60  ;;  %v11415_v63 = vor.u32 %v14067_v11, %v11412_v48  ;;  %v14123_v17 = vld [vmem:[#allocation9 + $0x39c] sm:$0xf] }
 0x4f6   :  { %v12274_v7 = vld [vmem:[#allocation9 + $0x898] sm:$0xf]  ;;  %v12883_v8 = vor.u32 %v14439_v34, %v12882_v52  ;;  %v13039_v52 = vor.u32 %v14474_v19, %v13036_v41  ;;  %v14131_v34 = vld [vmem:[#allocation9 + $0x3dc] sm:$0xf] }
 0x4f7   :  { %v14287_v42 = vld [vmem:[#allocation9 + $0x8b4] sm:$0xf0]  ;;  %8191 = vmatpush.bf16.msrb.mxu1 %v12563_v56  ;;  %8112 = vmatpush.bf16.msrb.mxu3 %v13103_v10  ;;  %v7860_v10 = vpop.f32.mrf.mxu3  ;;  %v14043_v58 = vld [vmem:[#allocation9 + $0x11c] sm:$0xf] }
 0x4f8   :  { %v12530_v28 = vld [vmem:[#allocation9 + $0xa98] sm:$0xf]  ;;  %v12275_v13 = vor.u32 %v14287_v42, %v12274_v7  ;;  %v13004_v7 = vld [vmem:[#allocation9 + $0xe70] sm:$0xf0]  ;;  %v11671_v42 = vor.u32 %v14131_v34, %v11668_v36  ;;  %v14027_v10 = vld [vmem:[#allocation9 + $0x9c] sm:$0xf] }
 0x4f9   :  { %v14351_v9 = vld [vmem:[#allocation9 + $0xab4] sm:$0xf0]  ;;  %8202 = vmatpush.bf16.msrb.mxu2 %v12883_v8  ;;  %v7885_v8 = vadd.f32 %v15217_v37, %v7872_v50  ;;  %v7951_v54 = vpop.f32.mrf.mxu2  ;;  %v14187_v50 = vld [vmem:[#allocation9 + $0x59c] sm:$0xf] }
 0x4fa   :  { %v12850_v27 = vld [vmem:[#allocation9 + $0xd18] sm:$0xf]  ;;  %v12531_v0 = vor.u32 %v14351_v9, %v12530_v28  ;;  %8179 = vmatpush.bf16.msrb.mxu0 %v12275_v13  ;;  %v14059_v9 = vld [vmem:[#allocation9 + $0x19c] sm:$0xf]  ;;  %v14458_v13 = vld [vmem:[#allocation9 + $0xe14] sm:$0xf] }
 0x4fb   :  { %v14431_v32 = vld [vmem:[#allocation9 + $0xd34] sm:$0xf0]  ;;  %8113 = vmatpush.bf16.msrb.mxu3 %v13071_v6  ;;  %v11383_v37 = vor.u32 %v14059_v9, %v11380_v51  ;;  %v11604_v6 = vld [vmem:[#allocation9 + $0x378] sm:$0xf0]  ;;  %v12975_v19 = vor.u32 %v14458_v13, %v12972_v23  ;;  %v15243_v11 = vpop.f32.mrf.mxu0 }
 0x4fc   :  { %v12242_v29 = vld [vmem:[#allocation9 + $0x858] sm:$0xf]  ;;  %v12851_v30 = vor.u32 %v14431_v32, %v12850_v27  ;;  %8192 = vmatpush.bf16.msrb.mxu1 %v12531_v0  ;;  %v15239_v27 = vadd.f32 %v15224_v15, %v7885_v8  ;;  %v13007_v32 = vor.u32 %v14466_v5, %v13004_v7  ;;  %v11348_v15 = vld [vmem:[#allocation9 + $0x178] sm:$0xf0] }
 0x4fd   :  { %v14279_v2 = vld [vmem:[#allocation9 + $0x874] sm:$0xf0]  ;;  %v15245_v48 = vpop.f32.mrf.mxu1  ;;  %v11284_v7 = vld [vmem:[#allocation9 + $0xf8] sm:$0xf0] }
 0x4fe   :  { %v12498_v33 = vld [vmem:[#allocation9 + $0xa58] sm:$0xf]  ;;  %v12243_v59 = vor.u32 %v14279_v2, %v12242_v29  ;;  %8203 = vmatpush.bf16.msrb.mxu2 %v12851_v30  ;;  %v11639_v2 = vor.u32 %v14123_v17, %v11636_v57  ;;  %v11540_v8 = vld [vmem:[#allocation9 + $0x2f8] sm:$0xf0] }
 0x4ff   :  { %v14343_v45 = vld [vmem:[#allocation9 + $0xa74] sm:$0xf0]  ;;  %8114 = vmatpush.bf16.msrb.mxu3 %v13039_v52  ;;  %v11892_v52 = vld [vmem:[#allocation9 + $0x5b8] sm:$0xf0] }
 0x500   :  { %v12818_v31 = vld [vmem:[#allocation9 + $0xcd8] sm:$0xf]  ;;  %v12499_v39 = vor.u32 %v14343_v45, %v12498_v33  ;;  %8180 = vmatpush.bf16.msrb.mxu0 %v12243_v59  ;;  %v14195_v59 = vld [vmem:[#allocation9 + $0x5dc] sm:$0xf]  ;;  %v11895_v5 = vor.u32 %v14187_v50, %v11892_v52 }
 0x501   :  { %v14423_v25 = vld [vmem:[#allocation9 + $0xcf4] sm:$0xf0]  ;;  %v14091_v54 = vld [vmem:[#allocation9 + $0x29c] sm:$0xf] }
 0x502   :  { %v12210_v53 = vld [vmem:[#allocation9 + $0x818] sm:$0xf]  ;;  %v12819_v22 = vor.u32 %v14423_v25, %v12818_v31  ;;  %8193 = vmatpush.bf16.msrb.mxu1 %v12499_v39  ;;  %v14051_v31 = vld [vmem:[#allocation9 + $0x15c] sm:$0xf] }
 0x503   :  { %v14271_v44 = vld [vmem:[#allocation9 + $0x834] sm:$0xf0]  ;;  %v14115_v25 = vld [vmem:[#allocation9 + $0x35c] sm:$0xf]  ;;  %8115 = vmatpush.bf16.msrb.mxu3 %v13007_v32  ;;  %v7977_v23 = vpop.f32.mrf.mxu0 }
 0x504   :  { %v12466_v55 = vld [vmem:[#allocation9 + $0xa18] sm:$0xf]  ;;  %v12211_v60 = vor.u32 %v14271_v44, %v12210_v53  ;;  %8204 = vmatpush.bf16.msrb.mxu2 %v12819_v22  ;;  %v11924_v39 = vld [vmem:[#allocation9 + $0x5f8] sm:$0xf0]  ;;  %v11351_v53 = vor.u32 %v14051_v31, %v11348_v15  ;;  %v11607_v44 = vor.u32 %v14115_v25, %v11604_v6 }
 0x505   :  { %v14335_v46 = vld [vmem:[#allocation9 + $0xa34] sm:$0xf0]  ;;  %v14019_v6 = vld [vmem:[#allocation9 + $0x5c] sm:$0xf] }
 0x506   :  { %v12786_v47 = vld [vmem:[#allocation9 + $0xc98] sm:$0xf]  ;;  %v12467_v56 = vor.u32 %v14335_v46, %v12466_v55  ;;  %8181 = vmatpush.bf16.msrb.mxu0 %v12211_v60  ;;  %v11927_v55 = vor.u32 %v14195_v59, %v11924_v39  ;;  %v11316_v46 = vld [vmem:[#allocation9 + $0x138] sm:$0xf0] }
 0x507   :  { %v14415_v35 = vld [vmem:[#allocation9 + $0xcb4] sm:$0xf0]  ;;  %8116 = vmatpush.bf16.msrb.mxu3 %v12975_v19  ;;  %v11319_v36 = vor.u32 %v14043_v58, %v11316_v46  ;;  %v11220_v59 = vld [vmem:[#allocation9 + $0x78] sm:$0xf0] }
 0x508   :  { %v12787_v38 = vor.u32 %v14415_v35, %v12786_v47  ;;  %v12754_v16 = vld [vmem:[#allocation9 + $0xc58] sm:$0xf]  ;;  %8194 = vmatpush.bf16.msrb.mxu1 %v12467_v56  ;;  %v14107_v47 = vld [vmem:[#allocation9 + $0x31c] sm:$0xf] }
 0x509   :  { %v14407_v28 = vld [vmem:[#allocation9 + $0xc74] sm:$0xf0]  ;;  %8182 = vmatmul.bf16.vlgmr.msrb.gmra.mxu0 %v15097_v14  ;;  %v11572_v35 = vld [vmem:[#allocation9 + $0x338] sm:$0xf0] }
 0x50a   :  { %8205 = vmatpush.bf16.msrb.mxu2 %v12787_v38  ;;  %8226 = vmatpush.bf16.msra.mxu0 %v11415_v63  ;;  %v12755_v0 = vor.u32 %v14407_v28, %v12754_v16  ;;  %v12722_v29 = vld [vmem:[#allocation9 + $0xc18] sm:$0xf]  ;;  %v11575_v60 = vor.u32 %v14107_v47, %v11572_v35  ;;  %v14035_v63 = vld [vmem:[#allocation9 + $0xdc] sm:$0xf] }
 0x50b   :  { %v14399_v30 = vld [vmem:[#allocation9 + $0xc34] sm:$0xf0]  ;;  %8195 = vmatmul.bf16.vlgmr.msrb.gmra.mxu1 %v15099_v20  ;;  %8117 = vmatmul.bf16.vlgmr.msrb.gmra.mxu3 %v15134_v1  ;;  %v14099_v16 = vld [vmem:[#allocation9 + $0x2dc] sm:$0xf]  ;;  %v11287_v51 = vor.u32 %v14035_v63, %v11284_v7 }
 0x50c   :  { %8239 = vmatpush.bf16.msra.mxu1 %v11671_v42  ;;  %v12178_v33 = vld [vmem:[#allocation9 + $0x7d8] sm:$0xf]  ;;  %v12723_v40 = vor.u32 %v14399_v30, %v12722_v29  ;;  %v14179_v42 = vld [vmem:[#allocation9 + $0x55c] sm:$0xf]  ;;  %v11543_v17 = vor.u32 %v14099_v16, %v11540_v8  ;;  %v7990_v29 = vpop.f32.mrf.mxu1 }
 0x50d   :  { %v14263_v45 = vld [vmem:[#allocation9 + $0x7f4] sm:$0xf0]  ;;  %v11860_v28 = vld [vmem:[#allocation9 + $0x578] sm:$0xf0] }
 0x50e   :  { %8206 = vmatpush.bf16.msrb.mxu2 %v12755_v0  ;;  %8227 = vmatpush.bf16.msra.mxu0 %v11383_v37  ;;  %v12179_v41 = vor.u32 %v14263_v45, %v12178_v33  ;;  %v12146_v22 = vld [vmem:[#allocation9 + $0x798] sm:$0xf]  ;;  %v11863_v13 = vor.u32 %v14179_v42, %v11860_v28  ;;  %v11252_v0 = vld [vmem:[#allocation9 + $0xb8] sm:$0xf0] }
 0x50f   :  { %v14255_v24 = vld [vmem:[#allocation9 + $0x7b4] sm:$0xf0]  ;;  %v11508_v37 = vld [vmem:[#allocation9 + $0x2b8] sm:$0xf0]  ;;  %v11255_v45 = vor.u32 %v14027_v10, %v11252_v0 }
 0x510   :  { %8240 = vmatpush.bf16.msra.mxu1 %v11639_v2  ;;  %8161 = vmatpush.bf16.msra.mxu3 %v12179_v41  ;;  %v12147_v34 = vor.u32 %v14255_v24, %v12146_v22  ;;  %v12114_v56 = vld [vmem:[#allocation9 + $0x758] sm:$0xf]  ;;  %v14171_v30 = vld [vmem:[#allocation9 + $0x51c] sm:$0xf]  ;;  %v11511_v31 = vor.u32 %v14091_v54, %v11508_v37  ;;  %v11223_v24 = vor.u32 %v14019_v6, %v11220_v59 }
 0x511   :  { %v14247_v38 = vld [vmem:[#allocation9 + $0x774] sm:$0xf0]  ;;  %v11828_v2 = vld [vmem:[#allocation9 + $0x538] sm:$0xf0] }
 0x512   :  { %8207 = vmatpush.bf16.msrb.mxu2 %v12723_v40  ;;  %8228 = vmatpush.bf16.msra.mxu0 %v11351_v53  ;;  %v12115_v9 = vor.u32 %v14247_v38, %v12114_v56  ;;  %v12082_v57 = vld [vmem:[#allocation9 + $0x718] sm:$0xf]  ;;  %v11831_v19 = vor.u32 %v14171_v30, %v11828_v2  ;;  %v14083_v39 = vld [vmem:[#allocation9 + $0x25c] sm:$0xf] }
 0x513   :  { %v14239_v32 = vld [vmem:[#allocation9 + $0x734] sm:$0xf0]  ;;  %v11476_v40 = vld [vmem:[#allocation9 + $0x278] sm:$0xf0] }
 0x514   :  { %8241 = vmatpush.bf16.msra.mxu1 %v11607_v44  ;;  %8162 = vmatpush.bf16.msra.mxu3 %v12147_v34  ;;  %v12083_v33 = vor.u32 %v14239_v32, %v12082_v57  ;;  %v12050_v15 = vld [vmem:[#allocation9 + $0x6d8] sm:$0xf]  ;;  %v14163_v41 = vld [vmem:[#allocation9 + $0x4dc] sm:$0xf]  ;;  %v11479_v58 = vor.u32 %v14083_v39, %v11476_v40  ;;  %v15252_v34 = vpop.f32.mrf.mxu2 }
 0x515   :  { %8208 = vmatmul.bf16.vlgmr.msrb.gmra.mxu2 %v15110_v4  ;;  %v14231_v25 = vld [vmem:[#allocation9 + $0x6f4] sm:$0xf0]  ;;  %v11796_v53 = vld [vmem:[#allocation9 + $0x4f8] sm:$0xf0] }
 0x516   :  { %8252 = vmatpush.bf16.msra.mxu2 %v11927_v55  ;;  %8229 = vmatpush.bf16.msra.mxu0 %v11319_v36  ;;  %v12051_v44 = vor.u32 %v14231_v25, %v12050_v15  ;;  %v12018_v22 = vld [vmem:[#allocation9 + $0x698] sm:$0xf]  ;;  %v7910_v55 = vpop.f32.mrf.mxu3  ;;  %v14011_v47 = vld [vmem:[#allocation9 + $0x1c] sm:$0xf]  ;;  %v11799_v50 = vor.u32 %v14163_v41, %v11796_v53 }
 0x517   :  { %v14223_v46 = vld [vmem:[#allocation9 + $0x6b4] sm:$0xf0]  ;;  %v11188_v35 = vld [vmem:[#allocation9 + $0x38] sm:$0xf0]  ;;  %v15250_v52 = vadd.f32 %v7910_v55, %v15239_v27 }
 0x518   :  { %8242 = vmatpush.bf16.msra.mxu1 %v11575_v60  ;;  %8163 = vmatpush.bf16.msra.mxu3 %v12115_v9  ;;  %v14075_v36 = vld [vmem:[#allocation9 + $0x21c] sm:$0xf]  ;;  %v12019_v7 = vor.u32 %v14223_v46, %v12018_v22  ;;  %v11191_v42 = vor.u32 %v14011_v47, %v11188_v35  ;;  %v11954_v30 = vld [vmem:[#allocation9 + $0x618] sm:$0xf]  ;;  %v4927_v46 = vperm.slane %v15228_v26, 5 }
 0x519   :  { %v11444_v60 = vld [vmem:[#allocation9 + $0x238] sm:$0xf0]  ;;  %v14519_v59 = vld [vmem:[#allocation9 + $0xff4] sm:$0xf0] }
 0x51a   :  { %8253 = vmatpush.bf16.msra.mxu2 %v11895_v5  ;;  %8230 = vmatpush.bf16.msra.mxu0 %v11287_v51  ;;  %v14155_v56 = vld [vmem:[#allocation9 + $0x49c] sm:$0xf]  ;;  %v11447_v28 = vor.u32 %v14075_v36, %v11444_v60  ;;  %v11986_v51 = vld [vmem:[#allocation9 + $0x658] sm:$0xf] }
 0x51b   :  { %v11764_v38 = vld [vmem:[#allocation9 + $0x4b8] sm:$0xf0] }
 0x51c   :  { %8243 = vmatpush.bf16.msra.mxu1 %v11543_v17  ;;  %8164 = vmatpush.bf16.msra.mxu3 %v12083_v33  ;;  %v14323_v63 = vld [vmem:[#allocation9 + $0x9dc] sm:$0xf]  ;;  %v11767_v9 = vor.u32 %v14155_v56, %v11764_v38  ;;  %v14215_v17 = vld [vmem:[#allocation9 + $0x674] sm:$0xf0]  ;;  %v8003_v33 = vpop.f32.mrf.mxu2 }
 0x51d   :  { %v12436_v5 = vld [vmem:[#allocation9 + $0x9f8] sm:$0xf0]  ;;  %v11987_v23 = vor.u32 %v14215_v17, %v11986_v51 }
 0x51e   :  { %8254 = vmatpush.bf16.msra.mxu2 %v11863_v13  ;;  %8231 = vmatpush.bf16.msra.mxu0 %v11255_v45  ;;  %v14387_v16 = vld [vmem:[#allocation9 + $0xbdc] sm:$0xf]  ;;  %v12439_v27 = vor.u32 %v14323_v63, %v12436_v5  ;;  %v7912_v29 = vpop.f32.mrf.mxu3  ;;  %v8027_v63 = vpop.f32.mrf.mxu0 }
 0x51f   :  { %v12692_v8 = vld [vmem:[#allocation9 + $0xbf8] sm:$0xf0]  ;;  %v8040_v5 = vpop.f32.mrf.mxu1 }
 0x520   :  { %8244 = vmatpush.bf16.msra.mxu1 %v11511_v31  ;;  %8165 = vmatpush.bf16.msra.mxu3 %v12051_v44  ;;  %v14147_v57 = vld [vmem:[#allocation9 + $0x45c] sm:$0xf]  ;;  %v12695_v32 = vor.u32 %v14387_v16, %v12692_v8  ;;  %v14207_v31 = vld [vmem:[#allocation9 + $0x634] sm:$0xf0]  ;;  %v8028_v8 = vadd.f32 %v8027_v63, %v4927_v46 }
 0x521   :  { %v11732_v10 = vld [vmem:[#allocation9 + $0x478] sm:$0xf0]  ;;  %v11955_v44 = vor.u32 %v14207_v31, %v11954_v30  ;;  %v13106_v30 = vld [vmem:[#allocation9 + $0xf18] sm:$0xf] }
 0x522   :  { %8255 = vmatpush.bf16.msra.mxu2 %v11831_v19  ;;  %8232 = vmatpush.bf16.msra.mxu0 %v11223_v24  ;;  %v14315_v13 = vld [vmem:[#allocation9 + $0x99c] sm:$0xf]  ;;  %v11735_v2 = vor.u32 %v14147_v57, %v11732_v10  ;;  %v13202_v19 = vld [vmem:[#allocation9 + $0xfd8] sm:$0xf]  ;;  %v8041_v17 = vadd.f32 %v8040_v5, %v8028_v8 }
 0x523   :  { %v12404_v0 = vld [vmem:[#allocation9 + $0x9b8] sm:$0xf0]  ;;  %v13203_v55 = vor.u32 %v14519_v59, %v13202_v19 }
 0x524   :  { %8245 = vmatpush.bf16.msra.mxu1 %v11479_v58  ;;  %8166 = vmatpush.bf16.msra.mxu3 %v12019_v7  ;;  %v14379_v54 = vld [vmem:[#allocation9 + $0xb9c] sm:$0xf]  ;;  %v12407_v45 = vor.u32 %v14315_v13, %v12404_v0 }
 0x525   :  { %v12660_v37 = vld [vmem:[#allocation9 + $0xbb8] sm:$0xf0] }
 0x526   :  { %8256 = vmatpush.bf16.msra.mxu2 %v11799_v50  ;;  %8233 = vmatpush.bf16.msra.mxu0 %v11191_v42  ;;  %v14139_v15 = vld [vmem:[#allocation9 + $0x41c] sm:$0xf]  ;;  %v12663_v6 = vor.u32 %v14379_v54, %v12660_v37  ;;  %v13170_v50 = vld [vmem:[#allocation9 + $0xf98] sm:$0xf] }
 0x527   :  { %v11700_v25 = vld [vmem:[#allocation9 + $0x438] sm:$0xf0]  ;;  %v8042_v19 = vpop.f32.mrf.mxu1 }
 0x528   :  { %8246 = vmatpush.bf16.msra.mxu1 %v11447_v28  ;;  %v14307_v39 = vld [vmem:[#allocation9 + $0x95c] sm:$0xf]  ;;  %8167 = vmatpush.bf16.msra.mxu3 %v11987_v23  ;;  %v11703_v58 = vor.u32 %v14139_v15, %v11700_v25 }
 0x529   :  { %8234 = vmatmul.bf16.vlgmr.msra.gmra.mxu0 %v15070_v21  ;;  %v12372_v40 = vld [vmem:[#allocation9 + $0x978] sm:$0xf0]  ;;  %v14511_v21 = vld [vmem:[#allocation9 + $0xfb4] sm:$0xf0] }
 0x52a   :  { %8257 = vmatpush.bf16.msra.mxu2 %v11767_v9  ;;  %8278 = vmatpush.bf16.msrb.mxu0 %v12439_v27  ;;  %v14371_v41 = vld [vmem:[#allocation9 + $0xb5c] sm:$0xf]  ;;  %v12375_v47 = vor.u32 %v14307_v39, %v12372_v40  ;;  %v13171_v42 = vor.u32 %v14511_v21, %v13170_v50  ;;  %v13138_v9 = vld [vmem:[#allocation9 + $0xf58] sm:$0xf] }
 0x52b   :  { %8247 = vmatmul.bf16.vlgmr.msra.gmra.mxu1 %v15072_v43  ;;  %v12628_v53 = vld [vmem:[#allocation9 + $0xb78] sm:$0xf0]  ;;  %v14503_v27 = vld [vmem:[#allocation9 + $0xf74] sm:$0xf0] }
 0x52c   :  { %8291 = vmatpush.bf16.msrb.mxu1 %v12695_v32  ;;  %v14451_v22 = vld [vmem:[#allocation9 + $0xddc] sm:$0xf]  ;;  %v12631_v35 = vor.u32 %v14371_v41, %v12628_v53  ;;  %8168 = vmatpush.bf16.msra.mxu3 %v11955_v44  ;;  %v13139_v37 = vor.u32 %v14503_v27, %v13138_v9  ;;  %v13074_v53 = vld [vmem:[#allocation9 + $0xed8] sm:$0xf] }
 0x52d   :  { %v12948_v24 = vld [vmem:[#allocation9 + $0xdf8] sm:$0xf0]  ;;  %v14487_v44 = vld [vmem:[#allocation9 + $0xef4] sm:$0xf0] }
 0x52e   :  { %8258 = vmatpush.bf16.msra.mxu2 %v11735_v2  ;;  %8279 = vmatpush.bf16.msrb.mxu0 %v12407_v45  ;;  %v14299_v36 = vld [vmem:[#allocation9 + $0x91c] sm:$0xf]  ;;  %v12951_v43 = vor.u32 %v14451_v22, %v12948_v24  ;;  %v14495_v2 = vld [vmem:[#allocation9 + $0xf34] sm:$0xf0]  ;;  %v13075_v50 = vor.u32 %v14487_v44, %v13074_v53 }
 0x52f   :  { %v12340_v60 = vld [vmem:[#allocation9 + $0x938] sm:$0xf0]  ;;  %8169 = vmatmul.bf16.vlgmr.msra.gmra.mxu3 %v15080_v62  ;;  %v13107_v39 = vor.u32 %v14495_v2, %v13106_v30  ;;  %v14526_v2 = vld [vmem:[%s15500_s7 + $0x30] sm:$0xff] }
 0x530   :  { %8292 = vmatpush.bf16.msrb.mxu1 %v12663_v6  ;;  %v14363_v56 = vld [vmem:[#allocation9 + $0xb1c] sm:$0xf]  ;;  %8213 = vmatpush.bf16.msrb.mxu3 %v13203_v55  ;;  %v12343_v26 = vor.u32 %v14299_v36, %v12340_v60  ;;  %v8029_v6 = vpop.f32.mrf.mxu0  ;;  %v13042_v60 = vld [vmem:[#allocation9 + $0xe98] sm:$0xf] }
 0x531   :  { %v12596_v38 = vld [vmem:[#allocation9 + $0xb38] sm:$0xf0] }
 0x532   :  { %v14443_v7 = vld [vmem:[#allocation9 + $0xd9c] sm:$0xf]  ;;  %8259 = vmatpush.bf16.msra.mxu2 %v11703_v58  ;;  %8280 = vmatpush.bf16.msrb.mxu0 %v12375_v47  ;;  %v12599_v28 = vor.u32 %v14363_v56, %v12596_v38  ;;  %v14479_v56 = vld [vmem:[#allocation9 + $0xeb4] sm:$0xf0] }
 0x533   :  { %v12916_v16 = vld [vmem:[#allocation9 + $0xdb8] sm:$0xf0] }
 0x534   :  { %8293 = vmatpush.bf16.msrb.mxu1 %v12631_v35  ;;  %v14291_v51 = vld [vmem:[#allocation9 + $0x8dc] sm:$0xf]  ;;  %v12919_v57 = vor.u32 %v14443_v7, %v12916_v16  ;;  %8214 = vmatpush.bf16.msrb.mxu3 %v13171_v42  ;;  %v8053_v7 = vpop.f32.mrf.mxu2 }
 0x535   :  { %v12308_v32 = vld [vmem:[#allocation9 + $0x8f8] sm:$0xf0]  ;;  %8260 = vmatmul.bf16.vlgmr.msra.gmra.mxu2 %v15078_v3 }
 0x536   :  { %8304 = vmatpush.bf16.msrb.mxu2 %v12951_v43  ;;  %v14355_v10 = vld [vmem:[#allocation9 + $0xadc] sm:$0xf]  ;;  %8281 = vmatpush.bf16.msrb.mxu0 %v12343_v26  ;;  %v12311_v23 = vor.u32 %v14291_v51, %v12308_v32  ;;  %v7962_v43 = vpop.f32.mrf.mxu3  ;;  %v15260_v26 = vadd.f32 %v8053_v7, %v8041_v17  ;;  %v13043_v51 = vor.u32 %v14479_v56, %v13042_v60  ;;  %v14530_v7 = vld [vmem:[%s15500_s7 + $0x50] sm:$0xff] }
 0x537   :  { %v12564_v13 = vld [vmem:[#allocation9 + $0xaf8] sm:$0xf0]  ;;  %v7963_v5 = vadd.f32 %v7962_v43, %v15234_v61  ;;  %v14527_v61 = vld [vmem:[%s15500_s7 + $0x38] sm:$0xff] }
 0x538   :  { %v14435_v0 = vld [vmem:[#allocation9 + $0xd5c] sm:$0xf]  ;;  %8294 = vmatpush.bf16.msrb.mxu1 %v12599_v28  ;;  %v12567_v29 = vor.u32 %v14355_v10, %v12564_v13  ;;  %8215 = vmatpush.bf16.msrb.mxu3 %v13139_v37  ;;  %v13010_v13 = vld [vmem:[#allocation9 + $0xe58] sm:$0xf] }
 0x539   :  { %v12884_v54 = vld [vmem:[#allocation9 + $0xd78] sm:$0xf0]  ;;  %v7976_v27 = vadd.f32 %v15243_v11, %v7963_v5  ;;  %v14522_v5 = vld [vmem:[%s15500_s7 + $0x10] sm:$0xff] }
 0x53a   :  { %v14283_v33 = vld [vmem:[#allocation9 + $0x89c] sm:$0xf]  ;;  %8305 = vmatpush.bf16.msrb.mxu2 %v12919_v57  ;;  %v12887_v45 = vor.u32 %v14435_v0, %v12884_v54  ;;  %8282 = vmatpush.bf16.msrb.mxu0 %v12311_v23  ;;  %v14471_v0 = vld [vmem:[#allocation9 + $0xe74] sm:$0xf0]  ;;  %v14535_v54 = vld [vmem:[%s15500_s7 + $0x78] sm:$0xff] }
 0x53b   :  { %v12276_v31 = vld [vmem:[#allocation9 + $0x8b8] sm:$0xf0]  ;;  %v7989_v17 = vadd.f32 %v15245_v48, %v7976_v27  ;;  %v14534_v48 = vld [vmem:[%s15500_s7 + $0x70] sm:$0xff] }
 0x53c   :  { %v14347_v15 = vld [vmem:[#allocation9 + $0xa9c] sm:$0xf]  ;;  %8295 = vmatpush.bf16.msrb.mxu1 %v12567_v29  ;;  %v12279_v40 = vor.u32 %v14283_v33, %v12276_v31  ;;  %8216 = vmatpush.bf16.msrb.mxu3 %v13107_v39  ;;  %v13011_v29 = vor.u32 %v14471_v0, %v13010_v13  ;;  %v12978_v31 = vld [vmem:[#allocation9 + $0xe18] sm:$0xf]  ;;  %v14528_v13 = vld [vmem:[%s15500_s7 + $0x40] sm:$0xff] }
 0x53d   :  { %v12532_v25 = vld [vmem:[#allocation9 + $0xab8] sm:$0xf0]  ;;  %v15271_v23 = vadd.f32 %v15252_v34, %v7989_v17  ;;  %v14538_v0 = vld [vmem:[%s15500_s7 + $0x90] sm:$0xff]  ;;  %v14627_v17 = vpop.eup %14626 }
 0x53e   :  { %v14427_v59 = vld [vmem:[#allocation9 + $0xd1c] sm:$0xf]  ;;  %v12535_v41 = vor.u32 %v14347_v15, %v12532_v25  ;;  %8306 = vmatpush.bf16.msrb.mxu2 %v12887_v45  ;;  %8283 = vmatpush.bf16.msrb.mxu0 %v12279_v40  ;;  %v7964_v30 = vpop.f32.mrf.mxu3  ;;  %v8055_v45 = vpop.f32.mrf.mxu2  ;;  %v14463_v15 = vld [vmem:[#allocation9 + $0xe34] sm:$0xf0] }
 0x53f   :  { %v12852_v3 = vld [vmem:[#allocation9 + $0xd38] sm:$0xf0]  ;;  %v8338_v45 = vpack.c.bf16 %v14627_v17, %v14627_v17 }
 0x540   :  { %v14275_v22 = vld [vmem:[#allocation9 + $0x85c] sm:$0xf]  ;;  %v12855_v24 = vor.u32 %v14427_v59, %v12852_v3  ;;  %8296 = vmatpush.bf16.msrb.mxu1 %v12535_v41  ;;  %8217 = vmatpush.bf16.msrb.mxu3 %v13075_v50  ;;  %v12979_v59 = vor.u32 %v14463_v15, %v12978_v31 }
 0x541   :  { %v12244_v58 = vld [vmem:[#allocation9 + $0x878] sm:$0xf0] }
 0x542   :  { %v14339_v55 = vld [vmem:[#allocation9 + $0xa5c] sm:$0xf]  ;;  %v12247_v21 = vor.u32 %v14275_v22, %v12244_v58  ;;  %8307 = vmatpush.bf16.msrb.mxu2 %v12855_v24  ;;  %v14524_v58 = vld [vmem:[%s15500_s7 + $0x20] sm:$0xff] }
 0x543   :  { %v12500_v46 = vld [vmem:[#allocation9 + $0xa78] sm:$0xf0]  ;;  %v15292_v22 = vpop.f32.mrf.mxu1 }
 0x544   :  { %v14419_v47 = vld [vmem:[#allocation9 + $0xcdc] sm:$0xf]  ;;  %v12503_v36 = vor.u32 %v14339_v55, %v12500_v46  ;;  %8284 = vmatpush.bf16.msrb.mxu0 %v12247_v21  ;;  %8218 = vmatpush.bf16.msrb.mxu3 %v13043_v51  ;;  %v14532_v55 = vld [vmem:[%s15500_s7 + $0x60] sm:$0xff]  ;;  %v14523_v21 = vld [vmem:[%s15500_s7 + $0x18] sm:$0xff] }
 0x545   :  { %v12820_v35 = vld [vmem:[#allocation9 + $0xcf8] sm:$0xf0] }
 0x546   :  { %v14267_v38 = vld [vmem:[#allocation9 + $0x81c] sm:$0xf]  ;;  %v12823_v63 = vor.u32 %v14419_v47, %v12820_v35  ;;  %8297 = vmatpush.bf16.msrb.mxu1 %v12503_v36  ;;  %v14542_v35 = vld [vmem:[%s15500_s7 + $0xb0] sm:$0xff]  ;;  %v14531_v36 = vld [vmem:[%s15500_s7 + $0x58] sm:$0xff] }
 0x547   :  { %v12212_v16 = vld [vmem:[#allocation9 + $0x838] sm:$0xf0]  ;;  %v15331_v51 = vpop.f32.mrf.mxu3 }
 0x548   :  { %v14331_v8 = vld [vmem:[#allocation9 + $0xa1c] sm:$0xf]  ;;  %v12215_v57 = vor.u32 %v14267_v38, %v12212_v16  ;;  %8308 = vmatpush.bf16.msrb.mxu2 %v12823_v63  ;;  %8219 = vmatpush.bf16.msrb.mxu3 %v13011_v29  ;;  %v14629_v29 = vpop.eup %14628 }
 0x549   :  { %v12468_v42 = vld [vmem:[#allocation9 + $0xa38] sm:$0xf0]  ;;  %v8339_v31 = vpack.c.bf16 %v14629_v29, %v14629_v29 }
 0x54a   :  { %v14411_v28 = vld [vmem:[#allocation9 + $0xc9c] sm:$0xf]  ;;  %v12471_v32 = vor.u32 %v14331_v8, %v12468_v42  ;;  %8285 = vmatpush.bf16.msrb.mxu0 %v12215_v57  ;;  %v14540_v42 = vld [vmem:[%s15500_s7 + $0xa0] sm:$0xff] }
 0x54b   :  { %v12788_v9 = vld [vmem:[#allocation9 + $0xcb8] sm:$0xf0]  ;;  %v8094_v38 = vpop.f32.mrf.mxu1 }
 0x54c   :  { %v12791_v10 = vor.u32 %v14411_v28, %v12788_v9  ;;  %v14403_v11 = vld [vmem:[#allocation9 + $0xc5c] sm:$0xf]  ;;  %8298 = vmatpush.bf16.msrb.mxu1 %v12471_v32  ;;  %8220 = vmatpush.bf16.msrb.mxu3 %v12979_v59  ;;  %v14555_v38 = vld [vmem:[%s15500_s7 + $0x118] sm:$0xff] }
 0x54d   :  { %v12756_v37 = vld [vmem:[#allocation9 + $0xc78] sm:$0xf0]  ;;  %8286 = vmatmul.bf16.vlgmr.msrb.gmra.mxu0 %v15097_v14  ;;  %v14543_v14 = vld [vmem:[%s15500_s7 + $0xb8] sm:$0xff] }
 0x54e   :  { %8309 = vmatpush.bf16.msrb.mxu2 %v12791_v10  ;;  %8862 = vmatpush.bf16.msra.mxu0 %v14527_v61  ;;  %v12759_v33 = vor.u32 %v14403_v11, %v12756_v37  ;;  %v14395_v34 = vld [vmem:[#allocation9 + $0xc1c] sm:$0xf] }
 0x54f   :  { %v12724_v25 = vld [vmem:[#allocation9 + $0xc38] sm:$0xf0]  ;;  %8299 = vmatmul.bf16.vlgmr.msrb.gmra.mxu1 %v15099_v20  ;;  %v15290_v20 = vpop.f32.mrf.mxu0  ;;  %8221 = vmatmul.bf16.vlgmr.msrb.gmra.mxu3 %v15134_v1 }
 0x550   :  { %8875 = vmatpush.bf16.msra.mxu1 %v14535_v54  ;;  %v14259_v6 = vld [vmem:[#allocation9 + $0x7dc] sm:$0xf]  ;;  %v12727_v3 = vor.u32 %v14395_v34, %v12724_v25  ;;  %v14559_v54 = vld [vmem:[%s15500_s7 + $0x138] sm:$0xff] }
 0x551   :  { %v12180_v19 = vld [vmem:[#allocation9 + $0x7f8] sm:$0xf0] }
 0x552   :  { %8310 = vmatpush.bf16.msrb.mxu2 %v12759_v33  ;;  %8863 = vmatpush.bf16.msra.mxu0 %v14526_v2  ;;  %v12183_v39 = vor.u32 %v14259_v6, %v12180_v19  ;;  %v14525_v40 = vld [vmem:[%s15500_s7 + $0x28] sm:$0xff]  ;;  %v14558_v33 = vld [vmem:[%s15500_s7 + $0x130] sm:$0xff]  ;;  %v14567_v6 = vld [vmem:[%s15500_s7 + $0x178] sm:$0xff] }
 0x553   :  { %v14533_v41 = vld [vmem:[%s15500_s7 + $0x68] sm:$0xff]  ;;  %v15336_v10 = vpop.f32.mrf.mxu2 }
 0x554   :  { %8876 = vmatpush.bf16.msra.mxu1 %v14534_v48  ;;  %v14251_v53 = vld [vmem:[#allocation9 + $0x79c] sm:$0xf]  ;;  %8265 = vmatpush.bf16.msra.mxu3 %v12183_v39  ;;  %v8016_v48 = vpop.f32.mrf.mxu3 }
 0x555   :  { %v12148_v44 = vld [vmem:[#allocation9 + $0x7b8] sm:$0xf0] }
 0x556   :  { %8311 = vmatpush.bf16.msrb.mxu2 %v12727_v3  ;;  %v12151_v24 = vor.u32 %v14251_v53, %v12148_v44  ;;  %8864 = vmatpush.bf16.msra.mxu0 %v14525_v40  ;;  %v14243_v46 = vld [vmem:[#allocation9 + $0x75c] sm:$0xf]  ;;  %v15363_v40 = vld [vmem:[#allocation10] sm:$0xff] }
 0x557   :  { %v12116_v47 = vld [vmem:[#allocation9 + $0x778] sm:$0xf0] }
 0x558   :  { %8877 = vmatpush.bf16.msra.mxu1 %v14533_v41  ;;  %8266 = vmatpush.bf16.msra.mxu3 %v12151_v24  ;;  %v12119_v50 = vor.u32 %v14243_v46, %v12116_v47  ;;  %v14235_v43 = vld [vmem:[#allocation9 + $0x71c] sm:$0xf]  ;;  %v4928_v41 = vperm.slane %v15363_v40, 6  ;;  %v14631_v24 = vpop.eup %14630 }
 0x559   :  { %8312 = vmatmul.bf16.vlgmr.msrb.gmra.mxu2 %v15110_v4  ;;  %v12084_v60 = vld [vmem:[#allocation9 + $0x738] sm:$0xf0]  ;;  %v8081_v4 = vpop.f32.mrf.mxu0 }
 0x55a   :  { %8888 = vmatpush.bf16.msra.mxu2 %v14543_v14  ;;  %8865 = vmatpush.bf16.msra.mxu0 %v14524_v58  ;;  %v14541_v56 = vld [vmem:[%s15500_s7 + $0xa8] sm:$0xff]  ;;  %v12087_v63 = vor.u32 %v14235_v43, %v12084_v60  ;;  %v14566_v58 = vld [vmem:[%s15500_s7 + $0x170] sm:$0xff] }
 0x55b   :  { %v14227_v16 = vld [vmem:[#allocation9 + $0x6dc] sm:$0xf]  ;;  %v8107_v15 = vpop.f32.mrf.mxu2 }
 0x55c   :  { %8878 = vmatpush.bf16.msra.mxu1 %v14532_v55  ;;  %8267 = vmatpush.bf16.msra.mxu3 %v12119_v50  ;;  %v12052_v8 = vld [vmem:[#allocation9 + $0x6f8] sm:$0xf0]  ;;  %v14556_v50 = vld [vmem:[%s15500_s7 + $0x120] sm:$0xff] }
 0x55d   :  { %v12055_v28 = vor.u32 %v14227_v16, %v12052_v8  ;;  %v14521_v9 = vld [vmem:[%s15500_s7 + $0x8] sm:$0xff]  ;;  %v14560_v15 = vld [vmem:[%s15500_s7 + $0x140] sm:$0xff] }
 0x55e   :  { %8889 = vmatpush.bf16.msra.mxu2 %v14542_v35  ;;  %8866 = vmatpush.bf16.msra.mxu0 %v14523_v21  ;;  %v14529_v27 = vld [vmem:[%s15500_s7 + $0x48] sm:$0xff]  ;;  %v8340_v21 = vpack.c.bf16 %v14631_v24, %v14631_v24 }
 0x55f   :  { %v14219_v57 = vld [vmem:[#allocation9 + $0x69c] sm:$0xf] }
 0x560   :  { %8879 = vmatpush.bf16.msra.mxu1 %v14531_v36  ;;  %8268 = vmatpush.bf16.msra.mxu3 %v12087_v63  ;;  %v12020_v32 = vld [vmem:[#allocation9 + $0x6b8] sm:$0xf0] }
 0x561   :  { %v12023_v61 = vor.u32 %v14219_v57, %v12020_v32  ;;  %v14211_v11 = vld [vmem:[#allocation9 + $0x65c] sm:$0xf]  ;;  %v8131_v55 = vpop.f32.mrf.mxu0  ;;  %v14563_v57 = vld [vmem:[%s15500_s7 + $0x158] sm:$0xff] }
 0x562   :  { %8890 = vmatpush.bf16.msra.mxu2 %v14541_v56  ;;  %8867 = vmatpush.bf16.msra.mxu0 %v14522_v5  ;;  %v11988_v37 = vld [vmem:[#allocation9 + $0x678] sm:$0xf0]  ;;  %v8132_v47 = vadd.f32 %v8131_v55, %v4928_v41  ;;  %v14546_v55 = vld [vmem:[%s15500_s7 + $0xd0] sm:$0xff] }
 0x563   :  { %v11991_v30 = vor.u32 %v14211_v11, %v11988_v37  ;;  %v14537_v2 = vld [vmem:[%s15500_s7 + $0x88] sm:$0xff]  ;;  %v8144_v46 = vpop.f32.mrf.mxu1  ;;  %v14552_v37 = vld [vmem:[%s15500_s7 + $0x100] sm:$0xff] }
 0x564   :  { %8880 = vmatpush.bf16.msra.mxu1 %v14530_v7  ;;  %8269 = vmatpush.bf16.msra.mxu3 %v12055_v28  ;;  %v14203_v34 = vld [vmem:[#allocation9 + $0x61c] sm:$0xf]  ;;  %v8145_v56 = vadd.f32 %v8144_v46, %v8132_v47  ;;  %v14564_v7 = vld [vmem:[%s15500_s7 + $0x160] sm:$0xff]  ;;  %v8015_v28 = vadd.f32 %v15331_v51, %v15271_v23 }
 0x565   :  { %v11956_v25 = vld [vmem:[#allocation9 + $0x638] sm:$0xf0] }
 0x566   :  { %8891 = vmatpush.bf16.msra.mxu2 %v14540_v42  ;;  %8868 = vmatpush.bf16.msra.mxu0 %v14521_v9  ;;  %v14515_v19 = vld [vmem:[#allocation9 + $0xfdc] sm:$0xf]  ;;  %v11959_v3 = vor.u32 %v14203_v34, %v11956_v25  ;;  %v14554_v42 = vld [vmem:[%s15500_s7 + $0x110] sm:$0xff]  ;;  %14632 = vtanh.f32 %v8015_v28 }
 0x567   :  { %v13204_v59 = vld [vmem:[#allocation9 + $0xff8] sm:$0xf0] }
 0x568   :  { %8881 = vmatpush.bf16.msra.mxu1 %v14529_v27  ;;  %8270 = vmatpush.bf16.msra.mxu3 %v12023_v61  ;;  %v13207_v39 = vor.u32 %v14515_v19, %v13204_v59  ;;  %v14557_v53 = vld [vmem:[%s15500_s7 + $0x128] sm:$0xff] }
 0x569   :  { %v14507_v44 = vld [vmem:[#allocation9 + $0xf9c] sm:$0xf]  ;;  %v8133_v16 = vpop.f32.mrf.mxu0 }
 0x56a   :  { %8892 = vmatpush.bf16.msra.mxu2 %v14539_v49  ;;  %8869 = vmatpush.bf16.msra.mxu0 %v14520_v18  ;;  %v13172_v14 = vld [vmem:[#allocation9 + $0xfb8] sm:$0xf0] }
 0x56b   :  { %v13175_v35 = vor.u32 %v14507_v44, %v13172_v14  ;;  %v14499_v36 = vld [vmem:[#allocation9 + $0xf5c] sm:$0xf]  ;;  %v8146_v8 = vpop.f32.mrf.mxu1  ;;  %v14547_v44 = vld [vmem:[%s15500_s7 + $0xd8] sm:$0xff] }
 0x56c   :  { %8882 = vmatpush.bf16.msra.mxu1 %v14528_v13  ;;  %8271 = vmatpush.bf16.msra.mxu3 %v11991_v30  ;;  %v13140_v43 = vld [vmem:[#allocation9 + $0xf78] sm:$0xf0]  ;;  %v14633_v48 = vpop.eup %14632 }
 0x56d   :  { %8870 = vmatmul.bf16.vlgmr.msra.gmra.mxu0 %v8338_v45  ;;  %v14565_v60 = vld [vmem:[%s15500_s7 + $0x168] sm:$0xff]  ;;  %v13143_v4 = vor.u32 %v14499_v36, %v13140_v43  ;;  %v8066_v61 = vpop.f32.mrf.mxu3  ;;  %v8342_v34 = vpack.c.bf16 %v14633_v48, %v14633_v48 }
 0x56e   :  { %8893 = vmatpush.bf16.msra.mxu2 %v14538_v0  ;;  %8914 = vmatpush.bf16.msrb.mxu0 %v14559_v54  ;;  %v14491_v63 = vld [vmem:[#allocation9 + $0xf1c] sm:$0xf]  ;;  %v8067_v23 = vadd.f32 %v8066_v61, %v15260_v26  ;;  %v14562_v0 = vld [vmem:[%s15500_s7 + $0x150] sm:$0xff] }
 0x56f   :  { %8883 = vmatmul.bf16.vlgmr.msra.gmra.mxu1 %v8339_v31  ;;  %v13108_v5 = vld [vmem:[#allocation9 + $0xf38] sm:$0xf0] }
 0x570   :  { %8927 = vmatpush.bf16.msrb.mxu1 %v14567_v6  ;;  %8272 = vmatpush.bf16.msra.mxu3 %v11959_v3  ;;  %v14483_v9 = vld [vmem:[#allocation9 + $0xedc] sm:$0xf]  ;;  %v8080_v54 = vadd.f32 %v15290_v20, %v8067_v23  ;;  %v14551_v6 = vld [vmem:[%s15500_s7 + $0xf8] sm:$0xff]  ;;  %v14550_v3 = vld [vmem:[%s15500_s7 + $0xf0] sm:$0xff] }
 0x571   :  { %v13076_v27 = vld [vmem:[#allocation9 + $0xef8] sm:$0xf0] }
 0x572   :  { %8894 = vmatpush.bf16.msra.mxu2 %v14537_v2  ;;  %8915 = vmatpush.bf16.msrb.mxu0 %v14558_v33  ;;  %v13079_v32 = vor.u32 %v14483_v9, %v13076_v27  ;;  %v14553_v49 = vld [vmem:[%s15500_s7 + $0x108] sm:$0xff]  ;;  %v8093_v26 = vadd.f32 %v15292_v22, %v8080_v54 }
 0x573   :  { %8273 = vmatmul.bf16.vlgmr.msra.gmra.mxu3 %v15080_v62  ;;  %v13111_v62 = vor.u32 %v14491_v63, %v13108_v5  ;;  %v14475_v18 = vld [vmem:[#allocation9 + $0xe9c] sm:$0xf]  ;;  %v8157_v51 = vpop.f32.mrf.mxu2 }
 0x574   :  { %8317 = vmatpush.bf16.msrb.mxu3 %v13207_v39  ;;  %8928 = vmatpush.bf16.msrb.mxu1 %v14566_v58  ;;  %v13044_v13 = vld [vmem:[#allocation9 + $0xeb8] sm:$0xf0]  ;;  %v15400_v17 = vadd.f32 %v8157_v51, %v8145_v56  ;;  %v8106_v14 = vadd.f32 %v15336_v10, %v8093_v26  ;;  %v14575_v10 = vld [vmem:[%s15500_s7 + $0x1b8] sm:$0xff] }
 0x575   :  { %v13047_v11 = vor.u32 %v14475_v18, %v13044_v13  ;;  %v14467_v29 = vld [vmem:[#allocation9 + $0xe5c] sm:$0xf]  ;;  %v8068_v20 = vpop.f32.mrf.mxu3  ;;  %v14568_v18 = vld [vmem:[%s15500_s7 + $0x180] sm:$0xff]  ;;  %v14583_v26 = vld [vmem:[%s15500_s7 + $0x1f8] sm:$0xff] }
 0x576   :  { %8895 = vmatpush.bf16.msra.mxu2 %v14536_v12  ;;  %8916 = vmatpush.bf16.msrb.mxu0 %v14557_v53  ;;  %v13012_v30 = vld [vmem:[#allocation9 + $0xe78] sm:$0xf0]  ;;  %v14548_v53 = vld [vmem:[%s15500_s7 + $0xe0] sm:$0xff]  ;;  %v14582_v20 = vld [vmem:[%s15500_s7 + $0x1f0] sm:$0xff] }
 0x577   :  { %v14561_v2 = vld [vmem:[%s15500_s7 + $0x148] sm:$0xff]  ;;  %v13015_v33 = vor.u32 %v14467_v29, %v13012_v30 }
 0x578   :  { %8318 = vmatpush.bf16.msrb.mxu3 %v13175_v35  ;;  %8929 = vmatpush.bf16.msrb.mxu1 %v14565_v60  ;;  %v14459_v45 = vld [vmem:[#allocation9 + $0xe1c] sm:$0xf]  ;;  %v4929_v60 = vperm.slane %v15363_v40, 7  ;;  %v14571_v40 = vld [vmem:[%s15500_s7 + $0x198] sm:$0xff] }
 0x579   :  { %8896 = vmatmul.bf16.vlgmr.msra.gmra.mxu2 %v8340_v21  ;;  %v12980_v31 = vld [vmem:[#allocation9 + $0xe38] sm:$0xf0]  ;;  %v14574_v21 = vld [vmem:[%s15500_s7 + $0x1b0] sm:$0xff] }
 0x57a   :  { %8917 = vmatpush.bf16.msrb.mxu0 %v14556_v50  ;;  %v12983_v22 = vor.u32 %v14459_v45, %v12980_v31  ;;  %v14549_v12 = vld [vmem:[%s15500_s7 + $0xe8] sm:$0xff]  ;;  %8940 = vmatpush.bf16.msrb.mxu2 %v14575_v10  ;;  %v14593_v31 = vld [vmem:[#allocation12] ss:$0 sm:$0xff] }
 0x57b   :  { %v8159_v25 = vpop.f32.mrf.mxu2  ;;  %v14545_v46 = vld [vmem:[%s15500_s7 + $0xc8] sm:$0xff] }
 0x57c   :  { %8319 = vmatpush.bf16.msrb.mxu3 %v13143_v4  ;;  %8930 = vmatpush.bf16.msrb.mxu1 %v14564_v7  ;;  %v14573_v56 = vld [vmem:[%s15500_s7 + $0x1a8] sm:$0xff]  ;;  %v14572_v7 = vld [vmem:[%s15500_s7 + $0x1a0] sm:$0xff] }
 0x57e   :  { %8918 = vmatpush.bf16.msrb.mxu0 %v14555_v38  ;;  %8941 = vmatpush.bf16.msrb.mxu2 %v14574_v21 }
 0x580   :  { %8320 = vmatpush.bf16.msrb.mxu3 %v13111_v62  ;;  %8931 = vmatpush.bf16.msrb.mxu1 %v14563_v57 }
 0x582   :  { %8919 = vmatpush.bf16.msrb.mxu0 %v14554_v42  ;;  %8942 = vmatpush.bf16.msrb.mxu2 %v14573_v56  ;;  %v14570_v42 = vld [vmem:[%s15500_s7 + $0x190] sm:$0xff] }
 0x584   :  { %8321 = vmatpush.bf16.msrb.mxu3 %v13079_v32  ;;  %8932 = vmatpush.bf16.msrb.mxu1 %v14562_v0 }
 0x586   :  { %8920 = vmatpush.bf16.msrb.mxu0 %v14553_v49  ;;  %v8183_v19 = vpop.f32.mrf.mxu0  ;;  %8943 = vmatpush.bf16.msrb.mxu2 %v14572_v7  ;;  %v14569_v49 = vld [vmem:[%s15500_s7 + $0x188] sm:$0xff] }
 0x588   :  { %8322 = vmatpush.bf16.msrb.mxu3 %v13047_v11  ;;  %8933 = vmatpush.bf16.msrb.mxu1 %v14561_v2  ;;  %v8196_v59 = vpop.f32.mrf.mxu1 }
 0x58a   :  { %8921 = vmatpush.bf16.msrb.mxu0 %v14552_v37  ;;  %8944 = vmatpush.bf16.msrb.mxu2 %v14571_v40 }
 0x58c   :  { %8323 = vmatpush.bf16.msrb.mxu3 %v13015_v33  ;;  %8934 = vmatpush.bf16.msrb.mxu1 %v14560_v15  ;;  %v14581_v15 = vld [vmem:[%s15500_s7 + $0x1e8] sm:$0xff] }
 0x58d   :  { %8922 = vmatmul.bf16.vlgmr.msrb.gmra.mxu0 %v8342_v34 }
 0x58e   :  { %v8185_v39 = vpop.f32.mrf.mxu0  ;;  %8945 = vmatpush.bf16.msrb.mxu2 %v14570_v42 }
 0x58f   :  { %v14578_v39 = vld [vmem:[%s15500_s7 + $0x1d0] sm:$0xff] }
 0x590   :  { %8324 = vmatpush.bf16.msrb.mxu3 %v12983_v22  ;;  %v8198_v41 = vpop.f32.mrf.mxu1 }
 0x592   :  { %8946 = vmatpush.bf16.msrb.mxu2 %v14569_v49 }
 0x593   :  { %8325 = vmatmul.bf16.vlgmr.msrb.gmra.mxu3 %v15134_v1  ;;  %v8118_v1 = vpop.f32.mrf.mxu3 }
 0x594   :  { %8901 = vmatpush.bf16.msra.mxu3 %v14551_v6  ;;  %v8119_v24 = vadd.f32 %v8118_v1, %v8106_v14  ;;  %v14580_v6 = vld [vmem:[%s15500_s7 + $0x1e0] sm:$0xff]  ;;  %v14577_v14 = vld [vmem:[%s15500_s7 + $0x1c8] sm:$0xff] }
 0x596   :  { %14634 = vtanh.f32 %v8119_v24  ;;  %8947 = vmatpush.bf16.msrb.mxu2 %v14568_v18 }
 0x597   :  { %14636 = vtanh.f32 %v15250_v52  ;;  %v14544_v52 = vld [vmem:[%s15500_s7 + $0xc0] sm:$0xff] }
 0x598   :  { %8902 = vmatpush.bf16.msra.mxu3 %v14550_v3  ;;  %v8209_v58 = vpop.f32.mrf.mxu2 }
 0x59b   :  { %v8120_v47 = vpop.f32.mrf.mxu3 }
 0x59c   :  { %8903 = vmatpush.bf16.msra.mxu3 %v14549_v12  ;;  %v14635_v35 = vpop.eup %14634 }
 0x59d   :  { %v8343_v36 = vpack.c.bf16 %v14635_v35, %v14635_v35  ;;  %v14637_v43 = vpop.eup %14636 }
 0x59e   :  { %v8341_v4 = vpack.c.bf16 %v14637_v43, %v14637_v43 }
 0x59f   :  { %8935 = vmatmul.bf16.vlgmr.msrb.gmra.mxu1 %v8343_v36 }
 0x5a0   :  { %8904 = vmatpush.bf16.msra.mxu3 %v14548_v53  ;;  %v8211_v50 = vpop.f32.mrf.mxu2 }
 0x5a4   :  { %8905 = vmatpush.bf16.msra.mxu3 %v14547_v44 }
 0x5a6   :  { %v8235_v38 = vpop.f32.mrf.mxu0 }
 0x5a7   :  { %v8236_v5 = vadd.f32 %v8235_v38, %v4929_v60 }
 0x5a8   :  { %8906 = vmatpush.bf16.msra.mxu3 %v14546_v55  ;;  %v8248_v63 = vpop.f32.mrf.mxu1  ;;  %v14576_v55 = vld [vmem:[%s15500_s7 + $0x1c0] sm:$0xff] }
 0x5a9   :  { %v8249_v16 = vadd.f32 %v8248_v63, %v8236_v5 }
 0x5ac   :  { %8907 = vmatpush.bf16.msra.mxu3 %v14545_v46 }
 0x5ae   :  { %v8237_v8 = vpop.f32.mrf.mxu0 }
 0x5b0   :  { %8908 = vmatpush.bf16.msra.mxu3 %v14544_v52  ;;  %v8250_v62 = vpop.f32.mrf.mxu1 }
 0x5b2   :  { %v8170_v28 = vpop.f32.mrf.mxu3 }
 0x5b3   :  { %8909 = vmatmul.bf16.vlgmr.msra.gmra.mxu3 %v8341_v4  ;;  %v8171_v9 = vadd.f32 %v8170_v28, %v15400_v17 }
 0x5b4   :  { %8953 = vmatpush.bf16.msrb.mxu3 %v14583_v26 }
 0x5b5   :  { %v8184_v32 = vadd.f32 %v8183_v19, %v8171_v9 }
 0x5b7   :  { %v8197_v61 = vadd.f32 %v8196_v59, %v8184_v32  ;;  %v14579_v59 = vld [vmem:[%s15500_s7 + $0x1d8] sm:$0xff] }
 0x5b8   :  { %v8261_v27 = vpop.f32.mrf.mxu2  ;;  %8954 = vmatpush.bf16.msrb.mxu3 %v14582_v20 }
 0x5b9   :  { %v8262_v57 = vadd.f32 %v8261_v27, %v8249_v16  ;;  %v8210_v11 = vadd.f32 %v8209_v58, %v8197_v61 }
 0x5ba   :  { %v8172_v13 = vpop.f32.mrf.mxu3 }
 0x5bc   :  { %8955 = vmatpush.bf16.msrb.mxu3 %v14581_v15 }
 0x5c0   :  { %v8263_v23 = vpop.f32.mrf.mxu2  ;;  %8956 = vmatpush.bf16.msrb.mxu3 %v14580_v6 }
 0x5c4   :  { %8957 = vmatpush.bf16.msrb.mxu3 %v14579_v59 }
 0x5c8   :  { %8958 = vmatpush.bf16.msrb.mxu3 %v14578_v39 }
 0x5ca   :  { %v8287_v51 = vpop.f32.mrf.mxu0 }
 0x5cc   :  { %v8300_v0 = vpop.f32.mrf.mxu1  ;;  %8959 = vmatpush.bf16.msrb.mxu3 %v14577_v14 }
 0x5d0   :  { %8960 = vmatpush.bf16.msrb.mxu3 %v14576_v55 }
 0x5d2   :  { %v8289_v17 = vpop.f32.mrf.mxu0  ;;  %v8222_v37 = vpop.f32.mrf.mxu3 }
 0x5d3   :  { %v8223_v29 = vadd.f32 %v8222_v37, %v8210_v11 }
 0x5d4   :  { %v8302_v54 = vpop.f32.mrf.mxu1 }
 0x5d5   :  { %14638 = vtanh.f32 %v8223_v29 }
 0x5da   :  { %v8224_v2 = vpop.f32.mrf.mxu3 }
 0x5db   :  { %v14639_v48 = vpop.eup %14638 }
 0x5dc   :  { %v8313_v30 = vpop.f32.mrf.mxu2  ;;  %v8344_v45 = vpack.c.bf16 %v14639_v48, %v14639_v48 }
 0x5de   :  { %8948 = vmatmul.bf16.vlgmr.msrb.gmra.mxu2 %v8344_v45 }
 0x5e4   :  { %v8315_v33 = vpop.f32.mrf.mxu2 }
 0x5ea   :  { %v8871_v34 = vpop.f32.mrf.mxu0 }
 0x5eb   :  { %v8872_v22 = vadd.f32 %v14593_v31, %v8871_v34 }
 0x5ec   :  { %v8884_v25 = vpop.f32.mrf.mxu1 }
 0x5ed   :  { %v8885_v19 = vadd.f32 %v8884_v25, %v8872_v22 }
 0x5f2   :  { %v8873_v3 = vpop.f32.mrf.mxu0 }
 0x5f4   :  { %v8886_v12 = vpop.f32.mrf.mxu1 }
 0x5f6   :  { %v8274_v41 = vpop.f32.mrf.mxu3 }
 0x5f7   :  { %v8275_v53 = vadd.f32 %v8274_v41, %v8262_v57 }
 0x5f9   :  { %v8288_v24 = vadd.f32 %v8287_v51, %v8275_v53 }
 0x5fb   :  { %v8301_v58 = vadd.f32 %v8300_v0, %v8288_v24 }
 0x5fc   :  { %v8897_v44 = vpop.f32.mrf.mxu2 }
 0x5fd   :  { %v8898_v1 = vadd.f32 %v8897_v44, %v8885_v19  ;;  %v8314_v50 = vadd.f32 %v8313_v30, %v8301_v58 }
 0x5fe   :  { %v8276_v46 = vpop.f32.mrf.mxu3 }
 0x604   :  { %v8899_v10 = vpop.f32.mrf.mxu2 }
 0x60a   :  { %v8923_v47 = vpop.f32.mrf.mxu0 }
 0x612   :  { %v8925_v35 = vpop.f32.mrf.mxu0 }
 0x616   :  { %v8326_v21 = vpop.f32.mrf.mxu3 }
 0x617   :  { %v8327_v36 = vadd.f32 %v8326_v21, %v8314_v50 }
 0x619   :  { %14640 = vtanh.f32 %v8327_v36 }
 0x61c   :  { %v8936_v56 = vpop.f32.mrf.mxu1 }
 0x61e   :  { %v8328_v52 = vpop.f32.mrf.mxu3 }
 0x61f   :  { %v14641_v43 = vpop.eup %14640 }
 0x620   :  { %v8345_v60 = vpack.c.bf16 %v14641_v43, %v14641_v43 }
 0x622   :  { %8961 = vmatmul.bf16.vlgmr.msrb.gmra.mxu3 %v8345_v60 }
 0x624   :  { %v8938_v4 = vpop.f32.mrf.mxu1 }
 0x636   :  { %v8910_v38 = vpop.f32.mrf.mxu3 }
 0x637   :  { %v8911_v63 = vadd.f32 %v8910_v38, %v8898_v1 }
 0x639   :  { %v8924_v5 = vadd.f32 %v8923_v47, %v8911_v63 }
 0x63b   :  { %v8937_v7 = vadd.f32 %v8936_v56, %v8924_v5 }
 0x63e   :  { %v8912_v16 = vpop.f32.mrf.mxu3 }
 0x661   :  { %v8949_v40 = vpop.f32.mrf.mxu2 }
 0x662   :  { %v8950_v62 = vadd.f32 %v8949_v40, %v8937_v7 }
 0x669   :  { %v8951_v8 = vpop.f32.mrf.mxu2 }
 0x6a5   :  { %v8962_v42 = vpop.f32.mrf.mxu3 }
 0x6a6   :  { %v8963_v28 = vadd.f32 %v8962_v42, %v8950_v62 }
 0x6a8   :  { %8967 = vst.msk [vmem:[%s15502_s9] sm:$0xff] %vm8966_vm1, %v8963_v28 }
 0x6ad   :  { %v8964_v9 = vpop.f32.mrf.mxu3 }
 0x6ae   :  { %8972 = vsyncpa [#allocation3], 1 }
 0x6af   :  { %8973 = vsyncpa [#allocation5], 1 }
 0x6b0   :  { %8974 = vsyncpa [#allocation8], 1 }
 0x6b1   :  { %8975 = vsyncpa [#allocation11], 1 }

</bundles_post_ra>
